<compile_context>
chip_gen: v7x
topology: tpu7x:2x2x1
jax: 0.10.0
libtpu: 0.0.40
codegen_flags: <defaults>
</compile_context>

<pallas_src>
import functools

import jax
import jax.numpy as jnp
from jax.experimental import pallas as pl
from jax.experimental.pallas import tpu as pltpu


# ----------------------------- helpers ------------------------------------ #

ROW_SPLIT = 2                   # >=2 parallel grid steps -> both v7x TCs work
ACT_DTYPE = jnp.bfloat16        # inter-kernel activation storage dtype


def _round_up(x, m):
    return ((x + m - 1) // m) * m


# --------------------------- Pallas kernels -------------------------------- #

def _fmm_kernel(*refs, relu_in, relu_out, has_skip):
    """Fused (im2col-)matmul: optional pre-ReLU, bf16 MXU dot, folded-BN bias,
    optional residual add, optional post-ReLU.  Accumulation in f32."""
    if has_skip:
        x_ref, w_ref, b_ref, s_ref, o_ref = refs
    else:
        x_ref, w_ref, b_ref, o_ref = refs
        s_ref = None
    x = x_ref[...]
    if relu_in:
        x = jnp.maximum(x, 0.0)
    y = jnp.dot(x.astype(jnp.bfloat16), w_ref[...],
                preferred_element_type=jnp.float32)
    y = y + b_ref[...]
    if has_skip:
        y = y + s_ref[...].astype(jnp.float32)
    if relu_out:
        y = jnp.maximum(y, 0.0)
    o_ref[...] = y.astype(o_ref.dtype)


def _pool_skip_kernel(t_ref, xs_ref, w_ref, b_ref, o_ref):
    """Fused MaxPool(3,2,1) (max over 9 pre-shifted taps) + stride-2 1x1 skip
    conv (BN folded into w/b) + residual add."""
    pooled = jnp.max(t_ref[...], axis=0).astype(jnp.float32)
    skip = jnp.dot(xs_ref[...].astype(jnp.bfloat16), w_ref[...],
                   preferred_element_type=jnp.float32) + b_ref[...]
    o_ref[...] = (pooled + skip).astype(o_ref.dtype)


def _head_kernel(x_ref, w_ref, b_ref, o_ref):
    """Fused global average pool + FC + softmax (all reductions in f32)."""
    pooled = jnp.mean(x_ref[...].astype(jnp.float32), axis=1)      # [N, C]
    logits = jnp.dot(pooled.astype(jnp.bfloat16), w_ref[...],
                     preferred_element_type=jnp.float32) + b_ref[...]
    m = jnp.max(logits, axis=-1, keepdims=True)
    e = jnp.exp(logits - m)
    o_ref[...] = e / jnp.sum(e, axis=-1, keepdims=True)


# --------------------------- Pallas wrappers ------------------------------- #

def fused_matmul(x2, w_bf16, bias, skip=None, relu_in=False, relu_out=False):
    """out = relu?( relu?(x2) @ w + bias (+ skip) ), rows split over a
    2-step parallel grid.  Output is stored in bf16."""
    m, k = x2.shape
    nout = w_bf16.shape[1]
    mp = _round_up(m, 8 * ROW_SPLIT)
    tm = mp // ROW_SPLIT
    x_p = jnp.pad(x2, ((0, mp - m), (0, 0)))

    args = [x_p, w_bf16, bias]
    in_specs = [pl.BlockSpec((tm, k), lambda i: (i, 0)),
                pl.BlockSpec((k, nout), lambda i: (0, 0)),
                pl.BlockSpec((1, nout), lambda i: (0, 0))]
    if skip is not None:
        skip_p = jnp.pad(skip, ((0, mp - m), (0, 0)))
        args.append(skip_p)
        in_specs.append(pl.BlockSpec((tm, nout), lambda i: (i, 0)))

    kern = functools.partial(_fmm_kernel, relu_in=relu_in, relu_out=relu_out,
                             has_skip=skip is not None)
    out = pl.pallas_call(
        kern,
        out_shape=jax.ShapeDtypeStruct((mp, nout), ACT_DTYPE),
        grid=(ROW_SPLIT,),
        in_specs=in_specs,
        out_specs=pl.BlockSpec((tm, nout), lambda i: (i, 0)),
        compiler_params=pltpu.CompilerParams(dimension_semantics=("parallel",)),
    )(*args)
    return out[:m]


def maxpool_add_skip(y, x_in, skip):
    """MaxPool2d(3, stride=2, pad=1) on y, fused with the block's stride-2
    1x1 skip conv (folded BN) on x_in and the residual add."""
    n, h, w, c = y.shape
    ho = (h - 1) // 2 + 1
    wo = (w - 1) // 2 + 1
    yp = jnp.pad(y, ((0, 0), (1, 1), (1, 1), (0, 0)),
                 constant_values=-jnp.inf)
    taps = [yp[:, kh:kh + 2 * (ho - 1) + 1:2,
               kw:kw + 2 * (wo - 1) + 1:2, :].reshape(n * ho * wo, c)
            for kh in range(3) for kw in range(3)]
    taps = jnp.stack(taps, axis=0)                           # [9, M, C] bf16

    xs = x_in[:, ::2, ::2, :]                                # stride-2 sample
    cin = xs.shape[-1]
    xs2 = xs.reshape(n * ho * wo, cin)

    m = n * ho * wo
    mp = _round_up(m, 8 * ROW_SPLIT)
    tm = mp // ROW_SPLIT
    taps_p = jnp.pad(taps, ((0, 0), (0, mp - m), (0, 0)))    # finite row pad
    xs_p = jnp.pad(xs2, ((0, mp - m), (0, 0)))

    out = pl.pallas_call(
        _pool_skip_kernel,
        out_shape=jax.ShapeDtypeStruct((mp, c), ACT_DTYPE),
        grid=(ROW_SPLIT,),
        in_specs=[pl.BlockSpec((9, tm, c), lambda i: (0, i, 0)),
                  pl.BlockSpec((tm, cin), lambda i: (i, 0)),
                  pl.BlockSpec((cin, c), lambda i: (0, 0)),
                  pl.BlockSpec((1, c), lambda i: (0, 0))],
        out_specs=pl.BlockSpec((tm, c), lambda i: (i, 0)),
        compiler_params=pltpu.CompilerParams(dimension_semantics=("parallel",)),
    )(taps_p, xs_p, skip['w'], skip['b'])
    return out[:m].reshape(n, ho, wo, c)


def head(x, fc):
    """Global avg-pool + FC + softmax in one kernel (f32 output)."""
    n, h, w, c = x.shape
    nc = fc['w'].shape[1]
    x3 = x.reshape(n, h * w, c)
    return pl.pallas_call(
        _head_kernel,
        out_shape=jax.ShapeDtypeStruct((n, nc), jnp.float32),
    )(x3, fc['w'], fc['b'])


# ----------------------- im2col glue (plain JAX) --------------------------- #

def _im2col3x3(x, stride, pad):
    # Tiny bf16 activations (< 1 MiB): the slice+concat is a single cheap XLA
    # data-movement fusion; all compute stays in the Pallas kernels.
    n, h, w, c = x.shape
    if pad:
        x = jnp.pad(x, ((0, 0), (pad, pad), (pad, pad), (0, 0)))
    hp, wp = x.shape[1], x.shape[2]
    ho = (hp - 3) // stride + 1
    wo = (wp - 3) // stride + 1
    cols = []
    for kh in range(3):
        for kw in range(3):
            cols.append(x[:, kh:kh + stride * (ho - 1) + 1:stride,
                          kw:kw + stride * (wo - 1) + 1:stride, :])
    cols = jnp.concatenate(cols, axis=-1)                    # (kh, kw, cin)
    return cols.reshape(n * ho * wo, 9 * c), (n, ho, wo)


# -------------------------- model building blocks -------------------------- #

def conv_stem(x, p, stride, pad):
    """3x3 conv + folded BN + ReLU as one fused matmul kernel."""
    cols, (n, ho, wo) = _im2col3x3(x, stride, pad)
    cout = p['w'].shape[1]
    y = fused_matmul(cols, p['w'], p['b'], relu_out=True)
    return y.reshape(n, ho, wo, cout)


def sepconv(x, unit, relu_in, relu_out=False, skip_rows=None):
    """SeparableConv2d + BN (folded) as ONE fused matmul kernel, with optional
    pre-ReLU, post-ReLU and fused residual add."""
    n, h, w, _ = x.shape
    cols, _ = _im2col3x3(x, 1, 1)
    cout = unit['w'].shape[1]
    y = fused_matmul(cols, unit['w'], unit['b'], skip=skip_rows,
                     relu_in=relu_in, relu_out=relu_out)
    return y.reshape(n, h, w, cout)


def xception_block(x, bp, stride, start_with_relu):
    n, h, w, c = x.shape
    units = bp['units']

    if stride == 1:
        if bp['skip'] is None:
            skip_rows = x.reshape(n * h * w, c)              # identity skip
        else:
            skip_rows = fused_matmul(x.reshape(n * h * w, c),
                                     bp['skip']['w'], bp['skip']['b'])
    else:
        skip_rows = None                                     # fused in pool

    out = x
    last = len(units) - 1
    for i, u in enumerate(units):
        fuse_add = (stride == 1 and i == last)
        out = sepconv(out, u, relu_in=(start_with_relu or i > 0),
                      skip_rows=skip_rows if fuse_add else None)

    if stride != 1:
        out = maxpool_add_skip(out, x, bp['skip'])
    return out


# ------------------------------ parameters --------------------------------- #

C1, C2 = 8, 16
B1, B2, B3 = 32, 64, 128
MID_REPS = 2
B12 = 160
C3, C4 = 192, 256


class ParamGen:
    def __init__(self, seed=0):
        self._key = jax.random.PRNGKey(seed)

    def normal(self, shape, scale=1.0):
        self._key, sub = jax.random.split(self._key)
        return scale * jax.random.normal(sub, shape, jnp.float32)


def _make_bn(pg, c):
    gamma = 1.0 + 0.1 * pg.normal((c,))
    beta = 0.1 * pg.normal((c,))
    mean = 0.1 * pg.normal((c,))
    var = 1.0 + 0.1 * jnp.abs(pg.normal((c,)))
    scale = gamma / jnp.sqrt(var + 1e-5)
    shift = beta - mean * scale
    return scale, shift


def _make_conv_folded(pg, cin, cout):
    w = pg.normal((3, 3, cin, cout), 1.0 / ((9 * cin) ** 0.5))
    scale, shift = _make_bn(pg, cout)
    wf = (w * scale).reshape(9 * cin, cout)                  # BN folded
    return {'w': wf.astype(jnp.bfloat16),
            'b': shift.reshape(1, cout).astype(jnp.float32)}


def _make_sep_folded(pg, cin, cout):
    dw = pg.normal((3, 3, cin), 1.0 / 3.0).reshape(9, cin)
    pw = pg.normal((cin, cout), 1.0 / (cin ** 0.5))
    scale, shift = _make_bn(pg, cout)
    # Fold depthwise + pointwise + BN into per-tap matrices:
    #   A[k*cin + c, o] = dw[k, c] * pw[c, o] * scale[o]
    a = (dw[:, :, None] * pw[None, :, :] * scale[None, None, :])
    a = a.reshape(9 * cin, cout)
    return {'w': a.astype(jnp.bfloat16),
            'b': shift.reshape(1, cout).astype(jnp.float32)}


def _make_block(pg, cin, cout, reps, stride, grow_first):
    units = []
    if grow_first:
        units.append(_make_sep_folded(pg, cin, cout))
        for _ in range(reps - 1):
            units.append(_make_sep_folded(pg, cout, cout))
    else:
        for _ in range(reps - 1):
            units.append(_make_sep_folded(pg, cin, cin))
        units.append(_make_sep_folded(pg, cin, cout))
    skip = None
    if cout != cin or stride != 1:
        w = pg.normal((cin, cout), 1.0 / (cin ** 0.5))
        scale, shift = _make_bn(pg, cout)
        skip = {'w': (w * scale).astype(jnp.bfloat16),
                'b': shift.reshape(1, cout).astype(jnp.float32)}
    return {'units': units, 'skip': skip}


def make_params(num_classes, seed=0):
    pg = ParamGen(seed)
    p = {}
    p['conv1'] = _make_conv_folded(pg, 3, C1)
    p['conv2'] = _make_conv_folded(pg, C1, C2)
    p['block1'] = _make_block(pg, C2, B1, 2, 2, True)
    p['block2'] = _make_block(pg, B1, B2, 2, 2, True)
    p['block3'] = _make_block(pg, B2, B3, 2, 2, True)
    p['middle'] = [_make_block(pg, B3, B3, 3, 1, True) for _ in range(MID_REPS)]
    p['block12'] = _make_block(pg, B3, B12, 2, 2, False)
    p['conv3'] = _make_sep_folded(pg, B12, C3)
    p['conv4'] = _make_sep_folded(pg, C3, C4)
    p['fc'] = {'w': pg.normal((C4, num_classes),
                              1.0 / (C4 ** 0.5)).astype(jnp.bfloat16),
               'b': pg.normal((num_classes,), 0.01).reshape(1, num_classes)}
    return p


# ------------------------------ full forward ------------------------------- #

def modeling_forward(params, x_nchw):
    # NCHW -> NHWC, bf16 activation storage (f32 accumulation inside kernels)
    x = jnp.transpose(x_nchw, (0, 2, 3, 1)).astype(ACT_DTYPE)

    # entry flow
    x = conv_stem(x, params['conv1'], stride=2, pad=0)
    x = conv_stem(x, params['conv2'], stride=1, pad=0)
    x = xception_block(x, params['block1'], stride=2, start_with_relu=False)
    x = xception_block(x, params['block2'], stride=2, start_with_relu=True)
    x = xception_block(x, params['block3'], stride=2, start_with_relu=True)

    # middle flow
    for bp in params['middle']:
        x = xception_block(x, bp, stride=1, start_with_relu=True)

    # exit flow
    x = xception_block(x, params['block12'], stride=2, start_with_relu=True)
    x = sepconv(x, params['conv3'], relu_in=False, relu_out=True)
    x = sepconv(x, params['conv4'], relu_in=False, relu_out=True)

    # global avg-pool + FC + softmax (one fused kernel), matches nn.Softmax()
    return head(x, params['fc'])


# ---------------------------------- main ------------------------------------ #

if __name__ == "__main__":
    num_classes = 10
    params = make_params(num_classes, seed=0)

    key = jax.random.PRNGKey(0)
    x = jax.random.normal(key, (2, 3, 32, 32), jnp.float32)      # NCHW input

    fwd = jax.jit(modeling_forward)
    out = jax.block_until_ready(fwd(params, x))

    assert out.shape == (2, num_classes)
    assert bool(jnp.all(jnp.isfinite(out)))
    # softmax rows sum to 1
    assert bool(jnp.allclose(jnp.sum(out, axis=-1), 1.0, atol=1e-4))

    print("KERNEL_OK")
</pallas_src>

<mosaic_0001>
module attributes {stable_mosaic.version = 11 : i64} {
  func.func @_fmm_kernel(%arg0: i32, %arg1: memref<232x27xbf16, #tpu.memory_space<vmem>>, %arg2: memref<27x8xbf16, #tpu.memory_space<vmem>>, %arg3: memref<1x8xf32, #tpu.memory_space<vmem>>, %arg4: memref<232x8xbf16, #tpu.memory_space<vmem>>) attributes {dimension_semantics = [#tpu.dimension_semantics<parallel>], iteration_bounds = array<i64: 2>, scalar_prefetch = 0 : i64, scratch_operands = 0 : i64, tpu.core_type = #tpu.core_type<tc>, window_params = [{transform_indices = @transform_0, window_bounds = array<i64: 232, 27>}, {pipeline_mode = #tpu.pipeline_mode<synchronous>, transform_indices = @transform_1, window_bounds = array<i64: 27, 8>}, {pipeline_mode = #tpu.pipeline_mode<synchronous>, transform_indices = @transform_2, window_bounds = array<i64: 1, 8>}, {transform_indices = @transform_3, window_bounds = array<i64: 232, 8>}]} {
    %c0 = arith.constant 0 : index
    %c0_0 = arith.constant 0 : index
    %0 = vector.load %arg1[%c0, %c0_0] : memref<232x27xbf16, #tpu.memory_space<vmem>>, vector<232x27xbf16>
    %c0_1 = arith.constant 0 : index
    %c0_2 = arith.constant 0 : index
    %1 = vector.load %arg2[%c0_1, %c0_2] : memref<27x8xbf16, #tpu.memory_space<vmem>>, vector<27x8xbf16>
    %cst = arith.constant dense<0.000000e+00> : vector<232x8xf32>
    %2 = tpu.matmul %0, %1, %cst {dimension_numbers = #tpu.dot_dimension_numbers<[1], [0], [0], [1], [0, 0, 1, 1], [], []>} : vector<232x27xbf16>, vector<27x8xbf16>, vector<232x8xf32> -> vector<232x8xf32>
    %c0_3 = arith.constant 0 : index
    %c0_4 = arith.constant 0 : index
    %3 = vector.load %arg3[%c0_3, %c0_4] : memref<1x8xf32, #tpu.memory_space<vmem>>, vector<1x8xf32>
    %4 = vector.broadcast %3 : vector<1x8xf32> to vector<232x8xf32>
    %5 = arith.addf %2, %4 : vector<232x8xf32>
    %cst_5 = arith.constant 0.000000e+00 : f32
    %6 = vector.broadcast %cst_5 : f32 to vector<232x8xf32>
    %7 = arith.maximumf %5, %6 : vector<232x8xf32>
    %8 = arith.truncf %7 : vector<232x8xf32> to vector<232x8xbf16>
    %c0_6 = arith.constant 0 : index
    %c0_7 = arith.constant 0 : index
    %9 = vector.load %arg4[%c0_6, %c0_7] : memref<232x8xbf16, #tpu.memory_space<vmem>>, vector<232x8xbf16>
    tpu.vector_store %arg4[%c0_6, %c0_7], %8 {strides = array<i32>} : memref<232x8xbf16, #tpu.memory_space<vmem>>, vector<232x8xbf16>,
    return
  }
  func.func @transform_0(%arg0: i32) -> (i32, i32) {
    %c0_i32 = arith.constant 0 : i32
    %c0_i32_0 = arith.constant 0 : i32
    return %arg0, %c0_i32 : i32, i32
  }
  func.func @transform_1(%arg0: i32) -> (i32, i32) {
    %c0_i32 = arith.constant 0 : i32
    %c0_i32_0 = arith.constant 0 : i32
    %c0_i32_1 = arith.constant 0 : i32
    return %c0_i32, %c0_i32_0 : i32, i32
  }
  func.func @transform_2(%arg0: i32) -> (i32, i32) {
    %c0_i32 = arith.constant 0 : i32
    %c0_i32_0 = arith.constant 0 : i32
    %c0_i32_1 = arith.constant 0 : i32
    return %c0_i32, %c0_i32_0 : i32, i32
  }
  func.func @transform_3(%arg0: i32) -> (i32, i32) {
    %c0_i32 = arith.constant 0 : i32
    %c0_i32_0 = arith.constant 0 : i32
    return %arg0, %c0_i32 : i32, i32
  }
}

module attributes {stable_mosaic.version = 11 : i64} {
  func.func @_fmm_kernel(%arg0: i32, %arg1: memref<176x72xbf16, #tpu.memory_space<vmem>>, %arg2: memref<72x16xbf16, #tpu.memory_space<vmem>>, %arg3: memref<1x16xf32, #tpu.memory_space<vmem>>, %arg4: memref<176x16xbf16, #tpu.memory_space<vmem>>) attributes {dimension_semantics = [#tpu.dimension_semantics<parallel>], iteration_bounds = array<i64: 2>, scalar_prefetch = 0 : i64, scratch_operands = 0 : i64, tpu.core_type = #tpu.core_type<tc>, window_params = [{transform_indices = @transform_0, window_bounds = array<i64: 176, 72>}, {pipeline_mode = #tpu.pipeline_mode<synchronous>, transform_indices = @transform_1, window_bounds = array<i64: 72, 16>}, {pipeline_mode = #tpu.pipeline_mode<synchronous>, transform_indices = @transform_2, window_bounds = array<i64: 1, 16>}, {transform_indices = @transform_3, window_bounds = array<i64: 176, 16>}]} {
    %c0 = arith.constant 0 : index
    %c0_0 = arith.constant 0 : index
    %0 = vector.load %arg1[%c0, %c0_0] : memref<176x72xbf16, #tpu.memory_space<vmem>>, vector<176x72xbf16>
    %c0_1 = arith.constant 0 : index
    %c0_2 = arith.constant 0 : index
    %1 = vector.load %arg2[%c0_1, %c0_2] : memref<72x16xbf16, #tpu.memory_space<vmem>>, vector<72x16xbf16>
    %cst = arith.constant dense<0.000000e+00> : vector<176x16xf32>
    %2 = tpu.matmul %0, %1, %cst {dimension_numbers = #tpu.dot_dimension_numbers<[1], [0], [0], [1], [0, 0, 1, 1], [], []>} : vector<176x72xbf16>, vector<72x16xbf16>, vector<176x16xf32> -> vector<176x16xf32>
    %c0_3 = arith.constant 0 : index
    %c0_4 = arith.constant 0 : index
    %3 = vector.load %arg3[%c0_3, %c0_4] : memref<1x16xf32, #tpu.memory_space<vmem>>, vector<1x16xf32>
    %4 = vector.broadcast %3 : vector<1x16xf32> to vector<176x16xf32>
    %5 = arith.addf %2, %4 : vector<176x16xf32>
    %cst_5 = arith.constant 0.000000e+00 : f32
    %6 = vector.broadcast %cst_5 : f32 to vector<176x16xf32>
    %7 = arith.maximumf %5, %6 : vector<176x16xf32>
    %8 = arith.truncf %7 : vector<176x16xf32> to vector<176x16xbf16>
    %c0_6 = arith.constant 0 : index
    %c0_7 = arith.constant 0 : index
    %9 = vector.load %arg4[%c0_6, %c0_7] : memref<176x16xbf16, #tpu.memory_space<vmem>>, vector<176x16xbf16>
    tpu.vector_store %arg4[%c0_6, %c0_7], %8 {strides = array<i32>} : memref<176x16xbf16, #tpu.memory_space<vmem>>, vector<176x16xbf16>,
    return
  }
  func.func @transform_0(%arg0: i32) -> (i32, i32) {
    %c0_i32 = arith.constant 0 : i32
    %c0_i32_0 = arith.constant 0 : i32
    return %arg0, %c0_i32 : i32, i32
  }
  func.func @transform_1(%arg0: i32) -> (i32, i32) {
    %c0_i32 = arith.constant 0 : i32
    %c0_i32_0 = arith.constant 0 : i32
    %c0_i32_1 = arith.constant 0 : i32
    return %c0_i32, %c0_i32_0 : i32, i32
  }
  func.func @transform_2(%arg0: i32) -> (i32, i32) {
    %c0_i32 = arith.constant 0 : i32
    %c0_i32_0 = arith.constant 0 : i32
    %c0_i32_1 = arith.constant 0 : i32
    return %c0_i32, %c0_i32_0 : i32, i32
  }
  func.func @transform_3(%arg0: i32) -> (i32, i32) {
    %c0_i32 = arith.constant 0 : i32
    %c0_i32_0 = arith.constant 0 : i32
    return %arg0, %c0_i32 : i32, i32
  }
}

module attributes {stable_mosaic.version = 11 : i64} {
  func.func @_fmm_kernel(%arg0: i32, %arg1: memref<176x144xbf16, #tpu.memory_space<vmem>>, %arg2: memref<144x32xbf16, #tpu.memory_space<vmem>>, %arg3: memref<1x32xf32, #tpu.memory_space<vmem>>, %arg4: memref<176x32xbf16, #tpu.memory_space<vmem>>) attributes {dimension_semantics = [#tpu.dimension_semantics<parallel>], iteration_bounds = array<i64: 2>, scalar_prefetch = 0 : i64, scratch_operands = 0 : i64, tpu.core_type = #tpu.core_type<tc>, window_params = [{transform_indices = @transform_0, window_bounds = array<i64: 176, 144>}, {pipeline_mode = #tpu.pipeline_mode<synchronous>, transform_indices = @transform_1, window_bounds = array<i64: 144, 32>}, {pipeline_mode = #tpu.pipeline_mode<synchronous>, transform_indices = @transform_2, window_bounds = array<i64: 1, 32>}, {transform_indices = @transform_3, window_bounds = array<i64: 176, 32>}]} {
    %c0 = arith.constant 0 : index
    %c0_0 = arith.constant 0 : index
    %0 = vector.load %arg1[%c0, %c0_0] : memref<176x144xbf16, #tpu.memory_space<vmem>>, vector<176x144xbf16>
    %c0_1 = arith.constant 0 : index
    %c0_2 = arith.constant 0 : index
    %1 = vector.load %arg2[%c0_1, %c0_2] : memref<144x32xbf16, #tpu.memory_space<vmem>>, vector<144x32xbf16>
    %cst = arith.constant dense<0.000000e+00> : vector<176x32xf32>
    %2 = tpu.matmul %0, %1, %cst {dimension_numbers = #tpu.dot_dimension_numbers<[1], [0], [0], [1], [0, 0, 1, 1], [], []>} : vector<176x144xbf16>, vector<144x32xbf16>, vector<176x32xf32> -> vector<176x32xf32>
    %c0_3 = arith.constant 0 : index
    %c0_4 = arith.constant 0 : index
    %3 = vector.load %arg3[%c0_3, %c0_4] : memref<1x32xf32, #tpu.memory_space<vmem>>, vector<1x32xf32>
    %4 = vector.broadcast %3 : vector<1x32xf32> to vector<176x32xf32>
    %5 = arith.addf %2, %4 : vector<176x32xf32>
    %6 = arith.truncf %5 : vector<176x32xf32> to vector<176x32xbf16>
    %c0_5 = arith.constant 0 : index
    %c0_6 = arith.constant 0 : index
    %7 = vector.load %arg4[%c0_5, %c0_6] : memref<176x32xbf16, #tpu.memory_space<vmem>>, vector<176x32xbf16>
    tpu.vector_store %arg4[%c0_5, %c0_6], %6 {strides = array<i32>} : memref<176x32xbf16, #tpu.memory_space<vmem>>, vector<176x32xbf16>,
    return
  }
  func.func @transform_0(%arg0: i32) -> (i32, i32) {
    %c0_i32 = arith.constant 0 : i32
    %c0_i32_0 = arith.constant 0 : i32
    return %arg0, %c0_i32 : i32, i32
  }
  func.func @transform_1(%arg0: i32) -> (i32, i32) {
    %c0_i32 = arith.constant 0 : i32
    %c0_i32_0 = arith.constant 0 : i32
    %c0_i32_1 = arith.constant 0 : i32
    return %c0_i32, %c0_i32_0 : i32, i32
  }
  func.func @transform_2(%arg0: i32) -> (i32, i32) {
    %c0_i32 = arith.constant 0 : i32
    %c0_i32_0 = arith.constant 0 : i32
    %c0_i32_1 = arith.constant 0 : i32
    return %c0_i32, %c0_i32_0 : i32, i32
  }
  func.func @transform_3(%arg0: i32) -> (i32, i32) {
    %c0_i32 = arith.constant 0 : i32
    %c0_i32_0 = arith.constant 0 : i32
    return %arg0, %c0_i32 : i32, i32
  }
}

module attributes {stable_mosaic.version = 11 : i64} {
  func.func @_fmm_kernel(%arg0: i32, %arg1: memref<176x288xbf16, #tpu.memory_space<vmem>>, %arg2: memref<288x32xbf16, #tpu.memory_space<vmem>>, %arg3: memref<1x32xf32, #tpu.memory_space<vmem>>, %arg4: memref<176x32xbf16, #tpu.memory_space<vmem>>) attributes {dimension_semantics = [#tpu.dimension_semantics<parallel>], iteration_bounds = array<i64: 2>, scalar_prefetch = 0 : i64, scratch_operands = 0 : i64, tpu.core_type = #tpu.core_type<tc>, window_params = [{transform_indices = @transform_0, window_bounds = array<i64: 176, 288>}, {pipeline_mode = #tpu.pipeline_mode<synchronous>, transform_indices = @transform_1, window_bounds = array<i64: 288, 32>}, {pipeline_mode = #tpu.pipeline_mode<synchronous>, transform_indices = @transform_2, window_bounds = array<i64: 1, 32>}, {transform_indices = @transform_3, window_bounds = array<i64: 176, 32>}]} {
    %c0 = arith.constant 0 : index
    %c0_0 = arith.constant 0 : index
    %0 = vector.load %arg1[%c0, %c0_0] : memref<176x288xbf16, #tpu.memory_space<vmem>>, vector<176x288xbf16>
    %cst = arith.constant 0.000000e+00 : bf16
    %1 = vector.broadcast %cst : bf16 to vector<176x288xbf16>
    %2 = arith.maximumf %0, %1 : vector<176x288xbf16>
    %c0_1 = arith.constant 0 : index
    %c0_2 = arith.constant 0 : index
    %3 = vector.load %arg2[%c0_1, %c0_2] : memref<288x32xbf16, #tpu.memory_space<vmem>>, vector<288x32xbf16>
    %cst_3 = arith.constant dense<0.000000e+00> : vector<176x32xf32>
    %4 = tpu.matmul %2, %3, %cst_3 {dimension_numbers = #tpu.dot_dimension_numbers<[1], [0], [0], [1], [0, 0, 1, 1], [], []>} : vector<176x288xbf16>, vector<288x32xbf16>, vector<176x32xf32> -> vector<176x32xf32>
    %c0_4 = arith.constant 0 : index
    %c0_5 = arith.constant 0 : index
    %5 = vector.load %arg3[%c0_4, %c0_5] : memref<1x32xf32, #tpu.memory_space<vmem>>, vector<1x32xf32>
    %6 = vector.broadcast %5 : vector<1x32xf32> to vector<176x32xf32>
    %7 = arith.addf %4, %6 : vector<176x32xf32>
    %8 = arith.truncf %7 : vector<176x32xf32> to vector<176x32xbf16>
    %c0_6 = arith.constant 0 : index
    %c0_7 = arith.constant 0 : index
    %9 = vector.load %arg4[%c0_6, %c0_7] : memref<176x32xbf16, #tpu.memory_space<vmem>>, vector<176x32xbf16>
    tpu.vector_store %arg4[%c0_6, %c0_7], %8 {strides = array<i32>} : memref<176x32xbf16, #tpu.memory_space<vmem>>, vector<176x32xbf16>,
    return
  }
  func.func @transform_0(%arg0: i32) -> (i32, i32) {
    %c0_i32 = arith.constant 0 : i32
    %c0_i32_0 = arith.constant 0 : i32
    return %arg0, %c0_i32 : i32, i32
  }
  func.func @transform_1(%arg0: i32) -> (i32, i32) {
    %c0_i32 = arith.constant 0 : i32
    %c0_i32_0 = arith.constant 0 : i32
    %c0_i32_1 = arith.constant 0 : i32
    return %c0_i32, %c0_i32_0 : i32, i32
  }
  func.func @transform_2(%arg0: i32) -> (i32, i32) {
    %c0_i32 = arith.constant 0 : i32
    %c0_i32_0 = arith.constant 0 : i32
    %c0_i32_1 = arith.constant 0 : i32
    return %c0_i32, %c0_i32_0 : i32, i32
  }
  func.func @transform_3(%arg0: i32) -> (i32, i32) {
    %c0_i32 = arith.constant 0 : i32
    %c0_i32_0 = arith.constant 0 : i32
    return %arg0, %c0_i32 : i32, i32
  }
}

module attributes {stable_mosaic.version = 11 : i64} {
  func.func @_pool_skip_kernel(%arg0: i32, %arg1: memref<9x56x32xbf16, #tpu.memory_space<vmem>>, %arg2: memref<56x16xbf16, #tpu.memory_space<vmem>>, %arg3: memref<16x32xbf16, #tpu.memory_space<vmem>>, %arg4: memref<1x32xf32, #tpu.memory_space<vmem>>, %arg5: memref<56x32xbf16, #tpu.memory_space<vmem>>) attributes {dimension_semantics = [#tpu.dimension_semantics<parallel>], iteration_bounds = array<i64: 2>, scalar_prefetch = 0 : i64, scratch_operands = 0 : i64, tpu.core_type = #tpu.core_type<tc>, window_params = [{transform_indices = @transform_0, window_bounds = array<i64: 9, 56, 32>}, {transform_indices = @transform_1, window_bounds = array<i64: 56, 16>}, {pipeline_mode = #tpu.pipeline_mode<synchronous>, transform_indices = @transform_2, window_bounds = array<i64: 16, 32>}, {pipeline_mode = #tpu.pipeline_mode<synchronous>, transform_indices = @transform_3, window_bounds = array<i64: 1, 32>}, {transform_indices = @transform_4, window_bounds = array<i64: 56, 32>}]} {
    %c0 = arith.constant 0 : index
    %c0_0 = arith.constant 0 : index
    %c0_1 = arith.constant 0 : index
    %0 = vector.load %arg1[%c0, %c0_0, %c0_1] : memref<9x56x32xbf16, #tpu.memory_space<vmem>>, vector<9x56x32xbf16>
    %cst = arith.constant dense<0xFF80> : vector<56x32xbf16>
    %1 = vector.multi_reduction <maximumf>, %0, %cst [0] : vector<9x56x32xbf16> to vector<56x32xbf16>
    %2 = arith.extf %1 : vector<56x32xbf16> to vector<56x32xf32>
    %c0_2 = arith.constant 0 : index
    %c0_3 = arith.constant 0 : index
    %3 = vector.load %arg2[%c0_2, %c0_3] : memref<56x16xbf16, #tpu.memory_space<vmem>>, vector<56x16xbf16>
    %c0_4 = arith.constant 0 : index
    %c0_5 = arith.constant 0 : index
    %4 = vector.load %arg3[%c0_4, %c0_5] : memref<16x32xbf16, #tpu.memory_space<vmem>>, vector<16x32xbf16>
    %cst_6 = arith.constant dense<0.000000e+00> : vector<56x32xf32>
    %5 = tpu.matmul %3, %4, %cst_6 {dimension_numbers = #tpu.dot_dimension_numbers<[1], [0], [0], [1], [0, 0, 1, 1], [], []>} : vector<56x16xbf16>, vector<16x32xbf16>, vector<56x32xf32> -> vector<56x32xf32>
    %c0_7 = arith.constant 0 : index
    %c0_8 = arith.constant 0 : index
    %6 = vector.load %arg4[%c0_7, %c0_8] : memref<1x32xf32, #tpu.memory_space<vmem>>, vector<1x32xf32>
    %7 = vector.broadcast %6 : vector<1x32xf32> to vector<56x32xf32>
    %8 = arith.addf %5, %7 : vector<56x32xf32>
    %9 = arith.addf %2, %8 : vector<56x32xf32>
    %10 = arith.truncf %9 : vector<56x32xf32> to vector<56x32xbf16>
    %c0_9 = arith.constant 0 : index
    %c0_10 = arith.constant 0 : index
    %11 = vector.load %arg5[%c0_9, %c0_10] : memref<56x32xbf16, #tpu.memory_space<vmem>>, vector<56x32xbf16>
    tpu.vector_store %arg5[%c0_9, %c0_10], %10 {strides = array<i32>} : memref<56x32xbf16, #tpu.memory_space<vmem>>, vector<56x32xbf16>,
    return
  }
  func.func @transform_0(%arg0: i32) -> (i32, i32, i32) {
    %c0_i32 = arith.constant 0 : i32
    %c0_i32_0 = arith.constant 0 : i32
    %c0_i32_1 = arith.constant 0 : i32
    return %c0_i32, %arg0, %c0_i32_0 : i32, i32, i32
  }
  func.func @transform_1(%arg0: i32) -> (i32, i32) {
    %c0_i32 = arith.constant 0 : i32
    %c0_i32_0 = arith.constant 0 : i32
    return %arg0, %c0_i32 : i32, i32
  }
  func.func @transform_2(%arg0: i32) -> (i32, i32) {
    %c0_i32 = arith.constant 0 : i32
    %c0_i32_0 = arith.constant 0 : i32
    %c0_i32_1 = arith.constant 0 : i32
    return %c0_i32, %c0_i32_0 : i32, i32
  }
  func.func @transform_3(%arg0: i32) -> (i32, i32) {
    %c0_i32 = arith.constant 0 : i32
    %c0_i32_0 = arith.constant 0 : i32
    %c0_i32_1 = arith.constant 0 : i32
    return %c0_i32, %c0_i32_0 : i32, i32
  }
  func.func @transform_4(%arg0: i32) -> (i32, i32) {
    %c0_i32 = arith.constant 0 : i32
    %c0_i32_0 = arith.constant 0 : i32
    return %arg0, %c0_i32 : i32, i32
  }
}

module attributes {stable_mosaic.version = 11 : i64} {
  func.func @_fmm_kernel(%arg0: i32, %arg1: memref<56x288xbf16, #tpu.memory_space<vmem>>, %arg2: memref<288x64xbf16, #tpu.memory_space<vmem>>, %arg3: memref<1x64xf32, #tpu.memory_space<vmem>>, %arg4: memref<56x64xbf16, #tpu.memory_space<vmem>>) attributes {dimension_semantics = [#tpu.dimension_semantics<parallel>], iteration_bounds = array<i64: 2>, scalar_prefetch = 0 : i64, scratch_operands = 0 : i64, tpu.core_type = #tpu.core_type<tc>, window_params = [{transform_indices = @transform_0, window_bounds = array<i64: 56, 288>}, {pipeline_mode = #tpu.pipeline_mode<synchronous>, transform_indices = @transform_1, window_bounds = array<i64: 288, 64>}, {pipeline_mode = #tpu.pipeline_mode<synchronous>, transform_indices = @transform_2, window_bounds = array<i64: 1, 64>}, {transform_indices = @transform_3, window_bounds = array<i64: 56, 64>}]} {
    %c0 = arith.constant 0 : index
    %c0_0 = arith.constant 0 : index
    %0 = vector.load %arg1[%c0, %c0_0] : memref<56x288xbf16, #tpu.memory_space<vmem>>, vector<56x288xbf16>
    %cst = arith.constant 0.000000e+00 : bf16
    %1 = vector.broadcast %cst : bf16 to vector<56x288xbf16>
    %2 = arith.maximumf %0, %1 : vector<56x288xbf16>
    %c0_1 = arith.constant 0 : index
    %c0_2 = arith.constant 0 : index
    %3 = vector.load %arg2[%c0_1, %c0_2] : memref<288x64xbf16, #tpu.memory_space<vmem>>, vector<288x64xbf16>
    %cst_3 = arith.constant dense<0.000000e+00> : vector<56x64xf32>
    %4 = tpu.matmul %2, %3, %cst_3 {dimension_numbers = #tpu.dot_dimension_numbers<[1], [0], [0], [1], [0, 0, 1, 1], [], []>} : vector<56x288xbf16>, vector<288x64xbf16>, vector<56x64xf32> -> vector<56x64xf32>
    %c0_4 = arith.constant 0 : index
    %c0_5 = arith.constant 0 : index
    %5 = vector.load %arg3[%c0_4, %c0_5] : memref<1x64xf32, #tpu.memory_space<vmem>>, vector<1x64xf32>
    %6 = vector.broadcast %5 : vector<1x64xf32> to vector<56x64xf32>
    %7 = arith.addf %4, %6 : vector<56x64xf32>
    %8 = arith.truncf %7 : vector<56x64xf32> to vector<56x64xbf16>
    %c0_6 = arith.constant 0 : index
    %c0_7 = arith.constant 0 : index
    %9 = vector.load %arg4[%c0_6, %c0_7] : memref<56x64xbf16, #tpu.memory_space<vmem>>, vector<56x64xbf16>
    tpu.vector_store %arg4[%c0_6, %c0_7], %8 {strides = array<i32>} : memref<56x64xbf16, #tpu.memory_space<vmem>>, vector<56x64xbf16>,
    return
  }
  func.func @transform_0(%arg0: i32) -> (i32, i32) {
    %c0_i32 = arith.constant 0 : i32
    %c0_i32_0 = arith.constant 0 : i32
    return %arg0, %c0_i32 : i32, i32
  }
  func.func @transform_1(%arg0: i32) -> (i32, i32) {
    %c0_i32 = arith.constant 0 : i32
    %c0_i32_0 = arith.constant 0 : i32
    %c0_i32_1 = arith.constant 0 : i32
    return %c0_i32, %c0_i32_0 : i32, i32
  }
  func.func @transform_2(%arg0: i32) -> (i32, i32) {
    %c0_i32 = arith.constant 0 : i32
    %c0_i32_0 = arith.constant 0 : i32
    %c0_i32_1 = arith.constant 0 : i32
    return %c0_i32, %c0_i32_0 : i32, i32
  }
  func.func @transform_3(%arg0: i32) -> (i32, i32) {
    %c0_i32 = arith.constant 0 : i32
    %c0_i32_0 = arith.constant 0 : i32
    return %arg0, %c0_i32 : i32, i32
  }
}

module attributes {stable_mosaic.version = 11 : i64} {
  func.func @_fmm_kernel(%arg0: i32, %arg1: memref<56x576xbf16, #tpu.memory_space<vmem>>, %arg2: memref<576x64xbf16, #tpu.memory_space<vmem>>, %arg3: memref<1x64xf32, #tpu.memory_space<vmem>>, %arg4: memref<56x64xbf16, #tpu.memory_space<vmem>>) attributes {dimension_semantics = [#tpu.dimension_semantics<parallel>], iteration_bounds = array<i64: 2>, scalar_prefetch = 0 : i64, scratch_operands = 0 : i64, tpu.core_type = #tpu.core_type<tc>, window_params = [{transform_indices = @transform_0, window_bounds = array<i64: 56, 576>}, {pipeline_mode = #tpu.pipeline_mode<synchronous>, transform_indices = @transform_1, window_bounds = array<i64: 576, 64>}, {pipeline_mode = #tpu.pipeline_mode<synchronous>, transform_indices = @transform_2, window_bounds = array<i64: 1, 64>}, {transform_indices = @transform_3, window_bounds = array<i64: 56, 64>}]} {
    %c0 = arith.constant 0 : index
    %c0_0 = arith.constant 0 : index
    %0 = vector.load %arg1[%c0, %c0_0] : memref<56x576xbf16, #tpu.memory_space<vmem>>, vector<56x576xbf16>
    %cst = arith.constant 0.000000e+00 : bf16
    %1 = vector.broadcast %cst : bf16 to vector<56x576xbf16>
    %2 = arith.maximumf %0, %1 : vector<56x576xbf16>
    %c0_1 = arith.constant 0 : index
    %c0_2 = arith.constant 0 : index
    %3 = vector.load %arg2[%c0_1, %c0_2] : memref<576x64xbf16, #tpu.memory_space<vmem>>, vector<576x64xbf16>
    %cst_3 = arith.constant dense<0.000000e+00> : vector<56x64xf32>
    %4 = tpu.matmul %2, %3, %cst_3 {dimension_numbers = #tpu.dot_dimension_numbers<[1], [0], [0], [1], [0, 0, 1, 1], [], []>} : vector<56x576xbf16>, vector<576x64xbf16>, vector<56x64xf32> -> vector<56x64xf32>
    %c0_4 = arith.constant 0 : index
    %c0_5 = arith.constant 0 : index
    %5 = vector.load %arg3[%c0_4, %c0_5] : memref<1x64xf32, #tpu.memory_space<vmem>>, vector<1x64xf32>
    %6 = vector.broadcast %5 : vector<1x64xf32> to vector<56x64xf32>
    %7 = arith.addf %4, %6 : vector<56x64xf32>
    %8 = arith.truncf %7 : vector<56x64xf32> to vector<56x64xbf16>
    %c0_6 = arith.constant 0 : index
    %c0_7 = arith.constant 0 : index
    %9 = vector.load %arg4[%c0_6, %c0_7] : memref<56x64xbf16, #tpu.memory_space<vmem>>, vector<56x64xbf16>
    tpu.vector_store %arg4[%c0_6, %c0_7], %8 {strides = array<i32>} : memref<56x64xbf16, #tpu.memory_space<vmem>>, vector<56x64xbf16>,
    return
  }
  func.func @transform_0(%arg0: i32) -> (i32, i32) {
    %c0_i32 = arith.constant 0 : i32
    %c0_i32_0 = arith.constant 0 : i32
    return %arg0, %c0_i32 : i32, i32
  }
  func.func @transform_1(%arg0: i32) -> (i32, i32) {
    %c0_i32 = arith.constant 0 : i32
    %c0_i32_0 = arith.constant 0 : i32
    %c0_i32_1 = arith.constant 0 : i32
    return %c0_i32, %c0_i32_0 : i32, i32
  }
  func.func @transform_2(%arg0: i32) -> (i32, i32) {
    %c0_i32 = arith.constant 0 : i32
    %c0_i32_0 = arith.constant 0 : i32
    %c0_i32_1 = arith.constant 0 : i32
    return %c0_i32, %c0_i32_0 : i32, i32
  }
  func.func @transform_3(%arg0: i32) -> (i32, i32) {
    %c0_i32 = arith.constant 0 : i32
    %c0_i32_0 = arith.constant 0 : i32
    return %arg0, %c0_i32 : i32, i32
  }
}

module attributes {stable_mosaic.version = 11 : i64} {
  func.func @_pool_skip_kernel(%arg0: i32, %arg1: memref<9x16x64xbf16, #tpu.memory_space<vmem>>, %arg2: memref<16x32xbf16, #tpu.memory_space<vmem>>, %arg3: memref<32x64xbf16, #tpu.memory_space<vmem>>, %arg4: memref<1x64xf32, #tpu.memory_space<vmem>>, %arg5: memref<16x64xbf16, #tpu.memory_space<vmem>>) attributes {dimension_semantics = [#tpu.dimension_semantics<parallel>], iteration_bounds = array<i64: 2>, scalar_prefetch = 0 : i64, scratch_operands = 0 : i64, tpu.core_type = #tpu.core_type<tc>, window_params = [{transform_indices = @transform_0, window_bounds = array<i64: 9, 16, 64>}, {transform_indices = @transform_1, window_bounds = array<i64: 16, 32>}, {pipeline_mode = #tpu.pipeline_mode<synchronous>, transform_indices = @transform_2, window_bounds = array<i64: 32, 64>}, {pipeline_mode = #tpu.pipeline_mode<synchronous>, transform_indices = @transform_3, window_bounds = array<i64: 1, 64>}, {transform_indices = @transform_4, window_bounds = array<i64: 16, 64>}]} {
    %c0 = arith.constant 0 : index
    %c0_0 = arith.constant 0 : index
    %c0_1 = arith.constant 0 : index
    %0 = vector.load %arg1[%c0, %c0_0, %c0_1] : memref<9x16x64xbf16, #tpu.memory_space<vmem>>, vector<9x16x64xbf16>
    %cst = arith.constant dense<0xFF80> : vector<16x64xbf16>
    %1 = vector.multi_reduction <maximumf>, %0, %cst [0] : vector<9x16x64xbf16> to vector<16x64xbf16>
    %2 = arith.extf %1 : vector<16x64xbf16> to vector<16x64xf32>
    %c0_2 = arith.constant 0 : index
    %c0_3 = arith.constant 0 : index
    %3 = vector.load %arg2[%c0_2, %c0_3] : memref<16x32xbf16, #tpu.memory_space<vmem>>, vector<16x32xbf16>
    %c0_4 = arith.constant 0 : index
    %c0_5 = arith.constant 0 : index
    %4 = vector.load %arg3[%c0_4, %c0_5] : memref<32x64xbf16, #tpu.memory_space<vmem>>, vector<32x64xbf16>
    %cst_6 = arith.constant dense<0.000000e+00> : vector<16x64xf32>
    %5 = tpu.matmul %3, %4, %cst_6 {dimension_numbers = #tpu.dot_dimension_numbers<[1], [0], [0], [1], [0, 0, 1, 1], [], []>} : vector<16x32xbf16>, vector<32x64xbf16>, vector<16x64xf32> -> vector<16x64xf32>
    %c0_7 = arith.constant 0 : index
    %c0_8 = arith.constant 0 : index
    %6 = vector.load %arg4[%c0_7, %c0_8] : memref<1x64xf32, #tpu.memory_space<vmem>>, vector<1x64xf32>
    %7 = vector.broadcast %6 : vector<1x64xf32> to vector<16x64xf32>
    %8 = arith.addf %5, %7 : vector<16x64xf32>
    %9 = arith.addf %2, %8 : vector<16x64xf32>
    %10 = arith.truncf %9 : vector<16x64xf32> to vector<16x64xbf16>
    %c0_9 = arith.constant 0 : index
    %c0_10 = arith.constant 0 : index
    %11 = vector.load %arg5[%c0_9, %c0_10] : memref<16x64xbf16, #tpu.memory_space<vmem>>, vector<16x64xbf16>
    tpu.vector_store %arg5[%c0_9, %c0_10], %10 {strides = array<i32>} : memref<16x64xbf16, #tpu.memory_space<vmem>>, vector<16x64xbf16>,
    return
  }
  func.func @transform_0(%arg0: i32) -> (i32, i32, i32) {
    %c0_i32 = arith.constant 0 : i32
    %c0_i32_0 = arith.constant 0 : i32
    %c0_i32_1 = arith.constant 0 : i32
    return %c0_i32, %arg0, %c0_i32_0 : i32, i32, i32
  }
  func.func @transform_1(%arg0: i32) -> (i32, i32) {
    %c0_i32 = arith.constant 0 : i32
    %c0_i32_0 = arith.constant 0 : i32
    return %arg0, %c0_i32 : i32, i32
  }
  func.func @transform_2(%arg0: i32) -> (i32, i32) {
    %c0_i32 = arith.constant 0 : i32
    %c0_i32_0 = arith.constant 0 : i32
    %c0_i32_1 = arith.constant 0 : i32
    return %c0_i32, %c0_i32_0 : i32, i32
  }
  func.func @transform_3(%arg0: i32) -> (i32, i32) {
    %c0_i32 = arith.constant 0 : i32
    %c0_i32_0 = arith.constant 0 : i32
    %c0_i32_1 = arith.constant 0 : i32
    return %c0_i32, %c0_i32_0 : i32, i32
  }
  func.func @transform_4(%arg0: i32) -> (i32, i32) {
    %c0_i32 = arith.constant 0 : i32
    %c0_i32_0 = arith.constant 0 : i32
    return %arg0, %c0_i32 : i32, i32
  }
}

module attributes {stable_mosaic.version = 11 : i64} {
  func.func @_fmm_kernel(%arg0: i32, %arg1: memref<16x576xbf16, #tpu.memory_space<vmem>>, %arg2: memref<576x128xbf16, #tpu.memory_space<vmem>>, %arg3: memref<1x128xf32, #tpu.memory_space<vmem>>, %arg4: memref<16x128xbf16, #tpu.memory_space<vmem>>) attributes {dimension_semantics = [#tpu.dimension_semantics<parallel>], iteration_bounds = array<i64: 2>, scalar_prefetch = 0 : i64, scratch_operands = 0 : i64, tpu.core_type = #tpu.core_type<tc>, window_params = [{transform_indices = @transform_0, window_bounds = array<i64: 16, 576>}, {pipeline_mode = #tpu.pipeline_mode<synchronous>, transform_indices = @transform_1, window_bounds = array<i64: 576, 128>}, {pipeline_mode = #tpu.pipeline_mode<synchronous>, transform_indices = @transform_2, window_bounds = array<i64: 1, 128>}, {transform_indices = @transform_3, window_bounds = array<i64: 16, 128>}]} {
    %c0 = arith.constant 0 : index
    %c0_0 = arith.constant 0 : index
    %0 = vector.load %arg1[%c0, %c0_0] : memref<16x576xbf16, #tpu.memory_space<vmem>>, vector<16x576xbf16>
    %cst = arith.constant 0.000000e+00 : bf16
    %1 = vector.broadcast %cst : bf16 to vector<16x576xbf16>
    %2 = arith.maximumf %0, %1 : vector<16x576xbf16>
    %c0_1 = arith.constant 0 : index
    %c0_2 = arith.constant 0 : index
    %3 = vector.load %arg2[%c0_1, %c0_2] : memref<576x128xbf16, #tpu.memory_space<vmem>>, vector<576x128xbf16>
    %cst_3 = arith.constant dense<0.000000e+00> : vector<16x128xf32>
    %4 = tpu.matmul %2, %3, %cst_3 {dimension_numbers = #tpu.dot_dimension_numbers<[1], [0], [0], [1], [0, 0, 1, 1], [], []>} : vector<16x576xbf16>, vector<576x128xbf16>, vector<16x128xf32> -> vector<16x128xf32>
    %c0_4 = arith.constant 0 : index
    %c0_5 = arith.constant 0 : index
    %5 = vector.load %arg3[%c0_4, %c0_5] : memref<1x128xf32, #tpu.memory_space<vmem>>, vector<1x128xf32>
    %6 = vector.broadcast %5 : vector<1x128xf32> to vector<16x128xf32>
    %7 = arith.addf %4, %6 : vector<16x128xf32>
    %8 = arith.truncf %7 : vector<16x128xf32> to vector<16x128xbf16>
    %c0_6 = arith.constant 0 : index
    %c0_7 = arith.constant 0 : index
    %9 = vector.load %arg4[%c0_6, %c0_7] : memref<16x128xbf16, #tpu.memory_space<vmem>>, vector<16x128xbf16>
    tpu.vector_store %arg4[%c0_6, %c0_7], %8 {strides = array<i32>} : memref<16x128xbf16, #tpu.memory_space<vmem>>, vector<16x128xbf16>,
    return
  }
  func.func @transform_0(%arg0: i32) -> (i32, i32) {
    %c0_i32 = arith.constant 0 : i32
    %c0_i32_0 = arith.constant 0 : i32
    return %arg0, %c0_i32 : i32, i32
  }
  func.func @transform_1(%arg0: i32) -> (i32, i32) {
    %c0_i32 = arith.constant 0 : i32
    %c0_i32_0 = arith.constant 0 : i32
    %c0_i32_1 = arith.constant 0 : i32
    return %c0_i32, %c0_i32_0 : i32, i32
  }
  func.func @transform_2(%arg0: i32) -> (i32, i32) {
    %c0_i32 = arith.constant 0 : i32
    %c0_i32_0 = arith.constant 0 : i32
    %c0_i32_1 = arith.constant 0 : i32
    return %c0_i32, %c0_i32_0 : i32, i32
  }
  func.func @transform_3(%arg0: i32) -> (i32, i32) {
    %c0_i32 = arith.constant 0 : i32
    %c0_i32_0 = arith.constant 0 : i32
    return %arg0, %c0_i32 : i32, i32
  }
}

module attributes {stable_mosaic.version = 11 : i64} {
  func.func @_fmm_kernel(%arg0: i32, %arg1: memref<16x1152xbf16, #tpu.memory_space<vmem>>, %arg2: memref<1152x128xbf16, #tpu.memory_space<vmem>>, %arg3: memref<1x128xf32, #tpu.memory_space<vmem>>, %arg4: memref<16x128xbf16, #tpu.memory_space<vmem>>) attributes {dimension_semantics = [#tpu.dimension_semantics<parallel>], iteration_bounds = array<i64: 2>, scalar_prefetch = 0 : i64, scratch_operands = 0 : i64, tpu.core_type = #tpu.core_type<tc>, window_params = [{transform_indices = @transform_0, window_bounds = array<i64: 16, 1152>}, {pipeline_mode = #tpu.pipeline_mode<synchronous>, transform_indices = @transform_1, window_bounds = array<i64: 1152, 128>}, {pipeline_mode = #tpu.pipeline_mode<synchronous>, transform_indices = @transform_2, window_bounds = array<i64: 1, 128>}, {transform_indices = @transform_3, window_bounds = array<i64: 16, 128>}]} {
    %c0 = arith.constant 0 : index
    %c0_0 = arith.constant 0 : index
    %0 = vector.load %arg1[%c0, %c0_0] : memref<16x1152xbf16, #tpu.memory_space<vmem>>, vector<16x1152xbf16>
    %cst = arith.constant 0.000000e+00 : bf16
    %1 = vector.broadcast %cst : bf16 to vector<16x1152xbf16>
    %2 = arith.maximumf %0, %1 : vector<16x1152xbf16>
    %c0_1 = arith.constant 0 : index
    %c0_2 = arith.constant 0 : index
    %3 = vector.load %arg2[%c0_1, %c0_2] : memref<1152x128xbf16, #tpu.memory_space<vmem>>, vector<1152x128xbf16>
    %cst_3 = arith.constant dense<0.000000e+00> : vector<16x128xf32>
    %4 = tpu.matmul %2, %3, %cst_3 {dimension_numbers = #tpu.dot_dimension_numbers<[1], [0], [0], [1], [0, 0, 1, 1], [], []>} : vector<16x1152xbf16>, vector<1152x128xbf16>, vector<16x128xf32> -> vector<16x128xf32>
    %c0_4 = arith.constant 0 : index
    %c0_5 = arith.constant 0 : index
    %5 = vector.load %arg3[%c0_4, %c0_5] : memref<1x128xf32, #tpu.memory_space<vmem>>, vector<1x128xf32>
    %6 = vector.broadcast %5 : vector<1x128xf32> to vector<16x128xf32>
    %7 = arith.addf %4, %6 : vector<16x128xf32>
    %8 = arith.truncf %7 : vector<16x128xf32> to vector<16x128xbf16>
    %c0_6 = arith.constant 0 : index
    %c0_7 = arith.constant 0 : index
    %9 = vector.load %arg4[%c0_6, %c0_7] : memref<16x128xbf16, #tpu.memory_space<vmem>>, vector<16x128xbf16>
    tpu.vector_store %arg4[%c0_6, %c0_7], %8 {strides = array<i32>} : memref<16x128xbf16, #tpu.memory_space<vmem>>, vector<16x128xbf16>,
    return
  }
  func.func @transform_0(%arg0: i32) -> (i32, i32) {
    %c0_i32 = arith.constant 0 : i32
    %c0_i32_0 = arith.constant 0 : i32
    return %arg0, %c0_i32 : i32, i32
  }
  func.func @transform_1(%arg0: i32) -> (i32, i32) {
    %c0_i32 = arith.constant 0 : i32
    %c0_i32_0 = arith.constant 0 : i32
    %c0_i32_1 = arith.constant 0 : i32
    return %c0_i32, %c0_i32_0 : i32, i32
  }
  func.func @transform_2(%arg0: i32) -> (i32, i32) {
    %c0_i32 = arith.constant 0 : i32
    %c0_i32_0 = arith.constant 0 : i32
    %c0_i32_1 = arith.constant 0 : i32
    return %c0_i32, %c0_i32_0 : i32, i32
  }
  func.func @transform_3(%arg0: i32) -> (i32, i32) {
    %c0_i32 = arith.constant 0 : i32
    %c0_i32_0 = arith.constant 0 : i32
    return %arg0, %c0_i32 : i32, i32
  }
}

module attributes {stable_mosaic.version = 11 : i64} {
  func.func @_pool_skip_kernel(%arg0: i32, %arg1: memref<9x8x128xbf16, #tpu.memory_space<vmem>>, %arg2: memref<8x64xbf16, #tpu.memory_space<vmem>>, %arg3: memref<64x128xbf16, #tpu.memory_space<vmem>>, %arg4: memref<1x128xf32, #tpu.memory_space<vmem>>, %arg5: memref<8x128xbf16, #tpu.memory_space<vmem>>) attributes {dimension_semantics = [#tpu.dimension_semantics<parallel>], iteration_bounds = array<i64: 2>, scalar_prefetch = 0 : i64, scratch_operands = 0 : i64, tpu.core_type = #tpu.core_type<tc>, window_params = [{transform_indices = @transform_0, window_bounds = array<i64: 9, 8, 128>}, {transform_indices = @transform_1, window_bounds = array<i64: 8, 64>}, {pipeline_mode = #tpu.pipeline_mode<synchronous>, transform_indices = @transform_2, window_bounds = array<i64: 64, 128>}, {pipeline_mode = #tpu.pipeline_mode<synchronous>, transform_indices = @transform_3, window_bounds = array<i64: 1, 128>}, {transform_indices = @transform_4, window_bounds = array<i64: 8, 128>}]} {
    %c0 = arith.constant 0 : index
    %c0_0 = arith.constant 0 : index
    %c0_1 = arith.constant 0 : index
    %0 = vector.load %arg1[%c0, %c0_0, %c0_1] : memref<9x8x128xbf16, #tpu.memory_space<vmem>>, vector<9x8x128xbf16>
    %cst = arith.constant dense<0xFF80> : vector<8x128xbf16>
    %1 = vector.multi_reduction <maximumf>, %0, %cst [0] : vector<9x8x128xbf16> to vector<8x128xbf16>
    %2 = arith.extf %1 : vector<8x128xbf16> to vector<8x128xf32>
    %c0_2 = arith.constant 0 : index
    %c0_3 = arith.constant 0 : index
    %3 = vector.load %arg2[%c0_2, %c0_3] : memref<8x64xbf16, #tpu.memory_space<vmem>>, vector<8x64xbf16>
    %c0_4 = arith.constant 0 : index
    %c0_5 = arith.constant 0 : index
    %4 = vector.load %arg3[%c0_4, %c0_5] : memref<64x128xbf16, #tpu.memory_space<vmem>>, vector<64x128xbf16>
    %cst_6 = arith.constant dense<0.000000e+00> : vector<8x128xf32>
    %5 = tpu.matmul %3, %4, %cst_6 {dimension_numbers = #tpu.dot_dimension_numbers<[1], [0], [0], [1], [0, 0, 1, 1], [], []>} : vector<8x64xbf16>, vector<64x128xbf16>, vector<8x128xf32> -> vector<8x128xf32>
    %c0_7 = arith.constant 0 : index
    %c0_8 = arith.constant 0 : index
    %6 = vector.load %arg4[%c0_7, %c0_8] : memref<1x128xf32, #tpu.memory_space<vmem>>, vector<1x128xf32>
    %7 = vector.broadcast %6 : vector<1x128xf32> to vector<8x128xf32>
    %8 = arith.addf %5, %7 : vector<8x128xf32>
    %9 = arith.addf %2, %8 : vector<8x128xf32>
    %10 = arith.truncf %9 : vector<8x128xf32> to vector<8x128xbf16>
    %c0_9 = arith.constant 0 : index
    %c0_10 = arith.constant 0 : index
    %11 = vector.load %arg5[%c0_9, %c0_10] : memref<8x128xbf16, #tpu.memory_space<vmem>>, vector<8x128xbf16>
    tpu.vector_store %arg5[%c0_9, %c0_10], %10 {strides = array<i32>} : memref<8x128xbf16, #tpu.memory_space<vmem>>, vector<8x128xbf16>,
    return
  }
  func.func @transform_0(%arg0: i32) -> (i32, i32, i32) {
    %c0_i32 = arith.constant 0 : i32
    %c0_i32_0 = arith.constant 0 : i32
    %c0_i32_1 = arith.constant 0 : i32
    return %c0_i32, %arg0, %c0_i32_0 : i32, i32, i32
  }
  func.func @transform_1(%arg0: i32) -> (i32, i32) {
    %c0_i32 = arith.constant 0 : i32
    %c0_i32_0 = arith.constant 0 : i32
    return %arg0, %c0_i32 : i32, i32
  }
  func.func @transform_2(%arg0: i32) -> (i32, i32) {
    %c0_i32 = arith.constant 0 : i32
    %c0_i32_0 = arith.constant 0 : i32
    %c0_i32_1 = arith.constant 0 : i32
    return %c0_i32, %c0_i32_0 : i32, i32
  }
  func.func @transform_3(%arg0: i32) -> (i32, i32) {
    %c0_i32 = arith.constant 0 : i32
    %c0_i32_0 = arith.constant 0 : i32
    %c0_i32_1 = arith.constant 0 : i32
    return %c0_i32, %c0_i32_0 : i32, i32
  }
  func.func @transform_4(%arg0: i32) -> (i32, i32) {
    %c0_i32 = arith.constant 0 : i32
    %c0_i32_0 = arith.constant 0 : i32
    return %arg0, %c0_i32 : i32, i32
  }
}

module attributes {stable_mosaic.version = 11 : i64} {
  func.func @_fmm_kernel(%arg0: i32, %arg1: memref<8x1152xbf16, #tpu.memory_space<vmem>>, %arg2: memref<1152x128xbf16, #tpu.memory_space<vmem>>, %arg3: memref<1x128xf32, #tpu.memory_space<vmem>>, %arg4: memref<8x128xbf16, #tpu.memory_space<vmem>>, %arg5: memref<8x128xbf16, #tpu.memory_space<vmem>>) attributes {dimension_semantics = [#tpu.dimension_semantics<parallel>], iteration_bounds = array<i64: 2>, scalar_prefetch = 0 : i64, scratch_operands = 0 : i64, tpu.core_type = #tpu.core_type<tc>, window_params = [{transform_indices = @transform_0, window_bounds = array<i64: 8, 1152>}, {pipeline_mode = #tpu.pipeline_mode<synchronous>, transform_indices = @transform_1, window_bounds = array<i64: 1152, 128>}, {pipeline_mode = #tpu.pipeline_mode<synchronous>, transform_indices = @transform_2, window_bounds = array<i64: 1, 128>}, {transform_indices = @transform_3, window_bounds = array<i64: 8, 128>}, {transform_indices = @transform_4, window_bounds = array<i64: 8, 128>}]} {
    %c0 = arith.constant 0 : index
    %c0_0 = arith.constant 0 : index
    %0 = vector.load %arg1[%c0, %c0_0] : memref<8x1152xbf16, #tpu.memory_space<vmem>>, vector<8x1152xbf16>
    %cst = arith.constant 0.000000e+00 : bf16
    %1 = vector.broadcast %cst : bf16 to vector<8x1152xbf16>
    %2 = arith.maximumf %0, %1 : vector<8x1152xbf16>
    %c0_1 = arith.constant 0 : index
    %c0_2 = arith.constant 0 : index
    %3 = vector.load %arg2[%c0_1, %c0_2] : memref<1152x128xbf16, #tpu.memory_space<vmem>>, vector<1152x128xbf16>
    %cst_3 = arith.constant dense<0.000000e+00> : vector<8x128xf32>
    %4 = tpu.matmul %2, %3, %cst_3 {dimension_numbers = #tpu.dot_dimension_numbers<[1], [0], [0], [1], [0, 0, 1, 1], [], []>} : vector<8x1152xbf16>, vector<1152x128xbf16>, vector<8x128xf32> -> vector<8x128xf32>
    %c0_4 = arith.constant 0 : index
    %c0_5 = arith.constant 0 : index
    %5 = vector.load %arg3[%c0_4, %c0_5] : memref<1x128xf32, #tpu.memory_space<vmem>>, vector<1x128xf32>
    %6 = vector.broadcast %5 : vector<1x128xf32> to vector<8x128xf32>
    %7 = arith.addf %4, %6 : vector<8x128xf32>
    %c0_6 = arith.constant 0 : index
    %c0_7 = arith.constant 0 : index
    %8 = vector.load %arg4[%c0_6, %c0_7] : memref<8x128xbf16, #tpu.memory_space<vmem>>, vector<8x128xbf16>
    %9 = arith.extf %8 : vector<8x128xbf16> to vector<8x128xf32>
    %10 = arith.addf %7, %9 : vector<8x128xf32>
    %11 = arith.truncf %10 : vector<8x128xf32> to vector<8x128xbf16>
    %c0_8 = arith.constant 0 : index
    %c0_9 = arith.constant 0 : index
    %12 = vector.load %arg5[%c0_8, %c0_9] : memref<8x128xbf16, #tpu.memory_space<vmem>>, vector<8x128xbf16>
    tpu.vector_store %arg5[%c0_8, %c0_9], %11 {strides = array<i32>} : memref<8x128xbf16, #tpu.memory_space<vmem>>, vector<8x128xbf16>,
    return
  }
  func.func @transform_0(%arg0: i32) -> (i32, i32) {
    %c0_i32 = arith.constant 0 : i32
    %c0_i32_0 = arith.constant 0 : i32
    return %arg0, %c0_i32 : i32, i32
  }
  func.func @transform_1(%arg0: i32) -> (i32, i32) {
    %c0_i32 = arith.constant 0 : i32
    %c0_i32_0 = arith.constant 0 : i32
    %c0_i32_1 = arith.constant 0 : i32
    return %c0_i32, %c0_i32_0 : i32, i32
  }
  func.func @transform_2(%arg0: i32) -> (i32, i32) {
    %c0_i32 = arith.constant 0 : i32
    %c0_i32_0 = arith.constant 0 : i32
    %c0_i32_1 = arith.constant 0 : i32
    return %c0_i32, %c0_i32_0 : i32, i32
  }
  func.func @transform_3(%arg0: i32) -> (i32, i32) {
    %c0_i32 = arith.constant 0 : i32
    %c0_i32_0 = arith.constant 0 : i32
    return %arg0, %c0_i32 : i32, i32
  }
  func.func @transform_4(%arg0: i32) -> (i32, i32) {
    %c0_i32 = arith.constant 0 : i32
    %c0_i32_0 = arith.constant 0 : i32
    return %arg0, %c0_i32 : i32, i32
  }
}

module attributes {stable_mosaic.version = 11 : i64} {
  func.func @_fmm_kernel(%arg0: i32, %arg1: memref<8x1152xbf16, #tpu.memory_space<vmem>>, %arg2: memref<1152x128xbf16, #tpu.memory_space<vmem>>, %arg3: memref<1x128xf32, #tpu.memory_space<vmem>>, %arg4: memref<8x128xbf16, #tpu.memory_space<vmem>>) attributes {dimension_semantics = [#tpu.dimension_semantics<parallel>], iteration_bounds = array<i64: 2>, scalar_prefetch = 0 : i64, scratch_operands = 0 : i64, tpu.core_type = #tpu.core_type<tc>, window_params = [{transform_indices = @transform_0, window_bounds = array<i64: 8, 1152>}, {pipeline_mode = #tpu.pipeline_mode<synchronous>, transform_indices = @transform_1, window_bounds = array<i64: 1152, 128>}, {pipeline_mode = #tpu.pipeline_mode<synchronous>, transform_indices = @transform_2, window_bounds = array<i64: 1, 128>}, {transform_indices = @transform_3, window_bounds = array<i64: 8, 128>}]} {
    %c0 = arith.constant 0 : index
    %c0_0 = arith.constant 0 : index
    %0 = vector.load %arg1[%c0, %c0_0] : memref<8x1152xbf16, #tpu.memory_space<vmem>>, vector<8x1152xbf16>
    %cst = arith.constant 0.000000e+00 : bf16
    %1 = vector.broadcast %cst : bf16 to vector<8x1152xbf16>
    %2 = arith.maximumf %0, %1 : vector<8x1152xbf16>
    %c0_1 = arith.constant 0 : index
    %c0_2 = arith.constant 0 : index
    %3 = vector.load %arg2[%c0_1, %c0_2] : memref<1152x128xbf16, #tpu.memory_space<vmem>>, vector<1152x128xbf16>
    %cst_3 = arith.constant dense<0.000000e+00> : vector<8x128xf32>
    %4 = tpu.matmul %2, %3, %cst_3 {dimension_numbers = #tpu.dot_dimension_numbers<[1], [0], [0], [1], [0, 0, 1, 1], [], []>} : vector<8x1152xbf16>, vector<1152x128xbf16>, vector<8x128xf32> -> vector<8x128xf32>
    %c0_4 = arith.constant 0 : index
    %c0_5 = arith.constant 0 : index
    %5 = vector.load %arg3[%c0_4, %c0_5] : memref<1x128xf32, #tpu.memory_space<vmem>>, vector<1x128xf32>
    %6 = vector.broadcast %5 : vector<1x128xf32> to vector<8x128xf32>
    %7 = arith.addf %4, %6 : vector<8x128xf32>
    %8 = arith.truncf %7 : vector<8x128xf32> to vector<8x128xbf16>
    %c0_6 = arith.constant 0 : index
    %c0_7 = arith.constant 0 : index
    %9 = vector.load %arg4[%c0_6, %c0_7] : memref<8x128xbf16, #tpu.memory_space<vmem>>, vector<8x128xbf16>
    tpu.vector_store %arg4[%c0_6, %c0_7], %8 {strides = array<i32>} : memref<8x128xbf16, #tpu.memory_space<vmem>>, vector<8x128xbf16>,
    return
  }
  func.func @transform_0(%arg0: i32) -> (i32, i32) {
    %c0_i32 = arith.constant 0 : i32
    %c0_i32_0 = arith.constant 0 : i32
    return %arg0, %c0_i32 : i32, i32
  }
  func.func @transform_1(%arg0: i32) -> (i32, i32) {
    %c0_i32 = arith.constant 0 : i32
    %c0_i32_0 = arith.constant 0 : i32
    %c0_i32_1 = arith.constant 0 : i32
    return %c0_i32, %c0_i32_0 : i32, i32
  }
  func.func @transform_2(%arg0: i32) -> (i32, i32) {
    %c0_i32 = arith.constant 0 : i32
    %c0_i32_0 = arith.constant 0 : i32
    %c0_i32_1 = arith.constant 0 : i32
    return %c0_i32, %c0_i32_0 : i32, i32
  }
  func.func @transform_3(%arg0: i32) -> (i32, i32) {
    %c0_i32 = arith.constant 0 : i32
    %c0_i32_0 = arith.constant 0 : i32
    return %arg0, %c0_i32 : i32, i32
  }
}

module attributes {stable_mosaic.version = 11 : i64} {
  func.func @_fmm_kernel(%arg0: i32, %arg1: memref<8x1152xbf16, #tpu.memory_space<vmem>>, %arg2: memref<1152x160xbf16, #tpu.memory_space<vmem>>, %arg3: memref<1x160xf32, #tpu.memory_space<vmem>>, %arg4: memref<8x160xbf16, #tpu.memory_space<vmem>>) attributes {dimension_semantics = [#tpu.dimension_semantics<parallel>], iteration_bounds = array<i64: 2>, scalar_prefetch = 0 : i64, scratch_operands = 0 : i64, tpu.core_type = #tpu.core_type<tc>, window_params = [{transform_indices = @transform_0, window_bounds = array<i64: 8, 1152>}, {pipeline_mode = #tpu.pipeline_mode<synchronous>, transform_indices = @transform_1, window_bounds = array<i64: 1152, 160>}, {pipeline_mode = #tpu.pipeline_mode<synchronous>, transform_indices = @transform_2, window_bounds = array<i64: 1, 160>}, {transform_indices = @transform_3, window_bounds = array<i64: 8, 160>}]} {
    %c0 = arith.constant 0 : index
    %c0_0 = arith.constant 0 : index
    %0 = vector.load %arg1[%c0, %c0_0] : memref<8x1152xbf16, #tpu.memory_space<vmem>>, vector<8x1152xbf16>
    %cst = arith.constant 0.000000e+00 : bf16
    %1 = vector.broadcast %cst : bf16 to vector<8x1152xbf16>
    %2 = arith.maximumf %0, %1 : vector<8x1152xbf16>
    %c0_1 = arith.constant 0 : index
    %c0_2 = arith.constant 0 : index
    %3 = vector.load %arg2[%c0_1, %c0_2] : memref<1152x160xbf16, #tpu.memory_space<vmem>>, vector<1152x160xbf16>
    %cst_3 = arith.constant dense<0.000000e+00> : vector<8x160xf32>
    %4 = tpu.matmul %2, %3, %cst_3 {dimension_numbers = #tpu.dot_dimension_numbers<[1], [0], [0], [1], [0, 0, 1, 1], [], []>} : vector<8x1152xbf16>, vector<1152x160xbf16>, vector<8x160xf32> -> vector<8x160xf32>
    %c0_4 = arith.constant 0 : index
    %c0_5 = arith.constant 0 : index
    %5 = vector.load %arg3[%c0_4, %c0_5] : memref<1x160xf32, #tpu.memory_space<vmem>>, vector<1x160xf32>
    %6 = vector.broadcast %5 : vector<1x160xf32> to vector<8x160xf32>
    %7 = arith.addf %4, %6 : vector<8x160xf32>
    %8 = arith.truncf %7 : vector<8x160xf32> to vector<8x160xbf16>
    %c0_6 = arith.constant 0 : index
    %c0_7 = arith.constant 0 : index
    %9 = vector.load %arg4[%c0_6, %c0_7] : memref<8x160xbf16, #tpu.memory_space<vmem>>, vector<8x160xbf16>
    tpu.vector_store %arg4[%c0_6, %c0_7], %8 {strides = array<i32>} : memref<8x160xbf16, #tpu.memory_space<vmem>>, vector<8x160xbf16>,
    return
  }
  func.func @transform_0(%arg0: i32) -> (i32, i32) {
    %c0_i32 = arith.constant 0 : i32
    %c0_i32_0 = arith.constant 0 : i32
    return %arg0, %c0_i32 : i32, i32
  }
  func.func @transform_1(%arg0: i32) -> (i32, i32) {
    %c0_i32 = arith.constant 0 : i32
    %c0_i32_0 = arith.constant 0 : i32
    %c0_i32_1 = arith.constant 0 : i32
    return %c0_i32, %c0_i32_0 : i32, i32
  }
  func.func @transform_2(%arg0: i32) -> (i32, i32) {
    %c0_i32 = arith.constant 0 : i32
    %c0_i32_0 = arith.constant 0 : i32
    %c0_i32_1 = arith.constant 0 : i32
    return %c0_i32, %c0_i32_0 : i32, i32
  }
  func.func @transform_3(%arg0: i32) -> (i32, i32) {
    %c0_i32 = arith.constant 0 : i32
    %c0_i32_0 = arith.constant 0 : i32
    return %arg0, %c0_i32 : i32, i32
  }
}

module attributes {stable_mosaic.version = 11 : i64} {
  func.func @_pool_skip_kernel(%arg0: i32, %arg1: memref<9x8x160xbf16, #tpu.memory_space<vmem>>, %arg2: memref<8x128xbf16, #tpu.memory_space<vmem>>, %arg3: memref<128x160xbf16, #tpu.memory_space<vmem>>, %arg4: memref<1x160xf32, #tpu.memory_space<vmem>>, %arg5: memref<8x160xbf16, #tpu.memory_space<vmem>>) attributes {dimension_semantics = [#tpu.dimension_semantics<parallel>], iteration_bounds = array<i64: 2>, scalar_prefetch = 0 : i64, scratch_operands = 0 : i64, tpu.core_type = #tpu.core_type<tc>, window_params = [{transform_indices = @transform_0, window_bounds = array<i64: 9, 8, 160>}, {transform_indices = @transform_1, window_bounds = array<i64: 8, 128>}, {pipeline_mode = #tpu.pipeline_mode<synchronous>, transform_indices = @transform_2, window_bounds = array<i64: 128, 160>}, {pipeline_mode = #tpu.pipeline_mode<synchronous>, transform_indices = @transform_3, window_bounds = array<i64: 1, 160>}, {transform_indices = @transform_4, window_bounds = array<i64: 8, 160>}]} {
    %c0 = arith.constant 0 : index
    %c0_0 = arith.constant 0 : index
    %c0_1 = arith.constant 0 : index
    %0 = vector.load %arg1[%c0, %c0_0, %c0_1] : memref<9x8x160xbf16, #tpu.memory_space<vmem>>, vector<9x8x160xbf16>
    %cst = arith.constant dense<0xFF80> : vector<8x160xbf16>
    %1 = vector.multi_reduction <maximumf>, %0, %cst [0] : vector<9x8x160xbf16> to vector<8x160xbf16>
    %2 = arith.extf %1 : vector<8x160xbf16> to vector<8x160xf32>
    %c0_2 = arith.constant 0 : index
    %c0_3 = arith.constant 0 : index
    %3 = vector.load %arg2[%c0_2, %c0_3] : memref<8x128xbf16, #tpu.memory_space<vmem>>, vector<8x128xbf16>
    %c0_4 = arith.constant 0 : index
    %c0_5 = arith.constant 0 : index
    %4 = vector.load %arg3[%c0_4, %c0_5] : memref<128x160xbf16, #tpu.memory_space<vmem>>, vector<128x160xbf16>
    %cst_6 = arith.constant dense<0.000000e+00> : vector<8x160xf32>
    %5 = tpu.matmul %3, %4, %cst_6 {dimension_numbers = #tpu.dot_dimension_numbers<[1], [0], [0], [1], [0, 0, 1, 1], [], []>} : vector<8x128xbf16>, vector<128x160xbf16>, vector<8x160xf32> -> vector<8x160xf32>
    %c0_7 = arith.constant 0 : index
    %c0_8 = arith.constant 0 : index
    %6 = vector.load %arg4[%c0_7, %c0_8] : memref<1x160xf32, #tpu.memory_space<vmem>>, vector<1x160xf32>
    %7 = vector.broadcast %6 : vector<1x160xf32> to vector<8x160xf32>
    %8 = arith.addf %5, %7 : vector<8x160xf32>
    %9 = arith.addf %2, %8 : vector<8x160xf32>
    %10 = arith.truncf %9 : vector<8x160xf32> to vector<8x160xbf16>
    %c0_9 = arith.constant 0 : index
    %c0_10 = arith.constant 0 : index
    %11 = vector.load %arg5[%c0_9, %c0_10] : memref<8x160xbf16, #tpu.memory_space<vmem>>, vector<8x160xbf16>
    tpu.vector_store %arg5[%c0_9, %c0_10], %10 {strides = array<i32>} : memref<8x160xbf16, #tpu.memory_space<vmem>>, vector<8x160xbf16>,
    return
  }
  func.func @transform_0(%arg0: i32) -> (i32, i32, i32) {
    %c0_i32 = arith.constant 0 : i32
    %c0_i32_0 = arith.constant 0 : i32
    %c0_i32_1 = arith.constant 0 : i32
    return %c0_i32, %arg0, %c0_i32_0 : i32, i32, i32
  }
  func.func @transform_1(%arg0: i32) -> (i32, i32) {
    %c0_i32 = arith.constant 0 : i32
    %c0_i32_0 = arith.constant 0 : i32
    return %arg0, %c0_i32 : i32, i32
  }
  func.func @transform_2(%arg0: i32) -> (i32, i32) {
    %c0_i32 = arith.constant 0 : i32
    %c0_i32_0 = arith.constant 0 : i32
    %c0_i32_1 = arith.constant 0 : i32
    return %c0_i32, %c0_i32_0 : i32, i32
  }
  func.func @transform_3(%arg0: i32) -> (i32, i32) {
    %c0_i32 = arith.constant 0 : i32
    %c0_i32_0 = arith.constant 0 : i32
    %c0_i32_1 = arith.constant 0 : i32
    return %c0_i32, %c0_i32_0 : i32, i32
  }
  func.func @transform_4(%arg0: i32) -> (i32, i32) {
    %c0_i32 = arith.constant 0 : i32
    %c0_i32_0 = arith.constant 0 : i32
    return %arg0, %c0_i32 : i32, i32
  }
}

module attributes {stable_mosaic.version = 11 : i64} {
  func.func @_fmm_kernel(%arg0: i32, %arg1: memref<8x1440xbf16, #tpu.memory_space<vmem>>, %arg2: memref<1440x192xbf16, #tpu.memory_space<vmem>>, %arg3: memref<1x192xf32, #tpu.memory_space<vmem>>, %arg4: memref<8x192xbf16, #tpu.memory_space<vmem>>) attributes {dimension_semantics = [#tpu.dimension_semantics<parallel>], iteration_bounds = array<i64: 2>, scalar_prefetch = 0 : i64, scratch_operands = 0 : i64, tpu.core_type = #tpu.core_type<tc>, window_params = [{transform_indices = @transform_0, window_bounds = array<i64: 8, 1440>}, {pipeline_mode = #tpu.pipeline_mode<synchronous>, transform_indices = @transform_1, window_bounds = array<i64: 1440, 192>}, {pipeline_mode = #tpu.pipeline_mode<synchronous>, transform_indices = @transform_2, window_bounds = array<i64: 1, 192>}, {transform_indices = @transform_3, window_bounds = array<i64: 8, 192>}]} {
    %c0 = arith.constant 0 : index
    %c0_0 = arith.constant 0 : index
    %0 = vector.load %arg1[%c0, %c0_0] : memref<8x1440xbf16, #tpu.memory_space<vmem>>, vector<8x1440xbf16>
    %c0_1 = arith.constant 0 : index
    %c0_2 = arith.constant 0 : index
    %1 = vector.load %arg2[%c0_1, %c0_2] : memref<1440x192xbf16, #tpu.memory_space<vmem>>, vector<1440x192xbf16>
    %cst = arith.constant dense<0.000000e+00> : vector<8x192xf32>
    %2 = tpu.matmul %0, %1, %cst {dimension_numbers = #tpu.dot_dimension_numbers<[1], [0], [0], [1], [0, 0, 1, 1], [], []>} : vector<8x1440xbf16>, vector<1440x192xbf16>, vector<8x192xf32> -> vector<8x192xf32>
    %c0_3 = arith.constant 0 : index
    %c0_4 = arith.constant 0 : index
    %3 = vector.load %arg3[%c0_3, %c0_4] : memref<1x192xf32, #tpu.memory_space<vmem>>, vector<1x192xf32>
    %4 = vector.broadcast %3 : vector<1x192xf32> to vector<8x192xf32>
    %5 = arith.addf %2, %4 : vector<8x192xf32>
    %cst_5 = arith.constant 0.000000e+00 : f32
    %6 = vector.broadcast %cst_5 : f32 to vector<8x192xf32>
    %7 = arith.maximumf %5, %6 : vector<8x192xf32>
    %8 = arith.truncf %7 : vector<8x192xf32> to vector<8x192xbf16>
    %c0_6 = arith.constant 0 : index
    %c0_7 = arith.constant 0 : index
    %9 = vector.load %arg4[%c0_6, %c0_7] : memref<8x192xbf16, #tpu.memory_space<vmem>>, vector<8x192xbf16>
    tpu.vector_store %arg4[%c0_6, %c0_7], %8 {strides = array<i32>} : memref<8x192xbf16, #tpu.memory_space<vmem>>, vector<8x192xbf16>,
    return
  }
  func.func @transform_0(%arg0: i32) -> (i32, i32) {
    %c0_i32 = arith.constant 0 : i32
    %c0_i32_0 = arith.constant 0 : i32
    return %arg0, %c0_i32 : i32, i32
  }
  func.func @transform_1(%arg0: i32) -> (i32, i32) {
    %c0_i32 = arith.constant 0 : i32
    %c0_i32_0 = arith.constant 0 : i32
    %c0_i32_1 = arith.constant 0 : i32
    return %c0_i32, %c0_i32_0 : i32, i32
  }
  func.func @transform_2(%arg0: i32) -> (i32, i32) {
    %c0_i32 = arith.constant 0 : i32
    %c0_i32_0 = arith.constant 0 : i32
    %c0_i32_1 = arith.constant 0 : i32
    return %c0_i32, %c0_i32_0 : i32, i32
  }
  func.func @transform_3(%arg0: i32) -> (i32, i32) {
    %c0_i32 = arith.constant 0 : i32
    %c0_i32_0 = arith.constant 0 : i32
    return %arg0, %c0_i32 : i32, i32
  }
}

module attributes {stable_mosaic.version = 11 : i64} {
  func.func @_fmm_kernel(%arg0: i32, %arg1: memref<8x1728xbf16, #tpu.memory_space<vmem>>, %arg2: memref<1728x256xbf16, #tpu.memory_space<vmem>>, %arg3: memref<1x256xf32, #tpu.memory_space<vmem>>, %arg4: memref<8x256xbf16, #tpu.memory_space<vmem>>) attributes {dimension_semantics = [#tpu.dimension_semantics<parallel>], iteration_bounds = array<i64: 2>, scalar_prefetch = 0 : i64, scratch_operands = 0 : i64, tpu.core_type = #tpu.core_type<tc>, window_params = [{transform_indices = @transform_0, window_bounds = array<i64: 8, 1728>}, {pipeline_mode = #tpu.pipeline_mode<synchronous>, transform_indices = @transform_1, window_bounds = array<i64: 1728, 256>}, {pipeline_mode = #tpu.pipeline_mode<synchronous>, transform_indices = @transform_2, window_bounds = array<i64: 1, 256>}, {transform_indices = @transform_3, window_bounds = array<i64: 8, 256>}]} {
    %c0 = arith.constant 0 : index
    %c0_0 = arith.constant 0 : index
    %0 = vector.load %arg1[%c0, %c0_0] : memref<8x1728xbf16, #tpu.memory_space<vmem>>, vector<8x1728xbf16>
    %c0_1 = arith.constant 0 : index
    %c0_2 = arith.constant 0 : index
    %1 = vector.load %arg2[%c0_1, %c0_2] : memref<1728x256xbf16, #tpu.memory_space<vmem>>, vector<1728x256xbf16>
    %cst = arith.constant dense<0.000000e+00> : vector<8x256xf32>
    %2 = tpu.matmul %0, %1, %cst {dimension_numbers = #tpu.dot_dimension_numbers<[1], [0], [0], [1], [0, 0, 1, 1], [], []>} : vector<8x1728xbf16>, vector<1728x256xbf16>, vector<8x256xf32> -> vector<8x256xf32>
    %c0_3 = arith.constant 0 : index
    %c0_4 = arith.constant 0 : index
    %3 = vector.load %arg3[%c0_3, %c0_4] : memref<1x256xf32, #tpu.memory_space<vmem>>, vector<1x256xf32>
    %4 = vector.broadcast %3 : vector<1x256xf32> to vector<8x256xf32>
    %5 = arith.addf %2, %4 : vector<8x256xf32>
    %cst_5 = arith.constant 0.000000e+00 : f32
    %6 = vector.broadcast %cst_5 : f32 to vector<8x256xf32>
    %7 = arith.maximumf %5, %6 : vector<8x256xf32>
    %8 = arith.truncf %7 : vector<8x256xf32> to vector<8x256xbf16>
    %c0_6 = arith.constant 0 : index
    %c0_7 = arith.constant 0 : index
    %9 = vector.load %arg4[%c0_6, %c0_7] : memref<8x256xbf16, #tpu.memory_space<vmem>>, vector<8x256xbf16>
    tpu.vector_store %arg4[%c0_6, %c0_7], %8 {strides = array<i32>} : memref<8x256xbf16, #tpu.memory_space<vmem>>, vector<8x256xbf16>,
    return
  }
  func.func @transform_0(%arg0: i32) -> (i32, i32) {
    %c0_i32 = arith.constant 0 : i32
    %c0_i32_0 = arith.constant 0 : i32
    return %arg0, %c0_i32 : i32, i32
  }
  func.func @transform_1(%arg0: i32) -> (i32, i32) {
    %c0_i32 = arith.constant 0 : i32
    %c0_i32_0 = arith.constant 0 : i32
    %c0_i32_1 = arith.constant 0 : i32
    return %c0_i32, %c0_i32_0 : i32, i32
  }
  func.func @transform_2(%arg0: i32) -> (i32, i32) {
    %c0_i32 = arith.constant 0 : i32
    %c0_i32_0 = arith.constant 0 : i32
    %c0_i32_1 = arith.constant 0 : i32
    return %c0_i32, %c0_i32_0 : i32, i32
  }
  func.func @transform_3(%arg0: i32) -> (i32, i32) {
    %c0_i32 = arith.constant 0 : i32
    %c0_i32_0 = arith.constant 0 : i32
    return %arg0, %c0_i32 : i32, i32
  }
}

module attributes {stable_mosaic.version = 11 : i64} {
  func.func @_head_kernel(%arg0: memref<2x1x256xbf16, #tpu.memory_space<vmem>>, %arg1: memref<256x10xbf16, #tpu.memory_space<vmem>>, %arg2: memref<1x10xf32, #tpu.memory_space<vmem>>, %arg3: memref<2x10xf32, #tpu.memory_space<vmem>>) attributes {dimension_semantics = [], scalar_prefetch = 0 : i64, scratch_operands = 0 : i64, tpu.core_type = #tpu.core_type<tc>} {
    %c0 = arith.constant 0 : index
    %c0_0 = arith.constant 0 : index
    %c0_1 = arith.constant 0 : index
    %0 = vector.load %arg0[%c0, %c0_0, %c0_1] : memref<2x1x256xbf16, #tpu.memory_space<vmem>>, vector<2x1x256xbf16>
    %1 = arith.extf %0 : vector<2x1x256xbf16> to vector<2x1x256xf32>
    %cst = arith.constant dense<0.000000e+00> : vector<2x256xf32>
    %2 = vector.multi_reduction <add>, %1, %cst [1] : vector<2x1x256xf32> to vector<2x256xf32>
    %cst_2 = arith.constant 1.000000e+00 : f32
    %3 = vector.broadcast %cst_2 : f32 to vector<2x256xf32>
    %4 = arith.divf %2, %3 : vector<2x256xf32>
    %5 = arith.truncf %4 : vector<2x256xf32> to vector<2x256xbf16>
    %c0_3 = arith.constant 0 : index
    %c0_4 = arith.constant 0 : index
    %6 = vector.load %arg1[%c0_3, %c0_4] : memref<256x10xbf16, #tpu.memory_space<vmem>>, vector<256x10xbf16>
    %cst_5 = arith.constant dense<0.000000e+00> : vector<2x10xf32>
    %7 = tpu.matmul %5, %6, %cst_5 {dimension_numbers = #tpu.dot_dimension_numbers<[1], [0], [0], [1], [0, 0, 1, 1], [], []>} : vector<2x256xbf16>, vector<256x10xbf16>, vector<2x10xf32> -> vector<2x10xf32>
    %c0_6 = arith.constant 0 : index
    %c0_7 = arith.constant 0 : index
    %8 = vector.load %arg2[%c0_6, %c0_7] : memref<1x10xf32, #tpu.memory_space<vmem>>, vector<1x10xf32>
    %9 = vector.broadcast %8 : vector<1x10xf32> to vector<2x10xf32>
    %10 = arith.addf %7, %9 : vector<2x10xf32>
    %cst_8 = arith.constant dense<0xFF800000> : vector<2xf32>
    %11 = vector.multi_reduction <maximumf>, %10, %cst_8 [1] : vector<2x10xf32> to vector<2xf32>
    %12 = vector.shape_cast %11 : vector<2xf32> to vector<2x1xf32>
    %13 = vector.broadcast %12 : vector<2x1xf32> to vector<2x10xf32>
    %14 = arith.subf %10, %13 : vector<2x10xf32>
    %15 = math.exp %14 : vector<2x10xf32>
    %cst_9 = arith.constant dense<0.000000e+00> : vector<2xf32>
    %16 = vector.multi_reduction <add>, %15, %cst_9 [1] : vector<2x10xf32> to vector<2xf32>
    %17 = vector.shape_cast %16 : vector<2xf32> to vector<2x1xf32>
    %18 = vector.broadcast %17 : vector<2x1xf32> to vector<2x10xf32>
    %19 = arith.divf %15, %18 : vector<2x10xf32>
    %c0_10 = arith.constant 0 : index
    %c0_11 = arith.constant 0 : index
    %20 = vector.load %arg3[%c0_10, %c0_11] : memref<2x10xf32, #tpu.memory_space<vmem>>, vector<2x10xf32>
    tpu.vector_store %arg3[%c0_10, %c0_11], %19 {strides = array<i32>} : memref<2x10xf32, #tpu.memory_space<vmem>>, vector<2x10xf32>,
    return
  }
}

</mosaic_0001>

<bundles_post_ra>
// kernel: modeling_forward.23
= control target key start
LH: loop header
LB: loop body
LE: loop exit
PB: predicated region body
PF: predicated region fallthrough
CT: control target
= control target key end

     0   :  { %s980_s12 = smov 0   ;;  %s1170_s0 = inlined_call_operand.vmem [shape: bf16[464,27], index: 0, kind: input, shape index: {}]   ;;  %s1171_s1 = inlined_call_operand.vmem [shape: bf16[27,8], index: 1, kind: input, shape index: {}]   ;;  %s1172_s2 = inlined_call_operand.vmem [shape: f32[1,8], index: 2, kind: input, shape index: {}]   ;;  %s1173_s3 = inlined_call_operand.vmem [shape: bf16[464,8], index: 3, kind: output, shape index: {}]  }
   0x1 LB: > { %s736_s13 = sadd.s32 4294967295, %s955_s12   ;;  %p740_p0 = scmp.ge.s32.totalorder %s955_s12, 1  ;;  %s955_s12 = sphi %s980_s12, %s13_s12  }
   0x2   : > { %p138_p1 = scmp.lt.s32.totalorder %s955_s12, 3 }
   0x4   : > { %p139_p2 = pnand %p740_p0, %p138_p1 }
   0x5   : > { %v932_v0 = vld [vmem:[%s1171_s1] sm:$0xff] (!%p139_p2)   ;;  %v957_v1 = vmov (!%p139_p2), 0.0   ;;  %v933_v2 = vld [vmem:[%s1171_s1 + $0x8] sm:$0x3f] (!%p139_p2)   ;;  %vm345_vm0 = vcmask (!%p139_p2), 1044480   ;;  %vm346_vm1 = vcmask (!%p139_p2), 1045504  }
   0x6   : > { %142 = sbr.rel (%p139_p2) target bundleno = 294 (0x126), region = 32  ;;  %853 = vmatprep.subr.bf16.mxu0 (!%p139_p2), %v957_v1  ;;  %917 = vmatprep.subr.bf16.mxu1 (!%p139_p2), %v957_v1  ;;  %v958_v3 = vmov (!%p139_p2), 65535   ;;  %vm959_vm2 = vmmov (!%p139_p2), 0   ;;  %vm299_vm3 = vcmask (!%p139_p2), 220160   ;;  %v1071_v22 = vld [vmem:[%s1172_s2] ss:$0 sm:$0xff] (!%p139_p2) }
   0x7   : > { %854 = vmatpush3.bf16.msra.mxu0 (!%p139_p2), %v932_v0  ;;  %919 = vmatpush3.bf16.msra.mxu1 (!%p139_p2), %v932_v0  ;;  %s162_s18 = smul.u32 (!%p139_p2), 29, %s736_s13  ;;  %v347_v4 = vsel (!%p139_p2), %vm345_vm0, 4294967295, %v958_v3  ;;  %vm650_vm4 = vcmask (!%p139_p2), 60416  }
   0x8   : > { %855 = vmatprep.subr.bf16.mxu0 (!%p139_p2), %v957_v1  ;;  %857 = vmatprep.mubr.msk.bf16.mxu0 (!%p139_p2), %vm959_vm2, %v957_v1  ;;  %v348_v5 = vsel (!%p139_p2), %vm346_vm1, %v347_v4, 0 }
   0x9   : > { %p163_p3 = scmp.lt.s32.totalorder (!%p139_p2), %s162_s18, 57  ;;  %918 = vmatprep.subr.bf16.mxu1 (!%p139_p2), %v957_v1  ;;  %889 = vmatprep.mubr.msk.bf16.mxu1 (!%p139_p2), %vm959_vm2, %v957_v1  ;;  %v350_v6 = vand.u32 (!%p139_p2), %v933_v2, %v348_v5 }
   0xb   : > { %856 = vmatpush3.bf16.msra.mxu0 (!%p139_p2), %v350_v6  ;;  %920 = vmatpush3.bf16.msra.mxu1 (!%p139_p2), %v350_v6 }
   0xd   : > { %s1175_s18 = smov (!%p163_p3, %s162_s18), 57 }
   0xe   : > { %s741_s19 = sshll.u32 %s1175_s18, 2 }
   0xf   : > { %s1010_s22 = scalar_lea.vmem %s1170_s0, %s741_s19  ;;  %s1081_s27 = scalar_lea.vmem %s1173_s3, %s741_s19 }
  0x10   : > { %v934_v7 = vld [vmem:[%s1010_s22] sm:$0xff]   ;;  %v936_v9 = vld [vmem:[%s1010_s22 + $0x8] sm:$0xff]   ;;  %v938_v11 = vld [vmem:[%s1010_s22 + $0x10] sm:$0xff]  }
  0x11   : > { %v935_v8 = vld [vmem:[%s1010_s22 + $0x40] sm:$0xff]   ;;  %858 = vmatmul.mubr.msk.bf16.vlgmr.msra.gmra.mrb[0].mxu0 %vm299_vm3, %v934_v7  ;;  %v937_v10 = vld [vmem:[%s1010_s22 + $0x48] sm:$0xff]   ;;  %v939_v12 = vld [vmem:[%s1010_s22 + $0x50] sm:$0xff]  }
  0x12   : > { %861 = vmatprep.mubr.msk.bf16.mxu0 %vm959_vm2, %v957_v1  ;;  %890 = vmatmul.mubr.msk.bf16.vlgmr.msra.gmra.mrb[0].mxu1 %vm299_vm3, %v935_v8  ;;  %v940_v13 = vld [vmem:[%s1010_s22 + $0x18] sm:$0xff]   ;;  %v942_v15 = vld [vmem:[%s1010_s22 + $0x20] sm:$0xff]   ;;  %v944_v17 = vld [vmem:[%s1010_s22 + $0x28] sm:$0xff]  }
  0x13   : > { %893 = vmatprep.mubr.msk.bf16.mxu1 %vm959_vm2, %v957_v1  ;;  %v941_v14 = vld [vmem:[%s1010_s22 + $0x58] sm:$0xff]   ;;  %v943_v16 = vld [vmem:[%s1010_s22 + $0x60] sm:$0xff]   ;;  %v945_v18 = vld [vmem:[%s1010_s22 + $0x68] sm:$0xff]  }
  0x14   : > { %v946_v19 = vld [vmem:[%s1010_s22 + $0x30] sm:$0xff]   ;;  %v948_v21 = vld [vmem:[%s1010_s22 + $0x38] sm:$0xff]  }
  0x15   : > { %v947_v20 = vld [vmem:[%s1010_s22 + $0x70] ss:$0 sps:$4 sm:$0xff]  }
  0x19   : > { %862 = vmatmul.mubr.msk.bf16.gmra.mrb[4].mxu0 %vm299_vm3, %v936_v9 }
  0x1a   : > { %865 = vmatprep.mubr.msk.bf16.mxu0 %vm959_vm2, %v957_v1  ;;  %894 = vmatmul.mubr.msk.bf16.gmra.mrb[4].mxu1 %vm299_vm3, %v937_v10 }
  0x1b   : > { %897 = vmatprep.mubr.msk.bf16.mxu1 %vm959_vm2, %v957_v1 }
  0x21   : > { %866 = vmatmul.mubr.msk.bf16.gmra.mrb[8].mxu0 %vm299_vm3, %v938_v11 }
  0x22   : > { %869 = vmatprep.mubr.msk.bf16.mxu0 %vm959_vm2, %v957_v1  ;;  %898 = vmatmul.mubr.msk.bf16.gmra.mrb[8].mxu1 %vm299_vm3, %v939_v12 }
  0x23   : > { %901 = vmatprep.mubr.msk.bf16.mxu1 %vm959_vm2, %v957_v1 }
  0x29   : > { %870 = vmatmul.mubr.msk.bf16.gmra.mrb[12].mxu0 %vm299_vm3, %v940_v13 }
  0x2a   : > { %873 = vmatprep.mubr.msk.bf16.mxu0 %vm959_vm2, %v957_v1  ;;  %902 = vmatmul.mubr.msk.bf16.gmra.mrb[12].mxu1 %vm299_vm3, %v941_v14 }
  0x2b   : > { %905 = vmatprep.mubr.msk.bf16.mxu1 %vm959_vm2, %v957_v1 }
  0x31   : > { %874 = vmatmul.mubr.msk.bf16.gmra.mrb[16].mxu0 %vm299_vm3, %v942_v15 }
  0x32   : > { %877 = vmatprep.mubr.msk.bf16.mxu0 %vm959_vm2, %v957_v1  ;;  %906 = vmatmul.mubr.msk.bf16.gmra.mrb[16].mxu1 %vm299_vm3, %v943_v16 }
  0x33   : > { %909 = vmatprep.mubr.msk.bf16.mxu1 %vm959_vm2, %v957_v1 }
  0x39   : > { %878 = vmatmul.mubr.msk.bf16.gmra.mrb[20].mxu0 %vm299_vm3, %v944_v17 }
  0x3a   : > { %881 = vmatprep.mubr.msk.bf16.mxu0 %vm959_vm2, %v957_v1  ;;  %910 = vmatmul.mubr.msk.bf16.gmra.mrb[20].mxu1 %vm299_vm3, %v945_v18 }
  0x3b   : > { %913 = vmatprep.mubr.msk.bf16.mxu1 %vm959_vm2, %v957_v1 }
  0x41   : > { %882 = vmatmul.mubr.msk.bf16.gmra.mrb[24].mxu0 %vm299_vm3, %v946_v19 }
  0x42   : > { %885 = vmatprep.mubr.msk.bf16.mxu0 %vm959_vm2, %v957_v1  ;;  %914 = vmatmul.mubr.msk.bf16.gmra.mrb[24].mxu1 %vm299_vm3, %v947_v20 }
  0x49   : > { %886 = vmatmul.mubr.msk.bf16.gmra.mrb[28].mxu0 %vm299_vm3, %v948_v21 }
  0xe4   : > { %v386_v23 = vpop.f32.mrb[0].mxu0 }
  0xe5   : > { %v387_v24 = vadd.f32 %v1071_v22, %v386_v23  ;;  %v859_v25 = vpop.f32.mrb[1].mxu0  ;;  %v450_v26 = vpop.f32.mrb[0].mxu1 }
  0xe6   : > { %v389_v27 = vpop.f32.mrb[2].mxu0  ;;  %v451_v28 = vadd.f32 %v1071_v22, %v450_v26  ;;  %v891_v29 = vpop.f32.mrb[1].mxu1 }
  0xe7   : > { %v504_v30 = vmax.f32 %v387_v24, 0.0  ;;  %v390_v31 = vadd.f32 %v1071_v22, %v389_v27  ;;  %v860_v32 = vpop.f32.mrb[3].mxu0  ;;  %v453_v33 = vpop.f32.mrb[2].mxu1 }
  0xe8   : > { %v520_v34 = vmax.f32 %v451_v28, 0.0  ;;  %v454_v35 = vadd.f32 %v1071_v22, %v453_v33  ;;  %v892_v36 = vpop.f32.mrb[3].mxu1 }
  0xe9   : > { %v807_v37 = vpack.c.bf16 %v504_v30, %v504_v30  ;;  %v505_v38 = vmax.f32 %v390_v31, 0.0 }
  0xea   : > { %v823_v39 = vpack.c.bf16 %v520_v34, %v520_v34  ;;  %v521_v40 = vmax.f32 %v454_v35, 0.0 }
  0xeb   : > { %651 = vst.msk [vmem:[%s1081_s27] sm:$0xf] %vm650_vm4, %v807_v37  ;;  %v808_v41 = vpack.c.bf16 %v505_v38, %v505_v38 }
  0xec   : > { %667 = vst.msk [vmem:[%s1081_s27 + $0x40] sm:$0xf] %vm650_vm4, %v823_v39  ;;  %v394_v42 = vpop.f32.mrb[4].mxu0  ;;  %v824_v43 = vpack.c.bf16 %v521_v40, %v521_v40 }
  0xed   : > { %652 = vst.msk [vmem:[%s1081_s27 + $0x4] sm:$0xf] %vm650_vm4, %v808_v41  ;;  %v395_v44 = vadd.f32 %v1071_v22, %v394_v42  ;;  %v863_v45 = vpop.f32.mrb[5].mxu0  ;;  %v458_v46 = vpop.f32.mrb[4].mxu1 }
  0xee   : > { %668 = vst.msk [vmem:[%s1081_s27 + $0x44] sm:$0xf] %vm650_vm4, %v824_v43  ;;  %v397_v47 = vpop.f32.mrb[6].mxu0  ;;  %v459_v48 = vadd.f32 %v1071_v22, %v458_v46  ;;  %v895_v49 = vpop.f32.mrb[5].mxu1 }
  0xef   : > { %v506_v50 = vmax.f32 %v395_v44, 0.0  ;;  %v398_v51 = vadd.f32 %v1071_v22, %v397_v47  ;;  %v864_v52 = vpop.f32.mrb[7].mxu0  ;;  %v461_v53 = vpop.f32.mrb[6].mxu1 }
  0xf0   : > { %v522_v54 = vmax.f32 %v459_v48, 0.0  ;;  %v462_v55 = vadd.f32 %v1071_v22, %v461_v53  ;;  %v896_v56 = vpop.f32.mrb[7].mxu1 }
  0xf1   : > { %v809_v57 = vpack.c.bf16 %v506_v50, %v506_v50  ;;  %v507_v58 = vmax.f32 %v398_v51, 0.0 }
  0xf2   : > { %v825_v59 = vpack.c.bf16 %v522_v54, %v522_v54  ;;  %v523_v60 = vmax.f32 %v462_v55, 0.0 }
  0xf3   : > { %653 = vst.msk [vmem:[%s1081_s27 + $0x8] sm:$0xf] %vm650_vm4, %v809_v57  ;;  %v810_v61 = vpack.c.bf16 %v507_v58, %v507_v58 }
  0xf4   : > { %669 = vst.msk [vmem:[%s1081_s27 + $0x48] sm:$0xf] %vm650_vm4, %v825_v59  ;;  %v402_v62 = vpop.f32.mrb[8].mxu0  ;;  %v826_v63 = vpack.c.bf16 %v523_v60, %v523_v60 }
  0xf5   : > { %654 = vst.msk [vmem:[%s1081_s27 + $0xc] sm:$0xf] %vm650_vm4, %v810_v61  ;;  %v403_v0 = vadd.f32 %v1071_v22, %v402_v62  ;;  %v867_v1 = vpop.f32.mrb[9].mxu0  ;;  %v466_v2 = vpop.f32.mrb[8].mxu1 }
  0xf6   : > { %670 = vst.msk [vmem:[%s1081_s27 + $0x4c] sm:$0xf] %vm650_vm4, %v826_v63  ;;  %v405_v3 = vpop.f32.mrb[10].mxu0  ;;  %v467_v4 = vadd.f32 %v1071_v22, %v466_v2  ;;  %v899_v5 = vpop.f32.mrb[9].mxu1 }
  0xf7   : > { %v508_v6 = vmax.f32 %v403_v0, 0.0  ;;  %v406_v7 = vadd.f32 %v1071_v22, %v405_v3  ;;  %v868_v8 = vpop.f32.mrb[11].mxu0  ;;  %v469_v9 = vpop.f32.mrb[10].mxu1 }
  0xf8   : > { %v524_v10 = vmax.f32 %v467_v4, 0.0  ;;  %v470_v11 = vadd.f32 %v1071_v22, %v469_v9  ;;  %v900_v12 = vpop.f32.mrb[11].mxu1 }
  0xf9   : > { %v811_v13 = vpack.c.bf16 %v508_v6, %v508_v6  ;;  %v509_v14 = vmax.f32 %v406_v7, 0.0 }
  0xfa   : > { %v827_v15 = vpack.c.bf16 %v524_v10, %v524_v10  ;;  %v525_v16 = vmax.f32 %v470_v11, 0.0 }
  0xfb   : > { %655 = vst.msk [vmem:[%s1081_s27 + $0x10] sm:$0xf] %vm650_vm4, %v811_v13  ;;  %v812_v17 = vpack.c.bf16 %v509_v14, %v509_v14 }
  0xfc   : > { %671 = vst.msk [vmem:[%s1081_s27 + $0x50] sm:$0xf] %vm650_vm4, %v827_v15  ;;  %v410_v18 = vpop.f32.mrb[12].mxu0  ;;  %v828_v19 = vpack.c.bf16 %v525_v16, %v525_v16 }
  0xfd   : > { %656 = vst.msk [vmem:[%s1081_s27 + $0x14] sm:$0xf] %vm650_vm4, %v812_v17  ;;  %v411_v20 = vadd.f32 %v1071_v22, %v410_v18  ;;  %v871_v21 = vpop.f32.mrb[13].mxu0  ;;  %v474_v23 = vpop.f32.mrb[12].mxu1 }
  0xfe   : > { %672 = vst.msk [vmem:[%s1081_s27 + $0x54] sm:$0xf] %vm650_vm4, %v828_v19  ;;  %v413_v24 = vpop.f32.mrb[14].mxu0  ;;  %v475_v25 = vadd.f32 %v1071_v22, %v474_v23  ;;  %v903_v26 = vpop.f32.mrb[13].mxu1 }
  0xff   : > { %v510_v27 = vmax.f32 %v411_v20, 0.0  ;;  %v414_v28 = vadd.f32 %v1071_v22, %v413_v24  ;;  %v872_v29 = vpop.f32.mrb[15].mxu0  ;;  %v477_v30 = vpop.f32.mrb[14].mxu1 }
 0x100   : > { %v526_v31 = vmax.f32 %v475_v25, 0.0  ;;  %v478_v32 = vadd.f32 %v1071_v22, %v477_v30  ;;  %v904_v33 = vpop.f32.mrb[15].mxu1 }
 0x101   : > { %v813_v34 = vpack.c.bf16 %v510_v27, %v510_v27  ;;  %v511_v35 = vmax.f32 %v414_v28, 0.0 }
 0x102   : > { %v829_v36 = vpack.c.bf16 %v526_v31, %v526_v31  ;;  %v527_v37 = vmax.f32 %v478_v32, 0.0 }
 0x103   : > { %657 = vst.msk [vmem:[%s1081_s27 + $0x18] sm:$0xf] %vm650_vm4, %v813_v34  ;;  %v814_v38 = vpack.c.bf16 %v511_v35, %v511_v35 }
 0x104   : > { %673 = vst.msk [vmem:[%s1081_s27 + $0x58] sm:$0xf] %vm650_vm4, %v829_v36  ;;  %v418_v39 = vpop.f32.mrb[16].mxu0  ;;  %v830_v40 = vpack.c.bf16 %v527_v37, %v527_v37 }
 0x105   : > { %658 = vst.msk [vmem:[%s1081_s27 + $0x1c] sm:$0xf] %vm650_vm4, %v814_v38  ;;  %v419_v41 = vadd.f32 %v1071_v22, %v418_v39  ;;  %v875_v42 = vpop.f32.mrb[17].mxu0  ;;  %v482_v43 = vpop.f32.mrb[16].mxu1 }
 0x106   : > { %674 = vst.msk [vmem:[%s1081_s27 + $0x5c] sm:$0xf] %vm650_vm4, %v830_v40  ;;  %v421_v44 = vpop.f32.mrb[18].mxu0  ;;  %v483_v45 = vadd.f32 %v1071_v22, %v482_v43  ;;  %v907_v46 = vpop.f32.mrb[17].mxu1 }
 0x107   : > { %v512_v47 = vmax.f32 %v419_v41, 0.0  ;;  %v422_v48 = vadd.f32 %v1071_v22, %v421_v44  ;;  %v876_v49 = vpop.f32.mrb[19].mxu0  ;;  %v485_v50 = vpop.f32.mrb[18].mxu1 }
 0x108   : > { %v528_v51 = vmax.f32 %v483_v45, 0.0  ;;  %v486_v52 = vadd.f32 %v1071_v22, %v485_v50  ;;  %v908_v53 = vpop.f32.mrb[19].mxu1 }
 0x109   : > { %v815_v54 = vpack.c.bf16 %v512_v47, %v512_v47  ;;  %v513_v55 = vmax.f32 %v422_v48, 0.0 }
 0x10a   : > { %v831_v56 = vpack.c.bf16 %v528_v51, %v528_v51  ;;  %v529_v57 = vmax.f32 %v486_v52, 0.0 }
 0x10b   : > { %659 = vst.msk [vmem:[%s1081_s27 + $0x20] sm:$0xf] %vm650_vm4, %v815_v54  ;;  %v816_v58 = vpack.c.bf16 %v513_v55, %v513_v55 }
 0x10c   : > { %675 = vst.msk [vmem:[%s1081_s27 + $0x60] sm:$0xf] %vm650_vm4, %v831_v56  ;;  %v426_v59 = vpop.f32.mrb[20].mxu0  ;;  %v832_v60 = vpack.c.bf16 %v529_v57, %v529_v57 }
 0x10d   : > { %660 = vst.msk [vmem:[%s1081_s27 + $0x24] sm:$0xf] %vm650_vm4, %v816_v58  ;;  %v427_v61 = vadd.f32 %v1071_v22, %v426_v59  ;;  %v879_v62 = vpop.f32.mrb[21].mxu0  ;;  %v490_v63 = vpop.f32.mrb[20].mxu1 }
 0x10e   : > { %676 = vst.msk [vmem:[%s1081_s27 + $0x64] sm:$0xf] %vm650_vm4, %v832_v60  ;;  %v429_v0 = vpop.f32.mrb[22].mxu0  ;;  %v491_v1 = vadd.f32 %v1071_v22, %v490_v63  ;;  %v911_v2 = vpop.f32.mrb[21].mxu1 }
 0x10f   : > { %v514_v3 = vmax.f32 %v427_v61, 0.0  ;;  %v430_v4 = vadd.f32 %v1071_v22, %v429_v0  ;;  %v880_v5 = vpop.f32.mrb[23].mxu0  ;;  %v493_v6 = vpop.f32.mrb[22].mxu1 }
 0x110   : > { %v530_v7 = vmax.f32 %v491_v1, 0.0  ;;  %v494_v8 = vadd.f32 %v1071_v22, %v493_v6  ;;  %v912_v9 = vpop.f32.mrb[23].mxu1 }
 0x111   : > { %v817_v10 = vpack.c.bf16 %v514_v3, %v514_v3  ;;  %v515_v11 = vmax.f32 %v430_v4, 0.0 }
 0x112   : > { %v833_v12 = vpack.c.bf16 %v530_v7, %v530_v7  ;;  %v531_v13 = vmax.f32 %v494_v8, 0.0 }
 0x113   : > { %661 = vst.msk [vmem:[%s1081_s27 + $0x28] sm:$0xf] %vm650_vm4, %v817_v10  ;;  %v818_v14 = vpack.c.bf16 %v515_v11, %v515_v11 }
 0x114   : > { %677 = vst.msk [vmem:[%s1081_s27 + $0x68] sm:$0xf] %vm650_vm4, %v833_v12  ;;  %v434_v15 = vpop.f32.mrb[24].mxu0  ;;  %v834_v16 = vpack.c.bf16 %v531_v13, %v531_v13 }
 0x115   : > { %662 = vst.msk [vmem:[%s1081_s27 + $0x2c] sm:$0xf] %vm650_vm4, %v818_v14  ;;  %v435_v17 = vadd.f32 %v1071_v22, %v434_v15  ;;  %v883_v18 = vpop.f32.mrb[25].mxu0  ;;  %v498_v19 = vpop.f32.mrb[24].mxu1 }
 0x116   : > { %678 = vst.msk [vmem:[%s1081_s27 + $0x6c] sm:$0xf] %vm650_vm4, %v834_v16  ;;  %v437_v20 = vpop.f32.mrb[26].mxu0  ;;  %v499_v21 = vadd.f32 %v1071_v22, %v498_v19  ;;  %v915_v23 = vpop.f32.mrb[25].mxu1 }
 0x117   : > { %v516_v24 = vmax.f32 %v435_v17, 0.0  ;;  %v438_v25 = vadd.f32 %v1071_v22, %v437_v20  ;;  %v884_v26 = vpop.f32.mrb[27].mxu0  ;;  %v501_v27 = vpop.f32.mrb[26].mxu1 }
 0x118   : > { %v532_v28 = vmax.f32 %v499_v21, 0.0  ;;  %v916_v29 = vpop.f32.mrb[27].mxu1 }
 0x119   : > { %v819_v30 = vpack.c.bf16 %v516_v24, %v516_v24  ;;  %v517_v31 = vmax.f32 %v438_v25, 0.0 }
 0x11a   : > { %v835_v32 = vpack.c.bf16 %v532_v28, %v532_v28 }
 0x11b   : > { %663 = vst.msk [vmem:[%s1081_s27 + $0x30] sm:$0xf] %vm650_vm4, %v819_v30  ;;  %v820_v33 = vpack.c.bf16 %v517_v31, %v517_v31 }
 0x11c   : > { %679 = vst.msk [vmem:[%s1081_s27 + $0x70] sm:$0xf] %vm650_vm4, %v835_v32  ;;  %v442_v34 = vpop.f32.mrb[28].mxu0 }
 0x11d   : > { %664 = vst.msk [vmem:[%s1081_s27 + $0x34] sm:$0xf] %vm650_vm4, %v820_v33  ;;  %v443_v35 = vadd.f32 %v1071_v22, %v442_v34  ;;  %v887_v36 = vpop.f32.mrb[29].mxu0 }
 0x11e   : > { %v445_v37 = vpop.f32.mrb[30].mxu0 }
 0x11f   : > { %v518_v38 = vmax.f32 %v443_v35, 0.0  ;;  %v446_v39 = vadd.f32 %v1071_v22, %v445_v37  ;;  %v888_v40 = vpop.f32.mrb[31].mxu0 }
 0x121   : > { %v821_v41 = vpack.c.bf16 %v518_v38, %v518_v38  ;;  %v519_v42 = vmax.f32 %v446_v39, 0.0 }
 0x123   : > { %665 = vst.msk [vmem:[%s1081_s27 + $0x38] sm:$0xf] %vm650_vm4, %v821_v41  ;;  %v822_v43 = vpack.c.bf16 %v519_v42, %v519_v42 }
 0x125   : > { %666 = vst.msk [vmem:[%s1081_s27 + $0x3c] sm:$0xf] %vm650_vm4, %v822_v43 }
 0x126 PF: > { %s13_s12 = sadd.s32 1, %s955_s12  }
 0x127   : > { %p10_p4 = scmp.ge.s32.totalorder %s13_s12, 4  }
 0x129   :  { %12 = sbr.rel (!%p10_p4) target bundleno = 1 (0x1), region = 62 }

// kernel: modeling_forward.24
= control target key start
LH: loop header
LB: loop body
LE: loop exit
PB: predicated region body
PF: predicated region fallthrough
CT: control target
= control target key end

     0   :  { %s860_s12 = smov 0   ;;  %s1028_s0 = inlined_call_operand.vmem [shape: bf16[352,72], index: 0, kind: input, shape index: {}]   ;;  %s1029_s1 = inlined_call_operand.vmem [shape: bf16[72,16], index: 1, kind: input, shape index: {}]   ;;  %s1030_s2 = inlined_call_operand.vmem [shape: f32[1,16], index: 2, kind: input, shape index: {}]   ;;  %s1031_s3 = inlined_call_operand.vmem [shape: bf16[352,16], index: 3, kind: output, shape index: {}]  }
   0x1 LB: > { %s643_s13 = sadd.s32 4294967295, %s836_s12   ;;  %p647_p0 = scmp.ge.s32.totalorder %s836_s12, 1  ;;  %s836_s12 = sphi %s860_s12, %s13_s12  }
   0x2   : > { %p138_p1 = scmp.lt.s32.totalorder %s836_s12, 3 }
   0x4   : > { %p139_p2 = pnand %p647_p0, %p138_p1 }
   0x5   : > { %v814_v0 = vld [vmem:[%s1029_s1] sm:$0xff] (!%p139_p2)   ;;  %v838_v1 = vmov (!%p139_p2), 0.0   ;;  %v815_v2 = vld [vmem:[%s1029_s1 + $0x8] sm:$0xff] (!%p139_p2)   ;;  %s162_s18 = smul.u32 (!%p139_p2), 22, %s643_s13  ;;  %vm839_vm0 = vmmov (!%p139_p2), 0   ;;  %v816_v3 = vld [vmem:[%s1029_s1 + $0x10] sm:$0xff] (!%p139_p2)  }
   0x6   : > { %142 = sbr.rel (%p139_p2) target bundleno = 287 (0x11f), region = 32  ;;  %740 = vmatprep.subr.bf16.mxu0 (!%p139_p2), %v838_v1  ;;  %794 = vmatprep.subr.bf16.mxu1 (!%p139_p2), %v838_v1  ;;  %v817_v4 = vld [vmem:[%s1029_s1 + $0x18] sm:$0xff] (!%p139_p2)   ;;  %v818_v5 = vld [vmem:[%s1029_s1 + $0x20] ss:$0 sps:$4 sm:$0xff] (!%p139_p2)   ;;  %vm329_vm1 = vcmask (!%p139_p2), 1043456   ;;  %vm295_vm2 = vcmask (!%p139_p2), 588800  }
   0x7   : > { %741 = vmatpush3.bf16.msra.mxu0 (!%p139_p2), %v814_v0  ;;  %799 = vmatpush3.bf16.msra.mxu1 (!%p139_p2), %v814_v0  ;;  %p163_p3 = scmp.lt.s32.totalorder (!%p139_p2), %s162_s18, 43  ;;  %v331_v6 = vsel (!%p139_p2), %vm329_vm1, %v818_v5, 0  ;;  %v950_v18 = vld [vmem:[%s1030_s2] ss:$0 sm:$0xff] (!%p139_p2)  ;;  %vm564_vm3 = vcmask (!%p139_p2), 125952  }
   0x8   : > { %742 = vmatprep.subr.bf16.mxu0 (!%p139_p2), %v838_v1  ;;  %795 = vmatprep.subr.bf16.mxu1 (!%p139_p2), %v838_v1 }
   0x9   : > { %750 = vmatprep.mubr.msk.bf16.mxu0 (!%p139_p2), %vm839_vm0, %v838_v1  ;;  %774 = vmatprep.mubr.msk.bf16.mxu1 (!%p139_p2), %vm839_vm0, %v838_v1 }
   0xb   : > { %743 = vmatpush3.bf16.msra.mxu0 (!%p139_p2), %v815_v2  ;;  %800 = vmatpush3.bf16.msra.mxu1 (!%p139_p2), %v815_v2 }
   0xc   : > { %744 = vmatprep.subr.bf16.mxu0 (!%p139_p2), %v838_v1  ;;  %796 = vmatprep.subr.bf16.mxu1 (!%p139_p2), %v838_v1 }
   0xd   : > { %s1033_s18 = smov (!%p163_p3, %s162_s18), 43 }
   0xe   : > { %s648_s21 = sshll.u32 %s1033_s18, 2 }
   0xf   : > { %745 = vmatpush3.bf16.msra.mxu0 %v816_v3  ;;  %801 = vmatpush3.bf16.msra.mxu1 %v816_v3  ;;  %s898_s26 = scalar_lea.vmem %s1028_s0, %s648_s21  ;;  %s961_s6 = scalar_lea.vmem %s1031_s3, %s648_s21 }
  0x10   : > { %746 = vmatprep.subr.bf16.mxu0 %v838_v1  ;;  %797 = vmatprep.subr.bf16.mxu1 %v838_v1  ;;  %v819_v7 = vld [vmem:[%s898_s26] sm:$0xff]   ;;  %v820_v8 = vld [vmem:[%s898_s26 + $0x30] sm:$0xff]   ;;  %v821_v9 = vld [vmem:[%s898_s26 + $0x8] sm:$0xff]  }
  0x11   : > { %v822_v10 = vld [vmem:[%s898_s26 + $0x38] sm:$0xff]   ;;  %v823_v11 = vld [vmem:[%s898_s26 + $0x10] sm:$0xff]   ;;  %v824_v12 = vld [vmem:[%s898_s26 + $0x40] sm:$0xff]  }
  0x12   : > { %v825_v13 = vld [vmem:[%s898_s26 + $0x18] sm:$0xff]   ;;  %v826_v14 = vld [vmem:[%s898_s26 + $0x48] sm:$0xff]   ;;  %v827_v15 = vld [vmem:[%s898_s26 + $0x20] sm:$0xff]  }
  0x13   : > { %747 = vmatpush3.bf16.msra.mxu0 %v817_v4  ;;  %802 = vmatpush3.bf16.msra.mxu1 %v817_v4  ;;  %v828_v16 = vld [vmem:[%s898_s26 + $0x50] sm:$0xff]   ;;  %v829_v17 = vld [vmem:[%s898_s26 + $0x28] sm:$0xff]  }
  0x14   : > { %748 = vmatprep.subr.bf16.mxu0 %v838_v1  ;;  %798 = vmatprep.subr.bf16.mxu1 %v838_v1 }
  0x17   : > { %749 = vmatpush3.bf16.msra.mxu0 %v331_v6  ;;  %803 = vmatpush3.bf16.msra.mxu1 %v331_v6 }
  0x1a   : > { %751 = vmatmul.mubr.msk.bf16.vlgmr.msra.gmra.mrb[0].mxu0 %vm295_vm2, %v819_v7  ;;  %775 = vmatmul.mubr.msk.bf16.vlgmr.msra.gmra.mrb[0].mxu1 %vm295_vm2, %v820_v8 }
  0x1b   : > { %754 = vmatprep.mubr.msk.bf16.mxu0 %vm839_vm0, %v838_v1  ;;  %778 = vmatprep.mubr.msk.bf16.mxu1 %vm839_vm0, %v838_v1 }
  0x22   : > { %755 = vmatmul.mubr.msk.bf16.gmra.mrb[4].mxu0 %vm295_vm2, %v821_v9  ;;  %779 = vmatmul.mubr.msk.bf16.gmra.mrb[4].mxu1 %vm295_vm2, %v822_v10 }
  0x23   : > { %758 = vmatprep.mubr.msk.bf16.mxu0 %vm839_vm0, %v838_v1  ;;  %782 = vmatprep.mubr.msk.bf16.mxu1 %vm839_vm0, %v838_v1 }
  0x2a   : > { %759 = vmatmul.mubr.msk.bf16.gmra.mrb[8].mxu0 %vm295_vm2, %v823_v11  ;;  %783 = vmatmul.mubr.msk.bf16.gmra.mrb[8].mxu1 %vm295_vm2, %v824_v12 }
  0x2b   : > { %762 = vmatprep.mubr.msk.bf16.mxu0 %vm839_vm0, %v838_v1  ;;  %786 = vmatprep.mubr.msk.bf16.mxu1 %vm839_vm0, %v838_v1 }
  0x32   : > { %763 = vmatmul.mubr.msk.bf16.gmra.mrb[12].mxu0 %vm295_vm2, %v825_v13  ;;  %787 = vmatmul.mubr.msk.bf16.gmra.mrb[12].mxu1 %vm295_vm2, %v826_v14 }
  0x33   : > { %766 = vmatprep.mubr.msk.bf16.mxu0 %vm839_vm0, %v838_v1  ;;  %790 = vmatprep.mubr.msk.bf16.mxu1 %vm839_vm0, %v838_v1 }
  0x3a   : > { %767 = vmatmul.mubr.msk.bf16.gmra.mrb[16].mxu0 %vm295_vm2, %v827_v15  ;;  %791 = vmatmul.mubr.msk.bf16.gmra.mrb[16].mxu1 %vm295_vm2, %v828_v16 }
  0x3b   : > { %770 = vmatprep.mubr.msk.bf16.mxu0 %vm839_vm0, %v838_v1 }
  0x42   : > { %771 = vmatmul.mubr.msk.bf16.gmra.mrb[20].mxu0 %vm295_vm2, %v829_v17 }
  0xed   : > { %v367_v19 = vpop.f32.mrb[0].mxu0  ;;  %v415_v20 = vpop.f32.mrb[0].mxu1 }
  0xee   : > { %v368_v21 = vadd.f32 %v950_v18, %v367_v19  ;;  %v752_v22 = vpop.f32.mrb[1].mxu0  ;;  %v416_v23 = vadd.f32 %v950_v18, %v415_v20  ;;  %v776_v24 = vpop.f32.mrb[1].mxu1 }
  0xef   : > { %v370_v25 = vpop.f32.mrb[2].mxu0  ;;  %v418_v26 = vpop.f32.mrb[2].mxu1 }
  0xf0   : > { %v454_v27 = vmax.f32 %v368_v21, 0.0  ;;  %v371_v28 = vadd.f32 %v950_v18, %v370_v25  ;;  %v753_v29 = vpop.f32.mrb[3].mxu0  ;;  %v466_v30 = vmax.f32 %v416_v23, 0.0  ;;  %v419_v31 = vadd.f32 %v950_v18, %v418_v26  ;;  %v777_v32 = vpop.f32.mrb[3].mxu1 }
  0xf2   : > { %v702_v33 = vpack.c.bf16 %v454_v27, %v454_v27  ;;  %v455_v34 = vmax.f32 %v371_v28, 0.0  ;;  %v714_v35 = vpack.c.bf16 %v466_v30, %v466_v30  ;;  %v467_v36 = vmax.f32 %v419_v31, 0.0 }
  0xf4   : > { %565 = vst.msk [vmem:[%s961_s6] sm:$0xf] %vm564_vm3, %v702_v33  ;;  %v703_v37 = vpack.c.bf16 %v455_v34, %v455_v34  ;;  %577 = vst.msk [vmem:[%s961_s6 + $0x30] sm:$0xf] %vm564_vm3, %v714_v35  ;;  %v715_v38 = vpack.c.bf16 %v467_v36, %v467_v36 }
  0xf5   : > { %v375_v39 = vpop.f32.mrb[4].mxu0  ;;  %v423_v40 = vpop.f32.mrb[4].mxu1 }
  0xf6   : > { %566 = vst.msk [vmem:[%s961_s6 + $0x4] sm:$0xf] %vm564_vm3, %v703_v37  ;;  %578 = vst.msk [vmem:[%s961_s6 + $0x34] sm:$0xf] %vm564_vm3, %v715_v38  ;;  %v376_v41 = vadd.f32 %v950_v18, %v375_v39  ;;  %v756_v42 = vpop.f32.mrb[5].mxu0  ;;  %v424_v43 = vadd.f32 %v950_v18, %v423_v40  ;;  %v780_v44 = vpop.f32.mrb[5].mxu1 }
  0xf7   : > { %v378_v45 = vpop.f32.mrb[6].mxu0  ;;  %v426_v46 = vpop.f32.mrb[6].mxu1 }
  0xf8   : > { %v456_v47 = vmax.f32 %v376_v41, 0.0  ;;  %v379_v48 = vadd.f32 %v950_v18, %v378_v45  ;;  %v757_v49 = vpop.f32.mrb[7].mxu0  ;;  %v468_v50 = vmax.f32 %v424_v43, 0.0  ;;  %v427_v51 = vadd.f32 %v950_v18, %v426_v46  ;;  %v781_v52 = vpop.f32.mrb[7].mxu1 }
  0xfa   : > { %v704_v53 = vpack.c.bf16 %v456_v47, %v456_v47  ;;  %v457_v54 = vmax.f32 %v379_v48, 0.0  ;;  %v716_v55 = vpack.c.bf16 %v468_v50, %v468_v50  ;;  %v469_v56 = vmax.f32 %v427_v51, 0.0 }
  0xfc   : > { %567 = vst.msk [vmem:[%s961_s6 + $0x8] sm:$0xf] %vm564_vm3, %v704_v53  ;;  %v705_v57 = vpack.c.bf16 %v457_v54, %v457_v54  ;;  %579 = vst.msk [vmem:[%s961_s6 + $0x38] sm:$0xf] %vm564_vm3, %v716_v55  ;;  %v717_v58 = vpack.c.bf16 %v469_v56, %v469_v56 }
  0xfd   : > { %v383_v59 = vpop.f32.mrb[8].mxu0  ;;  %v431_v60 = vpop.f32.mrb[8].mxu1 }
  0xfe   : > { %568 = vst.msk [vmem:[%s961_s6 + $0xc] sm:$0xf] %vm564_vm3, %v705_v57  ;;  %580 = vst.msk [vmem:[%s961_s6 + $0x3c] sm:$0xf] %vm564_vm3, %v717_v58  ;;  %v384_v61 = vadd.f32 %v950_v18, %v383_v59  ;;  %v760_v62 = vpop.f32.mrb[9].mxu0  ;;  %v432_v63 = vadd.f32 %v950_v18, %v431_v60  ;;  %v784_v0 = vpop.f32.mrb[9].mxu1 }
  0xff   : > { %v386_v1 = vpop.f32.mrb[10].mxu0  ;;  %v434_v2 = vpop.f32.mrb[10].mxu1 }
 0x100   : > { %v458_v3 = vmax.f32 %v384_v61, 0.0  ;;  %v387_v4 = vadd.f32 %v950_v18, %v386_v1  ;;  %v761_v5 = vpop.f32.mrb[11].mxu0  ;;  %v470_v6 = vmax.f32 %v432_v63, 0.0  ;;  %v435_v7 = vadd.f32 %v950_v18, %v434_v2  ;;  %v785_v8 = vpop.f32.mrb[11].mxu1 }
 0x102   : > { %v706_v9 = vpack.c.bf16 %v458_v3, %v458_v3  ;;  %v459_v10 = vmax.f32 %v387_v4, 0.0  ;;  %v718_v11 = vpack.c.bf16 %v470_v6, %v470_v6  ;;  %v471_v12 = vmax.f32 %v435_v7, 0.0 }
 0x104   : > { %569 = vst.msk [vmem:[%s961_s6 + $0x10] sm:$0xf] %vm564_vm3, %v706_v9  ;;  %v707_v13 = vpack.c.bf16 %v459_v10, %v459_v10  ;;  %581 = vst.msk [vmem:[%s961_s6 + $0x40] sm:$0xf] %vm564_vm3, %v718_v11  ;;  %v719_v14 = vpack.c.bf16 %v471_v12, %v471_v12 }
 0x105   : > { %v391_v15 = vpop.f32.mrb[12].mxu0  ;;  %v439_v16 = vpop.f32.mrb[12].mxu1 }
 0x106   : > { %570 = vst.msk [vmem:[%s961_s6 + $0x14] sm:$0xf] %vm564_vm3, %v707_v13  ;;  %582 = vst.msk [vmem:[%s961_s6 + $0x44] sm:$0xf] %vm564_vm3, %v719_v14  ;;  %v392_v17 = vadd.f32 %v950_v18, %v391_v15  ;;  %v764_v19 = vpop.f32.mrb[13].mxu0  ;;  %v440_v20 = vadd.f32 %v950_v18, %v439_v16  ;;  %v788_v21 = vpop.f32.mrb[13].mxu1 }
 0x107   : > { %v394_v22 = vpop.f32.mrb[14].mxu0  ;;  %v442_v23 = vpop.f32.mrb[14].mxu1 }
 0x108   : > { %v460_v24 = vmax.f32 %v392_v17, 0.0  ;;  %v395_v25 = vadd.f32 %v950_v18, %v394_v22  ;;  %v765_v26 = vpop.f32.mrb[15].mxu0  ;;  %v472_v27 = vmax.f32 %v440_v20, 0.0  ;;  %v443_v28 = vadd.f32 %v950_v18, %v442_v23  ;;  %v789_v29 = vpop.f32.mrb[15].mxu1 }
 0x10a   : > { %v708_v30 = vpack.c.bf16 %v460_v24, %v460_v24  ;;  %v461_v31 = vmax.f32 %v395_v25, 0.0  ;;  %v720_v32 = vpack.c.bf16 %v472_v27, %v472_v27  ;;  %v473_v33 = vmax.f32 %v443_v28, 0.0 }
 0x10c   : > { %571 = vst.msk [vmem:[%s961_s6 + $0x18] sm:$0xf] %vm564_vm3, %v708_v30  ;;  %v709_v34 = vpack.c.bf16 %v461_v31, %v461_v31  ;;  %583 = vst.msk [vmem:[%s961_s6 + $0x48] sm:$0xf] %vm564_vm3, %v720_v32  ;;  %v721_v35 = vpack.c.bf16 %v473_v33, %v473_v33 }
 0x10d   : > { %v399_v36 = vpop.f32.mrb[16].mxu0  ;;  %v447_v37 = vpop.f32.mrb[16].mxu1 }
 0x10e   : > { %572 = vst.msk [vmem:[%s961_s6 + $0x1c] sm:$0xf] %vm564_vm3, %v709_v34  ;;  %584 = vst.msk [vmem:[%s961_s6 + $0x4c] sm:$0xf] %vm564_vm3, %v721_v35  ;;  %v400_v38 = vadd.f32 %v950_v18, %v399_v36  ;;  %v768_v39 = vpop.f32.mrb[17].mxu0  ;;  %v448_v40 = vadd.f32 %v950_v18, %v447_v37  ;;  %v792_v41 = vpop.f32.mrb[17].mxu1 }
 0x10f   : > { %v402_v42 = vpop.f32.mrb[18].mxu0  ;;  %v450_v43 = vpop.f32.mrb[18].mxu1 }
 0x110   : > { %v462_v44 = vmax.f32 %v400_v38, 0.0  ;;  %v403_v45 = vadd.f32 %v950_v18, %v402_v42  ;;  %v769_v46 = vpop.f32.mrb[19].mxu0  ;;  %v474_v47 = vmax.f32 %v448_v40, 0.0  ;;  %v451_v48 = vadd.f32 %v950_v18, %v450_v43  ;;  %v793_v49 = vpop.f32.mrb[19].mxu1 }
 0x112   : > { %v710_v50 = vpack.c.bf16 %v462_v44, %v462_v44  ;;  %v463_v51 = vmax.f32 %v403_v45, 0.0  ;;  %v722_v52 = vpack.c.bf16 %v474_v47, %v474_v47  ;;  %v475_v53 = vmax.f32 %v451_v48, 0.0 }
 0x114   : > { %573 = vst.msk [vmem:[%s961_s6 + $0x20] sm:$0xf] %vm564_vm3, %v710_v50  ;;  %v711_v54 = vpack.c.bf16 %v463_v51, %v463_v51  ;;  %585 = vst.msk [vmem:[%s961_s6 + $0x50] sm:$0xf] %vm564_vm3, %v722_v52  ;;  %v723_v55 = vpack.c.bf16 %v475_v53, %v475_v53 }
 0x115   : > { %v407_v56 = vpop.f32.mrb[20].mxu0 }
 0x116   : > { %574 = vst.msk [vmem:[%s961_s6 + $0x24] sm:$0xf] %vm564_vm3, %v711_v54  ;;  %586 = vst.msk [vmem:[%s961_s6 + $0x54] sm:$0xf] %vm564_vm3, %v723_v55  ;;  %v408_v57 = vadd.f32 %v950_v18, %v407_v56  ;;  %v772_v58 = vpop.f32.mrb[21].mxu0 }
 0x117   : > { %v410_v59 = vpop.f32.mrb[22].mxu0 }
 0x118   : > { %v464_v60 = vmax.f32 %v408_v57, 0.0  ;;  %v411_v61 = vadd.f32 %v950_v18, %v410_v59  ;;  %v773_v62 = vpop.f32.mrb[23].mxu0 }
 0x11a   : > { %v712_v63 = vpack.c.bf16 %v464_v60, %v464_v60  ;;  %v465_v0 = vmax.f32 %v411_v61, 0.0 }
 0x11c   : > { %575 = vst.msk [vmem:[%s961_s6 + $0x28] sm:$0xf] %vm564_vm3, %v712_v63  ;;  %v713_v1 = vpack.c.bf16 %v465_v0, %v465_v0 }
 0x11e   : > { %576 = vst.msk [vmem:[%s961_s6 + $0x2c] sm:$0xf] %vm564_vm3, %v713_v1 }
 0x11f PF: > { %s13_s12 = sadd.s32 1, %s836_s12  }
 0x120   : > { %p10_p4 = scmp.ge.s32.totalorder %s13_s12, 4  }
 0x122   :  { %12 = sbr.rel (!%p10_p4) target bundleno = 1 (0x1), region = 62 }

// kernel: modeling_forward.25
= control target key start
LH: loop header
LB: loop body
LE: loop exit
PB: predicated region body
PF: predicated region fallthrough
CT: control target
= control target key end

     0   :  { %s896_s12 = smov 0   ;;  %s1052_s0 = inlined_call_operand.vmem [shape: bf16[352,144], index: 0, kind: input, shape index: {}]   ;;  %s1053_s1 = inlined_call_operand.vmem [shape: bf16[144,32], index: 1, kind: input, shape index: {}]   ;;  %s1054_s2 = inlined_call_operand.vmem [shape: f32[1,32], index: 2, kind: input, shape index: {}]   ;;  %s1055_s3 = inlined_call_operand.vmem [shape: bf16[352,32], index: 3, kind: output, shape index: {}]  }
   0x1 LB: > { %s700_s13 = sadd.s32 4294967295, %s873_s12   ;;  %p704_p0 = scmp.ge.s32.totalorder %s873_s12, 1  ;;  %s873_s12 = sphi %s896_s12, %s13_s12  }
   0x2   : > { %p139_p1 = scmp.lt.s32.totalorder %s873_s12, 3 }
   0x4   : > { %p140_p2 = pnand %p704_p0, %p139_p1 }
   0x5   : > { %v825_v0 = vld [vmem:[%s1053_s1] sm:$0xff] (!%p140_p2)   ;;  %v875_v1 = vmov (!%p140_p2), 0   ;;  %s164_s16 = smul.u32 (!%p140_p2), 22, %s700_s13  ;;  %v826_v2 = vld [vmem:[%s1053_s1 + $0x8] sm:$0xff] (!%p140_p2)   ;;  %v827_v3 = vld [vmem:[%s1053_s1 + $0x10] sm:$0xff] (!%p140_p2)   ;;  %vm378_vm0 = vcmask (!%p140_p2), 130048  }
   0x6   : > { %143 = sbr.rel (%p140_p2) target bundleno = 301 (0x12d), region = 32  ;;  %412 = vmatprep.subr.bf16.mxu0 (!%p140_p2), %v875_v1  ;;  %798 = vmatprep.subr.bf16.mxu1 (!%p140_p2), %v875_v1  ;;  %v828_v4 = vld [vmem:[%s1053_s1 + $0x18] sm:$0xff] (!%p140_p2)   ;;  %v829_v7 = vld [vmem:[%s1053_s1 + $0x20] sm:$0xff] (!%p140_p2)   ;;  %v830_v8 = vld [vmem:[%s1053_s1 + $0x28] sm:$0xff] (!%p140_p2)   ;;  %vm621_vm1 = vcmask (!%p140_p2), 257024  }
   0x7   : > { %413 = vmatpush1.bf16.msra.mxu0 (!%p140_p2), %v825_v0  ;;  %807 = vmatpush1.bf16.msra.mxu1 (!%p140_p2), %v825_v0  ;;  %p165_p3 = scmp.lt.s32.totalorder (!%p140_p2), %s164_s16, 43  ;;  %v831_v9 = vld [vmem:[%s1053_s1 + $0x30] sm:$0xff] (!%p140_p2)   ;;  %v832_v10 = vld [vmem:[%s1053_s1 + $0x38] sm:$0xff] (!%p140_p2)   ;;  %v833_v11 = vld [vmem:[%s1053_s1 + $0x40] sm:$0xff] (!%p140_p2)  }
   0x8   : > { %414 = vmatprep.subr.bf16.mxu0 (!%p140_p2), %v875_v1  ;;  %799 = vmatprep.subr.bf16.mxu1 (!%p140_p2), %v875_v1  ;;  %v975_v32 = vld [vmem:[%s1054_s2] ss:$0 sm:$0xff] (!%p140_p2) }
   0xb   : > { %415 = vmatpush1.bf16.msra.mxu0 (!%p140_p2), %v826_v2  ;;  %808 = vmatpush1.bf16.msra.mxu1 (!%p140_p2), %v826_v2 }
   0xc   : > { %416 = vmatprep.subr.bf16.mxu0 (!%p140_p2), %v875_v1  ;;  %800 = vmatprep.subr.bf16.mxu1 (!%p140_p2), %v875_v1 }
   0xd   : > { %s1057_s16 = smov (!%p165_p3, %s164_s16), 43 }
   0xe   : > { %s775_s21 = sshll.u32 %s1057_s16, 3  ;;  %s707_s13 = sshll.u32 %s1057_s16, 2 }
   0xf   : > { %s919_s24 = scalar_lea.vmem %s1052_s0, %s775_s21  ;;  %417 = vmatpush1.bf16.msra.mxu0 %v827_v3  ;;  %809 = vmatpush1.bf16.msra.mxu1 %v827_v3  ;;  %s983_s17 = scalar_lea.vmem %s1055_s3, %s707_s13 }
  0x10   : > { %v836_v5 = vld [vmem:[%s919_s24 + $0x4] ss:$8 sps:$4 sm:$0xff]   ;;  %418 = vmatprep.subr.bf16.mxu0 %v875_v1  ;;  %801 = vmatprep.subr.bf16.mxu1 %v875_v1  ;;  %v834_v12 = vld [vmem:[%s919_s24] ss:$8 sps:$4 sm:$0xff]   ;;  %v840_v14 = vld [vmem:[%s919_s24 + $0x14] ss:$8 sps:$4 sm:$0xff]  }
  0x11   : > { %v839_v6 = vld [vmem:[%s919_s24 + $0x64] ss:$8 sps:$4 sm:$0xff]   ;;  %740 = vmatprep.mubr.msk.bf16.mxu0 %vm378_vm0, %v836_v5  ;;  %v837_v13 = vld [vmem:[%s919_s24 + $0x60] ss:$8 sps:$4 sm:$0xff]   ;;  %v843_v15 = vld [vmem:[%s919_s24 + $0x74] ss:$8 sps:$4 sm:$0xff]  }
  0x12   : > { %746 = vmatprep.mubr.msk.bf16.mxu1 %vm378_vm0, %v839_v6  ;;  %v842_v16 = vld [vmem:[%s919_s24 + $0x10] ss:$8 sps:$4 sm:$0xff]   ;;  %v846_v18 = vld [vmem:[%s919_s24 + $0x24] ss:$8 sps:$4 sm:$0xff]   ;;  %v848_v20 = vld [vmem:[%s919_s24 + $0x20] ss:$8 sps:$4 sm:$0xff]  }
  0x13   : > { %419 = vmatpush1.bf16.msra.mxu0 %v828_v4  ;;  %810 = vmatpush1.bf16.msra.mxu1 %v828_v4  ;;  %v845_v17 = vld [vmem:[%s919_s24 + $0x70] ss:$8 sps:$4 sm:$0xff]   ;;  %v849_v19 = vld [vmem:[%s919_s24 + $0x84] ss:$8 sps:$4 sm:$0xff]   ;;  %v851_v21 = vld [vmem:[%s919_s24 + $0x80] ss:$8 sps:$4 sm:$0xff]  }
  0x14   : > { %420 = vmatprep.subr.bf16.mxu0 %v875_v1  ;;  %802 = vmatprep.subr.bf16.mxu1 %v875_v1  ;;  %v852_v22 = vld [vmem:[%s919_s24 + $0x34] ss:$8 sps:$4 sm:$0xff]   ;;  %v854_v24 = vld [vmem:[%s919_s24 + $0x30] ss:$8 sps:$4 sm:$0xff]   ;;  %v858_v26 = vld [vmem:[%s919_s24 + $0x44] ss:$8 sps:$4 sm:$0xff]  }
  0x15   : > { %v855_v23 = vld [vmem:[%s919_s24 + $0x94] ss:$8 sps:$4 sm:$0xff]   ;;  %v857_v25 = vld [vmem:[%s919_s24 + $0x90] ss:$8 sps:$4 sm:$0xff]   ;;  %v861_v27 = vld [vmem:[%s919_s24 + $0xa4] ss:$8 sps:$4 sm:$0xff]  }
  0x16   : > { %v860_v28 = vld [vmem:[%s919_s24 + $0x40] ss:$8 sps:$4 sm:$0xff]   ;;  %v864_v30 = vld [vmem:[%s919_s24 + $0x54] ss:$8 sps:$4 sm:$0xff]   ;;  %v866_v31 = vld [vmem:[%s919_s24 + $0x50] ss:$8 sps:$4 sm:$0xff]  }
  0x17   : > { %421 = vmatpush1.bf16.msra.mxu0 %v829_v7  ;;  %811 = vmatpush1.bf16.msra.mxu1 %v829_v7  ;;  %v863_v29 = vld [vmem:[%s919_s24 + $0xa0] ss:$8 sps:$4 sm:$0xff]  }
  0x18   : > { %422 = vmatprep.subr.bf16.mxu0 %v875_v1  ;;  %803 = vmatprep.subr.bf16.mxu1 %v875_v1 }
  0x1b   : > { %423 = vmatpush1.bf16.msra.mxu0 %v830_v8  ;;  %812 = vmatpush1.bf16.msra.mxu1 %v830_v8 }
  0x1c   : > { %424 = vmatprep.subr.bf16.mxu0 %v875_v1  ;;  %804 = vmatprep.subr.bf16.mxu1 %v875_v1 }
  0x1f   : > { %425 = vmatpush1.bf16.msra.mxu0 %v831_v9  ;;  %813 = vmatpush1.bf16.msra.mxu1 %v831_v9 }
  0x20   : > { %426 = vmatprep.subr.bf16.mxu0 %v875_v1  ;;  %805 = vmatprep.subr.bf16.mxu1 %v875_v1 }
  0x23   : > { %427 = vmatpush1.bf16.msra.mxu0 %v832_v10  ;;  %814 = vmatpush1.bf16.msra.mxu1 %v832_v10 }
  0x24   : > { %428 = vmatprep.subr.bf16.mxu0 %v875_v1  ;;  %806 = vmatprep.subr.bf16.mxu1 %v875_v1 }
  0x27   : > { %429 = vmatpush1.bf16.msra.mxu0 %v833_v11  ;;  %815 = vmatpush1.bf16.msra.mxu1 %v833_v11 }
  0x2a   : > { %445 = vmatmul.mubr.bf16.vlgmr.msra.gmra.mrb[0].mxu0 %v834_v12  ;;  %493 = vmatmul.mubr.bf16.vlgmr.msra.gmra.mrb[0].mxu1 %v837_v13 }
  0x2b   : > { %741 = vmatprep.mubr.msk.bf16.mxu0 %vm378_vm0, %v840_v14  ;;  %747 = vmatprep.mubr.msk.bf16.mxu1 %vm378_vm0, %v843_v15 }
  0x32   : > { %453 = vmatmul.mubr.bf16.gmra.mrb[4].mxu0 %v842_v16  ;;  %501 = vmatmul.mubr.bf16.gmra.mrb[4].mxu1 %v845_v17 }
  0x33   : > { %742 = vmatprep.mubr.msk.bf16.mxu0 %vm378_vm0, %v846_v18  ;;  %748 = vmatprep.mubr.msk.bf16.mxu1 %vm378_vm0, %v849_v19 }
  0x3a   : > { %461 = vmatmul.mubr.bf16.gmra.mrb[8].mxu0 %v848_v20  ;;  %509 = vmatmul.mubr.bf16.gmra.mrb[8].mxu1 %v851_v21 }
  0x3b   : > { %743 = vmatprep.mubr.msk.bf16.mxu0 %vm378_vm0, %v852_v22  ;;  %749 = vmatprep.mubr.msk.bf16.mxu1 %vm378_vm0, %v855_v23 }
  0x42   : > { %469 = vmatmul.mubr.bf16.gmra.mrb[12].mxu0 %v854_v24  ;;  %517 = vmatmul.mubr.bf16.gmra.mrb[12].mxu1 %v857_v25 }
  0x43   : > { %744 = vmatprep.mubr.msk.bf16.mxu0 %vm378_vm0, %v858_v26  ;;  %750 = vmatprep.mubr.msk.bf16.mxu1 %vm378_vm0, %v861_v27 }
  0x4a   : > { %477 = vmatmul.mubr.bf16.gmra.mrb[16].mxu0 %v860_v28  ;;  %525 = vmatmul.mubr.bf16.gmra.mrb[16].mxu1 %v863_v29 }
  0x4b   : > { %745 = vmatprep.mubr.msk.bf16.mxu0 %vm378_vm0, %v864_v30 }
  0x52   : > { %485 = vmatmul.mubr.bf16.gmra.mrb[20].mxu0 %v866_v31 }
  0xfd   : > { %v446_v33 = vpop.f32.mrb[0].mxu0  ;;  %v494_v34 = vpop.f32.mrb[0].mxu1 }
  0xfe   : > { %v447_v35 = vadd.f32 %v975_v32, %v446_v33  ;;  %v448_v36 = vpop.f32.mrb[1].mxu0  ;;  %v495_v37 = vadd.f32 %v975_v32, %v494_v34  ;;  %v496_v38 = vpop.f32.mrb[1].mxu1 }
  0xff   : > { %v449_v39 = vpop.f32.mrb[2].mxu0  ;;  %v497_v40 = vpop.f32.mrb[2].mxu1 }
 0x100   : > { %v776_v41 = vpack.c.bf16 %v447_v35, %v447_v35  ;;  %v450_v42 = vadd.f32 %v975_v32, %v449_v39  ;;  %v451_v43 = vpop.f32.mrb[3].mxu0  ;;  %v788_v44 = vpack.c.bf16 %v495_v37, %v495_v37  ;;  %v498_v45 = vadd.f32 %v975_v32, %v497_v40  ;;  %v499_v46 = vpop.f32.mrb[3].mxu1 }
 0x102   : > { %622 = vst.msk [vmem:[%s983_s17] sm:$0xf] %vm621_vm1, %v776_v41  ;;  %v777_v47 = vpack.c.bf16 %v450_v42, %v450_v42  ;;  %634 = vst.msk [vmem:[%s983_s17 + $0x30] sm:$0xf] %vm621_vm1, %v788_v44  ;;  %v789_v48 = vpack.c.bf16 %v498_v45, %v498_v45 }
 0x104   : > { %623 = vst.msk [vmem:[%s983_s17 + $0x4] sm:$0xf] %vm621_vm1, %v777_v47  ;;  %635 = vst.msk [vmem:[%s983_s17 + $0x34] sm:$0xf] %vm621_vm1, %v789_v48 }
 0x105   : > { %v454_v49 = vpop.f32.mrb[4].mxu0  ;;  %v502_v50 = vpop.f32.mrb[4].mxu1 }
 0x106   : > { %v455_v51 = vadd.f32 %v975_v32, %v454_v49  ;;  %v456_v52 = vpop.f32.mrb[5].mxu0  ;;  %v503_v53 = vadd.f32 %v975_v32, %v502_v50  ;;  %v504_v54 = vpop.f32.mrb[5].mxu1 }
 0x107   : > { %v457_v55 = vpop.f32.mrb[6].mxu0  ;;  %v505_v56 = vpop.f32.mrb[6].mxu1 }
 0x108   : > { %v778_v57 = vpack.c.bf16 %v455_v51, %v455_v51  ;;  %v458_v58 = vadd.f32 %v975_v32, %v457_v55  ;;  %v459_v59 = vpop.f32.mrb[7].mxu0  ;;  %v790_v60 = vpack.c.bf16 %v503_v53, %v503_v53  ;;  %v506_v61 = vadd.f32 %v975_v32, %v505_v56  ;;  %v507_v62 = vpop.f32.mrb[7].mxu1 }
 0x10a   : > { %624 = vst.msk [vmem:[%s983_s17 + $0x8] sm:$0xf] %vm621_vm1, %v778_v57  ;;  %v779_v63 = vpack.c.bf16 %v458_v58, %v458_v58  ;;  %636 = vst.msk [vmem:[%s983_s17 + $0x38] sm:$0xf] %vm621_vm1, %v790_v60  ;;  %v791_v0 = vpack.c.bf16 %v506_v61, %v506_v61 }
 0x10c   : > { %625 = vst.msk [vmem:[%s983_s17 + $0xc] sm:$0xf] %vm621_vm1, %v779_v63  ;;  %637 = vst.msk [vmem:[%s983_s17 + $0x3c] sm:$0xf] %vm621_vm1, %v791_v0 }
 0x10d   : > { %v462_v1 = vpop.f32.mrb[8].mxu0  ;;  %v510_v2 = vpop.f32.mrb[8].mxu1 }
 0x10e   : > { %v463_v3 = vadd.f32 %v975_v32, %v462_v1  ;;  %v464_v4 = vpop.f32.mrb[9].mxu0  ;;  %v511_v5 = vadd.f32 %v975_v32, %v510_v2  ;;  %v512_v6 = vpop.f32.mrb[9].mxu1 }
 0x10f   : > { %v465_v7 = vpop.f32.mrb[10].mxu0  ;;  %v513_v8 = vpop.f32.mrb[10].mxu1 }
 0x110   : > { %v780_v9 = vpack.c.bf16 %v463_v3, %v463_v3  ;;  %v466_v10 = vadd.f32 %v975_v32, %v465_v7  ;;  %v467_v11 = vpop.f32.mrb[11].mxu0  ;;  %v792_v12 = vpack.c.bf16 %v511_v5, %v511_v5  ;;  %v514_v13 = vadd.f32 %v975_v32, %v513_v8  ;;  %v515_v14 = vpop.f32.mrb[11].mxu1 }
 0x112   : > { %626 = vst.msk [vmem:[%s983_s17 + $0x10] sm:$0xf] %vm621_vm1, %v780_v9  ;;  %v781_v15 = vpack.c.bf16 %v466_v10, %v466_v10  ;;  %638 = vst.msk [vmem:[%s983_s17 + $0x40] sm:$0xf] %vm621_vm1, %v792_v12  ;;  %v793_v16 = vpack.c.bf16 %v514_v13, %v514_v13 }
 0x114   : > { %627 = vst.msk [vmem:[%s983_s17 + $0x14] sm:$0xf] %vm621_vm1, %v781_v15  ;;  %639 = vst.msk [vmem:[%s983_s17 + $0x44] sm:$0xf] %vm621_vm1, %v793_v16 }
 0x115   : > { %v470_v17 = vpop.f32.mrb[12].mxu0  ;;  %v518_v18 = vpop.f32.mrb[12].mxu1 }
 0x116   : > { %v471_v19 = vadd.f32 %v975_v32, %v470_v17  ;;  %v472_v20 = vpop.f32.mrb[13].mxu0  ;;  %v519_v21 = vadd.f32 %v975_v32, %v518_v18  ;;  %v520_v22 = vpop.f32.mrb[13].mxu1 }
 0x117   : > { %v473_v23 = vpop.f32.mrb[14].mxu0  ;;  %v521_v24 = vpop.f32.mrb[14].mxu1 }
 0x118   : > { %v782_v25 = vpack.c.bf16 %v471_v19, %v471_v19  ;;  %v474_v26 = vadd.f32 %v975_v32, %v473_v23  ;;  %v475_v27 = vpop.f32.mrb[15].mxu0  ;;  %v794_v28 = vpack.c.bf16 %v519_v21, %v519_v21  ;;  %v522_v29 = vadd.f32 %v975_v32, %v521_v24  ;;  %v523_v30 = vpop.f32.mrb[15].mxu1 }
 0x11a   : > { %628 = vst.msk [vmem:[%s983_s17 + $0x18] sm:$0xf] %vm621_vm1, %v782_v25  ;;  %v783_v31 = vpack.c.bf16 %v474_v26, %v474_v26  ;;  %640 = vst.msk [vmem:[%s983_s17 + $0x48] sm:$0xf] %vm621_vm1, %v794_v28  ;;  %v795_v33 = vpack.c.bf16 %v522_v29, %v522_v29 }
 0x11c   : > { %629 = vst.msk [vmem:[%s983_s17 + $0x1c] sm:$0xf] %vm621_vm1, %v783_v31  ;;  %641 = vst.msk [vmem:[%s983_s17 + $0x4c] sm:$0xf] %vm621_vm1, %v795_v33 }
 0x11d   : > { %v478_v34 = vpop.f32.mrb[16].mxu0  ;;  %v526_v35 = vpop.f32.mrb[16].mxu1 }
 0x11e   : > { %v479_v36 = vadd.f32 %v975_v32, %v478_v34  ;;  %v480_v37 = vpop.f32.mrb[17].mxu0  ;;  %v527_v38 = vadd.f32 %v975_v32, %v526_v35  ;;  %v528_v39 = vpop.f32.mrb[17].mxu1 }
 0x11f   : > { %v481_v40 = vpop.f32.mrb[18].mxu0  ;;  %v529_v41 = vpop.f32.mrb[18].mxu1 }
 0x120   : > { %v784_v42 = vpack.c.bf16 %v479_v36, %v479_v36  ;;  %v482_v43 = vadd.f32 %v975_v32, %v481_v40  ;;  %v483_v44 = vpop.f32.mrb[19].mxu0  ;;  %v796_v45 = vpack.c.bf16 %v527_v38, %v527_v38  ;;  %v530_v46 = vadd.f32 %v975_v32, %v529_v41  ;;  %v531_v47 = vpop.f32.mrb[19].mxu1 }
 0x122   : > { %630 = vst.msk [vmem:[%s983_s17 + $0x20] sm:$0xf] %vm621_vm1, %v784_v42  ;;  %v785_v48 = vpack.c.bf16 %v482_v43, %v482_v43  ;;  %642 = vst.msk [vmem:[%s983_s17 + $0x50] sm:$0xf] %vm621_vm1, %v796_v45  ;;  %v797_v49 = vpack.c.bf16 %v530_v46, %v530_v46 }
 0x124   : > { %631 = vst.msk [vmem:[%s983_s17 + $0x24] sm:$0xf] %vm621_vm1, %v785_v48  ;;  %643 = vst.msk [vmem:[%s983_s17 + $0x54] sm:$0xf] %vm621_vm1, %v797_v49 }
 0x125   : > { %v486_v50 = vpop.f32.mrb[20].mxu0 }
 0x126   : > { %v487_v51 = vadd.f32 %v975_v32, %v486_v50  ;;  %v488_v52 = vpop.f32.mrb[21].mxu0 }
 0x127   : > { %v489_v53 = vpop.f32.mrb[22].mxu0 }
 0x128   : > { %v786_v54 = vpack.c.bf16 %v487_v51, %v487_v51  ;;  %v490_v55 = vadd.f32 %v975_v32, %v489_v53  ;;  %v491_v56 = vpop.f32.mrb[23].mxu0 }
 0x12a   : > { %632 = vst.msk [vmem:[%s983_s17 + $0x28] sm:$0xf] %vm621_vm1, %v786_v54  ;;  %v787_v57 = vpack.c.bf16 %v490_v55, %v490_v55 }
 0x12c   : > { %633 = vst.msk [vmem:[%s983_s17 + $0x2c] sm:$0xf] %vm621_vm1, %v787_v57 }
 0x12d PF: > { %s13_s12 = sadd.s32 1, %s873_s12  }
 0x12e   : > { %p10_p4 = scmp.ge.s32.totalorder %s13_s12, 4  }
 0x130   :  { %12 = sbr.rel (!%p10_p4) target bundleno = 1 (0x1), region = 62 }

// kernel: modeling_forward.26
= control target key start
LH: loop header
LB: loop body
LE: loop exit
PB: predicated region body
PF: predicated region fallthrough
CT: control target
= control target key end

     0   :  { %s1345_s12 = smov 0   ;;  %s1691_s0 = inlined_call_operand.vmem [shape: bf16[352,288], index: 0, kind: input, shape index: {}]   ;;  %s1692_s1 = inlined_call_operand.vmem [shape: bf16[288,32], index: 1, kind: input, shape index: {}]   ;;  %s1693_s2 = inlined_call_operand.vmem [shape: f32[1,32], index: 2, kind: input, shape index: {}]   ;;  %s1694_s3 = inlined_call_operand.vmem [shape: bf16[352,32], index: 3, kind: output, shape index: {}]  }
   0x1 LB: > { %s1025_s13 = sadd.s32 4294967295, %s1320_s12   ;;  %p1029_p0 = scmp.ge.s32.totalorder %s1320_s12, 1  ;;  %s1320_s12 = sphi %s1345_s12, %s13_s12  }
   0x2   : > { %p139_p1 = scmp.lt.s32.totalorder %s1320_s12, 3 }
   0x4   : > { %p140_p2 = pnand %p1029_p0, %p139_p1 }
   0x5   : > { %v1296_v0 = vld [vmem:[%s1692_s1 + $0x40] sm:$0xff] (!%p140_p2)   ;;  %v1322_v2 = vmov (!%p140_p2), 0.0   ;;  %s164_s18 = smul.u32 (!%p140_p2), 22, %s1025_s13  ;;  %v1298_v3 = vld [vmem:[%s1692_s1 + $0x48] sm:$0xff] (!%p140_p2)   ;;  %v1300_v5 = vld [vmem:[%s1692_s1 + $0x50] sm:$0xff] (!%p140_p2)   ;;  %vm1323_vm0 = vmmov (!%p140_p2), 0  }
   0x6   : > { %143 = sbr.rel (%p140_p2) target bundleno = 342 (0x156), region = 32  ;;  %v1297_v1 = vld [vmem:[%s1692_s1] sm:$0xff] (!%p140_p2)   ;;  %1236 = vmatprep.subr.bf16.mxu1 (!%p140_p2), %v1322_v2  ;;  %1141 = vmatprep.subr.bf16.mxu0 (!%p140_p2), %v1296_v0  ;;  %v1299_v4 = vld [vmem:[%s1692_s1 + $0x8] sm:$0xff] (!%p140_p2)   ;;  %v1301_v6 = vld [vmem:[%s1692_s1 + $0x10] sm:$0xff] (!%p140_p2)   ;;  %v1324_v15 = vmov (!%p140_p2), 0   ;;  %vm582_vm1 = vcmask (!%p140_p2), 261120  }
   0x7   : > { %1142 = vmatpush3.bf16.msra.mxu0 (!%p140_p2), %v1297_v1  ;;  %p165_p3 = scmp.lt.s32.totalorder (!%p140_p2), %s164_s18, 43  ;;  %1240 = vmatprep.mubr.msk.bf16.mxu1 (!%p140_p2), %vm1323_vm0, %v1322_v2  ;;  %v1302_v7 = vld [vmem:[%s1692_s1 + $0x58] sm:$0xff] (!%p140_p2)   ;;  %v1304_v9 = vld [vmem:[%s1692_s1 + $0x60] sm:$0xff] (!%p140_p2)   ;;  %v1306_v12 = vld [vmem:[%s1692_s1 + $0x68] sm:$0xff] (!%p140_p2)   ;;  %vm946_vm2 = vcmask (!%p140_p2), 257024  }
   0x8   : > { %1143 = vmatprep.subr.bf16.mxu0 (!%p140_p2), %v1298_v3  ;;  %v1303_v8 = vld [vmem:[%s1692_s1 + $0x18] sm:$0xff] (!%p140_p2)   ;;  %v1310_v10 = vld [vmem:[%s1692_s1 + $0x80] sm:$0xff] (!%p140_p2)   ;;  %v1313_v18 = vld [vmem:[%s1692_s1 + $0x88] sm:$0xff] (!%p140_p2)  }
   0x9   : > { %v1305_v11 = vld [vmem:[%s1692_s1 + $0x20] sm:$0xff] (!%p140_p2)   ;;  %1237 = vmatpush3.bf16.msra.mxu1 (!%p140_p2), %v1310_v10  ;;  %v1307_v20 = vld [vmem:[%s1692_s1 + $0x28] sm:$0xff] (!%p140_p2)   ;;  %v1308_v23 = vld [vmem:[%s1692_s1 + $0x70] sm:$0xff] (!%p140_p2)  }
   0xa   : > { %1238 = vmatprep.subr.bf16.mxu1 (!%p140_p2), %v1322_v2  ;;  %v1309_v29 = vld [vmem:[%s1692_s1 + $0x30] sm:$0xff] (!%p140_p2)   ;;  %v1311_v30 = vld [vmem:[%s1692_s1 + $0x78] sm:$0xff] (!%p140_p2)  }
   0xb   : > { %1144 = vmatpush3.bf16.msra.mxu0 (!%p140_p2), %v1299_v4  ;;  %v1312_v35 = vld [vmem:[%s1692_s1 + $0x38] sm:$0xff] (!%p140_p2)  }
   0xc   : > { %1145 = vmatprep.subr.bf16.mxu0 (!%p140_p2), %v1300_v5 }
   0xd   : > { %s1696_s18 = smov (!%p165_p3, %s164_s18), 43  ;;  %1239 = vmatpush3.bf16.msra.mxu1 %v1313_v18 }
   0xe   : > { %s1284_s29 = smul.u32 12, %s1696_s18  ;;  %s1031_s5 = sshll.u32 %s1696_s18, 2 }
   0xf   : > { %1146 = vmatpush3.bf16.msra.mxu0 %v1301_v6  ;;  %s1622_s8 = scalar_lea.vmem %s1694_s3, %s1031_s5 }
  0x10   : > { %1147 = vmatprep.subr.bf16.mxu0 %v1302_v7  ;;  %s1392_s11 = scalar_lea.vmem %s1691_s0, %s1284_s29 }
  0x11   : > { %v178_v13 = vld [vmem:[%s1392_s11] sm:$0xff]  ;;  %v180_v14 = vld [vmem:[%s1392_s11 + $0xc] sm:$0xff]  ;;  %v179_v19 = vld [vmem:[%s1392_s11 + $0x8] sm:$0xf] }
  0x12   : > { %v222_v16 = vmax.bf16 %v1324_v15, %v178_v13  ;;  %v224_v17 = vmax.bf16 %v1324_v15, %v180_v14  ;;  %v181_v21 = vld [vmem:[%s1392_s11 + $0x14] sm:$0xf]  ;;  %v223_v22 = vmax.bf16 %v1324_v15, %v179_v19  ;;  %v183_v26 = vld [vmem:[%s1392_s11 + $0x20] sm:$0xf]  ;;  %v185_v27 = vld [vmem:[%s1392_s11 + $0x2c] sm:$0xf] }
  0x13   : > { %1148 = vmatpush3.bf16.msra.mxu0 %v1303_v8  ;;  %v225_v25 = vmax.bf16 %v1324_v15, %v181_v21  ;;  %v182_v31 = vld [vmem:[%s1392_s11 + $0x18] sm:$0xff]  ;;  %v184_v32 = vld [vmem:[%s1392_s11 + $0x24] sm:$0xff]  ;;  %v227_v33 = vmax.bf16 %v1324_v15, %v183_v26  ;;  %v229_v34 = vmax.bf16 %v1324_v15, %v185_v27  ;;  %v212_v45 = vld [vmem:[%s1392_s11 + $0xcc] sm:$0xff] }
  0x14   : > { %1149 = vmatprep.subr.bf16.mxu0 %v1304_v9  ;;  %v1034_v24 = vcombine.high %v222_v16, %v224_v17  ;;  %v1437_v36 = vmax.bf16 %v1324_v15, %v182_v31  ;;  %v228_v37 = vmax.bf16 %v1324_v15, %v184_v32  ;;  %v187_v38 = vld [vmem:[%s1392_s11 + $0x38] sm:$0xf]  ;;  %v189_v39 = vld [vmem:[%s1392_s11 + $0x44] sm:$0xf]  ;;  %v1033_v42 = vcombine.low %v222_v16, %v224_v17  ;;  %v211_v46 = vld [vmem:[%s1392_s11 + $0xc8] sm:$0xf] }
  0x15   : > { %v1035_v28 = vcombine.low %v223_v22, %v225_v25  ;;  %v1038_v40 = vcombine.low %v227_v33, %v229_v34  ;;  %v210_v41 = vld [vmem:[%s1392_s11 + $0xc0] sm:$0xff]  ;;  %v231_v43 = vmax.bf16 %v1324_v15, %v187_v38  ;;  %v233_v44 = vmax.bf16 %v1324_v15, %v189_v39  ;;  %v213_v47 = vld [vmem:[%s1392_s11 + $0xd4] sm:$0xf]  ;;  %v214_v51 = vld [vmem:[%s1392_s11 + $0xd8] sm:$0xff] }
  0x16   : > { %648 = vmatprep.mubr.bf16.mxu0 %v1034_v24  ;;  %v1037_v48 = vcombine.high %v1437_v36, %v228_v37  ;;  %v186_v49 = vld [vmem:[%s1392_s11 + $0x30] sm:$0xff]  ;;  %v188_v50 = vld [vmem:[%s1392_s11 + $0x3c] sm:$0xff]  ;;  %v216_v52 = vld [vmem:[%s1392_s11 + $0xe4] sm:$0xff]  ;;  %v1458_v54 = vmax.bf16 %v1324_v15, %v210_v41  ;;  %v1461_v55 = vmax.bf16 %v1324_v15, %v212_v45  ;;  %v1464_v56 = vmax.bf16 %v1324_v15, %v211_v46 }
  0x17   : > { %1150 = vmatpush3.bf16.msra.mxu0 %v1305_v11  ;;  %1241 = vmatmul.mubr.msk.bf16.vlgmr.msra.gmra.mrb[0].mxu1 %vm582_vm1, %v1035_v28  ;;  %v215_v53 = vld [vmem:[%s1392_s11 + $0xe0] sm:$0xf]  ;;  %v1467_v57 = vmax.bf16 %v1324_v15, %v213_v47  ;;  %v217_v58 = vld [vmem:[%s1392_s11 + $0xec] sm:$0xf]  ;;  %v218_v59 = vld [vmem:[%s1392_s11 + $0xf0] sm:$0xff]  ;;  %v230_v61 = vmax.bf16 %v1324_v15, %v186_v49  ;;  %v232_v62 = vmax.bf16 %v1324_v15, %v188_v50 }
  0x18   : > { %1151 = vmatprep.subr.bf16.mxu0 %v1306_v12  ;;  %1244 = vmatprep.mubr.msk.bf16.mxu1 %vm1323_vm0, %v1322_v2  ;;  %v220_v60 = vld [vmem:[%s1392_s11 + $0xfc] sm:$0xff]  ;;  %v1041_v63 = vcombine.low %v231_v43, %v233_v44  ;;  %v1475_v0 = vmax.bf16 %v1324_v15, %v214_v51  ;;  %v219_v1 = vld [vmem:[%s1392_s11 + $0xf8] sm:$0xf]  ;;  %v221_v3 = vld [vmem:[%s1392_s11 + $0x104] sm:$0xf]  ;;  %v1058_v4 = vcombine.high %v1458_v54, %v1461_v55 }
  0x19   : > { %v1057_v5 = vcombine.low %v1458_v54, %v1461_v55  ;;  %v1059_v6 = vcombine.low %v1464_v56, %v1467_v57  ;;  %v1486_v7 = vmax.bf16 %v1324_v15, %v216_v52  ;;  %v1489_v8 = vmax.bf16 %v1324_v15, %v215_v53  ;;  %v191_v12 = vld [vmem:[%s1392_s11 + $0x50] sm:$0xf]  ;;  %v193_v13 = vld [vmem:[%s1392_s11 + $0x5c] sm:$0xf]  ;;  %v190_v25 = vld [vmem:[%s1392_s11 + $0x48] sm:$0xff] }
  0x1a   : > { %v1492_v9 = vmax.bf16 %v1324_v15, %v217_v58  ;;  %v1495_v10 = vmax.bf16 %v1324_v15, %v218_v59  ;;  %v1498_v11 = vmax.bf16 %v1324_v15, %v220_v60  ;;  %v1507_v17 = vmax.bf16 %v1324_v15, %v219_v1  ;;  %v192_v26 = vld [vmem:[%s1392_s11 + $0x54] sm:$0xff]  ;;  %v195_v32 = vld [vmem:[%s1392_s11 + $0x68] sm:$0xf]  ;;  %v199_v43 = vld [vmem:[%s1392_s11 + $0x80] sm:$0xf] }
  0x1b   : > { %1152 = vmatpush3.bf16.msra.mxu0 %v1307_v20  ;;  %v1061_v14 = vcombine.high %v1475_v0, %v1486_v7  ;;  %v1060_v16 = vcombine.low %v1475_v0, %v1486_v7  ;;  %v1510_v18 = vmax.bf16 %v1324_v15, %v221_v3  ;;  %v1036_v19 = vcombine.low %v1437_v36, %v228_v37  ;;  %v197_v33 = vld [vmem:[%s1392_s11 + $0x74] sm:$0xf]  ;;  %v194_v36 = vld [vmem:[%s1392_s11 + $0x60] sm:$0xff]  ;;  %v196_v37 = vld [vmem:[%s1392_s11 + $0x6c] sm:$0xff] }
  0x1c   : > { %1153 = vmatprep.subr.bf16.mxu0 %v1308_v23  ;;  %v1062_v20 = vcombine.low %v1489_v8, %v1492_v9  ;;  %v1064_v21 = vcombine.high %v1495_v10, %v1498_v11  ;;  %v1063_v22 = vcombine.low %v1495_v10, %v1498_v11  ;;  %v1040_v23 = vcombine.high %v230_v61, %v232_v62  ;;  %v201_v44 = vld [vmem:[%s1392_s11 + $0x8c] sm:$0xf]  ;;  %v198_v47 = vld [vmem:[%s1392_s11 + $0x78] sm:$0xff]  ;;  %v205_v59 = vld [vmem:[%s1392_s11 + $0xa4] sm:$0xf] }
  0x1d   : > { %v1065_v24 = vcombine.low %v1507_v17, %v1510_v18  ;;  %v235_v27 = vmax.bf16 %v1324_v15, %v191_v12  ;;  %v237_v28 = vmax.bf16 %v1324_v15, %v193_v13  ;;  %v1039_v34 = vcombine.low %v230_v61, %v232_v62  ;;  %v203_v58 = vld [vmem:[%s1392_s11 + $0x98] sm:$0xf]  ;;  %v202_v62 = vld [vmem:[%s1392_s11 + $0x90] sm:$0xff]  ;;  %v1614_v0 = vld [vmem:[%s1693_s2] ss:$0 sm:$0xff] }
  0x1e   : > { %v239_v38 = vmax.bf16 %v1324_v15, %v195_v32  ;;  %v241_v39 = vmax.bf16 %v1324_v15, %v197_v33  ;;  %v240_v41 = vmax.bf16 %v1324_v15, %v196_v37  ;;  %v243_v49 = vmax.bf16 %v1324_v15, %v199_v43 }
  0x1f   : > { %1154 = vmatpush3.bf16.msra.mxu0 %v1309_v29  ;;  %1245 = vmatmul.mubr.msk.bf16.gmra.mrb[4].mxu1 %vm582_vm1, %v1038_v40  ;;  %v234_v29 = vmax.bf16 %v1324_v15, %v190_v25  ;;  %v1044_v31 = vcombine.low %v235_v27, %v237_v28  ;;  %v238_v40 = vmax.bf16 %v1324_v15, %v194_v36  ;;  %v209_v25 = vld [vmem:[%s1392_s11 + $0xbc] sm:$0xf]  ;;  %v206_v28 = vld [vmem:[%s1392_s11 + $0xa8] sm:$0xff] }
  0x20   : > { %1155 = vmatprep.subr.bf16.mxu0 %v1311_v30  ;;  %1248 = vmatprep.mubr.msk.bf16.mxu1 %vm1323_vm0, %v1322_v2  ;;  %v236_v30 = vmax.bf16 %v1324_v15, %v192_v26  ;;  %v245_v50 = vmax.bf16 %v1324_v15, %v201_v44  ;;  %v242_v51 = vmax.bf16 %v1324_v15, %v198_v47 }
  0x21   : > { %v1046_v46 = vcombine.high %v238_v40, %v240_v41  ;;  %v1045_v60 = vcombine.low %v238_v40, %v240_v41  ;;  %v247_v1 = vmax.bf16 %v1324_v15, %v203_v58  ;;  %v249_v3 = vmax.bf16 %v1324_v15, %v205_v59 }
  0x22   : > { %v1042_v45 = vcombine.low %v234_v29, %v236_v30  ;;  %v1050_v53 = vcombine.low %v243_v49, %v245_v50  ;;  %v246_v12 = vmax.bf16 %v1324_v15, %v202_v62  ;;  %v250_v32 = vmax.bf16 %v1324_v15, %v206_v28 }
  0x23   : > { %1156 = vmatpush3.bf16.msra.mxu0 %v1312_v35  ;;  %v1043_v35 = vcombine.high %v234_v29, %v236_v30  ;;  %v208_v29 = vld [vmem:[%s1392_s11 + $0xb4] sm:$0xff] }
  0x24   : > { %v252_v33 = vmax.bf16 %v1324_v15, %v208_v29 }
  0x26   : > { %649 = vmatmul.mubr.bf16.vlgmr.msra.gmra.mrb[0].mxu0 %v1033_v42  ;;  %v1047_v42 = vcombine.low %v239_v38, %v241_v39  ;;  %v1055_v36 = vcombine.high %v250_v32, %v252_v33  ;;  %v1054_v37 = vcombine.low %v250_v32, %v252_v33 }
  0x27   : > { %656 = vmatprep.mubr.bf16.mxu0 %v1037_v48  ;;  %1249 = vmatmul.mubr.msk.bf16.gmra.mrb[8].mxu1 %vm582_vm1, %v1041_v63  ;;  %v200_v48 = vld [vmem:[%s1392_s11 + $0x84] sm:$0xff]  ;;  %v204_v63 = vld [vmem:[%s1392_s11 + $0x9c] sm:$0xff] }
  0x28   : > { %1252 = vmatprep.mubr.msk.bf16.mxu1 %vm1323_vm0, %v1322_v2  ;;  %v244_v52 = vmax.bf16 %v1324_v15, %v200_v48  ;;  %v248_v13 = vmax.bf16 %v1324_v15, %v204_v63 }
  0x2a   : > { %v1049_v61 = vcombine.high %v242_v51, %v244_v52  ;;  %v1048_v26 = vcombine.low %v242_v51, %v244_v52  ;;  %v1052_v27 = vcombine.high %v246_v12, %v248_v13 }
  0x2e   : > { %657 = vmatmul.mubr.bf16.gmra.mrb[4].mxu0 %v1036_v19  ;;  %v1053_v19 = vcombine.low %v247_v1, %v249_v3 }
  0x2f   : > { %664 = vmatprep.mubr.bf16.mxu0 %v1040_v23  ;;  %1253 = vmatmul.mubr.msk.bf16.gmra.mrb[12].mxu1 %vm582_vm1, %v1044_v31  ;;  %v207_v23 = vld [vmem:[%s1392_s11 + $0xb0] sm:$0xf]  ;;  %v253_v31 = vmax.bf16 %v1324_v15, %v209_v25 }
  0x30   : > { %1256 = vmatprep.mubr.msk.bf16.mxu1 %vm1323_vm0, %v1322_v2  ;;  %v251_v30 = vmax.bf16 %v1324_v15, %v207_v23 }
  0x36   : > { %665 = vmatmul.mubr.bf16.gmra.mrb[8].mxu0 %v1039_v34  ;;  %v1056_v34 = vcombine.low %v251_v30, %v253_v31 }
  0x37   : > { %672 = vmatprep.mubr.bf16.mxu0 %v1043_v35  ;;  %1257 = vmatmul.mubr.msk.bf16.gmra.mrb[16].mxu1 %vm582_vm1, %v1047_v42  ;;  %v1051_v35 = vcombine.low %v246_v12, %v248_v13 }
  0x38   : > { %1260 = vmatprep.mubr.msk.bf16.mxu1 %vm1323_vm0, %v1322_v2 }
  0x3e   : > { %673 = vmatmul.mubr.bf16.gmra.mrb[12].mxu0 %v1042_v45 }
  0x3f   : > { %680 = vmatprep.mubr.bf16.mxu0 %v1046_v46  ;;  %1261 = vmatmul.mubr.msk.bf16.gmra.mrb[20].mxu1 %vm582_vm1, %v1050_v53 }
  0x40   : > { %1264 = vmatprep.mubr.msk.bf16.mxu1 %vm1323_vm0, %v1322_v2 }
  0x46   : > { %681 = vmatmul.mubr.bf16.gmra.mrb[16].mxu0 %v1045_v60 }
  0x47   : > { %688 = vmatprep.mubr.bf16.mxu0 %v1049_v61  ;;  %1265 = vmatmul.mubr.msk.bf16.gmra.mrb[24].mxu1 %vm582_vm1, %v1053_v19 }
  0x48   : > { %1268 = vmatprep.mubr.msk.bf16.mxu1 %vm1323_vm0, %v1322_v2 }
  0x4e   : > { %689 = vmatmul.mubr.bf16.gmra.mrb[20].mxu0 %v1048_v26 }
  0x4f   : > { %696 = vmatprep.mubr.bf16.mxu0 %v1052_v27  ;;  %1269 = vmatmul.mubr.msk.bf16.gmra.mrb[28].mxu1 %vm582_vm1, %v1056_v34 }
  0x50   : > { %1272 = vmatprep.mubr.msk.bf16.mxu1 %vm1323_vm0, %v1322_v2 }
  0x56   : > { %697 = vmatmul.mubr.bf16.gmra.mrb[24].mxu0 %v1051_v35 }
  0x57   : > { %704 = vmatprep.mubr.bf16.mxu0 %v1055_v36  ;;  %1273 = vmatmul.mubr.msk.bf16.gmra.mrb[32].mxu1 %vm582_vm1, %v1059_v6 }
  0x58   : > { %1276 = vmatprep.mubr.msk.bf16.mxu1 %vm1323_vm0, %v1322_v2 }
  0x5e   : > { %705 = vmatmul.mubr.bf16.gmra.mrb[28].mxu0 %v1054_v37 }
  0x5f   : > { %712 = vmatprep.mubr.bf16.mxu0 %v1058_v4  ;;  %1277 = vmatmul.mubr.msk.bf16.gmra.mrb[36].mxu1 %vm582_vm1, %v1062_v20 }
  0x60   : > { %1280 = vmatprep.mubr.msk.bf16.mxu1 %vm1323_vm0, %v1322_v2 }
  0x66   : > { %713 = vmatmul.mubr.bf16.gmra.mrb[32].mxu0 %v1057_v5 }
  0x67   : > { %720 = vmatprep.mubr.bf16.mxu0 %v1061_v14  ;;  %1281 = vmatmul.mubr.msk.bf16.gmra.mrb[40].mxu1 %vm582_vm1, %v1065_v24 }
  0x6e   : > { %721 = vmatmul.mubr.bf16.gmra.mrb[36].mxu0 %v1060_v16 }
  0x6f   : > { %728 = vmatprep.mubr.bf16.mxu0 %v1064_v21 }
  0x76   : > { %729 = vmatmul.mubr.bf16.gmra.mrb[40].mxu0 %v1063_v22 }
  0xea   : > { %v771_v2 = vpop.f32.mrb[0].mxu1 }
  0xeb   : > { %v1242_v15 = vpop.f32.mrb[1].mxu1 }
  0xec   : > { %v774_v54 = vpop.f32.mrb[2].mxu1 }
  0xed   : > { %v1243_v55 = vpop.f32.mrb[3].mxu1 }
  0xf2   : > { %v779_v56 = vpop.f32.mrb[4].mxu1 }
  0xf3   : > { %v1246_v57 = vpop.f32.mrb[5].mxu1 }
  0xf4   : > { %v782_v5 = vpop.f32.mrb[6].mxu1 }
  0xf5   : > { %v1247_v7 = vpop.f32.mrb[7].mxu1 }
  0xf9   : > { %v1157_v4 = vpop.f32.mrb[0].mxu0 }
  0xfa   : > { %v1158_v6 = vpop.f32.mrb[1].mxu0  ;;  %v787_v18 = vpop.f32.mrb[8].mxu1 }
  0xfb   : > { %v1159_v8 = vadd.f32 %v1158_v6, %v1157_v4  ;;  %v1160_v9 = vpop.f32.mrb[2].mxu0  ;;  %v1250_v20 = vpop.f32.mrb[9].mxu1 }
  0xfc   : > { %v1161_v10 = vpop.f32.mrb[3].mxu0  ;;  %v790_v38 = vpop.f32.mrb[10].mxu1 }
  0xfd   : > { %v651_v11 = vadd.f32 %v1159_v8, %v1614_v0  ;;  %v1162_v14 = vadd.f32 %v1161_v10, %v1160_v9  ;;  %v1251_v40 = vpop.f32.mrb[11].mxu1 }
  0xff   : > { %v772_v16 = vadd.f32 %v771_v2, %v651_v11  ;;  %v654_v17 = vadd.f32 %v1162_v14, %v1614_v0 }
 0x101   : > { %v1119_v21 = vpack.c.bf16 %v772_v16, %v772_v16  ;;  %v775_v22 = vadd.f32 %v774_v54, %v654_v17  ;;  %v1163_v24 = vpop.f32.mrb[4].mxu0 }
 0x102   : > { %v1164_v39 = vpop.f32.mrb[5].mxu0  ;;  %v795_v49 = vpop.f32.mrb[12].mxu1 }
 0x103   : > { %947 = vst.msk [vmem:[%s1622_s8] sm:$0xf] %vm946_vm2, %v1119_v21  ;;  %v1120_v41 = vpack.c.bf16 %v775_v22, %v775_v22  ;;  %v1165_v42 = vadd.f32 %v1164_v39, %v1163_v24  ;;  %v1166_v43 = vpop.f32.mrb[6].mxu0  ;;  %v1254_v50 = vpop.f32.mrb[13].mxu1 }
 0x104   : > { %v1167_v44 = vpop.f32.mrb[7].mxu0  ;;  %v798_v58 = vpop.f32.mrb[14].mxu1 }
 0x105   : > { %948 = vst.msk [vmem:[%s1622_s8 + $0x4] sm:$0xf] %vm946_vm2, %v1120_v41  ;;  %v659_v45 = vadd.f32 %v1165_v42, %v1614_v0  ;;  %v1168_v46 = vadd.f32 %v1167_v44, %v1166_v43  ;;  %v1255_v60 = vpop.f32.mrb[15].mxu1 }
 0x107   : > { %v780_v47 = vadd.f32 %v779_v56, %v659_v45  ;;  %v662_v48 = vadd.f32 %v1168_v46, %v1614_v0 }
 0x109   : > { %v1121_v51 = vpack.c.bf16 %v780_v47, %v780_v47  ;;  %v783_v52 = vadd.f32 %v782_v5, %v662_v48  ;;  %v1169_v53 = vpop.f32.mrb[8].mxu0 }
 0x10a   : > { %v1170_v59 = vpop.f32.mrb[9].mxu0  ;;  %v803_v23 = vpop.f32.mrb[16].mxu1 }
 0x10b   : > { %949 = vst.msk [vmem:[%s1622_s8 + $0x8] sm:$0xf] %vm946_vm2, %v1121_v51  ;;  %v1122_v61 = vpack.c.bf16 %v783_v52, %v783_v52  ;;  %v1171_v62 = vadd.f32 %v1170_v59, %v1169_v53  ;;  %v1172_v63 = vpop.f32.mrb[10].mxu0  ;;  %v1258_v25 = vpop.f32.mrb[17].mxu1 }
 0x10c   : > { %v1173_v1 = vpop.f32.mrb[11].mxu0  ;;  %v806_v29 = vpop.f32.mrb[18].mxu1 }
 0x10d   : > { %950 = vst.msk [vmem:[%s1622_s8 + $0xc] sm:$0xf] %vm946_vm2, %v1122_v61  ;;  %v667_v3 = vadd.f32 %v1171_v62, %v1614_v0  ;;  %v1174_v12 = vadd.f32 %v1173_v1, %v1172_v63  ;;  %v1259_v31 = vpop.f32.mrb[19].mxu1 }
 0x10f   : > { %v788_v13 = vadd.f32 %v787_v18, %v667_v3  ;;  %v670_v19 = vadd.f32 %v1174_v12, %v1614_v0 }
 0x111   : > { %v1123_v26 = vpack.c.bf16 %v788_v13, %v788_v13  ;;  %v791_v27 = vadd.f32 %v790_v38, %v670_v19  ;;  %v1175_v28 = vpop.f32.mrb[12].mxu0 }
 0x112   : > { %v1176_v30 = vpop.f32.mrb[13].mxu0  ;;  %v811_v54 = vpop.f32.mrb[20].mxu1 }
 0x113   : > { %951 = vst.msk [vmem:[%s1622_s8 + $0x10] sm:$0xf] %vm946_vm2, %v1123_v26  ;;  %v1124_v32 = vpack.c.bf16 %v791_v27, %v791_v27  ;;  %v1177_v33 = vadd.f32 %v1176_v30, %v1175_v28  ;;  %v1178_v34 = vpop.f32.mrb[14].mxu0  ;;  %v1262_v55 = vpop.f32.mrb[21].mxu1 }
 0x114   : > { %v1179_v35 = vpop.f32.mrb[15].mxu0  ;;  %v814_v5 = vpop.f32.mrb[22].mxu1 }
 0x115   : > { %952 = vst.msk [vmem:[%s1622_s8 + $0x14] sm:$0xf] %vm946_vm2, %v1124_v32  ;;  %v675_v36 = vadd.f32 %v1177_v33, %v1614_v0  ;;  %v1180_v37 = vadd.f32 %v1179_v35, %v1178_v34  ;;  %v1263_v7 = vpop.f32.mrb[23].mxu1 }
 0x117   : > { %v796_v2 = vadd.f32 %v795_v49, %v675_v36  ;;  %v678_v15 = vadd.f32 %v1180_v37, %v1614_v0 }
 0x119   : > { %v1125_v56 = vpack.c.bf16 %v796_v2, %v796_v2  ;;  %v799_v57 = vadd.f32 %v798_v58, %v678_v15  ;;  %v1181_v4 = vpop.f32.mrb[16].mxu0 }
 0x11a   : > { %v1182_v6 = vpop.f32.mrb[17].mxu0  ;;  %v819_v20 = vpop.f32.mrb[24].mxu1 }
 0x11b   : > { %953 = vst.msk [vmem:[%s1622_s8 + $0x18] sm:$0xf] %vm946_vm2, %v1125_v56  ;;  %v1126_v8 = vpack.c.bf16 %v799_v57, %v799_v57  ;;  %v1183_v9 = vadd.f32 %v1182_v6, %v1181_v4  ;;  %v1184_v10 = vpop.f32.mrb[18].mxu0  ;;  %v1266_v21 = vpop.f32.mrb[25].mxu1 }
 0x11c   : > { %v1185_v11 = vpop.f32.mrb[19].mxu0  ;;  %v822_v39 = vpop.f32.mrb[26].mxu1 }
 0x11d   : > { %954 = vst.msk [vmem:[%s1622_s8 + $0x1c] sm:$0xf] %vm946_vm2, %v1126_v8  ;;  %v683_v14 = vadd.f32 %v1183_v9, %v1614_v0  ;;  %v1186_v16 = vadd.f32 %v1185_v11, %v1184_v10  ;;  %v1267_v41 = vpop.f32.mrb[27].mxu1 }
 0x11f   : > { %v804_v17 = vadd.f32 %v803_v23, %v683_v14  ;;  %v686_v18 = vadd.f32 %v1186_v16, %v1614_v0 }
 0x121   : > { %v1127_v22 = vpack.c.bf16 %v804_v17, %v804_v17  ;;  %v807_v24 = vadd.f32 %v806_v29, %v686_v18  ;;  %v1187_v38 = vpop.f32.mrb[20].mxu0 }
 0x122   : > { %v1188_v40 = vpop.f32.mrb[21].mxu0  ;;  %v827_v50 = vpop.f32.mrb[28].mxu1 }
 0x123   : > { %955 = vst.msk [vmem:[%s1622_s8 + $0x20] sm:$0xf] %vm946_vm2, %v1127_v22  ;;  %v1128_v42 = vpack.c.bf16 %v807_v24, %v807_v24  ;;  %v1189_v43 = vadd.f32 %v1188_v40, %v1187_v38  ;;  %v1190_v44 = vpop.f32.mrb[22].mxu0  ;;  %v1270_v51 = vpop.f32.mrb[29].mxu1 }
 0x124   : > { %v1191_v45 = vpop.f32.mrb[23].mxu0  ;;  %v830_v59 = vpop.f32.mrb[30].mxu1 }
 0x125   : > { %956 = vst.msk [vmem:[%s1622_s8 + $0x24] sm:$0xf] %vm946_vm2, %v1128_v42  ;;  %v691_v46 = vadd.f32 %v1189_v43, %v1614_v0  ;;  %v1192_v47 = vadd.f32 %v1191_v45, %v1190_v44  ;;  %v1271_v61 = vpop.f32.mrb[31].mxu1 }
 0x127   : > { %v812_v48 = vadd.f32 %v811_v54, %v691_v46  ;;  %v694_v49 = vadd.f32 %v1192_v47, %v1614_v0 }
 0x129   : > { %v1129_v52 = vpack.c.bf16 %v812_v48, %v812_v48  ;;  %v815_v53 = vadd.f32 %v814_v5, %v694_v49  ;;  %v1193_v58 = vpop.f32.mrb[24].mxu0 }
 0x12a   : > { %v1194_v60 = vpop.f32.mrb[25].mxu0  ;;  %v835_v25 = vpop.f32.mrb[32].mxu1 }
 0x12b   : > { %957 = vst.msk [vmem:[%s1622_s8 + $0x28] sm:$0xf] %vm946_vm2, %v1129_v52  ;;  %v1130_v62 = vpack.c.bf16 %v815_v53, %v815_v53  ;;  %v1195_v63 = vadd.f32 %v1194_v60, %v1193_v58  ;;  %v1196_v1 = vpop.f32.mrb[26].mxu0  ;;  %v1274_v26 = vpop.f32.mrb[33].mxu1 }
 0x12c   : > { %v1197_v3 = vpop.f32.mrb[27].mxu0  ;;  %v838_v30 = vpop.f32.mrb[34].mxu1 }
 0x12d   : > { %958 = vst.msk [vmem:[%s1622_s8 + $0x2c] sm:$0xf] %vm946_vm2, %v1130_v62  ;;  %v699_v12 = vadd.f32 %v1195_v63, %v1614_v0  ;;  %v1198_v13 = vadd.f32 %v1197_v3, %v1196_v1  ;;  %v1275_v32 = vpop.f32.mrb[35].mxu1 }
 0x12f   : > { %v820_v19 = vadd.f32 %v819_v20, %v699_v12  ;;  %v702_v23 = vadd.f32 %v1198_v13, %v1614_v0 }
 0x131   : > { %v1131_v27 = vpack.c.bf16 %v820_v19, %v820_v19  ;;  %v823_v28 = vadd.f32 %v822_v39, %v702_v23  ;;  %v1199_v29 = vpop.f32.mrb[28].mxu0 }
 0x132   : > { %v1200_v31 = vpop.f32.mrb[29].mxu0  ;;  %v843_v55 = vpop.f32.mrb[36].mxu1 }
 0x133   : > { %959 = vst.msk [vmem:[%s1622_s8 + $0x30] sm:$0xf] %vm946_vm2, %v1131_v27  ;;  %v1132_v33 = vpack.c.bf16 %v823_v28, %v823_v28  ;;  %v1201_v34 = vadd.f32 %v1200_v31, %v1199_v29  ;;  %v1202_v35 = vpop.f32.mrb[30].mxu0  ;;  %v1278_v56 = vpop.f32.mrb[37].mxu1 }
 0x134   : > { %v1203_v36 = vpop.f32.mrb[31].mxu0  ;;  %v846_v6 = vpop.f32.mrb[38].mxu1 }
 0x135   : > { %960 = vst.msk [vmem:[%s1622_s8 + $0x34] sm:$0xf] %vm946_vm2, %v1132_v33  ;;  %v707_v37 = vadd.f32 %v1201_v34, %v1614_v0  ;;  %v1204_v2 = vadd.f32 %v1203_v36, %v1202_v35  ;;  %v1279_v8 = vpop.f32.mrb[39].mxu1 }
 0x137   : > { %v828_v15 = vadd.f32 %v827_v50, %v707_v37  ;;  %v710_v54 = vadd.f32 %v1204_v2, %v1614_v0 }
 0x139   : > { %v1133_v57 = vpack.c.bf16 %v828_v15, %v828_v15  ;;  %v831_v4 = vadd.f32 %v830_v59, %v710_v54  ;;  %v1205_v5 = vpop.f32.mrb[32].mxu0 }
 0x13a   : > { %v1206_v7 = vpop.f32.mrb[33].mxu0  ;;  %v851_v21 = vpop.f32.mrb[40].mxu1 }
 0x13b   : > { %961 = vst.msk [vmem:[%s1622_s8 + $0x38] sm:$0xf] %vm946_vm2, %v1133_v57  ;;  %v1134_v9 = vpack.c.bf16 %v831_v4, %v831_v4  ;;  %v1207_v10 = vadd.f32 %v1206_v7, %v1205_v5  ;;  %v1208_v11 = vpop.f32.mrb[34].mxu0  ;;  %v1282_v22 = vpop.f32.mrb[41].mxu1 }
 0x13c   : > { %v1209_v14 = vpop.f32.mrb[35].mxu0  ;;  %v854_v40 = vpop.f32.mrb[42].mxu1 }
 0x13d   : > { %962 = vst.msk [vmem:[%s1622_s8 + $0x3c] sm:$0xf] %vm946_vm2, %v1134_v9  ;;  %v715_v16 = vadd.f32 %v1207_v10, %v1614_v0  ;;  %v1210_v17 = vadd.f32 %v1209_v14, %v1208_v11  ;;  %v1283_v42 = vpop.f32.mrb[43].mxu1 }
 0x13f   : > { %v836_v18 = vadd.f32 %v835_v25, %v715_v16  ;;  %v718_v20 = vadd.f32 %v1210_v17, %v1614_v0 }
 0x141   : > { %v1135_v24 = vpack.c.bf16 %v836_v18, %v836_v18  ;;  %v839_v38 = vadd.f32 %v838_v30, %v718_v20  ;;  %v1211_v39 = vpop.f32.mrb[36].mxu0 }
 0x142   : > { %v1212_v41 = vpop.f32.mrb[37].mxu0 }
 0x143   : > { %963 = vst.msk [vmem:[%s1622_s8 + $0x40] sm:$0xf] %vm946_vm2, %v1135_v24  ;;  %v1136_v43 = vpack.c.bf16 %v839_v38, %v839_v38  ;;  %v1213_v44 = vadd.f32 %v1212_v41, %v1211_v39  ;;  %v1214_v45 = vpop.f32.mrb[38].mxu0 }
 0x144   : > { %v1215_v46 = vpop.f32.mrb[39].mxu0 }
 0x145   : > { %964 = vst.msk [vmem:[%s1622_s8 + $0x44] sm:$0xf] %vm946_vm2, %v1136_v43  ;;  %v723_v47 = vadd.f32 %v1213_v44, %v1614_v0  ;;  %v1216_v48 = vadd.f32 %v1215_v46, %v1214_v45 }
 0x147   : > { %v844_v49 = vadd.f32 %v843_v55, %v723_v47  ;;  %v726_v50 = vadd.f32 %v1216_v48, %v1614_v0 }
 0x149   : > { %v1137_v51 = vpack.c.bf16 %v844_v49, %v844_v49  ;;  %v847_v52 = vadd.f32 %v846_v6, %v726_v50  ;;  %v1217_v53 = vpop.f32.mrb[40].mxu0 }
 0x14a   : > { %v1218_v58 = vpop.f32.mrb[41].mxu0 }
 0x14b   : > { %965 = vst.msk [vmem:[%s1622_s8 + $0x48] sm:$0xf] %vm946_vm2, %v1137_v51  ;;  %v1138_v59 = vpack.c.bf16 %v847_v52, %v847_v52  ;;  %v1219_v60 = vadd.f32 %v1218_v58, %v1217_v53  ;;  %v1220_v61 = vpop.f32.mrb[42].mxu0 }
 0x14c   : > { %v1221_v62 = vpop.f32.mrb[43].mxu0 }
 0x14d   : > { %966 = vst.msk [vmem:[%s1622_s8 + $0x4c] sm:$0xf] %vm946_vm2, %v1138_v59  ;;  %v731_v63 = vadd.f32 %v1219_v60, %v1614_v0  ;;  %v1222_v1 = vadd.f32 %v1221_v62, %v1220_v61 }
 0x14f   : > { %v852_v3 = vadd.f32 %v851_v21, %v731_v63  ;;  %v734_v12 = vadd.f32 %v1222_v1, %v1614_v0 }
 0x151   : > { %v1139_v13 = vpack.c.bf16 %v852_v3, %v852_v3  ;;  %v855_v19 = vadd.f32 %v854_v40, %v734_v12 }
 0x153   : > { %967 = vst.msk [vmem:[%s1622_s8 + $0x50] sm:$0xf] %vm946_vm2, %v1139_v13  ;;  %v1140_v23 = vpack.c.bf16 %v855_v19, %v855_v19 }
 0x155   : > { %968 = vst.msk [vmem:[%s1622_s8 + $0x54] sm:$0xf] %vm946_vm2, %v1140_v23 }
 0x156 PF: > { %s13_s12 = sadd.s32 1, %s1320_s12  }
 0x157   : > { %p10_p4 = scmp.ge.s32.totalorder %s13_s12, 4  }
 0x159   :  { %12 = sbr.rel (!%p10_p4) target bundleno = 1 (0x1), region = 62 }

// kernel: modeling_forward.27
= control target key start
LH: loop header
LB: loop body
LE: loop exit
PB: predicated region body
PF: predicated region fallthrough
CT: control target
= control target key end

     0   :  { %s1197_s15 = smov 0   ;;  %s1199_s16 = smov 0   ;;  %s1491_s0 = inlined_call_operand.vmem [shape: bf16[9,112,32], index: 0, kind: input, shape index: {}]   ;;  %s1492_s1 = inlined_call_operand.vmem [shape: bf16[112,16], index: 1, kind: input, shape index: {}]   ;;  %s1493_s2 = inlined_call_operand.vmem [shape: bf16[16,32], index: 2, kind: input, shape index: {}]   ;;  %s1494_s3 = inlined_call_operand.vmem [shape: f32[1,32], index: 3, kind: input, shape index: {}]   ;;  %s1495_s4 = inlined_call_operand.vmem [shape: bf16[112,32], index: 4, kind: output, shape index: {}]  }
   0x1   :  { %s1201_s17 = smov 0  }
   0x2 LB: > { %s1065_s18 = sadd.s32 4294967295, %s1170_s17   ;;  %s1214_s19 = sadd.s32 1, %s1170_s17   ;;  %s1170_s17 = sphi %s1201_s17, %s1498_s17   ;;  %s1166_s16 = sphi %s1199_s16, %s1497_s16   ;;  %s1162_s15 = sphi %s1197_s15, %s1496_s15  }
   0x3   : > { %s18_s20 = ssub.s32 %s1170_s17, %s1214_s19  ;;  %s21_s21 = sadd.s32 1, %s1166_s16 }
   0x4   : > { %p19_p0 = scmp.eq.s32.totalorder %s18_s20, 0  ;;  %p28_p1 = scmp.ne.s32.totalorder %s1166_s16, %s1162_s15 }
   0x5   : > { %p29_p2 = scmp.eq.s32.totalorder %s1170_s17, 0  ;;  %p1068_p4 = scmp.ge.s32.totalorder %s1170_s17, 2 }
   0x6   : > { %s1223_s22 = scalar_select %p19_p0, %s1166_s16, %s21_s21  }
   0x7   : > { %p30_p3 = por %p29_p2, %p28_p1  ;;  %154 = sbr.rel (%p1068_p4) target bundleno = 37 (0x25), region = 24 }
   0xe   : > { %157 = sbr.rel (!%p30_p3) target bundleno = 37 (0x25), region = 28  ;;  %s159_s23 = sand.u32 (%p30_p3), 1, %s1166_s16  }
   0xf   : > { %s1092_s24 = smul.u32 (%p30_p3), 28, %s1170_s17 }
  0x10   : > { %s1117_s25 = smul.u32 (%p30_p3), 252, %s159_s23 }
  0x11   : > { %s1231_s28 = scalar_lea.vmem (%p30_p3), %s1491_s0, %s1092_s24 }
  0x12   : > { %v180_v0 = vld [vmem:[%s1231_s28] sm:$0xff] (%p30_p3)   ;;  %v184_v1 = vld [vmem:[%s1231_s28 + $0x8] sm:$0xff] (%p30_p3)   ;;  %v188_v2 = vld [vmem:[%s1231_s28 + $0x10] sm:$0xff] (%p30_p3)   ;;  %s1236_s29 = scalar_lea.vmem (%p30_p3), [#allocation2], %s1117_s25 }
  0x13   : > { %181 = vst [vmem:[%s1236_s29] sm:$0xff] (%p30_p3), %v180_v0   ;;  %185 = vst [vmem:[%s1236_s29 + $0x8] sm:$0xff] (%p30_p3), %v184_v1   ;;  %v192_v3 = vld [vmem:[%s1231_s28 + $0x18] sm:$0xf] (%p30_p3)  ;;  %v198_v5 = vld [vmem:[%s1231_s28 + $0x40] sm:$0xff] (%p30_p3)  }
  0x14   : > { %189 = vst [vmem:[%s1236_s29 + $0x10] sm:$0xff] (%p30_p3), %v188_v2   ;;  %v194_v4 = vld [vmem:[%s1231_s28 + $0x38] sm:$0xff] (%p30_p3)   ;;  %193 = vst [vmem:[%s1236_s29 + $0x18] sm:$0xf] (%p30_p3), %v192_v3  ;;  %v202_v6 = vld [vmem:[%s1231_s28 + $0x48] sm:$0xff] (%p30_p3)  }
  0x15   : > { %195 = vst [vmem:[%s1236_s29 + $0x1c] sm:$0xff] %v194_v4   ;;  %199 = vst [vmem:[%s1236_s29 + $0x24] sm:$0xff] %v198_v5   ;;  %v206_v7 = vld [vmem:[%s1231_s28 + $0x50] sm:$0xf]  ;;  %v212_v9 = vld [vmem:[%s1231_s28 + $0x78] sm:$0xff]  }
  0x16   : > { %v208_v8 = vld [vmem:[%s1231_s28 + $0x70] sm:$0xff]   ;;  %203 = vst [vmem:[%s1236_s29 + $0x2c] sm:$0xff] %v202_v6   ;;  %207 = vst [vmem:[%s1236_s29 + $0x34] sm:$0xf] %v206_v7  ;;  %v216_v10 = vld [vmem:[%s1231_s28 + $0x80] sm:$0xff]  }
  0x17   : > { %209 = vst [vmem:[%s1236_s29 + $0x38] sm:$0xff] %v208_v8   ;;  %v220_v11 = vld [vmem:[%s1231_s28 + $0x88] sm:$0xf]  ;;  %213 = vst [vmem:[%s1236_s29 + $0x40] sm:$0xff] %v212_v9   ;;  %v226_v13 = vld [vmem:[%s1231_s28 + $0xb0] sm:$0xff]  }
  0x18   : > { %217 = vst [vmem:[%s1236_s29 + $0x48] sm:$0xff] %v216_v10   ;;  %221 = vst [vmem:[%s1236_s29 + $0x50] sm:$0xf] %v220_v11  ;;  %v222_v12 = vld [vmem:[%s1231_s28 + $0xa8] sm:$0xff]   ;;  %v230_v14 = vld [vmem:[%s1231_s28 + $0xb8] sm:$0xff]  }
  0x19   : > { %223 = vst [vmem:[%s1236_s29 + $0x54] sm:$0xff] %v222_v12   ;;  %227 = vst [vmem:[%s1236_s29 + $0x5c] sm:$0xff] %v226_v13   ;;  %v234_v15 = vld [vmem:[%s1231_s28 + $0xc0] sm:$0xf]  ;;  %v240_v17 = vld [vmem:[%s1231_s28 + $0xe8] sm:$0xff]  }
  0x1a   : > { %231 = vst [vmem:[%s1236_s29 + $0x64] sm:$0xff] %v230_v14   ;;  %v236_v16 = vld [vmem:[%s1231_s28 + $0xe0] sm:$0xff]   ;;  %235 = vst [vmem:[%s1236_s29 + $0x6c] sm:$0xf] %v234_v15  ;;  %v244_v18 = vld [vmem:[%s1231_s28 + $0xf0] sm:$0xff]  }
  0x1b   : > { %237 = vst [vmem:[%s1236_s29 + $0x70] sm:$0xff] %v236_v16   ;;  %241 = vst [vmem:[%s1236_s29 + $0x78] sm:$0xff] %v240_v17   ;;  %v248_v19 = vld [vmem:[%s1231_s28 + $0xf8] sm:$0xf]  ;;  %v254_v21 = vld [vmem:[%s1231_s28 + $0x120] sm:$0xff]  }
  0x1c   : > { %v250_v20 = vld [vmem:[%s1231_s28 + $0x118] sm:$0xff]   ;;  %245 = vst [vmem:[%s1236_s29 + $0x80] sm:$0xff] %v244_v18   ;;  %249 = vst [vmem:[%s1236_s29 + $0x88] sm:$0xf] %v248_v19  ;;  %v258_v22 = vld [vmem:[%s1231_s28 + $0x128] sm:$0xff]  }
  0x1d   : > { %251 = vst [vmem:[%s1236_s29 + $0x8c] sm:$0xff] %v250_v20   ;;  %v262_v23 = vld [vmem:[%s1231_s28 + $0x130] sm:$0xf]  ;;  %255 = vst [vmem:[%s1236_s29 + $0x94] sm:$0xff] %v254_v21   ;;  %v268_v25 = vld [vmem:[%s1231_s28 + $0x158] sm:$0xff]  }
  0x1e   : > { %259 = vst [vmem:[%s1236_s29 + $0x9c] sm:$0xff] %v258_v22   ;;  %263 = vst [vmem:[%s1236_s29 + $0xa4] sm:$0xf] %v262_v23  ;;  %v264_v24 = vld [vmem:[%s1231_s28 + $0x150] sm:$0xff]   ;;  %v272_v26 = vld [vmem:[%s1231_s28 + $0x160] sm:$0xff]  }
  0x1f   : > { %265 = vst [vmem:[%s1236_s29 + $0xa8] sm:$0xff] %v264_v24   ;;  %269 = vst [vmem:[%s1236_s29 + $0xb0] sm:$0xff] %v268_v25   ;;  %v276_v27 = vld [vmem:[%s1231_s28 + $0x168] sm:$0xf]  ;;  %v282_v29 = vld [vmem:[%s1231_s28 + $0x190] sm:$0xff]  }
  0x20   : > { %273 = vst [vmem:[%s1236_s29 + $0xb8] sm:$0xff] %v272_v26   ;;  %v278_v28 = vld [vmem:[%s1231_s28 + $0x188] sm:$0xff]   ;;  %277 = vst [vmem:[%s1236_s29 + $0xc0] sm:$0xf] %v276_v27  ;;  %v286_v30 = vld [vmem:[%s1231_s28 + $0x198] sm:$0xff]  }
  0x21   : > { %279 = vst [vmem:[%s1236_s29 + $0xc4] sm:$0xff] %v278_v28   ;;  %283 = vst [vmem:[%s1236_s29 + $0xcc] sm:$0xff] %v282_v29   ;;  %v290_v31 = vld [vmem:[%s1231_s28 + $0x1a0] sm:$0xf]  ;;  %v296_v33 = vld [vmem:[%s1231_s28 + $0x1c8] sm:$0xff]  }
  0x22   : > { %v292_v32 = vld [vmem:[%s1231_s28 + $0x1c0] sm:$0xff]   ;;  %287 = vst [vmem:[%s1236_s29 + $0xd4] sm:$0xff] %v286_v30   ;;  %291 = vst [vmem:[%s1236_s29 + $0xdc] sm:$0xf] %v290_v31  ;;  %v300_v34 = vld [vmem:[%s1231_s28 + $0x1d0] sm:$0xff]  }
  0x23   : > { %293 = vst [vmem:[%s1236_s29 + $0xe0] sm:$0xff] %v292_v32   ;;  %v304_v35 = vld [vmem:[%s1231_s28 + $0x1d8] sm:$0xf]  ;;  %297 = vst [vmem:[%s1236_s29 + $0xe8] sm:$0xff] %v296_v33  }
  0x24   : > { %301 = vst [vmem:[%s1236_s29 + $0xf0] sm:$0xff] %v300_v34   ;;  %305 = vst [vmem:[%s1236_s29 + $0xf8] sm:$0xf] %v304_v35 }
  0x25 PF: > { %p1070_p5 = scmp.ge.s32.totalorder %s1170_s17, 1  ;;  %p462_p6 = scmp.lt.s32.totalorder %s1170_s17, 3 }
  0x27   : > { %p463_p7 = pnand %p1070_p5, %p462_p6 }
  0x28   : > { %v1143_v36 = vld [vmem:[%s1493_s2] sm:$0xff] (!%p463_p7)   ;;  %s500_s6 = smul.u32 (!%p463_p7), 7, %s1065_s18  ;;  %vm871_vm0 = vcmask (!%p463_p7), 130048   ;;  %s469_s11 = sand.u32 (!%p463_p7), 1, %s1162_s15   ;;  %vm577_vm1 = vcmask (!%p463_p7), 257024  }
  0x29   : > { %466 = sbr.rel (%p463_p7) target bundleno = 275 (0x113), region = 73  ;;  %1105 = vmatprep.subr.bf16.mxu0 (!%p463_p7), %v1143_v36  ;;  %1115 = vmatprep.subr.bf16.mxu1 (!%p463_p7), %v1143_v36 }
  0x2a   : > { %p501_p8 = scmp.lt.s32.totalorder (!%p463_p7), %s500_s6, 13  ;;  %1106 = vmatpush3.bf16.msra.mxu0 (!%p463_p7), %v1143_v36  ;;  %1116 = vmatpush3.bf16.msra.mxu1 (!%p463_p7), %v1143_v36  ;;  %s1118_s12 = smul.u32 (!%p463_p7), 252, %s469_s11 }
  0x2c   : > { %s1323_s13 = scalar_lea.vmem (!%p463_p7), [#allocation2], %s1118_s12 }
  0x2d   : > { %v516_v41 = vld [vmem:[%s1323_s13 + $0x8] sm:$0xf] (!%p463_p7)  ;;  %v523_v42 = vld [vmem:[%s1323_s13 + $0x24] sm:$0xf] (!%p463_p7)  ;;  %v530_v43 = vld [vmem:[%s1323_s13 + $0x40] sm:$0xf] (!%p463_p7) }
  0x2e   : > { %v537_v44 = vld [vmem:[%s1323_s13 + $0x5c] sm:$0xf] (!%p463_p7)  ;;  %v544_v45 = vld [vmem:[%s1323_s13 + $0x78] sm:$0xf] (!%p463_p7)  ;;  %v551_v46 = vld [vmem:[%s1323_s13 + $0x94] sm:$0xf] (!%p463_p7) }
  0x2f   : > { %v558_v47 = vld [vmem:[%s1323_s13 + $0xb0] sm:$0xf] (!%p463_p7)  ;;  %v565_v48 = vld [vmem:[%s1323_s13 + $0xcc] sm:$0xf] (!%p463_p7)  ;;  %v650_v49 = vsel (!%p463_p7), %vm577_vm1, %v516_v41, 4286644096 }
  0x30   : > { %s1500_s6 = smov (!%p501_p8, %s500_s6), 13  ;;  %v653_v50 = vsel %vm577_vm1, %v523_v42, 4286644096  ;;  %v657_v51 = vsel %vm577_vm1, %v530_v43, 4286644096 }
  0x31   : > { %s1071_s7 = sshll.u32 %s1500_s6, 2  ;;  %v1337_v52 = vsel %vm577_vm1, %v537_v44, 4286644096  ;;  %v520_v53 = vld [vmem:[%s1323_s13 + $0x18] sm:$0xf]  ;;  %v655_v17 = vmax.bf16 %v653_v50, %v650_v49 }
  0x32   : > { %s504_s10 = scalar_lea.vmem %s1492_s1, %s1071_s7  ;;  %v527_v54 = vld [vmem:[%s1323_s13 + $0x34] sm:$0xf]  ;;  %v1342_v55 = vsel %vm577_vm1, %v544_v45, 4286644096  ;;  %v534_v56 = vld [vmem:[%s1323_s13 + $0x50] sm:$0xf]  ;;  %s510_s20 = scalar_lea.vmem %s1495_s4, %s1071_s7 }
  0x33   : > { %v1144_v37 = vld [vmem:[%s504_s10] sm:$0xff]   ;;  %v1145_v38 = vld [vmem:[%s504_s10 + $0x10] sm:$0xff]   ;;  %v1146_v39 = vld [vmem:[%s504_s10 + $0x8] sm:$0xff]   ;;  %v1347_v58 = vsel %vm577_vm1, %v551_v46, 4286644096  ;;  %v659_v35 = vmax.bf16 %v657_v51, %v655_v17 }
  0x34   : > { %1107 = vmatprep.mubr.msk.bf16.mxu0 %vm871_vm0, %v1144_v37  ;;  %1111 = vmatprep.mubr.msk.bf16.mxu1 %vm871_vm0, %v1145_v38  ;;  %v1147_v40 = vld [vmem:[%s504_s10 + $0x18] ss:$0 sps:$4 sm:$0xff]   ;;  %v514_v57 = vld [vmem:[%s1323_s13] sm:$0xf]  ;;  %v1350_v59 = vsel %vm577_vm1, %v558_v47, 4286644096 }
  0x35   : > { %1108 = vmatmul.mubr.msk.bf16.vlgmr.msra.gmra.mrb[0].mxu0 %vm871_vm0, %v1146_v39  ;;  %1112 = vmatmul.mubr.msk.bf16.vlgmr.msra.gmra.mrb[0].mxu1 %vm871_vm0, %v1147_v40  ;;  %v1353_v60 = vsel %vm577_vm1, %v565_v48, 4286644096  ;;  %v790_v61 = vsel %vm577_vm1, %v520_v53, 4286644096  ;;  %v793_v62 = vsel %vm577_vm1, %v527_v54, 4286644096 }
  0x36   : > { %v521_v63 = vld [vmem:[%s1323_s13 + $0x1c] sm:$0xf]  ;;  %v797_v0 = vsel %vm577_vm1, %v534_v56, 4286644096  ;;  %v580_v1 = vsel %vm577_vm1, %v514_v57, 4286644096  ;;  %v795_v21 = vmax.bf16 %v793_v62, %v790_v61  ;;  %v663_v56 = vmax.bf16 %v1337_v52, %v659_v35 }
  0x37   : > { %v518_v2 = vld [vmem:[%s1323_s13 + $0x10] sm:$0xf]  ;;  %v525_v3 = vld [vmem:[%s1323_s13 + $0x2c] sm:$0xf]  ;;  %v524_v5 = vld [vmem:[%s1323_s13 + $0x28] sm:$0xf] }
  0x38   : > { %v517_v4 = vld [vmem:[%s1323_s13 + $0xc] sm:$0xf]  ;;  %v528_v6 = vld [vmem:[%s1323_s13 + $0x38] sm:$0xf]  ;;  %v583_v7 = vsel %vm577_vm1, %v521_v63, 4286644096  ;;  %v799_v40 = vmax.bf16 %v797_v0, %v795_v21 }
  0x39   : > { %v515_v8 = vld [vmem:[%s1323_s13 + $0x4] sm:$0xf]  ;;  %v522_v9 = vld [vmem:[%s1323_s13 + $0x20] sm:$0xf]  ;;  %v532_v10 = vld [vmem:[%s1323_s13 + $0x48] sm:$0xf]  ;;  %v585_v22 = vmax.bf16 %v583_v7, %v580_v1 }
  0x3a   : > { %v720_v11 = vsel %vm577_vm1, %v518_v2, 4286644096  ;;  %v519_v12 = vld [vmem:[%s1323_s13 + $0x14] sm:$0xf]  ;;  %v526_v13 = vld [vmem:[%s1323_s13 + $0x30] sm:$0xf] }
  0x3b   : > { %v723_v14 = vsel %vm577_vm1, %v525_v3, 4286644096  ;;  %v685_v15 = vsel %vm577_vm1, %v517_v4, 4286644096  ;;  %v688_v16 = vsel %vm577_vm1, %v524_v5, 4286644096 }
  0x3c   : > { %v531_v18 = vld [vmem:[%s1323_s13 + $0x44] sm:$0xf]  ;;  %v615_v19 = vsel %vm577_vm1, %v515_v8, 4286644096  ;;  %v618_v20 = vsel %vm577_vm1, %v522_v9, 4286644096  ;;  %v725_v28 = vmax.bf16 %v723_v14, %v720_v11  ;;  %v690_v29 = vmax.bf16 %v688_v16, %v685_v15 }
  0x3d   : > { %v529_v23 = vld [vmem:[%s1323_s13 + $0x3c] sm:$0xf]  ;;  %v755_v24 = vsel %vm577_vm1, %v519_v12, 4286644096  ;;  %v758_v25 = vsel %vm577_vm1, %v526_v13, 4286644096  ;;  %v620_v34 = vmax.bf16 %v618_v20, %v615_v19  ;;  %v667_v13 = vmax.bf16 %v1342_v55, %v663_v56 }
  0x3e   : > { %v541_v26 = vld [vmem:[%s1323_s13 + $0x6c] sm:$0xf]  ;;  %v587_v27 = vsel %vm577_vm1, %v528_v6, 4286644096  ;;  %v535_v31 = vld [vmem:[%s1323_s13 + $0x54] sm:$0xf]  ;;  %v760_v39 = vmax.bf16 %v758_v25, %v755_v24 }
  0x3f   : > { %v533_v30 = vld [vmem:[%s1323_s13 + $0x4c] sm:$0xf]  ;;  %v727_v32 = vsel %vm577_vm1, %v532_v10, 4286644096  ;;  %v692_v33 = vsel %vm577_vm1, %v531_v18, 4286644096  ;;  %v589_v42 = vmax.bf16 %v587_v27, %v585_v22 }
  0x40   : > { %v539_v36 = vld [vmem:[%s1323_s13 + $0x64] sm:$0xf]  ;;  %v538_v37 = vld [vmem:[%s1323_s13 + $0x60] sm:$0xf]  ;;  %v622_v38 = vsel %vm577_vm1, %v529_v23, 4286644096  ;;  %v729_v47 = vmax.bf16 %v727_v32, %v725_v28  ;;  %v694_v48 = vmax.bf16 %v692_v33, %v690_v29 }
  0x41   : > { %v801_v41 = vsel %vm577_vm1, %v541_v26, 4286644096  ;;  %v536_v43 = vld [vmem:[%s1323_s13 + $0x58] sm:$0xf]  ;;  %v762_v44 = vsel %vm577_vm1, %v533_v30, 4286644096  ;;  %v624_v54 = vmax.bf16 %v622_v38, %v620_v34 }
  0x42   : > { %v548_v45 = vld [vmem:[%s1323_s13 + $0x88] sm:$0xf]  ;;  %v591_v46 = vsel %vm577_vm1, %v535_v31, 4286644096  ;;  %v542_v50 = vld [vmem:[%s1323_s13 + $0x70] sm:$0xf]  ;;  %v764_v63 = vmax.bf16 %v762_v44, %v760_v39  ;;  %v803_v0 = vmax.bf16 %v801_v41, %v799_v40  ;;  %v671_v31 = vmax.bf16 %v1347_v58, %v667_v13 }
  0x43   : > { %v540_v49 = vld [vmem:[%s1323_s13 + $0x68] sm:$0xf]  ;;  %v731_v51 = vsel %vm577_vm1, %v539_v36, 4286644096  ;;  %v696_v53 = vsel %vm577_vm1, %v538_v37, 4286644096  ;;  %v593_v2 = vmax.bf16 %v591_v46, %v589_v42 }
  0x44   : > { %v546_v57 = vld [vmem:[%s1323_s13 + $0x80] sm:$0xf]  ;;  %v545_v61 = vld [vmem:[%s1323_s13 + $0x7c] sm:$0xf]  ;;  %v626_v62 = vsel %vm577_vm1, %v536_v43, 4286644096  ;;  %v733_v7 = vmax.bf16 %v731_v51, %v729_v47  ;;  %v698_v52 = vmax.bf16 %v696_v53, %v694_v48 }
  0x45   : > { %v805_v1 = vsel %vm577_vm1, %v548_v45, 4286644096  ;;  %v543_v3 = vld [vmem:[%s1323_s13 + $0x74] sm:$0xf]  ;;  %v766_v4 = vsel %vm577_vm1, %v540_v49, 4286644096  ;;  %v628_v12 = vmax.bf16 %v626_v62, %v624_v54 }
  0x46   : > { %v555_v5 = vld [vmem:[%s1323_s13 + $0xa4] sm:$0xf]  ;;  %v595_v6 = vsel %vm577_vm1, %v542_v50, 4286644096  ;;  %v549_v9 = vld [vmem:[%s1323_s13 + $0x8c] sm:$0xf]  ;;  %v768_v17 = vmax.bf16 %v766_v4, %v764_v63  ;;  %v807_v18 = vmax.bf16 %v805_v1, %v803_v0  ;;  %v675_v50 = vmax.bf16 %v1350_v59, %v671_v31 }
  0x47   : > { %v547_v8 = vld [vmem:[%s1323_s13 + $0x84] sm:$0xf]  ;;  %v735_v10 = vsel %vm577_vm1, %v546_v57, 4286644096  ;;  %v700_v11 = vsel %vm577_vm1, %v545_v61, 4286644096  ;;  %v597_v20 = vmax.bf16 %v595_v6, %v593_v2 }
  0x48   : > { %v553_v14 = vld [vmem:[%s1323_s13 + $0x9c] sm:$0xf]  ;;  %v552_v15 = vld [vmem:[%s1323_s13 + $0x98] sm:$0xf]  ;;  %v630_v16 = vsel %vm577_vm1, %v543_v3, 4286644096  ;;  %v737_v25 = vmax.bf16 %v735_v10, %v733_v7  ;;  %v702_v55 = vmax.bf16 %v700_v11, %v698_v52 }
  0x49   : > { %v809_v19 = vsel %vm577_vm1, %v555_v5, 4286644096  ;;  %v550_v21 = vld [vmem:[%s1323_s13 + $0x90] sm:$0xf]  ;;  %v770_v22 = vsel %vm577_vm1, %v547_v8, 4286644096  ;;  %v632_v30 = vmax.bf16 %v630_v16, %v628_v12  ;;  %v679_v8 = vmax.bf16 %v1353_v60, %v675_v50 }
  0x4a   : > { %v562_v23 = vld [vmem:[%s1323_s13 + $0xc0] sm:$0xf]  ;;  %v599_v24 = vsel %vm577_vm1, %v549_v9, 4286644096  ;;  %v556_v27 = vld [vmem:[%s1323_s13 + $0xa8] sm:$0xf]  ;;  %v772_v35 = vmax.bf16 %v770_v22, %v768_v17  ;;  %v811_v36 = vmax.bf16 %v809_v19, %v807_v18 }
  0x4b   : > { %v554_v26 = vld [vmem:[%s1323_s13 + $0xa0] sm:$0xf]  ;;  %v739_v28 = vsel %vm577_vm1, %v553_v14, 4286644096  ;;  %v704_v29 = vsel %vm577_vm1, %v552_v15, 4286644096  ;;  %v601_v38 = vmax.bf16 %v599_v24, %v597_v20 }
  0x4c   : > { %v560_v32 = vld [vmem:[%s1323_s13 + $0xb8] sm:$0xf]  ;;  %v559_v33 = vld [vmem:[%s1323_s13 + $0xb4] sm:$0xf]  ;;  %v634_v34 = vsel %vm577_vm1, %v550_v21, 4286644096  ;;  %v741_v43 = vmax.bf16 %v739_v28, %v737_v25  ;;  %v706_v58 = vmax.bf16 %v704_v29, %v702_v55 }
  0x4d   : > { %v813_v37 = vsel %vm577_vm1, %v562_v23, 4286644096  ;;  %v557_v39 = vld [vmem:[%s1323_s13 + $0xac] sm:$0xf]  ;;  %v774_v40 = vsel %vm577_vm1, %v554_v26, 4286644096  ;;  %v636_v48 = vmax.bf16 %v634_v34, %v632_v30 }
  0x4e   : > { %v569_v41 = vld [vmem:[%s1323_s13 + $0xdc] sm:$0xf]  ;;  %v603_v42 = vsel %vm577_vm1, %v556_v27, 4286644096  ;;  %v563_v45 = vld [vmem:[%s1323_s13 + $0xc4] sm:$0xf]  ;;  %v776_v56 = vmax.bf16 %v774_v40, %v772_v35  ;;  %v815_v57 = vmax.bf16 %v813_v37, %v811_v36 }
  0x4f   : > { %v561_v44 = vld [vmem:[%s1323_s13 + $0xbc] sm:$0xf]  ;;  %v743_v46 = vsel %vm577_vm1, %v560_v32, 4286644096  ;;  %v708_v47 = vsel %vm577_vm1, %v559_v33, 4286644096  ;;  %v605_v62 = vmax.bf16 %v603_v42, %v601_v38 }
  0x50   : > { %v572_v49 = vld [vmem:[%s1323_s13 + $0xe8] sm:$0xf]  ;;  %v567_v51 = vld [vmem:[%s1323_s13 + $0xd4] sm:$0xf]  ;;  %v566_v53 = vld [vmem:[%s1323_s13 + $0xd0] sm:$0xf]  ;;  %v745_v3 = vmax.bf16 %v743_v46, %v741_v43  ;;  %v710_v59 = vmax.bf16 %v708_v47, %v706_v58 }
  0x51   : > { %v638_v54 = vsel %vm577_vm1, %v557_v39, 4286644096  ;;  %v817_v61 = vsel %vm577_vm1, %v569_v41, 4286644096  ;;  %v564_v63 = vld [vmem:[%s1323_s13 + $0xc8] sm:$0xf] }
  0x52   : > { %v778_v0 = vsel %vm577_vm1, %v561_v44, 4286644096  ;;  %v576_v1 = vld [vmem:[%s1323_s13 + $0xf8] sm:$0xf]  ;;  %v607_v2 = vsel %vm577_vm1, %v563_v45, 4286644096  ;;  %v640_v52 = vmax.bf16 %v638_v54, %v636_v48  ;;  %v819_v14 = vmax.bf16 %v817_v61, %v815_v57 }
  0x53   : > { %v568_v4 = vld [vmem:[%s1323_s13 + $0xd8] sm:$0xf]  ;;  %v570_v5 = vld [vmem:[%s1323_s13 + $0xe0] sm:$0xf]  ;;  %v747_v6 = vsel %vm577_vm1, %v567_v51, 4286644096  ;;  %v780_v12 = vmax.bf16 %v778_v0, %v776_v56  ;;  %v609_v15 = vmax.bf16 %v607_v2, %v605_v62 }
  0x54   : > { %v712_v7 = vsel %vm577_vm1, %v566_v53, 4286644096  ;;  %v574_v9 = vld [vmem:[%s1323_s13 + $0xf0] sm:$0xf]  ;;  %v573_v10 = vld [vmem:[%s1323_s13 + $0xec] sm:$0xf]  ;;  %v749_v20 = vmax.bf16 %v747_v6, %v745_v3 }
  0x55   : > { %v642_v11 = vsel %vm577_vm1, %v564_v63, 4286644096  ;;  %v681_v13 = vsel %vm577_vm1, %v572_v49, 4286644096  ;;  %v571_v16 = vld [vmem:[%s1323_s13 + $0xe4] sm:$0xf]  ;;  %v714_v21 = vmax.bf16 %v712_v7, %v710_v59 }
  0x56   : > { %v782_v17 = vsel %vm577_vm1, %v568_v4, 4286644096  ;;  %v821_v18 = vsel %vm577_vm1, %v576_v1, 4286644096  ;;  %v611_v19 = vsel %vm577_vm1, %v570_v5, 4286644096  ;;  %v644_v24 = vmax.bf16 %v642_v11, %v640_v52 }
  0x57   : > { %v575_v22 = vld [vmem:[%s1323_s13 + $0xf4] sm:$0xf]  ;;  %v751_v60 = vsel %vm577_vm1, %v574_v9, 4286644096  ;;  %v716_v23 = vsel %vm577_vm1, %v573_v10, 4286644096  ;;  %v683_v25 = vmax.bf16 %v681_v13, %v679_v8  ;;  %v784_v26 = vmax.bf16 %v782_v17, %v780_v12 }
  0x58   : > { %v646_v55 = vsel %vm577_vm1, %v571_v16, 4286644096  ;;  %v823_v27 = vmax.bf16 %v821_v18, %v819_v14  ;;  %v613_v28 = vmax.bf16 %v611_v19, %v609_v15  ;;  %v786_v29 = vsel %vm577_vm1, %v575_v22, 4286644096  ;;  %v1073_v32 = vld [vmem:[%s1494_s3] ss:$0 sm:$0xff] }
  0x59   : > { %v753_v30 = vmax.bf16 %v751_v60, %v749_v20  ;;  %v718_v31 = vmax.bf16 %v716_v23, %v714_v21  ;;  %v648_v33 = vmax.bf16 %v646_v55, %v644_v24  ;;  %v826_v34 = vunpack.c.l.bf16 %v683_v25 }
  0x5a   : > { %v788_v35 = vmax.bf16 %v786_v29, %v784_v26  ;;  %v830_v37 = vunpack.c.l.bf16 %v823_v27  ;;  %v824_v38 = vunpack.c.l.bf16 %v613_v28 }
  0x5b   : > { %v828_v42 = vunpack.c.l.bf16 %v753_v30  ;;  %v827_v43 = vunpack.c.l.bf16 %v718_v31  ;;  %v825_v47 = vunpack.c.l.bf16 %v648_v33 }
  0x5c   : > { %v829_v54 = vunpack.c.l.bf16 %v788_v35 }
 0x108   : > { %v1109_v36 = vpop.f32.mrb[0].mxu0  ;;  %v1113_v40 = vpop.f32.mrb[0].mxu1 }
 0x109   : > { %v927_v39 = vadd.f32 %v1109_v36, %v1073_v32  ;;  %v918_v41 = vpop.f32.mrb[1].mxu0  ;;  %v943_v58 = vadd.f32 %v1113_v40, %v1073_v32  ;;  %v934_v45 = vpop.f32.mrb[1].mxu1 }
 0x10a   : > { %v919_v44 = vadd.f32 %v1073_v32, %v918_v41  ;;  %v1110_v46 = vpop.f32.mrb[2].mxu0  ;;  %v935_v49 = vadd.f32 %v1073_v32, %v934_v45  ;;  %v1114_v51 = vpop.f32.mrb[2].mxu1 }
 0x10b   : > { %v950_v48 = vadd.f32 %v927_v39, %v826_v34  ;;  %v930_v50 = vadd.f32 %v1110_v46, %v1073_v32  ;;  %v921_v53 = vpop.f32.mrb[3].mxu0  ;;  %v954_v56 = vadd.f32 %v943_v58, %v830_v37  ;;  %v937_v62 = vpop.f32.mrb[3].mxu1 }
 0x10c   : > { %v948_v57 = vadd.f32 %v919_v44, %v824_v38  ;;  %v922_v61 = vadd.f32 %v1073_v32, %v921_v53  ;;  %v952_v0 = vadd.f32 %v935_v49, %v828_v42  ;;  %v938_v2 = vadd.f32 %v1073_v32, %v937_v62 }
 0x10d   : > { %v1095_v63 = vpack.c.bf16 %v950_v48, %v950_v48  ;;  %v951_v1 = vadd.f32 %v930_v50, %v827_v43  ;;  %v1099_v3 = vpack.c.bf16 %v954_v56, %v954_v56 }
 0x10e   : > { %v1093_v59 = vpack.c.bf16 %v948_v57, %v948_v57  ;;  %v949_v4 = vadd.f32 %v922_v61, %v825_v47  ;;  %v1097_v5 = vpack.c.bf16 %v952_v0, %v952_v0  ;;  %v953_v7 = vadd.f32 %v938_v2, %v829_v54 }
 0x10f   : > { %986 = vst.msk [vmem:[%s510_s20 + $0x8] sm:$0xf] %vm577_vm1, %v1095_v63  ;;  %v1096_v6 = vpack.c.bf16 %v951_v1, %v951_v1  ;;  %990 = vst.msk [vmem:[%s510_s20 + $0x18] sm:$0xf] %vm577_vm1, %v1099_v3 }
 0x110   : > { %984 = vst.msk [vmem:[%s510_s20] sm:$0xf] %vm577_vm1, %v1093_v59  ;;  %v1094_v52 = vpack.c.bf16 %v949_v4, %v949_v4  ;;  %988 = vst.msk [vmem:[%s510_s20 + $0x10] sm:$0xf] %vm577_vm1, %v1097_v5  ;;  %v1098_v8 = vpack.c.bf16 %v953_v7, %v953_v7 }
 0x111   : > { %987 = vst.msk [vmem:[%s510_s20 + $0xc] sm:$0xf] %vm577_vm1, %v1096_v6 }
 0x112   : > { %985 = vst.msk [vmem:[%s510_s20 + $0x4] sm:$0xf] %vm577_vm1, %v1094_v52  ;;  %989 = vst.msk [vmem:[%s510_s20 + $0x14] sm:$0xf] %vm577_vm1, %v1098_v8 }
 0x113 PF: > { %p11_p9 = scmp.ge.s32.totalorder %s1214_s19, 4   ;;  %s1496_s15 = smov %s1166_s16 }
 0x114   : > { %s1497_s16 = smov %s1223_s22  ;;  %s1498_s17 = smov %s1214_s19 }
 0x115   :  { %13 = sbr.rel (!%p11_p9) target bundleno = 2 (0x2), region = 115 }

// kernel: modeling_forward.28
= control target key start
LH: loop header
LB: loop body
LE: loop exit
PB: predicated region body
PF: predicated region fallthrough
CT: control target
= control target key end

     0   :  { %s835_s12 = smov 0   ;;  %s963_s0 = inlined_call_operand.vmem [shape: bf16[112,288], index: 0, kind: input, shape index: {}]   ;;  %s964_s1 = inlined_call_operand.vmem [shape: bf16[288,64], index: 1, kind: input, shape index: {}]   ;;  %s965_s2 = inlined_call_operand.vmem [shape: f32[1,64], index: 2, kind: input, shape index: {}]   ;;  %s966_s3 = inlined_call_operand.vmem [shape: bf16[112,64], index: 3, kind: output, shape index: {}]  }
   0x1 LB: > { %s646_s13 = sadd.s32 4294967295, %s812_s12   ;;  %p650_p0 = scmp.ge.s32.totalorder %s812_s12, 1  ;;  %s812_s12 = sphi %s835_s12, %s13_s12  }
   0x2   : > { %p139_p1 = scmp.lt.s32.totalorder %s812_s12, 3 }
   0x4   : > { %p140_p2 = pnand %p650_p0, %p139_p1 }
   0x5   : > { %v788_v0 = vld [vmem:[%s964_s1 + $0x40] sm:$0xff] (!%p140_p2)   ;;  %s164_s16 = smul.u32 (!%p140_p2), 7, %s646_s13  ;;  %v790_v2 = vld [vmem:[%s964_s1 + $0x48] sm:$0xff] (!%p140_p2)   ;;  %v792_v4 = vld [vmem:[%s964_s1 + $0x50] sm:$0xff] (!%p140_p2)   ;;  %v814_v14 = vmov (!%p140_p2), 0   ;;  %vm412_vm0 = vcmask (!%p140_p2), 261120  }
   0x6   : > { %143 = sbr.rel (%p140_p2) target bundleno = 278 (0x116), region = 32  ;;  %v789_v1 = vld [vmem:[%s964_s1] sm:$0xff] (!%p140_p2)   ;;  %704 = vmatprep.subr.bf16.mxu0 (!%p140_p2), %v788_v0  ;;  %762 = vmatprep.subr.bf16.mxu1 (!%p140_p2), %v788_v0  ;;  %v791_v3 = vld [vmem:[%s964_s1 + $0x8] sm:$0xff] (!%p140_p2)   ;;  %v793_v5 = vld [vmem:[%s964_s1 + $0x10] sm:$0xff] (!%p140_p2)   ;;  %vm582_vm1 = vcmask (!%p140_p2), 519168  }
   0x7   : > { %p165_p3 = scmp.lt.s32.totalorder (!%p140_p2), %s164_s16, 13  ;;  %705 = vmatpush3.bf16.msra.mxu0 (!%p140_p2), %v789_v1  ;;  %770 = vmatpush3.bf16.msra.mxu1 (!%p140_p2), %v789_v1  ;;  %v794_v6 = vld [vmem:[%s964_s1 + $0x58] sm:$0xff] (!%p140_p2)   ;;  %v796_v8 = vld [vmem:[%s964_s1 + $0x60] sm:$0xff] (!%p140_p2)   ;;  %v798_v10 = vld [vmem:[%s964_s1 + $0x68] sm:$0xff] (!%p140_p2)  }
   0x8   : > { %706 = vmatprep.subr.bf16.mxu0 (!%p140_p2), %v790_v2  ;;  %763 = vmatprep.subr.bf16.mxu1 (!%p140_p2), %v790_v2  ;;  %v795_v7 = vld [vmem:[%s964_s1 + $0x18] sm:$0xff] (!%p140_p2)   ;;  %v797_v9 = vld [vmem:[%s964_s1 + $0x20] sm:$0xff] (!%p140_p2)   ;;  %v799_v18 = vld [vmem:[%s964_s1 + $0x28] sm:$0xff] (!%p140_p2)  }
   0x9   : > { %v800_v21 = vld [vmem:[%s964_s1 + $0x70] sm:$0xff] (!%p140_p2)   ;;  %v802_v23 = vld [vmem:[%s964_s1 + $0x78] sm:$0xff] (!%p140_p2)   ;;  %v804_v31 = vld [vmem:[%s964_s1 + $0x80] sm:$0xff] (!%p140_p2)  }
   0xa   : > { %v801_v22 = vld [vmem:[%s964_s1 + $0x30] sm:$0xff] (!%p140_p2)   ;;  %v803_v28 = vld [vmem:[%s964_s1 + $0x38] sm:$0xff] (!%p140_p2)   ;;  %v805_v36 = vld [vmem:[%s964_s1 + $0x88] sm:$0xff] (!%p140_p2)  }
   0xb   : > { %707 = vmatpush3.bf16.msra.mxu0 (!%p140_p2), %v791_v3  ;;  %771 = vmatpush3.bf16.msra.mxu1 (!%p140_p2), %v791_v3 }
   0xc   : > { %708 = vmatprep.subr.bf16.mxu0 (!%p140_p2), %v792_v4  ;;  %764 = vmatprep.subr.bf16.mxu1 (!%p140_p2), %v792_v4 }
   0xd   : > { %s968_s16 = smov (!%p165_p3, %s164_s16), 13 }
   0xe   : > { %s778_s29 = smul.u32 12, %s968_s16  ;;  %s652_s5 = sshll.u32 %s968_s16, 2 }
   0xf   : > { %709 = vmatpush3.bf16.msra.mxu0 %v793_v5  ;;  %772 = vmatpush3.bf16.msra.mxu1 %v793_v5  ;;  %s944_s8 = scalar_lea.vmem %s966_s3, %s652_s5 }
  0x10   : > { %710 = vmatprep.subr.bf16.mxu0 %v794_v6  ;;  %765 = vmatprep.subr.bf16.mxu1 %v794_v6  ;;  %s876_s9 = scalar_lea.vmem %s963_s0, %s778_s29  ;;  %v653_v6 = vld [vmem:[%s965_s2] ss:$0 sm:$0xff] }
  0x11   : > { %v178_v11 = vld [vmem:[%s876_s9] sm:$0xff]  ;;  %v180_v12 = vld [vmem:[%s876_s9 + $0xc] sm:$0xff]  ;;  %v182_v24 = vld [vmem:[%s876_s9 + $0x18] sm:$0xff] }
  0x12   : > { %v190_v13 = vld [vmem:[%s876_s9 + $0x48] sm:$0xff]  ;;  %v192_v15 = vmax.bf16 %v814_v14, %v178_v11  ;;  %v194_v16 = vmax.bf16 %v814_v14, %v180_v12  ;;  %v181_v27 = vld [vmem:[%s876_s9 + $0x14] sm:$0xf]  ;;  %v196_v29 = vmax.bf16 %v814_v14, %v182_v24  ;;  %v183_v38 = vld [vmem:[%s876_s9 + $0x20] sm:$0xf] }
  0x13   : > { %711 = vmatpush3.bf16.msra.mxu0 %v795_v7  ;;  %773 = vmatpush3.bf16.msra.mxu1 %v795_v7  ;;  %v204_v17 = vmax.bf16 %v814_v14, %v190_v13  ;;  %v184_v25 = vld [vmem:[%s876_s9 + $0x24] sm:$0xff]  ;;  %v195_v33 = vmax.bf16 %v814_v14, %v181_v27  ;;  %v185_v39 = vld [vmem:[%s876_s9 + $0x2c] sm:$0xf]  ;;  %v186_v40 = vld [vmem:[%s876_s9 + $0x30] sm:$0xff]  ;;  %v197_v45 = vmax.bf16 %v814_v14, %v183_v38 }
  0x14   : > { %712 = vmatprep.subr.bf16.mxu0 %v796_v8  ;;  %766 = vmatprep.subr.bf16.mxu1 %v796_v8  ;;  %v655_v19 = vcombine.high %v192_v15, %v194_v16  ;;  %v179_v26 = vld [vmem:[%s876_s9 + $0x8] sm:$0xf]  ;;  %v198_v30 = vmax.bf16 %v814_v14, %v184_v25  ;;  %v654_v34 = vcombine.low %v192_v15, %v194_v16  ;;  %v188_v42 = vld [vmem:[%s876_s9 + $0x3c] sm:$0xff]  ;;  %v187_v43 = vld [vmem:[%s876_s9 + $0x38] sm:$0xf] }
  0x15   : > { %v664_v20 = vcombine.high %v204_v17, %v204_v17  ;;  %v193_v32 = vmax.bf16 %v814_v14, %v179_v26  ;;  %v663_v35 = vcombine.low %v204_v17, %v204_v17  ;;  %v189_v44 = vld [vmem:[%s876_s9 + $0x44] sm:$0xf]  ;;  %v199_v46 = vmax.bf16 %v814_v14, %v185_v39  ;;  %v191_v55 = vld [vmem:[%s876_s9 + $0x50] sm:$0xf] }
  0x16   : > { %457 = vmatprep.mubr.bf16.mxu0 %v655_v19  ;;  %v658_v37 = vcombine.high %v196_v29, %v198_v30  ;;  %v200_v47 = vmax.bf16 %v814_v14, %v186_v40  ;;  %v202_v48 = vmax.bf16 %v814_v14, %v188_v42  ;;  %v201_v49 = vmax.bf16 %v814_v14, %v187_v43 }
  0x17   : > { %713 = vmatpush3.bf16.msra.mxu0 %v797_v9  ;;  %774 = vmatpush3.bf16.msra.mxu1 %v797_v9  ;;  %v656_v41 = vcombine.low %v193_v32, %v195_v33  ;;  %v203_v50 = vmax.bf16 %v814_v14, %v189_v44  ;;  %v657_v51 = vcombine.low %v196_v29, %v198_v30 }
  0x18   : > { %714 = vmatprep.subr.bf16.mxu0 %v798_v10  ;;  %767 = vmatprep.subr.bf16.mxu1 %v798_v10  ;;  %v659_v52 = vcombine.low %v197_v45, %v199_v46  ;;  %v661_v53 = vcombine.high %v200_v47, %v202_v48  ;;  %v205_v56 = vmax.bf16 %v814_v14, %v191_v55 }
  0x19   : > { %481 = vmatprep.mubr.bf16.mxu1 %v664_v20  ;;  %v662_v54 = vcombine.low %v201_v49, %v203_v50  ;;  %v660_v57 = vcombine.low %v200_v47, %v202_v48 }
  0x1a   : > { %v665_v58 = vcombine.low %v205_v56, %v205_v56 }
  0x1b   : > { %715 = vmatpush3.bf16.msra.mxu0 %v799_v18  ;;  %775 = vmatpush3.bf16.msra.mxu1 %v799_v18 }
  0x1c   : > { %716 = vmatprep.subr.bf16.mxu0 %v800_v21  ;;  %768 = vmatprep.subr.bf16.mxu1 %v800_v21 }
  0x1f   : > { %717 = vmatpush3.bf16.msra.mxu0 %v801_v22  ;;  %776 = vmatpush3.bf16.msra.mxu1 %v801_v22 }
  0x20   : > { %718 = vmatprep.subr.bf16.mxu0 %v802_v23  ;;  %769 = vmatprep.subr.bf16.mxu1 %v802_v23 }
  0x23   : > { %719 = vmatpush3.bf16.msra.mxu0 %v803_v28  ;;  %777 = vmatpush3.bf16.msra.mxu1 %v803_v28 }
  0x24   : > { %750 = vmatprep.subr.bf16.mxu1 %v804_v31 }
  0x26   : > { %458 = vmatmul.mubr.bf16.vlgmr.msra.gmra.mrb[0].mxu0 %v654_v34  ;;  %482 = vmatmul.mubr.bf16.vlgmr.msra.gmra.mrb[0].mxu1 %v663_v35 }
  0x27   : > { %751 = vmatpush3.bf16.msra.mxu1 %v804_v31  ;;  %465 = vmatprep.mubr.bf16.mxu0 %v658_v37 }
  0x28   : > { %752 = vmatprep.subr.bf16.mxu1 %v805_v36  ;;  %754 = vmatprep.mubr.msk.bf16.mxu1 %vm412_vm0, %v656_v41 }
  0x2b   : > { %753 = vmatpush3.bf16.msra.mxu1 %v805_v36 }
  0x2e   : > { %466 = vmatmul.mubr.bf16.gmra.mrb[4].mxu0 %v657_v51  ;;  %755 = vmatmul.mubr.msk.bf16.vlgmr.msra.gmra.mrb[4].mxu1 %vm412_vm0, %v659_v52 }
  0x2f   : > { %473 = vmatprep.mubr.bf16.mxu0 %v661_v53  ;;  %758 = vmatprep.mubr.msk.bf16.mxu1 %vm412_vm0, %v662_v54 }
  0x36   : > { %474 = vmatmul.mubr.bf16.gmra.mrb[8].mxu0 %v660_v57  ;;  %759 = vmatmul.mubr.msk.bf16.gmra.mrb[8].mxu1 %vm412_vm0, %v665_v58 }
  0xf9   : > { %v720_v59 = vpop.f32.mrb[0].mxu0  ;;  %v738_v60 = vpop.f32.mrb[0].mxu1 }
  0xfa   : > { %v721_v61 = vpop.f32.mrb[1].mxu0  ;;  %v739_v62 = vpop.f32.mrb[1].mxu1 }
  0xfb   : > { %v722_v63 = vadd.f32 %v721_v61, %v720_v59  ;;  %v723_v0 = vpop.f32.mrb[2].mxu0  ;;  %v740_v1 = vadd.f32 %v739_v62, %v738_v60  ;;  %v741_v2 = vpop.f32.mrb[2].mxu1 }
  0xfc   : > { %v724_v3 = vpop.f32.mrb[3].mxu0  ;;  %v742_v4 = vpop.f32.mrb[3].mxu1 }
  0xfd   : > { %v725_v5 = vadd.f32 %v724_v3, %v723_v0  ;;  %v460_v9 = vadd.f32 %v722_v63, %v653_v6  ;;  %v484_v26 = vadd.f32 %v740_v1, %v653_v6 }
  0xff   : > { %v463_v16 = vadd.f32 %v725_v5, %v653_v6 }
 0x101   : > { %v726_v7 = vpop.f32.mrb[4].mxu0  ;;  %v756_v8 = vpop.f32.mrb[4].mxu1 }
 0x102   : > { %v727_v10 = vpop.f32.mrb[5].mxu0  ;;  %v523_v11 = vpop.f32.mrb[5].mxu1 }
 0x103   : > { %v728_v12 = vadd.f32 %v727_v10, %v726_v7  ;;  %v524_v13 = vadd.f32 %v523_v11, %v460_v9  ;;  %v729_v14 = vpop.f32.mrb[6].mxu0  ;;  %v757_v15 = vpop.f32.mrb[6].mxu1 }
 0x104   : > { %v730_v17 = vpop.f32.mrb[7].mxu0  ;;  %v526_v18 = vpop.f32.mrb[7].mxu1 }
 0x105   : > { %v468_v19 = vadd.f32 %v728_v12, %v653_v6  ;;  %v697_v20 = vpack.c.bf16 %v524_v13, %v524_v13  ;;  %v731_v21 = vadd.f32 %v730_v17, %v729_v14  ;;  %v527_v22 = vadd.f32 %v526_v18, %v463_v16 }
 0x107   : > { %v532_v23 = vadd.f32 %v756_v8, %v468_v19  ;;  %583 = vst.msk [vmem:[%s944_s8] sm:$0xf] %vm582_vm1, %v697_v20  ;;  %v471_v24 = vadd.f32 %v731_v21, %v653_v6  ;;  %v698_v25 = vpack.c.bf16 %v527_v22, %v527_v22 }
 0x109   : > { %v699_v27 = vpack.c.bf16 %v532_v23, %v532_v23  ;;  %v535_v28 = vadd.f32 %v757_v15, %v471_v24  ;;  %584 = vst.msk [vmem:[%s944_s8 + $0x4] sm:$0xf] %vm582_vm1, %v698_v25  ;;  %v732_v29 = vpop.f32.mrb[8].mxu0  ;;  %v760_v30 = vpop.f32.mrb[8].mxu1 }
 0x10a   : > { %v548_v31 = vadd.f32 %v760_v30, %v484_v26  ;;  %v733_v32 = vpop.f32.mrb[9].mxu0  ;;  %v539_v33 = vpop.f32.mrb[9].mxu1 }
 0x10b   : > { %585 = vst.msk [vmem:[%s944_s8 + $0x8] sm:$0xf] %vm582_vm1, %v699_v27  ;;  %v700_v34 = vpack.c.bf16 %v535_v28, %v535_v28  ;;  %v734_v35 = vadd.f32 %v733_v32, %v732_v29  ;;  %v735_v36 = vpop.f32.mrb[10].mxu0  ;;  %v761_v37 = vpop.f32.mrb[10].mxu1 }
 0x10c   : > { %v703_v38 = vpack.c.bf16 %v548_v31, %v548_v31  ;;  %v736_v39 = vpop.f32.mrb[11].mxu0  ;;  %v542_v40 = vpop.f32.mrb[11].mxu1 }
 0x10d   : > { %586 = vst.msk [vmem:[%s944_s8 + $0xc] sm:$0xf] %vm582_vm1, %v700_v34  ;;  %v476_v41 = vadd.f32 %v734_v35, %v653_v6  ;;  %v737_v42 = vadd.f32 %v736_v39, %v735_v36 }
 0x10e   : > { %589 = vst.msk [vmem:[%s944_s8 + $0x18] sm:$0xf] %vm582_vm1, %v703_v38 }
 0x10f   : > { %v540_v43 = vadd.f32 %v539_v33, %v476_v41  ;;  %v479_v44 = vadd.f32 %v737_v42, %v653_v6 }
 0x111   : > { %v701_v45 = vpack.c.bf16 %v540_v43, %v540_v43  ;;  %v543_v46 = vadd.f32 %v542_v40, %v479_v44 }
 0x113   : > { %587 = vst.msk [vmem:[%s944_s8 + $0x10] sm:$0xf] %vm582_vm1, %v701_v45  ;;  %v702_v47 = vpack.c.bf16 %v543_v46, %v543_v46 }
 0x115   : > { %588 = vst.msk [vmem:[%s944_s8 + $0x14] sm:$0xf] %vm582_vm1, %v702_v47 }
 0x116 PF: > { %s13_s12 = sadd.s32 1, %s812_s12  }
 0x117   : > { %p10_p4 = scmp.ge.s32.totalorder %s13_s12, 4  }
 0x119   :  { %12 = sbr.rel (!%p10_p4) target bundleno = 1 (0x1), region = 62 }

// kernel: modeling_forward.29
= control target key start
LH: loop header
LB: loop body
LE: loop exit
PB: predicated region body
PF: predicated region fallthrough
CT: control target
= control target key end

     0   :  { %s1176_s12 = smov 0   ;;  %s1361_s0 = inlined_call_operand.vmem [shape: bf16[112,576], index: 0, kind: input, shape index: {}]   ;;  %s1362_s1 = inlined_call_operand.vmem [shape: bf16[576,64], index: 1, kind: input, shape index: {}]   ;;  %s1363_s2 = inlined_call_operand.vmem [shape: f32[1,64], index: 2, kind: input, shape index: {}]   ;;  %s1364_s3 = inlined_call_operand.vmem [shape: bf16[112,64], index: 3, kind: output, shape index: {}]  }
   0x1 LB: > { %s905_s13 = sadd.s32 4294967295, %s1153_s12   ;;  %p909_p0 = scmp.ge.s32.totalorder %s1153_s12, 1  ;;  %s1153_s12 = sphi %s1176_s12, %s13_s12  }
   0x2   : > { %p139_p1 = scmp.lt.s32.totalorder %s1153_s12, 3 }
   0x4   : > { %p140_p2 = pnand %p909_p0, %p139_p1 }
   0x5   : > { %v1111_v0 = vld [vmem:[%s1362_s1 + $0x40] sm:$0xff] (!%p140_p2)   ;;  %v1115_v4 = vld [vmem:[%s1362_s1 + $0x48] sm:$0xff] (!%p140_p2)   ;;  %v1119_v8 = vld [vmem:[%s1362_s1 + $0x50] sm:$0xff] (!%p140_p2)   ;;  %s164_s17 = smul.u32 (!%p140_p2), 7, %s905_s13  ;;  %v1155_v35 = vmov (!%p140_p2), 0   ;;  %vm607_vm0 = vcmask (!%p140_p2), 523264  }
   0x6   : > { %143 = sbr.rel (%p140_p2) target bundleno = 292 (0x124), region = 32  ;;  %v1112_v1 = vld [vmem:[%s1362_s1 + $0xc0] sm:$0xff] (!%p140_p2)   ;;  %989 = vmatprep.subr.bf16.mxu0 (!%p140_p2), %v1111_v0  ;;  %v1116_v5 = vld [vmem:[%s1362_s1 + $0xc8] sm:$0xff] (!%p140_p2)   ;;  %v1120_v9 = vld [vmem:[%s1362_s1 + $0xd0] sm:$0xff] (!%p140_p2)   ;;  %vm841_vm1 = vcmask (!%p140_p2), 519168  }
   0x7   : > { %v1113_v2 = vld [vmem:[%s1362_s1] sm:$0xff] (!%p140_p2)   ;;  %1029 = vmatprep.subr.bf16.mxu1 (!%p140_p2), %v1112_v1  ;;  %v1117_v6 = vld [vmem:[%s1362_s1 + $0x8] sm:$0xff] (!%p140_p2)   ;;  %v1121_v10 = vld [vmem:[%s1362_s1 + $0x10] sm:$0xff] (!%p140_p2)   ;;  %p165_p3 = scmp.lt.s32.totalorder (!%p140_p2), %s164_s17, 13 }
   0x8   : > { %v1114_v3 = vld [vmem:[%s1362_s1 + $0x80] sm:$0xff] (!%p140_p2)   ;;  %990 = vmatpush3.bf16.msra.mxu0 (!%p140_p2), %v1113_v2  ;;  %v1118_v7 = vld [vmem:[%s1362_s1 + $0x88] sm:$0xff] (!%p140_p2)   ;;  %v1122_v11 = vld [vmem:[%s1362_s1 + $0x90] sm:$0xff] (!%p140_p2)  }
   0x9   : > { %1030 = vmatpush3.bf16.msra.mxu1 (!%p140_p2), %v1114_v3  ;;  %991 = vmatprep.subr.bf16.mxu0 (!%p140_p2), %v1115_v4  ;;  %v1123_v12 = vld [vmem:[%s1362_s1 + $0x58] sm:$0xff] (!%p140_p2)   ;;  %v1127_v16 = vld [vmem:[%s1362_s1 + $0x60] sm:$0xff] (!%p140_p2)   ;;  %v1131_v20 = vld [vmem:[%s1362_s1 + $0x68] sm:$0xff] (!%p140_p2)  }
   0xa   : > { %1031 = vmatprep.subr.bf16.mxu1 (!%p140_p2), %v1116_v5  ;;  %v1124_v13 = vld [vmem:[%s1362_s1 + $0xd8] sm:$0xff] (!%p140_p2)   ;;  %v1128_v17 = vld [vmem:[%s1362_s1 + $0xe0] sm:$0xff] (!%p140_p2)   ;;  %v1132_v21 = vld [vmem:[%s1362_s1 + $0xe8] sm:$0xff] (!%p140_p2)  }
   0xb   : > { %v1125_v14 = vld [vmem:[%s1362_s1 + $0x18] sm:$0xff] (!%p140_p2)   ;;  %v1129_v18 = vld [vmem:[%s1362_s1 + $0x20] sm:$0xff] (!%p140_p2)   ;;  %v1133_v22 = vld [vmem:[%s1362_s1 + $0x28] sm:$0xff] (!%p140_p2)  }
   0xc   : > { %992 = vmatpush3.bf16.msra.mxu0 (!%p140_p2), %v1117_v6  ;;  %v1126_v15 = vld [vmem:[%s1362_s1 + $0x98] sm:$0xff] (!%p140_p2)   ;;  %v1130_v19 = vld [vmem:[%s1362_s1 + $0xa0] sm:$0xff] (!%p140_p2)   ;;  %v1134_v23 = vld [vmem:[%s1362_s1 + $0xa8] sm:$0xff] (!%p140_p2)  }
   0xd   : > { %1032 = vmatpush3.bf16.msra.mxu1 %v1118_v7  ;;  %993 = vmatprep.subr.bf16.mxu0 %v1119_v8  ;;  %s1366_s17 = smov (!%p165_p3, %s164_s17), 13  ;;  %v1135_v24 = vld [vmem:[%s1362_s1 + $0x70] sm:$0xff]   ;;  %v1139_v28 = vld [vmem:[%s1362_s1 + $0x78] sm:$0xff]   ;;  %v1143_v41 = vld [vmem:[%s1362_s1 + $0x100] sm:$0xff]  }
   0xe   : > { %1033 = vmatprep.subr.bf16.mxu1 %v1120_v9  ;;  %v1136_v25 = vld [vmem:[%s1362_s1 + $0xf0] sm:$0xff]   ;;  %s1101_s16 = smul.u32 20, %s1366_s17  ;;  %v1140_v29 = vld [vmem:[%s1362_s1 + $0xf8] sm:$0xff]   ;;  %v1144_v53 = vld [vmem:[%s1362_s1 + $0x108] sm:$0xff]   ;;  %s911_s18 = sshll.u32 %s1366_s17, 2 }
   0xf   : > { %v1137_v26 = vld [vmem:[%s1362_s1 + $0x30] sm:$0xff]   ;;  %v1141_v30 = vld [vmem:[%s1362_s1 + $0x38] sm:$0xff]   ;;  %s175_s21 = scalar_lea.vmem %s1364_s3, %s911_s18 }
  0x10   : > { %994 = vmatpush3.bf16.msra.mxu0 %v1121_v10  ;;  %v1138_v27 = vld [vmem:[%s1362_s1 + $0xb0] sm:$0xff]   ;;  %s1282_s27 = scalar_lea.vmem %s1361_s0, %s1101_s16  ;;  %v1142_v31 = vld [vmem:[%s1362_s1 + $0xb8] sm:$0xff]  }
  0x11   : > { %1034 = vmatpush3.bf16.msra.mxu1 %v1122_v11  ;;  %995 = vmatprep.subr.bf16.mxu0 %v1123_v12  ;;  %v178_v32 = vld [vmem:[%s1282_s27] sm:$0xff]  ;;  %v181_v33 = vld [vmem:[%s1282_s27 + $0x14] sm:$0xff]  ;;  %v179_v34 = vld [vmem:[%s1282_s27 + $0x8] sm:$0xff] }
  0x12   : > { %1035 = vmatprep.subr.bf16.mxu1 %v1124_v13  ;;  %v199_v36 = vmax.bf16 %v1155_v35, %v178_v32  ;;  %v202_v37 = vmax.bf16 %v1155_v35, %v181_v33  ;;  %v182_v38 = vld [vmem:[%s1282_s27 + $0x1c] sm:$0xff]  ;;  %v200_v39 = vmax.bf16 %v1155_v35, %v179_v34  ;;  %v184_v42 = vld [vmem:[%s1282_s27 + $0x28] sm:$0xff]  ;;  %v185_v48 = vld [vmem:[%s1282_s27 + $0x30] sm:$0xff] }
  0x13   : > { %v203_v40 = vmax.bf16 %v1155_v35, %v182_v38  ;;  %v187_v43 = vld [vmem:[%s1282_s27 + $0x3c] sm:$0xff]  ;;  %v205_v46 = vmax.bf16 %v1155_v35, %v184_v42  ;;  %v188_v49 = vld [vmem:[%s1282_s27 + $0x44] sm:$0xff]  ;;  %v206_v52 = vmax.bf16 %v1155_v35, %v185_v48  ;;  %v190_v54 = vld [vmem:[%s1282_s27 + $0x50] sm:$0xff] }
  0x14   : > { %996 = vmatpush3.bf16.msra.mxu0 %v1125_v14  ;;  %v914_v44 = vcombine.high %v199_v36, %v202_v37  ;;  %v913_v45 = vcombine.low %v199_v36, %v202_v37  ;;  %v208_v47 = vmax.bf16 %v1155_v35, %v187_v43  ;;  %v209_v56 = vmax.bf16 %v1155_v35, %v188_v49  ;;  %v193_v57 = vld [vmem:[%s1282_s27 + $0x64] sm:$0xff]  ;;  %v191_v58 = vld [vmem:[%s1282_s27 + $0x58] sm:$0xff]  ;;  %v194_v59 = vld [vmem:[%s1282_s27 + $0x6c] sm:$0xff] }
  0x15   : > { %1036 = vmatpush3.bf16.msra.mxu1 %v1126_v15  ;;  %997 = vmatprep.subr.bf16.mxu0 %v1127_v16  ;;  %v916_v50 = vcombine.high %v200_v39, %v203_v40  ;;  %v915_v51 = vcombine.low %v200_v39, %v203_v40  ;;  %v211_v61 = vmax.bf16 %v1155_v35, %v190_v54  ;;  %v1145_v1 = vld [vmem:[%s1362_s1 + $0x110] sm:$0xff]   ;;  %v196_v6 = vld [vmem:[%s1282_s27 + $0x78] sm:$0xff]  ;;  %v197_v7 = vld [vmem:[%s1282_s27 + $0x80] sm:$0xff] }
  0x16   : > { %1037 = vmatprep.subr.bf16.mxu1 %v1128_v17  ;;  %652 = vmatprep.mubr.bf16.mxu0 %v914_v44  ;;  %v919_v55 = vcombine.high %v205_v46, %v208_v47  ;;  %v921_v60 = vcombine.high %v206_v52, %v209_v56  ;;  %v214_v62 = vmax.bf16 %v1155_v35, %v193_v57  ;;  %v1146_v8 = vld [vmem:[%s1362_s1 + $0x118] sm:$0xff]   ;;  %v180_v15 = vld [vmem:[%s1282_s27 + $0x10] sm:$0xf]  ;;  %v183_v16 = vld [vmem:[%s1282_s27 + $0x24] sm:$0xf] }
  0x17   : > { %716 = vmatprep.mubr.bf16.mxu1 %v916_v50  ;;  %v212_v63 = vmax.bf16 %v1155_v35, %v191_v58  ;;  %v215_v0 = vmax.bf16 %v1155_v35, %v194_v59  ;;  %v918_v2 = vcombine.low %v205_v46, %v208_v47  ;;  %v920_v3 = vcombine.low %v206_v52, %v209_v56  ;;  %v192_v17 = vld [vmem:[%s1282_s27 + $0x60] sm:$0xf] }
  0x18   : > { %998 = vmatpush3.bf16.msra.mxu0 %v1129_v18  ;;  %v924_v4 = vcombine.high %v211_v61, %v214_v62  ;;  %v217_v9 = vmax.bf16 %v1155_v35, %v196_v6  ;;  %v218_v10 = vmax.bf16 %v1155_v35, %v197_v7  ;;  %v923_v11 = vcombine.low %v211_v61, %v214_v62  ;;  %v195_v18 = vld [vmem:[%s1282_s27 + $0x74] sm:$0xf]  ;;  %v912_v38 = vld [vmem:[%s1363_s2] ss:$0 sm:$0xff] }
  0x19   : > { %1038 = vmatpush3.bf16.msra.mxu1 %v1130_v19  ;;  %999 = vmatprep.subr.bf16.mxu0 %v1131_v20  ;;  %v926_v5 = vcombine.high %v212_v63, %v215_v0  ;;  %v925_v12 = vcombine.low %v212_v63, %v215_v0  ;;  %v201_v19 = vmax.bf16 %v1155_v35, %v180_v15 }
  0x1a   : > { %1039 = vmatprep.subr.bf16.mxu1 %v1132_v21  ;;  %v929_v13 = vcombine.high %v217_v9, %v217_v9  ;;  %v931_v14 = vcombine.high %v218_v10, %v218_v10  ;;  %v204_v20 = vmax.bf16 %v1155_v35, %v183_v16  ;;  %v213_v21 = vmax.bf16 %v1155_v35, %v192_v17 }
  0x1c   : > { %1000 = vmatpush3.bf16.msra.mxu0 %v1133_v22  ;;  %v216_v22 = vmax.bf16 %v1155_v35, %v195_v18 }
  0x1d   : > { %1040 = vmatpush3.bf16.msra.mxu1 %v1134_v23  ;;  %1001 = vmatprep.subr.bf16.mxu0 %v1135_v24  ;;  %v928_v23 = vcombine.low %v217_v9, %v217_v9  ;;  %v930_v24 = vcombine.low %v218_v10, %v218_v10 }
  0x1e   : > { %1041 = vmatprep.subr.bf16.mxu1 %v1136_v25  ;;  %v917_v25 = vcombine.low %v201_v19, %v204_v20 }
  0x20   : > { %1002 = vmatpush3.bf16.msra.mxu0 %v1137_v26  ;;  %v186_v26 = vld [vmem:[%s1282_s27 + $0x38] sm:$0xf] }
  0x21   : > { %1042 = vmatpush3.bf16.msra.mxu1 %v1138_v27  ;;  %1003 = vmatprep.subr.bf16.mxu0 %v1139_v28  ;;  %v189_v27 = vld [vmem:[%s1282_s27 + $0x4c] sm:$0xf]  ;;  %v927_v28 = vcombine.low %v213_v21, %v216_v22 }
  0x22   : > { %1043 = vmatprep.subr.bf16.mxu1 %v1140_v29  ;;  %v198_v29 = vld [vmem:[%s1282_s27 + $0x88] sm:$0xf] }
  0x23   : > { %v219_v32 = vmax.bf16 %v1155_v35, %v198_v29 }
  0x24   : > { %1004 = vmatpush3.bf16.msra.mxu0 %v1141_v30  ;;  %v207_v30 = vmax.bf16 %v1155_v35, %v186_v26 }
  0x25   : > { %1044 = vmatpush3.bf16.msra.mxu1 %v1142_v31  ;;  %1077 = vmatprep.subr.bf16.mxu0 %v1143_v41  ;;  %v210_v31 = vmax.bf16 %v1155_v35, %v189_v27  ;;  %v932_v34 = vcombine.low %v219_v32, %v219_v32 }
  0x26   : > { %1093 = vmatprep.subr.bf16.mxu1 %v1143_v41 }
  0x27   : > { %653 = vmatmul.mubr.bf16.vlgmr.msra.gmra.mrb[0].mxu0 %v913_v45  ;;  %v922_v33 = vcombine.low %v207_v30, %v210_v31 }
  0x28   : > { %717 = vmatmul.mubr.bf16.vlgmr.msra.gmra.mrb[0].mxu1 %v915_v51  ;;  %1078 = vmatpush3.bf16.msra.mxu0 %v1143_v41 }
  0x29   : > { %1097 = vmatpush3.bf16.msra.mxu1 %v1143_v41  ;;  %660 = vmatprep.mubr.bf16.mxu0 %v919_v55 }
  0x2a   : > { %724 = vmatprep.mubr.bf16.mxu1 %v921_v60  ;;  %1079 = vmatprep.subr.bf16.mxu0 %v1144_v53 }
  0x2b   : > { %1094 = vmatprep.subr.bf16.mxu1 %v1144_v53 }
  0x2c   : > { %1080 = vmatpush3.bf16.msra.mxu0 %v1144_v53 }
  0x2d   : > { %1098 = vmatpush3.bf16.msra.mxu1 %v1144_v53  ;;  %1081 = vmatprep.subr.bf16.mxu0 %v1145_v1 }
  0x2e   : > { %1095 = vmatprep.subr.bf16.mxu1 %v1145_v1 }
  0x2f   : > { %661 = vmatmul.mubr.bf16.gmra.mrb[4].mxu0 %v918_v2 }
  0x30   : > { %725 = vmatmul.mubr.bf16.gmra.mrb[4].mxu1 %v920_v3  ;;  %668 = vmatprep.mubr.bf16.mxu0 %v924_v4 }
  0x31   : > { %732 = vmatprep.mubr.bf16.mxu1 %v926_v5  ;;  %1082 = vmatpush3.bf16.msra.mxu0 %v1145_v1 }
  0x32   : > { %1099 = vmatpush3.bf16.msra.mxu1 %v1145_v1  ;;  %1083 = vmatprep.subr.bf16.mxu0 %v1146_v8 }
  0x33   : > { %1096 = vmatprep.subr.bf16.mxu1 %v1146_v8 }
  0x35   : > { %1084 = vmatpush3.bf16.msra.mxu0 %v1146_v8 }
  0x36   : > { %1100 = vmatpush3.bf16.msra.mxu1 %v1146_v8 }
  0x37   : > { %669 = vmatmul.mubr.bf16.gmra.mrb[8].mxu0 %v923_v11 }
  0x38   : > { %733 = vmatmul.mubr.bf16.gmra.mrb[8].mxu1 %v925_v12  ;;  %676 = vmatprep.mubr.bf16.mxu0 %v929_v13 }
  0x39   : > { %740 = vmatprep.mubr.bf16.mxu1 %v931_v14 }
  0x3f   : > { %677 = vmatmul.mubr.bf16.gmra.mrb[12].mxu0 %v928_v23 }
  0x40   : > { %741 = vmatmul.mubr.bf16.gmra.mrb[12].mxu1 %v930_v24  ;;  %1085 = vmatprep.mubr.msk.bf16.mxu0 %vm607_vm0, %v917_v25 }
  0x41   : > { %1089 = vmatprep.mubr.msk.bf16.mxu1 %vm607_vm0, %v927_v28 }
  0x47   : > { %1086 = vmatmul.mubr.msk.bf16.vlgmr.msra.gmra.mrb[16].mxu0 %vm607_vm0, %v922_v33 }
  0x48   : > { %1090 = vmatmul.mubr.msk.bf16.vlgmr.msra.gmra.mrb[16].mxu1 %vm607_vm0, %v932_v34 }
  0xfa   : > { %v1005_v36 = vpop.f32.mrb[0].mxu0 }
  0xfb   : > { %v1045_v37 = vpop.f32.mrb[0].mxu1  ;;  %v1006_v39 = vpop.f32.mrb[1].mxu0 }
  0xfc   : > { %v1007_v40 = vadd.f32 %v1006_v39, %v1005_v36  ;;  %v1046_v41 = vpop.f32.mrb[1].mxu1  ;;  %v1008_v42 = vpop.f32.mrb[2].mxu0 }
  0xfd   : > { %v1047_v43 = vadd.f32 %v1046_v41, %v1045_v37  ;;  %v1048_v44 = vpop.f32.mrb[2].mxu1  ;;  %v1009_v45 = vpop.f32.mrb[3].mxu0 }
  0xfe   : > { %v655_v46 = vadd.f32 %v1007_v40, %v912_v38  ;;  %v1010_v35 = vadd.f32 %v1009_v45, %v1008_v42  ;;  %v1049_v47 = vpop.f32.mrb[3].mxu1 }
  0xff   : > { %v1050_v48 = vadd.f32 %v1049_v47, %v1048_v44 }
 0x100   : > { %v658_v49 = vadd.f32 %v1010_v35, %v912_v38  ;;  %v719_v50 = vadd.f32 %v1047_v43, %v655_v46 }
 0x102   : > { %v1011_v51 = vpop.f32.mrb[4].mxu0  ;;  %v722_v52 = vadd.f32 %v1050_v48, %v658_v49 }
 0x103   : > { %v1051_v53 = vpop.f32.mrb[4].mxu1  ;;  %v1012_v54 = vpop.f32.mrb[5].mxu0 }
 0x104   : > { %v1013_v55 = vadd.f32 %v1012_v54, %v1011_v51  ;;  %v1052_v56 = vpop.f32.mrb[5].mxu1  ;;  %v1014_v57 = vpop.f32.mrb[6].mxu0 }
 0x105   : > { %v1053_v58 = vadd.f32 %v1052_v56, %v1051_v53  ;;  %v1054_v59 = vpop.f32.mrb[6].mxu1  ;;  %v1015_v60 = vpop.f32.mrb[7].mxu0 }
 0x106   : > { %v663_v61 = vadd.f32 %v1013_v55, %v912_v38  ;;  %v1016_v62 = vadd.f32 %v1015_v60, %v1014_v57  ;;  %v1055_v63 = vpop.f32.mrb[7].mxu1 }
 0x107   : > { %v1056_v0 = vadd.f32 %v1055_v63, %v1054_v59 }
 0x108   : > { %v666_v1 = vadd.f32 %v1016_v62, %v912_v38  ;;  %v727_v2 = vadd.f32 %v1053_v58, %v663_v61 }
 0x10a   : > { %v1017_v3 = vpop.f32.mrb[8].mxu0  ;;  %v730_v4 = vadd.f32 %v1056_v0, %v666_v1 }
 0x10b   : > { %v1057_v5 = vpop.f32.mrb[8].mxu1  ;;  %v1018_v6 = vpop.f32.mrb[9].mxu0 }
 0x10c   : > { %v1019_v7 = vadd.f32 %v1018_v6, %v1017_v3  ;;  %v1058_v8 = vpop.f32.mrb[9].mxu1  ;;  %v1020_v9 = vpop.f32.mrb[10].mxu0 }
 0x10d   : > { %v1059_v10 = vadd.f32 %v1058_v8, %v1057_v5  ;;  %v1060_v11 = vpop.f32.mrb[10].mxu1  ;;  %v1021_v12 = vpop.f32.mrb[11].mxu0 }
 0x10e   : > { %v671_v13 = vadd.f32 %v1019_v7, %v912_v38  ;;  %v1022_v14 = vadd.f32 %v1021_v12, %v1020_v9  ;;  %v1061_v15 = vpop.f32.mrb[11].mxu1 }
 0x10f   : > { %v1062_v16 = vadd.f32 %v1061_v15, %v1060_v11 }
 0x110   : > { %v674_v17 = vadd.f32 %v1022_v14, %v912_v38  ;;  %v735_v18 = vadd.f32 %v1059_v10, %v671_v13 }
 0x112   : > { %v1023_v19 = vpop.f32.mrb[12].mxu0  ;;  %v738_v20 = vadd.f32 %v1062_v16, %v674_v17 }
 0x113   : > { %v1063_v21 = vpop.f32.mrb[12].mxu1  ;;  %v1024_v22 = vpop.f32.mrb[13].mxu0 }
 0x114   : > { %v1025_v23 = vadd.f32 %v1024_v22, %v1023_v19  ;;  %v1064_v24 = vpop.f32.mrb[13].mxu1  ;;  %v1026_v25 = vpop.f32.mrb[14].mxu0 }
 0x115   : > { %v1065_v26 = vadd.f32 %v1064_v24, %v1063_v21  ;;  %v1066_v27 = vpop.f32.mrb[14].mxu1  ;;  %v1027_v28 = vpop.f32.mrb[15].mxu0 }
 0x116   : > { %v679_v29 = vadd.f32 %v1025_v23, %v912_v38  ;;  %v1067_v30 = vpop.f32.mrb[15].mxu1 }
 0x118   : > { %v743_v31 = vadd.f32 %v1065_v26, %v679_v29 }
 0x11a   : > { %v1087_v32 = vpop.f32.mrb[16].mxu0 }
 0x11b   : > { %v791_v33 = vadd.f32 %v1087_v32, %v727_v2  ;;  %v1091_v34 = vpop.f32.mrb[16].mxu1  ;;  %v782_v36 = vpop.f32.mrb[17].mxu0 }
 0x11c   : > { %v807_v37 = vadd.f32 %v1091_v34, %v743_v31  ;;  %v783_v39 = vadd.f32 %v782_v36, %v719_v50  ;;  %v798_v40 = vpop.f32.mrb[17].mxu1  ;;  %v1088_v41 = vpop.f32.mrb[18].mxu0 }
 0x11d   : > { %v984_v42 = vpack.c.bf16 %v791_v33, %v791_v33  ;;  %v799_v43 = vadd.f32 %v798_v40, %v735_v18  ;;  %v794_v44 = vadd.f32 %v1088_v41, %v730_v4  ;;  %v1092_v38 = vpop.f32.mrb[18].mxu1  ;;  %v785_v45 = vpop.f32.mrb[19].mxu0 }
 0x11e   : > { %v988_v46 = vpack.c.bf16 %v807_v37, %v807_v37  ;;  %v982_v35 = vpack.c.bf16 %v783_v39, %v783_v39  ;;  %v786_v47 = vadd.f32 %v785_v45, %v722_v52  ;;  %v801_v48 = vpop.f32.mrb[19].mxu1 }
 0x11f   : > { %844 = vst.msk [vmem:[%s175_s21 + $0x8] sm:$0xf] %vm841_vm1, %v984_v42  ;;  %v986_v49 = vpack.c.bf16 %v799_v43, %v799_v43  ;;  %v985_v51 = vpack.c.bf16 %v794_v44, %v794_v44  ;;  %v802_v53 = vadd.f32 %v801_v48, %v738_v20 }
 0x120   : > { %848 = vst.msk [vmem:[%s175_s21 + $0x18] sm:$0xf] %vm841_vm1, %v988_v46  ;;  %842 = vst.msk [vmem:[%s175_s21] sm:$0xf] %vm841_vm1, %v982_v35  ;;  %v983_v50 = vpack.c.bf16 %v786_v47, %v786_v47 }
 0x121   : > { %846 = vst.msk [vmem:[%s175_s21 + $0x10] sm:$0xf] %vm841_vm1, %v986_v49  ;;  %845 = vst.msk [vmem:[%s175_s21 + $0xc] sm:$0xf] %vm841_vm1, %v985_v51  ;;  %v987_v54 = vpack.c.bf16 %v802_v53, %v802_v53 }
 0x122   : > { %843 = vst.msk [vmem:[%s175_s21 + $0x4] sm:$0xf] %vm841_vm1, %v983_v50 }
 0x123   : > { %847 = vst.msk [vmem:[%s175_s21 + $0x14] sm:$0xf] %vm841_vm1, %v987_v54 }
 0x124 PF: > { %s13_s12 = sadd.s32 1, %s1153_s12  }
 0x125   : > { %p10_p4 = scmp.ge.s32.totalorder %s13_s12, 4  }
 0x127   :  { %12 = sbr.rel (!%p10_p4) target bundleno = 1 (0x1), region = 62 }

// kernel: modeling_forward.30
= control target key start
LH: loop header
LB: loop body
LE: loop exit
PB: predicated region body
PF: predicated region fallthrough
CT: control target
= control target key end

     0   :  { %s703_s15 = smov 0   ;;  %s705_s16 = smov 0   ;;  %s814_s0 = inlined_call_operand.vmem [shape: bf16[9,32,64], index: 0, kind: input, shape index: {}]   ;;  %s815_s1 = inlined_call_operand.vmem [shape: bf16[32,32], index: 1, kind: input, shape index: {}]   ;;  %s816_s2 = inlined_call_operand.vmem [shape: bf16[32,64], index: 2, kind: input, shape index: {}]   ;;  %s817_s3 = inlined_call_operand.vmem [shape: f32[1,64], index: 3, kind: input, shape index: {}]   ;;  %s818_s4 = inlined_call_operand.vmem [shape: bf16[32,64], index: 4, kind: output, shape index: {}]  }
   0x1   :  { %s707_s17 = smov 0  }
   0x2 LB: > { %s587_s18 = sadd.s32 4294967295, %s674_s17   ;;  %s720_s19 = sadd.s32 1, %s674_s17   ;;  %s674_s17 = sphi %s707_s17, %s821_s17   ;;  %s670_s16 = sphi %s705_s16, %s820_s16   ;;  %s666_s15 = sphi %s703_s15, %s819_s15  }
   0x3   : > { %s18_s20 = ssub.s32 %s674_s17, %s720_s19  ;;  %s21_s21 = sadd.s32 1, %s670_s16 }
   0x4   : > { %p19_p0 = scmp.eq.s32.totalorder %s18_s20, 0  ;;  %p28_p1 = scmp.ne.s32.totalorder %s670_s16, %s666_s15 }
   0x5   : > { %p29_p2 = scmp.eq.s32.totalorder %s674_s17, 0  ;;  %p590_p4 = scmp.ge.s32.totalorder %s674_s17, 2 }
   0x6   : > { %s729_s22 = scalar_select %p19_p0, %s670_s16, %s21_s21  }
   0x7   : > { %p30_p3 = por %p29_p2, %p28_p1  ;;  %154 = sbr.rel (%p590_p4) target bundleno = 23 (0x17), region = 24 }
   0xe   : > { %157 = sbr.rel (!%p30_p3) target bundleno = 23 (0x17), region = 28  ;;  %s159_s23 = sand.u32 (%p30_p3), 1, %s670_s16  }
   0xf   : > { %s607_s24 = sshll.u32 (%p30_p3), %s674_s17, 3  ;;  %s621_s25 = smul.u32 (%p30_p3), 72, %s159_s23 }
  0x10   : > { %s164_s28 = scalar_lea.vmem (%p30_p3), %s814_s0, %s607_s24 }
  0x11   : > { %v180_v0 = vld [vmem:[%s164_s28] sm:$0xff] (%p30_p3)   ;;  %v184_v1 = vld [vmem:[%s164_s28 + $0x10] sm:$0xff] (%p30_p3)   ;;  %s161_s29 = scalar_lea.vmem (%p30_p3), [#allocation2], %s621_s25 }
  0x12   : > { %v188_v2 = vld [vmem:[%s164_s28 + $0x20] sm:$0xff] (%p30_p3)   ;;  %v192_v3 = vld [vmem:[%s164_s28 + $0x30] sm:$0xff] (%p30_p3)   ;;  %181 = vst [vmem:[%s161_s29] sm:$0xff] (%p30_p3), %v180_v0   ;;  %185 = vst [vmem:[%s161_s29 + $0x8] sm:$0xff] (%p30_p3), %v184_v1  }
  0x13   : > { %v196_v4 = vld [vmem:[%s164_s28 + $0x40] sm:$0xff] (%p30_p3)   ;;  %v200_v5 = vld [vmem:[%s164_s28 + $0x50] sm:$0xff] (%p30_p3)   ;;  %189 = vst [vmem:[%s161_s29 + $0x10] sm:$0xff] (%p30_p3), %v188_v2   ;;  %193 = vst [vmem:[%s161_s29 + $0x18] sm:$0xff] (%p30_p3), %v192_v3  }
  0x14   : > { %197 = vst [vmem:[%s161_s29 + $0x20] sm:$0xff] (%p30_p3), %v196_v4   ;;  %201 = vst [vmem:[%s161_s29 + $0x28] sm:$0xff] (%p30_p3), %v200_v5   ;;  %v204_v6 = vld [vmem:[%s164_s28 + $0x60] sm:$0xff] (%p30_p3)   ;;  %v208_v7 = vld [vmem:[%s164_s28 + $0x70] sm:$0xff] (%p30_p3)  }
  0x15   : > { %v212_v8 = vld [vmem:[%s164_s28 + $0x80] sm:$0xff]   ;;  %205 = vst [vmem:[%s161_s29 + $0x30] sm:$0xff] %v204_v6   ;;  %209 = vst [vmem:[%s161_s29 + $0x38] sm:$0xff] %v208_v7  }
  0x16   : > { %213 = vst [vmem:[%s161_s29 + $0x40] sm:$0xff] %v212_v8  }
  0x17 PF: > { %p593_p5 = scmp.ge.s32.totalorder %s674_s17, 1  ;;  %p282_p6 = scmp.lt.s32.totalorder %s674_s17, 3 }
  0x19   : > { %p283_p7 = pnand %p593_p5, %p282_p6 }
  0x1a   : > { %v649_v9 = vld [vmem:[%s816_s2] sm:$0xff] (!%p283_p7)   ;;  %v676_v10 = vmov (!%p283_p7), 0.0   ;;  %v650_v11 = vld [vmem:[%s816_s2 + $0x8] sm:$0xff] (!%p283_p7)   ;;  %vm677_vm0 = vmmov (!%p283_p7), 0   ;;  %s594_s8 = sshll.u32 (!%p283_p7), %s587_s18, 1  ;;  %vm456_vm1 = vcmask (!%p283_p7), 261120  }
  0x1b   : > { %286 = sbr.rel (%p283_p7) target bundleno = 259 (0x103), region = 73  ;;  %613 = vmatprep.subr.bf16.mxu0 (!%p283_p7), %v676_v10  ;;  %617 = vmatprep.mubr.msk.bf16.mxu0 (!%p283_p7), %vm677_vm0, %v676_v10  ;;  %p321_p8 = scmp.lt.s32.totalorder (!%p283_p7), %s594_s8, 3  ;;  %vm352_vm2 = vcmask (!%p283_p7), 519168   ;;  %v598_v1 = vld [vmem:[%s817_s3] ss:$0 sm:$0xff] (!%p283_p7) }
  0x1c   : > { %614 = vmatpush3.bf16.msra.mxu0 (!%p283_p7), %v649_v9  ;;  %s289_s13 = sand.u32 (!%p283_p7), 1, %s666_s15  }
  0x1d   : > { %615 = vmatprep.subr.bf16.mxu0 (!%p283_p7), %v676_v10  ;;  %s622_s14 = smul.u32 (!%p283_p7), 72, %s289_s13 }
  0x1f   : > { %s756_s17 = scalar_lea.vmem (!%p283_p7), [#allocation2], %s622_s14 }
  0x20   : > { %616 = vmatpush3.bf16.msra.mxu0 (!%p283_p7), %v650_v11  ;;  %v334_v13 = vld [vmem:[%s756_s17] sm:$0xf] (!%p283_p7)  ;;  %v338_v14 = vld [vmem:[%s756_s17 + $0x10] sm:$0xf] (!%p283_p7)  ;;  %v335_v15 = vld [vmem:[%s756_s17 + $0x4] sm:$0xf] (!%p283_p7) }
  0x21   : > { %v339_v16 = vld [vmem:[%s756_s17 + $0x14] sm:$0xf] (!%p283_p7)  ;;  %v355_v17 = vsel (!%p283_p7), %vm352_vm2, %v334_v13, 4286644096  ;;  %v361_v18 = vsel (!%p283_p7), %vm352_vm2, %v338_v14, 4286644096 }
  0x22   : > { %s823_s8 = smov (!%p321_p8, %s594_s8), 3  ;;  %v336_v19 = vld [vmem:[%s756_s17 + $0x8] sm:$0xf]  ;;  %v340_v20 = vld [vmem:[%s756_s17 + $0x18] sm:$0xf]  ;;  %v363_v24 = vmax.bf16 %v361_v18, %v355_v17 }
  0x23   : > { %s595_s9 = sshll.u32 %s823_s8, 2  ;;  %v342_v21 = vld [vmem:[%s756_s17 + $0x20] sm:$0xf]  ;;  %v390_v22 = vsel %vm352_vm2, %v335_v15, 4286644096 }
  0x24   : > { %s324_s12 = scalar_lea.vmem %s815_s1, %s595_s9  ;;  %v396_v23 = vsel %vm352_vm2, %v339_v16, 4286644096  ;;  %v337_v25 = vld [vmem:[%s756_s17 + $0xc] sm:$0xf]  ;;  %v341_v26 = vld [vmem:[%s756_s17 + $0x1c] sm:$0xf]  ;;  %s330_s23 = scalar_lea.vmem %s818_s4, %s595_s9 }
  0x25   : > { %v651_v12 = vld [vmem:[%s324_s12] sm:$0xff]   ;;  %v358_v28 = vsel %vm352_vm2, %v336_v19, 4286644096  ;;  %v365_v29 = vsel %vm352_vm2, %v340_v20, 4286644096  ;;  %v398_v33 = vmax.bf16 %v396_v23, %v390_v22 }
  0x26   : > { %618 = vmatmul.mubr.msk.bf16.vlgmr.msra.gmra.mrb[0].mxu0 %vm456_vm1, %v651_v12  ;;  %v343_v27 = vld [vmem:[%s756_s17 + $0x24] sm:$0xf]  ;;  %v369_v30 = vsel %vm352_vm2, %v342_v21, 4286644096  ;;  %v344_v31 = vld [vmem:[%s756_s17 + $0x28] sm:$0xf]  ;;  %v367_v37 = vmax.bf16 %v365_v29, %v358_v28 }
  0x27   : > { %v346_v32 = vld [vmem:[%s756_s17 + $0x30] sm:$0xf]  ;;  %v393_v34 = vsel %vm352_vm2, %v337_v25, 4286644096  ;;  %v400_v35 = vsel %vm352_vm2, %v341_v26, 4286644096  ;;  %v371_v38 = vmax.bf16 %v369_v30, %v363_v24 }
  0x28   : > { %v404_v36 = vsel %vm352_vm2, %v343_v27, 4286644096  ;;  %v345_v39 = vld [vmem:[%s756_s17 + $0x2c] sm:$0xf]  ;;  %v347_v40 = vld [vmem:[%s756_s17 + $0x34] sm:$0xf]  ;;  %v402_v45 = vmax.bf16 %v400_v35, %v393_v34 }
  0x29   : > { %v373_v41 = vsel %vm352_vm2, %v344_v31, 4286644096  ;;  %v377_v42 = vsel %vm352_vm2, %v346_v32, 4286644096  ;;  %v348_v43 = vld [vmem:[%s756_s17 + $0x38] sm:$0xf]  ;;  %v406_v46 = vmax.bf16 %v404_v36, %v398_v33 }
  0x2a   : > { %v350_v44 = vld [vmem:[%s756_s17 + $0x40] sm:$0xf]  ;;  %v408_v47 = vsel %vm352_vm2, %v345_v39, 4286644096  ;;  %v412_v48 = vsel %vm352_vm2, %v347_v40, 4286644096  ;;  %v375_v49 = vmax.bf16 %v373_v41, %v367_v37  ;;  %v379_v50 = vmax.bf16 %v377_v42, %v371_v38 }
  0x2b   : > { %v349_v51 = vld [vmem:[%s756_s17 + $0x3c] sm:$0xf]  ;;  %v351_v52 = vld [vmem:[%s756_s17 + $0x44] sm:$0xf]  ;;  %v381_v53 = vsel %vm352_vm2, %v348_v43, 4286644096  ;;  %v410_v55 = vmax.bf16 %v408_v47, %v402_v45  ;;  %v414_v56 = vmax.bf16 %v412_v48, %v406_v46 }
  0x2c   : > { %v385_v54 = vsel %vm352_vm2, %v350_v44, 4286644096  ;;  %v416_v57 = vsel %vm352_vm2, %v349_v51, 4286644096  ;;  %v420_v58 = vsel %vm352_vm2, %v351_v52, 4286644096  ;;  %v383_v59 = vmax.bf16 %v381_v53, %v375_v49 }
  0x2d   : > { %v387_v60 = vmax.bf16 %v385_v54, %v379_v50  ;;  %v418_v61 = vmax.bf16 %v416_v57, %v410_v55  ;;  %v422_v62 = vmax.bf16 %v420_v58, %v414_v56 }
  0x2f   : > { %v388_v63 = vmax.bf16 %v387_v60, %v383_v59  ;;  %v423_v0 = vmax.bf16 %v422_v62, %v418_v61 }
  0x31   : > { %v424_v2 = vunpack.c.l.bf16 %v388_v63  ;;  %v425_v6 = vunpack.c.l.bf16 %v423_v0 }
  0xf9   : > { %v494_v3 = vpop.f32.mrb[0].mxu0 }
  0xfa   : > { %v495_v4 = vadd.f32 %v598_v1, %v494_v3  ;;  %v619_v5 = vpop.f32.mrb[1].mxu0 }
  0xfb   : > { %v497_v7 = vpop.f32.mrb[2].mxu0 }
  0xfc   : > { %v501_v8 = vadd.f32 %v495_v4, %v424_v2  ;;  %v498_v9 = vadd.f32 %v598_v1, %v497_v7  ;;  %v620_v10 = vpop.f32.mrb[3].mxu0 }
  0xfe   : > { %v608_v11 = vpack.c.bf16 %v501_v8, %v501_v8  ;;  %v502_v12 = vadd.f32 %v498_v9, %v425_v6 }
 0x100   : > { %511 = vst.msk [vmem:[%s330_s23] sm:$0xf] %vm352_vm2, %v608_v11  ;;  %v609_v13 = vpack.c.bf16 %v502_v12, %v502_v12 }
 0x102   : > { %512 = vst.msk [vmem:[%s330_s23 + $0x4] sm:$0xf] %vm352_vm2, %v609_v13 }
 0x103 PF: > { %p11_p9 = scmp.ge.s32.totalorder %s720_s19, 4   ;;  %s819_s15 = smov %s670_s16 }
 0x104   : > { %s820_s16 = smov %s729_s22  ;;  %s821_s17 = smov %s720_s19 }
 0x105   :  { %13 = sbr.rel (!%p11_p9) target bundleno = 2 (0x2), region = 115 }

// kernel: modeling_forward.31
= control target key start
LH: loop header
LB: loop body
LE: loop exit
PB: predicated region body
PF: predicated region fallthrough
CT: control target
= control target key end

     0   :  { %s906_s12 = smov 0   ;;  %s1048_s0 = inlined_call_operand.vmem [shape: bf16[32,576], index: 0, kind: input, shape index: {}]   ;;  %s1049_s1 = inlined_call_operand.vmem [shape: bf16[576,128], index: 1, kind: input, shape index: {}]   ;;  %s1050_s2 = inlined_call_operand.vmem [shape: f32[1,128], index: 2, kind: input, shape index: {}]   ;;  %s1051_s3 = inlined_call_operand.vmem [shape: bf16[32,128], index: 3, kind: output, shape index: {}]  }
   0x1 LB: > { %s703_s13 = sadd.s32 4294967295, %s881_s12   ;;  %p707_p0 = scmp.ge.s32.totalorder %s881_s12, 1  ;;  %s881_s12 = sphi %s906_s12, %s13_s12  }
   0x2   : > { %p139_p1 = scmp.lt.s32.totalorder %s881_s12, 3 }
   0x4   : > { %p140_p2 = pnand %p707_p0, %p139_p1 }
   0x5   : > { %v839_v0 = vld [vmem:[%s1049_s1 + $0x40] sm:$0xff] (!%p140_p2)   ;;  %v843_v4 = vld [vmem:[%s1049_s1 + $0x48] sm:$0xff] (!%p140_p2)   ;;  %v847_v8 = vld [vmem:[%s1049_s1 + $0x50] sm:$0xff] (!%p140_p2)   ;;  %s708_s17 = sshll.u32 (!%p140_p2), %s703_s13, 1  ;;  %v883_v33 = vmov (!%p140_p2), 0   ;;  %v884_v37 = vmov (!%p140_p2), 0.0  }
   0x6   : > { %143 = sbr.rel (%p140_p2) target bundleno = 273 (0x111), region = 32  ;;  %v840_v1 = vld [vmem:[%s1049_s1] sm:$0xff] (!%p140_p2)   ;;  %766 = vmatprep.subr.bf16.mxu0 (!%p140_p2), %v839_v0  ;;  %v844_v5 = vld [vmem:[%s1049_s1 + $0x8] sm:$0xff] (!%p140_p2)   ;;  %v848_v9 = vld [vmem:[%s1049_s1 + $0x10] sm:$0xff] (!%p140_p2)   ;;  %p165_p3 = scmp.lt.s32.totalorder (!%p140_p2), %s708_s17, 3  ;;  %vm885_vm0 = vmmov (!%p140_p2), 0  }
   0x7   : > { %v841_v2 = vld [vmem:[%s1049_s1 + $0xc0] sm:$0xff] (!%p140_p2)   ;;  %767 = vmatpush3.bf16.msra.mxu0 (!%p140_p2), %v840_v1  ;;  %v845_v6 = vld [vmem:[%s1049_s1 + $0xc8] sm:$0xff] (!%p140_p2)   ;;  %v849_v10 = vld [vmem:[%s1049_s1 + $0xd0] sm:$0xff] (!%p140_p2)   ;;  %vm510_vm1 = vcmask (!%p140_p2), 523264  }
   0x8   : > { %v842_v3 = vld [vmem:[%s1049_s1 + $0x80] sm:$0xff] (!%p140_p2)   ;;  %788 = vmatprep.subr.bf16.mxu1 (!%p140_p2), %v841_v2  ;;  %768 = vmatprep.subr.bf16.mxu0 (!%p140_p2), %v843_v4  ;;  %v846_v7 = vld [vmem:[%s1049_s1 + $0x88] sm:$0xff] (!%p140_p2)   ;;  %v850_v11 = vld [vmem:[%s1049_s1 + $0x90] sm:$0xff] (!%p140_p2)  }
   0x9   : > { %789 = vmatpush3.bf16.msra.mxu1 (!%p140_p2), %v842_v3  ;;  %v851_v12 = vld [vmem:[%s1049_s1 + $0x58] sm:$0xff] (!%p140_p2)   ;;  %v855_v16 = vld [vmem:[%s1049_s1 + $0x60] sm:$0xff] (!%p140_p2)   ;;  %v859_v20 = vld [vmem:[%s1049_s1 + $0x68] sm:$0xff] (!%p140_p2)  }
   0xa   : > { %790 = vmatprep.subr.bf16.mxu1 (!%p140_p2), %v845_v6  ;;  %v852_v13 = vld [vmem:[%s1049_s1 + $0x18] sm:$0xff] (!%p140_p2)   ;;  %v856_v17 = vld [vmem:[%s1049_s1 + $0x20] sm:$0xff] (!%p140_p2)   ;;  %v860_v21 = vld [vmem:[%s1049_s1 + $0x28] sm:$0xff] (!%p140_p2)  }
   0xb   : > { %769 = vmatpush3.bf16.msra.mxu0 (!%p140_p2), %v844_v5  ;;  %v853_v14 = vld [vmem:[%s1049_s1 + $0xd8] sm:$0xff] (!%p140_p2)   ;;  %v857_v18 = vld [vmem:[%s1049_s1 + $0xe0] sm:$0xff] (!%p140_p2)   ;;  %v861_v22 = vld [vmem:[%s1049_s1 + $0xe8] sm:$0xff] (!%p140_p2)  }
   0xc   : > { %770 = vmatprep.subr.bf16.mxu0 (!%p140_p2), %v847_v8  ;;  %v854_v15 = vld [vmem:[%s1049_s1 + $0x98] sm:$0xff] (!%p140_p2)   ;;  %v858_v19 = vld [vmem:[%s1049_s1 + $0xa0] sm:$0xff] (!%p140_p2)   ;;  %v862_v23 = vld [vmem:[%s1049_s1 + $0xa8] sm:$0xff] (!%p140_p2)  }
   0xd   : > { %791 = vmatpush3.bf16.msra.mxu1 %v846_v7  ;;  %s1053_s17 = smov (!%p165_p3, %s708_s17), 3  ;;  %v863_v24 = vld [vmem:[%s1049_s1 + $0x70] sm:$0xff]   ;;  %v867_v28 = vld [vmem:[%s1049_s1 + $0x78] sm:$0xff]   ;;  %v871_v44 = vld [vmem:[%s1049_s1 + $0x100] sm:$0xff]  }
   0xe   : > { %792 = vmatprep.subr.bf16.mxu1 %v849_v10  ;;  %s827_s14 = smul.u32 20, %s1053_s17  ;;  %v864_v25 = vld [vmem:[%s1049_s1 + $0x30] sm:$0xff]   ;;  %v868_v29 = vld [vmem:[%s1049_s1 + $0x38] sm:$0xff]   ;;  %v872_v47 = vld [vmem:[%s1049_s1 + $0x108] sm:$0xff]   ;;  %s711_s18 = sshll.u32 %s1053_s17, 2 }
   0xf   : > { %771 = vmatpush3.bf16.msra.mxu0 %v848_v9  ;;  %v865_v26 = vld [vmem:[%s1049_s1 + $0xf0] sm:$0xff]   ;;  %v869_v30 = vld [vmem:[%s1049_s1 + $0xf8] sm:$0xff]   ;;  %v712_v56 = vld [vmem:[%s1050_s2] ss:$0 sm:$0xff]  ;;  %s175_s21 = scalar_lea.vmem %s1051_s3, %s711_s18 }
  0x10   : > { %772 = vmatprep.subr.bf16.mxu0 %v851_v12  ;;  %v866_v27 = vld [vmem:[%s1049_s1 + $0xb0] sm:$0xff]   ;;  %s1009_s13 = scalar_lea.vmem %s1048_s0, %s827_s14  ;;  %v870_v36 = vld [vmem:[%s1049_s1 + $0xb8] sm:$0xff]  }
  0x11   : > { %793 = vmatpush3.bf16.msra.mxu1 %v850_v11  ;;  %v178_v31 = vld [vmem:[%s1009_s13] sm:$0xff]  ;;  %v181_v32 = vld [vmem:[%s1009_s13 + $0x14] sm:$0xff]  ;;  %v179_v38 = vld [vmem:[%s1009_s13 + $0x8] sm:$0xff] }
  0x12   : > { %794 = vmatprep.subr.bf16.mxu1 %v853_v14  ;;  %v184_v34 = vmax.bf16 %v883_v33, %v178_v31  ;;  %v187_v35 = vmax.bf16 %v883_v33, %v181_v32  ;;  %v182_v39 = vld [vmem:[%s1009_s13 + $0x1c] sm:$0xff]  ;;  %v185_v40 = vmax.bf16 %v883_v33, %v179_v38  ;;  %v873_v48 = vld [vmem:[%s1049_s1 + $0x110] sm:$0xff]   ;;  %v183_v50 = vld [vmem:[%s1009_s13 + $0x24] sm:$0xf] }
  0x13   : > { %773 = vmatpush3.bf16.msra.mxu0 %v852_v13  ;;  %v188_v43 = vmax.bf16 %v883_v33, %v182_v39  ;;  %v180_v49 = vld [vmem:[%s1009_s13 + $0x10] sm:$0xf]  ;;  %v189_v52 = vmax.bf16 %v883_v33, %v183_v50  ;;  %v874_v53 = vld [vmem:[%s1049_s1 + $0x118] sm:$0xff]  }
  0x14   : > { %774 = vmatprep.subr.bf16.mxu0 %v855_v16  ;;  %v714_v41 = vcombine.high %v184_v34, %v187_v35  ;;  %v713_v42 = vcombine.low %v184_v34, %v187_v35  ;;  %v186_v51 = vmax.bf16 %v883_v33, %v180_v49 }
  0x15   : > { %795 = vmatpush3.bf16.msra.mxu1 %v854_v15  ;;  %v716_v45 = vcombine.high %v185_v40, %v188_v43  ;;  %v715_v46 = vcombine.low %v185_v40, %v188_v43 }
  0x16   : > { %796 = vmatprep.subr.bf16.mxu1 %v857_v18  ;;  %546 = vmatprep.mubr.bf16.mxu0 %v714_v41  ;;  %v717_v54 = vcombine.low %v186_v51, %v189_v52 }
  0x17   : > { %775 = vmatpush3.bf16.msra.mxu0 %v856_v17  ;;  %587 = vmatprep.mubr.bf16.mxu1 %v716_v45 }
  0x18   : > { %776 = vmatprep.subr.bf16.mxu0 %v859_v20 }
  0x19   : > { %797 = vmatpush3.bf16.msra.mxu1 %v858_v19 }
  0x1a   : > { %798 = vmatprep.subr.bf16.mxu1 %v861_v22 }
  0x1b   : > { %777 = vmatpush3.bf16.msra.mxu0 %v860_v21 }
  0x1c   : > { %778 = vmatprep.subr.bf16.mxu0 %v863_v24 }
  0x1d   : > { %799 = vmatpush3.bf16.msra.mxu1 %v862_v23 }
  0x1e   : > { %800 = vmatprep.subr.bf16.mxu1 %v865_v26 }
  0x1f   : > { %779 = vmatpush3.bf16.msra.mxu0 %v864_v25 }
  0x20   : > { %780 = vmatprep.subr.bf16.mxu0 %v867_v28 }
  0x21   : > { %801 = vmatpush3.bf16.msra.mxu1 %v866_v27 }
  0x22   : > { %802 = vmatprep.subr.bf16.mxu1 %v869_v30 }
  0x23   : > { %781 = vmatpush3.bf16.msra.mxu0 %v868_v29 }
  0x24   : > { %815 = vmatprep.subr.bf16.mxu0 %v884_v37 }
  0x25   : > { %803 = vmatpush3.bf16.msra.mxu1 %v870_v36 }
  0x26   : > { %547 = vmatmul.mubr.bf16.vlgmr.msra.gmra.mrb[0].mxu0 %v713_v42 }
  0x27   : > { %816 = vmatpush3.bf16.msra.mxu0 %v871_v44  ;;  %823 = vmatprep.mubr.msk.bf16.mxu0 %vm885_vm0, %v884_v37 }
  0x28   : > { %588 = vmatmul.mubr.bf16.vlgmr.msra.gmra.mrb[0].mxu1 %v715_v46  ;;  %817 = vmatprep.subr.bf16.mxu0 %v884_v37 }
  0x2b   : > { %818 = vmatpush3.bf16.msra.mxu0 %v872_v47 }
  0x2c   : > { %819 = vmatprep.subr.bf16.mxu0 %v884_v37 }
  0x2f   : > { %820 = vmatpush3.bf16.msra.mxu0 %v873_v48 }
  0x30   : > { %821 = vmatprep.subr.bf16.mxu0 %v884_v37 }
  0x33   : > { %822 = vmatpush3.bf16.msra.mxu0 %v874_v53 }
  0x36   : > { %824 = vmatmul.mubr.msk.bf16.vlgmr.msra.gmra.mrb[4].mxu0 %vm510_vm1, %v717_v54 }
  0xf9   : > { %v782_v55 = vpop.f32.mrb[0].mxu0 }
  0xfa   : > { %v783_v57 = vpop.f32.mrb[1].mxu0 }
  0xfb   : > { %v784_v58 = vadd.f32 %v783_v57, %v782_v55  ;;  %v785_v59 = vpop.f32.mrb[2].mxu0  ;;  %v804_v60 = vpop.f32.mrb[0].mxu1 }
  0xfc   : > { %v786_v61 = vpop.f32.mrb[3].mxu0  ;;  %v805_v62 = vpop.f32.mrb[1].mxu1 }
  0xfd   : > { %v549_v63 = vadd.f32 %v784_v58, %v712_v56  ;;  %v787_v0 = vadd.f32 %v786_v61, %v785_v59  ;;  %v806_v1 = vadd.f32 %v805_v62, %v804_v60  ;;  %v807_v2 = vpop.f32.mrb[2].mxu1 }
  0xfe   : > { %v808_v3 = vpop.f32.mrb[3].mxu1 }
  0xff   : > { %v552_v4 = vadd.f32 %v787_v0, %v712_v56  ;;  %v809_v5 = vadd.f32 %v808_v3, %v807_v2  ;;  %v590_v6 = vadd.f32 %v806_v1, %v549_v63 }
 0x101   : > { %v593_v7 = vadd.f32 %v809_v5, %v552_v4 }
 0x109   : > { %v630_v8 = vpop.f32.mrb[4].mxu0 }
 0x10a   : > { %v631_v9 = vadd.f32 %v630_v8, %v590_v6  ;;  %v825_v10 = vpop.f32.mrb[5].mxu0 }
 0x10b   : > { %v633_v11 = vpop.f32.mrb[6].mxu0 }
 0x10c   : > { %v634_v12 = vadd.f32 %v633_v11, %v593_v7  ;;  %v826_v13 = vpop.f32.mrb[7].mxu0 }
 0x10e   : > { %v764_v14 = vpack.c.bf16 %v634_v12, %v631_v9 }
 0x110   : > { %765 = vst [vmem:[%s175_s21] sm:$0xff] %v764_v14  }
 0x111 PF: > { %s13_s12 = sadd.s32 1, %s881_s12  }
 0x112   : > { %p10_p4 = scmp.ge.s32.totalorder %s13_s12, 4  }
 0x114   :  { %12 = sbr.rel (!%p10_p4) target bundleno = 1 (0x1), region = 62 }

// kernel: modeling_forward.32
= control target key start
LH: loop header
LB: loop body
LE: loop exit
PB: predicated region body
PF: predicated region fallthrough
CT: control target
= control target key end

     0   :  { %s1432_s12 = smov 0   ;;  %s1696_s0 = inlined_call_operand.vmem [shape: bf16[32,1152], index: 0, kind: input, shape index: {}]   ;;  %s1697_s1 = inlined_call_operand.vmem [shape: bf16[1152,128], index: 1, kind: input, shape index: {}]   ;;  %s1698_s2 = inlined_call_operand.vmem [shape: f32[1,128], index: 2, kind: input, shape index: {}]   ;;  %s1699_s3 = inlined_call_operand.vmem [shape: bf16[32,128], index: 3, kind: output, shape index: {}]  }
   0x1 LB: > { %s1098_s13 = sadd.s32 4294967295, %s1407_s12   ;;  %p1102_p0 = scmp.ge.s32.totalorder %s1407_s12, 1  ;;  %s1407_s12 = sphi %s1432_s12, %s13_s12  }
   0x2   : > { %p139_p1 = scmp.lt.s32.totalorder %s1407_s12, 3 }
   0x4   : > { %p140_p2 = pnand %p1102_p0, %p139_p1 }
   0x5   : > { %v1329_v0 = vld [vmem:[%s1697_s1 + $0x40] sm:$0xff] (!%p140_p2)   ;;  %v1333_v4 = vld [vmem:[%s1697_s1 + $0x48] sm:$0xff] (!%p140_p2)   ;;  %v1337_v8 = vld [vmem:[%s1697_s1 + $0x50] sm:$0xff] (!%p140_p2)   ;;  %s1103_s17 = sshll.u32 (!%p140_p2), %s1098_s13, 1  ;;  %v1409_v33 = vmov (!%p140_p2), 0   ;;  %vm1411_vm0 = vmmov (!%p140_p2), 0  }
   0x6   : > { %143 = sbr.rel (%p140_p2) target bundleno = 321 (0x141), region = 32  ;;  %v1330_v1 = vld [vmem:[%s1697_s1] sm:$0xff] (!%p140_p2)   ;;  %1200 = vmatprep.subr.bf16.mxu0 (!%p140_p2), %v1329_v0  ;;  %v1334_v5 = vld [vmem:[%s1697_s1 + $0x8] sm:$0xff] (!%p140_p2)   ;;  %v1338_v9 = vld [vmem:[%s1697_s1 + $0x10] sm:$0xff] (!%p140_p2)   ;;  %p165_p3 = scmp.lt.s32.totalorder (!%p140_p2), %s1103_s17, 3 }
   0x7   : > { %v1331_v2 = vld [vmem:[%s1697_s1 + $0xc0] sm:$0xff] (!%p140_p2)   ;;  %1201 = vmatpush3.bf16.msra.mxu0 (!%p140_p2), %v1330_v1  ;;  %v1335_v6 = vld [vmem:[%s1697_s1 + $0xc8] sm:$0xff] (!%p140_p2)   ;;  %v1339_v10 = vld [vmem:[%s1697_s1 + $0xd0] sm:$0xff] (!%p140_p2)  }
   0x8   : > { %v1332_v3 = vld [vmem:[%s1697_s1 + $0x80] sm:$0xff] (!%p140_p2)   ;;  %1222 = vmatprep.subr.bf16.mxu1 (!%p140_p2), %v1331_v2  ;;  %1202 = vmatprep.subr.bf16.mxu0 (!%p140_p2), %v1333_v4  ;;  %v1336_v7 = vld [vmem:[%s1697_s1 + $0x88] sm:$0xff] (!%p140_p2)   ;;  %v1340_v11 = vld [vmem:[%s1697_s1 + $0x90] sm:$0xff] (!%p140_p2)  }
   0x9   : > { %1223 = vmatpush3.bf16.msra.mxu1 (!%p140_p2), %v1332_v3  ;;  %v1341_v12 = vld [vmem:[%s1697_s1 + $0x58] sm:$0xff] (!%p140_p2)   ;;  %v1345_v16 = vld [vmem:[%s1697_s1 + $0x60] sm:$0xff] (!%p140_p2)   ;;  %v1349_v20 = vld [vmem:[%s1697_s1 + $0x68] sm:$0xff] (!%p140_p2)  }
   0xa   : > { %1224 = vmatprep.subr.bf16.mxu1 (!%p140_p2), %v1335_v6  ;;  %v1342_v13 = vld [vmem:[%s1697_s1 + $0x18] sm:$0xff] (!%p140_p2)   ;;  %v1346_v17 = vld [vmem:[%s1697_s1 + $0x20] sm:$0xff] (!%p140_p2)   ;;  %v1350_v21 = vld [vmem:[%s1697_s1 + $0x28] sm:$0xff] (!%p140_p2)  }
   0xb   : > { %1203 = vmatpush3.bf16.msra.mxu0 (!%p140_p2), %v1334_v5  ;;  %v1343_v14 = vld [vmem:[%s1697_s1 + $0xd8] sm:$0xff] (!%p140_p2)   ;;  %v1347_v18 = vld [vmem:[%s1697_s1 + $0xe0] sm:$0xff] (!%p140_p2)   ;;  %v1351_v22 = vld [vmem:[%s1697_s1 + $0xe8] sm:$0xff] (!%p140_p2)  }
   0xc   : > { %1204 = vmatprep.subr.bf16.mxu0 (!%p140_p2), %v1337_v8  ;;  %v1344_v15 = vld [vmem:[%s1697_s1 + $0x98] sm:$0xff] (!%p140_p2)   ;;  %v1348_v19 = vld [vmem:[%s1697_s1 + $0xa0] sm:$0xff] (!%p140_p2)   ;;  %v1352_v23 = vld [vmem:[%s1697_s1 + $0xa8] sm:$0xff] (!%p140_p2)  }
   0xd   : > { %1225 = vmatpush3.bf16.msra.mxu1 %v1336_v7  ;;  %s1701_s17 = smov (!%p165_p3, %s1103_s17), 3  ;;  %v1353_v24 = vld [vmem:[%s1697_s1 + $0x70] sm:$0xff]   ;;  %v1357_v28 = vld [vmem:[%s1697_s1 + $0x78] sm:$0xff]   ;;  %v1361_v37 = vld [vmem:[%s1697_s1 + $0x140] sm:$0xff]  }
   0xe   : > { %1226 = vmatprep.subr.bf16.mxu1 %v1339_v10  ;;  %s1317_s14 = smul.u32 36, %s1701_s17  ;;  %v1354_v25 = vld [vmem:[%s1697_s1 + $0x30] sm:$0xff]   ;;  %v1358_v29 = vld [vmem:[%s1697_s1 + $0x38] sm:$0xff]   ;;  %v1362_v44 = vld [vmem:[%s1697_s1 + $0x100] sm:$0xff]   ;;  %s1106_s16 = sshll.u32 %s1701_s17, 2 }
   0xf   : > { %1205 = vmatpush3.bf16.msra.mxu0 %v1338_v9  ;;  %v1355_v26 = vld [vmem:[%s1697_s1 + $0xf0] sm:$0xff]   ;;  %v1359_v30 = vld [vmem:[%s1697_s1 + $0xf8] sm:$0xff]   ;;  %v1363_v45 = vld [vmem:[%s1697_s1 + $0x1c0] sm:$0xff]   ;;  %s175_s20 = scalar_lea.vmem %s1699_s3, %s1106_s16 }
  0x10   : > { %1206 = vmatprep.subr.bf16.mxu0 %v1341_v12  ;;  %v1356_v27 = vld [vmem:[%s1697_s1 + $0xb0] sm:$0xff]   ;;  %s1535_s13 = scalar_lea.vmem %s1696_s0, %s1317_s14  ;;  %v1360_v36 = vld [vmem:[%s1697_s1 + $0xb8] sm:$0xff]   ;;  %v1364_v48 = vld [vmem:[%s1697_s1 + $0x180] sm:$0xff]  }
  0x11   : > { %1227 = vmatpush3.bf16.msra.mxu1 %v1340_v11  ;;  %v178_v31 = vld [vmem:[%s1535_s13] sm:$0xff]  ;;  %v179_v38 = vld [vmem:[%s1535_s13 + $0x8] sm:$0xff]  ;;  %v1369_v53 = vld [vmem:[%s1697_s1 + $0x150] sm:$0xff]  }
  0x12   : > { %1228 = vmatprep.subr.bf16.mxu1 %v1343_v14  ;;  %v183_v32 = vld [vmem:[%s1535_s13 + $0x24] sm:$0xff]  ;;  %v188_v34 = vmax.bf16 %v1409_v33, %v178_v31  ;;  %v184_v41 = vld [vmem:[%s1535_s13 + $0x2c] sm:$0xff]  ;;  %v189_v42 = vmax.bf16 %v1409_v33, %v179_v38  ;;  %v1373_v57 = vld [vmem:[%s1697_s1 + $0x158] sm:$0xff]  }
  0x13   : > { %1207 = vmatpush3.bf16.msra.mxu0 %v1342_v13  ;;  %v193_v35 = vmax.bf16 %v1409_v33, %v183_v32  ;;  %v194_v43 = vmax.bf16 %v1409_v33, %v184_v41  ;;  %v1365_v49 = vld [vmem:[%s1697_s1 + $0x148] sm:$0xff]   ;;  %v1370_v54 = vld [vmem:[%s1697_s1 + $0x110] sm:$0xff]   ;;  %v1374_v58 = vld [vmem:[%s1697_s1 + $0x118] sm:$0xff]  }
  0x14   : > { %1208 = vmatprep.subr.bf16.mxu0 %v1345_v16  ;;  %v1366_v50 = vld [vmem:[%s1697_s1 + $0x108] sm:$0xff]   ;;  %v1371_v55 = vld [vmem:[%s1697_s1 + $0x1d0] sm:$0xff]   ;;  %v1375_v59 = vld [vmem:[%s1697_s1 + $0x1d8] sm:$0xff]  }
  0x15   : > { %1229 = vmatpush3.bf16.msra.mxu1 %v1344_v15  ;;  %v1109_v39 = vcombine.high %v188_v34, %v193_v35  ;;  %v1108_v40 = vcombine.low %v188_v34, %v193_v35  ;;  %v1111_v46 = vcombine.high %v189_v42, %v194_v43  ;;  %v1110_v47 = vcombine.low %v189_v42, %v194_v43  ;;  %v1367_v51 = vld [vmem:[%s1697_s1 + $0x1c8] sm:$0xff]   ;;  %v1372_v56 = vld [vmem:[%s1697_s1 + $0x190] sm:$0xff]   ;;  %v1376_v60 = vld [vmem:[%s1697_s1 + $0x198] sm:$0xff]  }
  0x16   : > { %1230 = vmatprep.subr.bf16.mxu1 %v1347_v18  ;;  %v1368_v52 = vld [vmem:[%s1697_s1 + $0x188] sm:$0xff]   ;;  %v1377_v61 = vld [vmem:[%s1697_s1 + $0x160] sm:$0xff]   ;;  %v1385_v5 = vld [vmem:[%s1697_s1 + $0x170] sm:$0xff]  }
  0x17   : > { %1209 = vmatpush3.bf16.msra.mxu0 %v1346_v17  ;;  %859 = vmatprep.mubr.bf16.mxu0 %v1109_v39  ;;  %v1378_v62 = vld [vmem:[%s1697_s1 + $0x120] sm:$0xff]   ;;  %v1381_v1 = vld [vmem:[%s1697_s1 + $0x168] sm:$0xff]   ;;  %v1386_v6 = vld [vmem:[%s1697_s1 + $0x130] sm:$0xff]  }
  0x18   : > { %1210 = vmatprep.subr.bf16.mxu0 %v1349_v20  ;;  %900 = vmatprep.mubr.bf16.mxu1 %v1111_v46  ;;  %v1379_v63 = vld [vmem:[%s1697_s1 + $0x1e0] sm:$0xff]   ;;  %v1382_v2 = vld [vmem:[%s1697_s1 + $0x128] sm:$0xff]   ;;  %v1387_v7 = vld [vmem:[%s1697_s1 + $0x1f0] sm:$0xff]  }
  0x19   : > { %1231 = vmatpush3.bf16.msra.mxu1 %v1348_v19  ;;  %v1380_v0 = vld [vmem:[%s1697_s1 + $0x1a0] sm:$0xff]   ;;  %v1383_v3 = vld [vmem:[%s1697_s1 + $0x1e8] sm:$0xff]   ;;  %v1388_v8 = vld [vmem:[%s1697_s1 + $0x1b0] sm:$0xff]  }
  0x1a   : > { %1232 = vmatprep.subr.bf16.mxu1 %v1351_v22  ;;  %v1384_v4 = vld [vmem:[%s1697_s1 + $0x1a8] sm:$0xff]   ;;  %v1389_v9 = vld [vmem:[%s1697_s1 + $0x178] sm:$0xff]   ;;  %v180_v12 = vld [vmem:[%s1535_s13 + $0x10] sm:$0xff] }
  0x1b   : > { %1211 = vmatpush3.bf16.msra.mxu0 %v1350_v21  ;;  %v1390_v10 = vld [vmem:[%s1697_s1 + $0x138] sm:$0xff]   ;;  %v190_v14 = vmax.bf16 %v1409_v33, %v180_v12  ;;  %v1410_v21 = vmov 0.0  }
  0x1c   : > { %1212 = vmatprep.subr.bf16.mxu0 %v1353_v24  ;;  %v1391_v11 = vld [vmem:[%s1697_s1 + $0x1f8] sm:$0xff]   ;;  %v1393_v24 = vld [vmem:[%s1697_s1 + $0x200] sm:$0xff]  }
  0x1d   : > { %1233 = vmatpush3.bf16.msra.mxu1 %v1352_v23  ;;  %v185_v13 = vld [vmem:[%s1535_s13 + $0x34] sm:$0xff]  ;;  %v186_v18 = vld [vmem:[%s1535_s13 + $0x3c] sm:$0xff] }
  0x1e   : > { %1234 = vmatprep.subr.bf16.mxu1 %v1355_v26  ;;  %v195_v15 = vmax.bf16 %v1409_v33, %v185_v13  ;;  %v1392_v16 = vld [vmem:[%s1697_s1 + $0x1b8] sm:$0xff]   ;;  %v196_v23 = vmax.bf16 %v1409_v33, %v186_v18 }
  0x1f   : > { %1213 = vmatpush3.bf16.msra.mxu0 %v1354_v25  ;;  %v181_v17 = vld [vmem:[%s1535_s13 + $0x18] sm:$0xff] }
  0x20   : > { %1214 = vmatprep.subr.bf16.mxu0 %v1357_v28  ;;  %v1113_v19 = vcombine.high %v190_v14, %v195_v15  ;;  %v1112_v20 = vcombine.low %v190_v14, %v195_v15  ;;  %v191_v22 = vmax.bf16 %v1409_v33, %v181_v17  ;;  %v182_v28 = vld [vmem:[%s1535_s13 + $0x20] sm:$0xf]  ;;  %v1396_v35 = vld [vmem:[%s1697_s1 + $0x218] sm:$0xff]  }
  0x21   : > { %1235 = vmatpush3.bf16.msra.mxu1 %v1356_v27  ;;  %v1394_v27 = vld [vmem:[%s1697_s1 + $0x208] sm:$0xff]   ;;  %v192_v31 = vmax.bf16 %v1409_v33, %v182_v28  ;;  %v1400_v38 = vld [vmem:[%s1697_s1 + $0x238] sm:$0xff]  }
  0x22   : > { %1236 = vmatprep.subr.bf16.mxu1 %v1359_v30  ;;  %v1115_v25 = vcombine.high %v191_v22, %v196_v23  ;;  %v1114_v26 = vcombine.low %v191_v22, %v196_v23  ;;  %v187_v30 = vld [vmem:[%s1535_s13 + $0x44] sm:$0xf] }
  0x23   : > { %1215 = vmatpush3.bf16.msra.mxu0 %v1358_v29  ;;  %v1395_v29 = vld [vmem:[%s1697_s1 + $0x210] sm:$0xff]   ;;  %v197_v32 = vmax.bf16 %v1409_v33, %v187_v30 }
  0x24   : > { %1244 = vmatprep.subr.bf16.mxu0 %v1361_v37  ;;  %v1398_v37 = vld [vmem:[%s1697_s1 + $0x228] sm:$0xff]   ;;  %v1399_v33 = vld [vmem:[%s1697_s1 + $0x230] sm:$0xff]  }
  0x25   : > { %1237 = vmatpush3.bf16.msra.mxu1 %v1360_v36  ;;  %v1116_v34 = vcombine.low %v192_v31, %v197_v32  ;;  %v1397_v36 = vld [vmem:[%s1697_s1 + $0x220] sm:$0xff]  }
  0x26   : > { %860 = vmatmul.mubr.bf16.vlgmr.msra.gmra.mrb[0].mxu0 %v1108_v40  ;;  %1266 = vmatprep.subr.bf16.mxu1 %v1363_v45  ;;  %v1107_v40 = vld [vmem:[%s1698_s2] ss:$0 sm:$0xff] }
  0x27   : > { %1245 = vmatpush3.bf16.msra.mxu0 %v1362_v44  ;;  %941 = vmatprep.mubr.bf16.mxu0 %v1113_v19 }
  0x28   : > { %901 = vmatmul.mubr.bf16.vlgmr.msra.gmra.mrb[0].mxu1 %v1110_v47  ;;  %1246 = vmatprep.subr.bf16.mxu0 %v1365_v49 }
  0x29   : > { %1267 = vmatpush3.bf16.msra.mxu1 %v1364_v48  ;;  %982 = vmatprep.mubr.bf16.mxu1 %v1115_v25 }
  0x2a   : > { %1268 = vmatprep.subr.bf16.mxu1 %v1367_v51 }
  0x2b   : > { %1247 = vmatpush3.bf16.msra.mxu0 %v1366_v50 }
  0x2c   : > { %1248 = vmatprep.subr.bf16.mxu0 %v1369_v53 }
  0x2d   : > { %1269 = vmatpush3.bf16.msra.mxu1 %v1368_v52 }
  0x2e   : > { %1270 = vmatprep.subr.bf16.mxu1 %v1371_v55 }
  0x2f   : > { %1249 = vmatpush3.bf16.msra.mxu0 %v1370_v54 }
  0x30   : > { %1250 = vmatprep.subr.bf16.mxu0 %v1373_v57 }
  0x31   : > { %1271 = vmatpush3.bf16.msra.mxu1 %v1372_v56 }
  0x32   : > { %1272 = vmatprep.subr.bf16.mxu1 %v1375_v59 }
  0x33   : > { %1251 = vmatpush3.bf16.msra.mxu0 %v1374_v58 }
  0x34   : > { %1252 = vmatprep.subr.bf16.mxu0 %v1377_v61 }
  0x35   : > { %1273 = vmatpush3.bf16.msra.mxu1 %v1376_v60 }
  0x36   : > { %1274 = vmatprep.subr.bf16.mxu1 %v1379_v63 }
  0x37   : > { %1253 = vmatpush3.bf16.msra.mxu0 %v1378_v62 }
  0x38   : > { %1254 = vmatprep.subr.bf16.mxu0 %v1381_v1 }
  0x39   : > { %1275 = vmatpush3.bf16.msra.mxu1 %v1380_v0 }
  0x3a   : > { %1276 = vmatprep.subr.bf16.mxu1 %v1383_v3 }
  0x3b   : > { %1255 = vmatpush3.bf16.msra.mxu0 %v1382_v2 }
  0x3c   : > { %1256 = vmatprep.subr.bf16.mxu0 %v1385_v5 }
  0x3d   : > { %1277 = vmatpush3.bf16.msra.mxu1 %v1384_v4 }
  0x3e   : > { %1278 = vmatprep.subr.bf16.mxu1 %v1387_v7 }
  0x3f   : > { %1257 = vmatpush3.bf16.msra.mxu0 %v1386_v6 }
  0x40   : > { %1258 = vmatprep.subr.bf16.mxu0 %v1389_v9 }
  0x41   : > { %1279 = vmatpush3.bf16.msra.mxu1 %v1388_v8 }
  0x42   : > { %1280 = vmatprep.subr.bf16.mxu1 %v1391_v11 }
  0x43   : > { %1259 = vmatpush3.bf16.msra.mxu0 %v1390_v10 }
  0x44   : > { %1297 = vmatprep.subr.bf16.mxu0 %v1410_v21 }
  0x45   : > { %1281 = vmatpush3.bf16.msra.mxu1 %v1392_v16 }
  0x46   : > { %942 = vmatmul.mubr.bf16.vlgmr.msra.gmra.mrb[4].mxu0 %v1112_v20 }
  0x47   : > { %1298 = vmatpush3.bf16.msra.mxu0 %v1393_v24  ;;  %1313 = vmatprep.mubr.msk.bf16.mxu0 %vm1411_vm0, %v1410_v21 }
  0x48   : > { %983 = vmatmul.mubr.bf16.vlgmr.msra.gmra.mrb[4].mxu1 %v1114_v26  ;;  %1299 = vmatprep.subr.bf16.mxu0 %v1410_v21 }
  0x4b   : > { %1300 = vmatpush3.bf16.msra.mxu0 %v1394_v27 }
  0x4c   : > { %1301 = vmatprep.subr.bf16.mxu0 %v1410_v21 }
  0x4f   : > { %1302 = vmatpush3.bf16.msra.mxu0 %v1395_v29 }
  0x50   : > { %1303 = vmatprep.subr.bf16.mxu0 %v1410_v21 }
  0x53   : > { %1304 = vmatpush3.bf16.msra.mxu0 %v1396_v35 }
  0x54   : > { %1305 = vmatprep.subr.bf16.mxu0 %v1410_v21 }
  0x57   : > { %1306 = vmatpush3.bf16.msra.mxu0 %v1397_v36 }
  0x58   : > { %1307 = vmatprep.subr.bf16.mxu0 %v1410_v21 }
  0x5b   : > { %1308 = vmatpush3.bf16.msra.mxu0 %v1398_v37 }
  0x5c   : > { %1309 = vmatprep.subr.bf16.mxu0 %v1410_v21 }
  0x5f   : > { %1310 = vmatpush3.bf16.msra.mxu0 %v1399_v33 }
  0x60   : > { %1311 = vmatprep.subr.bf16.mxu0 %v1410_v21 }
  0x63   : > { %1312 = vmatpush3.bf16.msra.mxu0 %v1400_v38 }
  0x66   : > { %1314 = vmatmul.mubr.bf16.vlgmr.msra.gmra.mrb[8].mxu0 %v1116_v34 }
  0xf9   : > { %v1216_v39 = vpop.f32.mrb[0].mxu0 }
  0xfa   : > { %v1217_v41 = vpop.f32.mrb[1].mxu0 }
  0xfb   : > { %v1218_v42 = vadd.f32 %v1217_v41, %v1216_v39  ;;  %v1219_v43 = vpop.f32.mrb[2].mxu0  ;;  %v1238_v44 = vpop.f32.mrb[0].mxu1 }
  0xfc   : > { %v1220_v45 = vpop.f32.mrb[3].mxu0  ;;  %v1239_v48 = vpop.f32.mrb[1].mxu1 }
  0xfd   : > { %v862_v46 = vadd.f32 %v1218_v42, %v1107_v40  ;;  %v1221_v47 = vadd.f32 %v1220_v45, %v1219_v43  ;;  %v1240_v49 = vadd.f32 %v1239_v48, %v1238_v44  ;;  %v1241_v50 = vpop.f32.mrb[2].mxu1 }
  0xfe   : > { %v1242_v52 = vpop.f32.mrb[3].mxu1 }
  0xff   : > { %v865_v51 = vadd.f32 %v1221_v47, %v1107_v40  ;;  %v903_v53 = vadd.f32 %v1240_v49, %v862_v46  ;;  %v1243_v54 = vadd.f32 %v1242_v52, %v1241_v50 }
 0x101   : > { %v906_v55 = vadd.f32 %v1243_v54, %v865_v51 }
 0x119   : > { %v1260_v56 = vpop.f32.mrb[4].mxu0 }
 0x11a   : > { %v1261_v57 = vpop.f32.mrb[5].mxu0 }
 0x11b   : > { %v1262_v58 = vadd.f32 %v1261_v57, %v1260_v56  ;;  %v1263_v59 = vpop.f32.mrb[6].mxu0  ;;  %v1282_v60 = vpop.f32.mrb[4].mxu1 }
 0x11c   : > { %v1264_v61 = vpop.f32.mrb[7].mxu0  ;;  %v1283_v62 = vpop.f32.mrb[5].mxu1 }
 0x11d   : > { %v944_v63 = vadd.f32 %v1262_v58, %v903_v53  ;;  %v1265_v0 = vadd.f32 %v1264_v61, %v1263_v59  ;;  %v1284_v1 = vadd.f32 %v1283_v62, %v1282_v60  ;;  %v1285_v2 = vpop.f32.mrb[6].mxu1 }
 0x11e   : > { %v1286_v3 = vpop.f32.mrb[7].mxu1 }
 0x11f   : > { %v947_v4 = vadd.f32 %v1265_v0, %v906_v55  ;;  %v1287_v5 = vadd.f32 %v1286_v3, %v1285_v2  ;;  %v985_v6 = vadd.f32 %v1284_v1, %v944_v63 }
 0x121   : > { %v988_v7 = vadd.f32 %v1287_v5, %v947_v4 }
 0x139   : > { %v1025_v8 = vpop.f32.mrb[8].mxu0 }
 0x13a   : > { %v1026_v9 = vadd.f32 %v1025_v8, %v985_v6  ;;  %v1315_v10 = vpop.f32.mrb[9].mxu0 }
 0x13b   : > { %v1028_v11 = vpop.f32.mrb[10].mxu0 }
 0x13c   : > { %v1029_v12 = vadd.f32 %v1028_v11, %v988_v7  ;;  %v1316_v13 = vpop.f32.mrb[11].mxu0 }
 0x13e   : > { %v1198_v14 = vpack.c.bf16 %v1029_v12, %v1026_v9 }
 0x140   : > { %1199 = vst [vmem:[%s175_s20] sm:$0xff] %v1198_v14  }
 0x141 PF: > { %s13_s12 = sadd.s32 1, %s1407_s12  }
 0x142   : > { %p10_p4 = scmp.ge.s32.totalorder %s13_s12, 4  }
 0x144   :  { %12 = sbr.rel (!%p10_p4) target bundleno = 1 (0x1), region = 62 }

// kernel: modeling_forward.33
= control target key start
LH: loop header
LB: loop body
LE: loop exit
PB: predicated region body
PF: predicated region fallthrough
CT: control target
= control target key end

     0   :  { %s609_s15 = smov 0   ;;  %s611_s16 = smov 0   ;;  %s697_s0 = inlined_call_operand.vmem [shape: bf16[9,16,128], index: 0, kind: input, shape index: {}]   ;;  %s698_s1 = inlined_call_operand.vmem [shape: bf16[16,64], index: 1, kind: input, shape index: {}]   ;;  %s699_s2 = inlined_call_operand.vmem [shape: bf16[64,128], index: 2, kind: input, shape index: {}]   ;;  %s700_s3 = inlined_call_operand.vmem [shape: f32[1,128], index: 3, kind: input, shape index: {}]   ;;  %s701_s4 = inlined_call_operand.vmem [shape: bf16[16,128], index: 4, kind: output, shape index: {}]  }
   0x1   :  { %s613_s17 = smov 0  }
   0x2 LB: > { %s493_s18 = sadd.s32 4294967295, %s580_s17   ;;  %s626_s19 = sadd.s32 1, %s580_s17   ;;  %s580_s17 = sphi %s613_s17, %s704_s17   ;;  %s576_s16 = sphi %s611_s16, %s703_s16   ;;  %s572_s15 = sphi %s609_s15, %s702_s15  }
   0x3   : > { %s18_s20 = ssub.s32 %s580_s17, %s626_s19  ;;  %s21_s21 = sadd.s32 1, %s576_s16 }
   0x4   : > { %p19_p0 = scmp.eq.s32.totalorder %s18_s20, 0  ;;  %p28_p1 = scmp.ne.s32.totalorder %s576_s16, %s572_s15 }
   0x5   : > { %p29_p2 = scmp.eq.s32.totalorder %s580_s17, 0  ;;  %p496_p4 = scmp.ge.s32.totalorder %s580_s17, 2 }
   0x6   : > { %s635_s22 = scalar_select %p19_p0, %s576_s16, %s21_s21  }
   0x7   : > { %p30_p3 = por %p29_p2, %p28_p1  ;;  %154 = sbr.rel (%p496_p4) target bundleno = 24 (0x18), region = 24 }
   0xe   : > { %157 = sbr.rel (!%p30_p3) target bundleno = 24 (0x18), region = 28  ;;  %s159_s23 = sand.u32 (%p30_p3), 1, %s576_s16  }
   0xf   : > { %s497_s24 = sshll.u32 (%p30_p3), %s580_s17, 2  ;;  %s526_s25 = smul.u32 (%p30_p3), 36, %s159_s23 }
  0x10   : > { %s163_s28 = scalar_lea.vmem (%p30_p3), %s697_s0, %s497_s24 }
  0x11   : > { %v179_v0 = vld [vmem:[%s163_s28] sm:$0xf] (%p30_p3)  ;;  %v181_v1 = vld [vmem:[%s163_s28 + $0x8] sm:$0xf] (%p30_p3)  ;;  %v183_v2 = vld [vmem:[%s163_s28 + $0x10] sm:$0xf] (%p30_p3) }
  0x12   : > { %v185_v3 = vld [vmem:[%s163_s28 + $0x18] sm:$0xf] (%p30_p3)  ;;  %v187_v4 = vld [vmem:[%s163_s28 + $0x20] sm:$0xf] (%p30_p3)  ;;  %s161_s29 = scalar_lea.vmem (%p30_p3), [#allocation2], %s526_s25 }
  0x13   : > { %180 = vst [vmem:[%s161_s29] sm:$0xf] (%p30_p3), %v179_v0  ;;  %182 = vst [vmem:[%s161_s29 + $0x4] sm:$0xf] (%p30_p3), %v181_v1  ;;  %v189_v5 = vld [vmem:[%s163_s28 + $0x28] sm:$0xf] (%p30_p3) }
  0x14   : > { %184 = vst [vmem:[%s161_s29 + $0x8] sm:$0xf] (%p30_p3), %v183_v2  ;;  %186 = vst [vmem:[%s161_s29 + $0xc] sm:$0xf] (%p30_p3), %v185_v3  ;;  %v191_v6 = vld [vmem:[%s163_s28 + $0x30] sm:$0xf] (%p30_p3) }
  0x15   : > { %188 = vst [vmem:[%s161_s29 + $0x10] sm:$0xf] %v187_v4  ;;  %v193_v7 = vld [vmem:[%s163_s28 + $0x38] sm:$0xf]  ;;  %190 = vst [vmem:[%s161_s29 + $0x14] sm:$0xf] %v189_v5 }
  0x16   : > { %192 = vst [vmem:[%s161_s29 + $0x18] sm:$0xf] %v191_v6  ;;  %194 = vst [vmem:[%s161_s29 + $0x1c] sm:$0xf] %v193_v7  ;;  %v195_v8 = vld [vmem:[%s163_s28 + $0x40] sm:$0xf] }
  0x17   : > { %196 = vst [vmem:[%s161_s29 + $0x20] sm:$0xf] %v195_v8 }
  0x18 PF: > { %p498_p5 = scmp.ge.s32.totalorder %s580_s17, 1  ;;  %p243_p6 = scmp.lt.s32.totalorder %s580_s17, 3 }
  0x1a   : > { %p244_p7 = pnand %p498_p5, %p243_p6 }
  0x1b   : > { %v554_v9 = vld [vmem:[%s699_s2] sm:$0xff] (!%p244_p7)   ;;  %v582_v10 = vmov (!%p244_p7), 0.0   ;;  %v555_v11 = vld [vmem:[%s699_s2 + $0x8] sm:$0xff] (!%p244_p7)   ;;  %vm583_vm0 = vmmov (!%p244_p7), 0   ;;  %p278_p8 = scmp.lt.s32.totalorder (!%p244_p7), %s493_s18, 1  ;;  %v556_v12 = vld [vmem:[%s699_s2 + $0x10] sm:$0xff] (!%p244_p7)  }
  0x1c   : > { %247 = sbr.rel (%p244_p7) target bundleno = 263 (0x107), region = 73  ;;  %514 = vmatprep.subr.bf16.mxu0 (!%p244_p7), %v582_v10  ;;  %522 = vmatprep.mubr.msk.bf16.mxu0 (!%p244_p7), %vm583_vm0, %v582_v10  ;;  %v557_v13 = vld [vmem:[%s699_s2 + $0x18] sm:$0xff] (!%p244_p7)   ;;  %vm375_vm1 = vcmask (!%p244_p7), 523264   ;;  %s250_s20 = sand.u32 (!%p244_p7), 1, %s572_s15   ;;  %vm297_vm2 = vcmask (!%p244_p7), 1043456  }
  0x1d   : > { %515 = vmatpush3.bf16.msra.mxu0 (!%p244_p7), %v554_v9  ;;  %s527_s21 = smul.u32 (!%p244_p7), 36, %s250_s20  ;;  %v501_v41 = vld [vmem:[%s700_s3] ss:$0 sm:$0xff] (!%p244_p7) }
  0x1e   : > { %516 = vmatprep.subr.bf16.mxu0 (!%p244_p7), %v582_v10 }
  0x1f   : > { %s252_s23 = scalar_lea.vmem (!%p244_p7), [#allocation2], %s527_s21 }
  0x20   : > { %v288_v15 = vld [vmem:[%s252_s23] sm:$0xf] (!%p244_p7)  ;;  %v292_v16 = vld [vmem:[%s252_s23 + $0x10] sm:$0xf] (!%p244_p7)  ;;  %v289_v17 = vld [vmem:[%s252_s23 + $0x4] sm:$0xf] (!%p244_p7) }
  0x21   : > { %517 = vmatpush3.bf16.msra.mxu0 (!%p244_p7), %v555_v11  ;;  %v290_v18 = vld [vmem:[%s252_s23 + $0x8] sm:$0xf] (!%p244_p7)  ;;  %v291_v19 = vld [vmem:[%s252_s23 + $0xc] sm:$0xf] (!%p244_p7)  ;;  %v293_v20 = vld [vmem:[%s252_s23 + $0x14] sm:$0xf] (!%p244_p7) }
  0x22   : > { %518 = vmatprep.subr.bf16.mxu0 (!%p244_p7), %v582_v10  ;;  %v300_v21 = vsel (!%p244_p7), %vm297_vm2, %v288_v15, 4286644096  ;;  %v312_v22 = vsel (!%p244_p7), %vm297_vm2, %v292_v16, 4286644096  ;;  %v294_v23 = vld [vmem:[%s252_s23 + $0x18] sm:$0xf] (!%p244_p7) }
  0x23   : > { %s706_s18 = smov (!%p278_p8, %s493_s18), 1  ;;  %v295_v24 = vld [vmem:[%s252_s23 + $0x1c] sm:$0xf]  ;;  %v296_v25 = vld [vmem:[%s252_s23 + $0x20] sm:$0xf]  ;;  %v314_v29 = vmax.bf16 %v312_v22, %v300_v21 }
  0x24   : > { %s499_s10 = sshll.u32 %s706_s18, 2  ;;  %v303_v26 = vsel %vm297_vm2, %v289_v17, 4286644096  ;;  %v306_v27 = vsel %vm297_vm2, %v290_v18, 4286644096 }
  0x25   : > { %519 = vmatpush3.bf16.msra.mxu0 %v556_v12  ;;  %s281_s17 = scalar_lea.vmem %s698_s1, %s499_s10  ;;  %v309_v28 = vsel %vm297_vm2, %v291_v19, 4286644096  ;;  %v316_v30 = vsel %vm297_vm2, %v293_v20, 4286644096  ;;  %v320_v31 = vsel %vm297_vm2, %v294_v23, 4286644096  ;;  %s285_s27 = scalar_lea.vmem %s701_s4, %s499_s10 }
  0x26   : > { %520 = vmatprep.subr.bf16.mxu0 %v582_v10  ;;  %v335_v14 = vld [vmem:[%s281_s17] sm:$0xf]  ;;  %v324_v32 = vsel %vm297_vm2, %v295_v24, 4286644096  ;;  %v328_v33 = vsel %vm297_vm2, %v296_v25, 4286644096  ;;  %v318_v34 = vmax.bf16 %v316_v30, %v303_v26  ;;  %v322_v35 = vmax.bf16 %v320_v31, %v306_v27 }
  0x27   : > { %v326_v36 = vmax.bf16 %v324_v32, %v309_v28  ;;  %v330_v37 = vmax.bf16 %v328_v33, %v314_v29 }
  0x29   : > { %521 = vmatpush3.bf16.msra.mxu0 %v557_v13  ;;  %v331_v38 = vmax.bf16 %v330_v37, %v318_v34  ;;  %v332_v39 = vmax.bf16 %v326_v36, %v322_v35 }
  0x2b   : > { %v333_v40 = vmax.bf16 %v332_v39, %v331_v38 }
  0x2c   : > { %523 = vmatmul.mubr.msk.bf16.vlgmr.msra.gmra.mrb[0].mxu0 %vm375_vm1, %v335_v14 }
  0x2d   : > { %v334_v42 = vunpack.c.l.bf16 %v333_v40 }
  0xff   : > { %v413_v43 = vpop.f32.mrb[0].mxu0 }
 0x100   : > { %v414_v44 = vadd.f32 %v501_v41, %v413_v43  ;;  %v524_v45 = vpop.f32.mrb[1].mxu0 }
 0x101   : > { %v416_v46 = vpop.f32.mrb[2].mxu0 }
 0x102   : > { %v419_v47 = vadd.f32 %v414_v44, %v334_v42  ;;  %v525_v48 = vpop.f32.mrb[3].mxu0 }
 0x104   : > { %v420_v49 = vpack.c.bf16 %v419_v47, %v419_v47 }
 0x106   : > { %421 = vst [vmem:[%s285_s27] sm:$0xf] %v420_v49 }
 0x107 PF: > { %p11_p9 = scmp.ge.s32.totalorder %s626_s19, 4   ;;  %s702_s15 = smov %s576_s16 }
 0x108   : > { %s703_s16 = smov %s635_s22  ;;  %s704_s17 = smov %s626_s19 }
 0x109   :  { %13 = sbr.rel (!%p11_p9) target bundleno = 2 (0x2), region = 115 }

// kernel: modeling_forward.36
= control target key start
LH: loop header
LB: loop body
LE: loop exit
PB: predicated region body
PF: predicated region fallthrough
CT: control target
= control target key end

     0   :  { %s1438_s15 = smov 0   ;;  %s1697_s0 = inlined_call_operand.vmem [shape: bf16[16,1152], index: 0, kind: input, shape index: {}]   ;;  %s1698_s1 = inlined_call_operand.vmem [shape: bf16[1152,128], index: 1, kind: input, shape index: {}]   ;;  %s1699_s2 = inlined_call_operand.vmem [shape: f32[1,128], index: 2, kind: input, shape index: {}]   ;;  %s1700_s3 = inlined_call_operand.vmem [shape: bf16[16,128], index: 3, kind: input, shape index: {}]   ;;  %s1701_s4 = inlined_call_operand.vmem [shape: bf16[16,128], index: 4, kind: output, shape index: {}]  }
   0x1 LB: > { %s1109_s16 = sadd.s32 4294967295, %s1408_s15   ;;  %p1113_p0 = scmp.ge.s32.totalorder %s1408_s15, 1  ;;  %s1408_s15 = sphi %s1438_s15, %s14_s15  }
   0x2   : > { %p171_p1 = scmp.lt.s32.totalorder %s1408_s15, 3 }
   0x4   : > { %p172_p2 = pnand %p1113_p0, %p171_p1 }
   0x5   : > { %v1330_v0 = vld [vmem:[%s1698_s1 + $0x40] sm:$0xff] (!%p172_p2)   ;;  %v1334_v4 = vld [vmem:[%s1698_s1 + $0x48] sm:$0xff] (!%p172_p2)   ;;  %v1338_v8 = vld [vmem:[%s1698_s1 + $0x50] sm:$0xff] (!%p172_p2)   ;;  %p200_p3 = scmp.lt.s32.totalorder (!%p172_p2), %s1109_s16, 1  ;;  %v1410_v32 = vmov (!%p172_p2), 0   ;;  %vm1412_vm0 = vmmov (!%p172_p2), 0  }
   0x6   : > { %175 = sbr.rel (%p172_p2) target bundleno = 321 (0x141), region = 36  ;;  %v1331_v1 = vld [vmem:[%s1698_s1] sm:$0xff] (!%p172_p2)   ;;  %1201 = vmatprep.subr.bf16.mxu0 (!%p172_p2), %v1330_v0  ;;  %v1335_v5 = vld [vmem:[%s1698_s1 + $0x8] sm:$0xff] (!%p172_p2)   ;;  %v1339_v9 = vld [vmem:[%s1698_s1 + $0x10] sm:$0xff] (!%p172_p2)  }
   0x7   : > { %v1332_v2 = vld [vmem:[%s1698_s1 + $0xc0] sm:$0xff] (!%p172_p2)   ;;  %1202 = vmatpush3.bf16.msra.mxu0 (!%p172_p2), %v1331_v1  ;;  %v1336_v6 = vld [vmem:[%s1698_s1 + $0xc8] sm:$0xff] (!%p172_p2)   ;;  %v1340_v10 = vld [vmem:[%s1698_s1 + $0xd0] sm:$0xff] (!%p172_p2)  }
   0x8   : > { %v1333_v3 = vld [vmem:[%s1698_s1 + $0x80] sm:$0xff] (!%p172_p2)   ;;  %1223 = vmatprep.subr.bf16.mxu1 (!%p172_p2), %v1332_v2  ;;  %1203 = vmatprep.subr.bf16.mxu0 (!%p172_p2), %v1334_v4  ;;  %v1337_v7 = vld [vmem:[%s1698_s1 + $0x88] sm:$0xff] (!%p172_p2)   ;;  %v1341_v11 = vld [vmem:[%s1698_s1 + $0x90] sm:$0xff] (!%p172_p2)  }
   0x9   : > { %1224 = vmatpush3.bf16.msra.mxu1 (!%p172_p2), %v1333_v3  ;;  %v1342_v12 = vld [vmem:[%s1698_s1 + $0x58] sm:$0xff] (!%p172_p2)   ;;  %v1346_v16 = vld [vmem:[%s1698_s1 + $0x60] sm:$0xff] (!%p172_p2)   ;;  %v1350_v20 = vld [vmem:[%s1698_s1 + $0x68] sm:$0xff] (!%p172_p2)  }
   0xa   : > { %1225 = vmatprep.subr.bf16.mxu1 (!%p172_p2), %v1336_v6  ;;  %v1343_v13 = vld [vmem:[%s1698_s1 + $0x18] sm:$0xff] (!%p172_p2)   ;;  %v1347_v17 = vld [vmem:[%s1698_s1 + $0x20] sm:$0xff] (!%p172_p2)   ;;  %v1351_v21 = vld [vmem:[%s1698_s1 + $0x28] sm:$0xff] (!%p172_p2)  }
   0xb   : > { %1204 = vmatpush3.bf16.msra.mxu0 (!%p172_p2), %v1335_v5  ;;  %v1344_v14 = vld [vmem:[%s1698_s1 + $0xd8] sm:$0xff] (!%p172_p2)   ;;  %v1348_v18 = vld [vmem:[%s1698_s1 + $0xe0] sm:$0xff] (!%p172_p2)   ;;  %v1352_v22 = vld [vmem:[%s1698_s1 + $0xe8] sm:$0xff] (!%p172_p2)  }
   0xc   : > { %1205 = vmatprep.subr.bf16.mxu0 (!%p172_p2), %v1338_v8  ;;  %v1345_v15 = vld [vmem:[%s1698_s1 + $0x98] sm:$0xff] (!%p172_p2)   ;;  %v1349_v19 = vld [vmem:[%s1698_s1 + $0xa0] sm:$0xff] (!%p172_p2)   ;;  %v1353_v23 = vld [vmem:[%s1698_s1 + $0xa8] sm:$0xff] (!%p172_p2)  }
   0xd   : > { %1226 = vmatpush3.bf16.msra.mxu1 %v1337_v7  ;;  %s1703_s16 = smov (!%p200_p3, %s1109_s16), 1  ;;  %v1354_v24 = vld [vmem:[%s1698_s1 + $0x70] sm:$0xff]   ;;  %v1358_v28 = vld [vmem:[%s1698_s1 + $0x78] sm:$0xff]   ;;  %v1362_v35 = vld [vmem:[%s1698_s1 + $0x140] sm:$0xff]  }
   0xe   : > { %1227 = vmatprep.subr.bf16.mxu1 %v1340_v10  ;;  %s1318_s19 = smul.u32 36, %s1703_s16  ;;  %v1355_v25 = vld [vmem:[%s1698_s1 + $0x30] sm:$0xff]   ;;  %v1359_v29 = vld [vmem:[%s1698_s1 + $0x38] sm:$0xff]   ;;  %v1363_v40 = vld [vmem:[%s1698_s1 + $0x100] sm:$0xff]   ;;  %s1115_s25 = sshll.u32 %s1703_s16, 2 }
   0xf   : > { %1206 = vmatpush3.bf16.msra.mxu0 %v1339_v9  ;;  %v1356_v26 = vld [vmem:[%s1698_s1 + $0xf0] sm:$0xff]   ;;  %v1360_v30 = vld [vmem:[%s1698_s1 + $0xf8] sm:$0xff]   ;;  %v1364_v41 = vld [vmem:[%s1698_s1 + $0x1c0] sm:$0xff]   ;;  %s208_s28 = scalar_lea.vmem %s1700_s3, %s1115_s25  ;;  %s212_s6 = scalar_lea.vmem %s1701_s4, %s1115_s25 }
  0x10   : > { %1207 = vmatprep.subr.bf16.mxu0 %v1342_v12  ;;  %v1357_v27 = vld [vmem:[%s1698_s1 + $0xb0] sm:$0xff]   ;;  %s1543_s30 = scalar_lea.vmem %s1697_s0, %s1318_s19  ;;  %v1361_v34 = vld [vmem:[%s1698_s1 + $0xb8] sm:$0xff]   ;;  %v1365_v44 = vld [vmem:[%s1698_s1 + $0x180] sm:$0xff]  }
  0x11   : > { %1228 = vmatpush3.bf16.msra.mxu1 %v1341_v11  ;;  %v214_v31 = vld [vmem:[%s1543_s30] sm:$0xff]  ;;  %v215_v36 = vld [vmem:[%s1543_s30 + $0x8] sm:$0xff]  ;;  %v1370_v49 = vld [vmem:[%s1698_s1 + $0x150] sm:$0xff]  }
  0x12   : > { %1229 = vmatprep.subr.bf16.mxu1 %v1344_v14  ;;  %v219_v33 = vmax.bf16 %v1410_v32, %v214_v31  ;;  %v220_v39 = vmax.bf16 %v1410_v32, %v215_v36  ;;  %v1366_v45 = vld [vmem:[%s1698_s1 + $0x148] sm:$0xff]   ;;  %v1371_v50 = vld [vmem:[%s1698_s1 + $0x110] sm:$0xff]   ;;  %v1374_v53 = vld [vmem:[%s1698_s1 + $0x158] sm:$0xff]  }
  0x13   : > { %1208 = vmatpush3.bf16.msra.mxu0 %v1343_v13  ;;  %v1367_v46 = vld [vmem:[%s1698_s1 + $0x108] sm:$0xff]   ;;  %v1372_v51 = vld [vmem:[%s1698_s1 + $0x1d0] sm:$0xff]   ;;  %v1375_v54 = vld [vmem:[%s1698_s1 + $0x118] sm:$0xff]  }
  0x14   : > { %1209 = vmatprep.subr.bf16.mxu0 %v1346_v16  ;;  %v1119_v37 = vcombine.high %v219_v33, %v219_v33  ;;  %v1118_v38 = vcombine.low %v219_v33, %v219_v33  ;;  %v1121_v42 = vcombine.high %v220_v39, %v220_v39  ;;  %v1120_v43 = vcombine.low %v220_v39, %v220_v39  ;;  %v1368_v47 = vld [vmem:[%s1698_s1 + $0x1c8] sm:$0xff]   ;;  %v1373_v52 = vld [vmem:[%s1698_s1 + $0x190] sm:$0xff]   ;;  %v1376_v55 = vld [vmem:[%s1698_s1 + $0x1d8] sm:$0xff]  }
  0x15   : > { %1230 = vmatpush3.bf16.msra.mxu1 %v1345_v15  ;;  %v1369_v48 = vld [vmem:[%s1698_s1 + $0x188] sm:$0xff]   ;;  %v1377_v56 = vld [vmem:[%s1698_s1 + $0x198] sm:$0xff]   ;;  %v1378_v57 = vld [vmem:[%s1698_s1 + $0x160] sm:$0xff]   ;;  %v1411_v16 = vmov 0.0  }
  0x16   : > { %1231 = vmatprep.subr.bf16.mxu1 %v1348_v18  ;;  %871 = vmatprep.mubr.bf16.mxu0 %v1119_v37  ;;  %v1379_v58 = vld [vmem:[%s1698_s1 + $0x120] sm:$0xff]   ;;  %v1382_v61 = vld [vmem:[%s1698_s1 + $0x168] sm:$0xff]   ;;  %v1386_v1 = vld [vmem:[%s1698_s1 + $0x170] sm:$0xff]  }
  0x17   : > { %1210 = vmatpush3.bf16.msra.mxu0 %v1347_v17  ;;  %911 = vmatprep.mubr.bf16.mxu1 %v1121_v42  ;;  %v1380_v59 = vld [vmem:[%s1698_s1 + $0x1e0] sm:$0xff]   ;;  %v1383_v62 = vld [vmem:[%s1698_s1 + $0x128] sm:$0xff]   ;;  %v1387_v2 = vld [vmem:[%s1698_s1 + $0x130] sm:$0xff]  }
  0x18   : > { %1211 = vmatprep.subr.bf16.mxu0 %v1350_v20  ;;  %v1381_v60 = vld [vmem:[%s1698_s1 + $0x1a0] sm:$0xff]   ;;  %v1384_v63 = vld [vmem:[%s1698_s1 + $0x1e8] sm:$0xff]   ;;  %v1388_v3 = vld [vmem:[%s1698_s1 + $0x1f0] sm:$0xff]  }
  0x19   : > { %1232 = vmatpush3.bf16.msra.mxu1 %v1349_v19  ;;  %v1385_v0 = vld [vmem:[%s1698_s1 + $0x1a8] sm:$0xff]   ;;  %v1389_v4 = vld [vmem:[%s1698_s1 + $0x1b0] sm:$0xff]   ;;  %v1390_v5 = vld [vmem:[%s1698_s1 + $0x178] sm:$0xff]  }
  0x1a   : > { %1233 = vmatprep.subr.bf16.mxu1 %v1352_v22  ;;  %v1391_v6 = vld [vmem:[%s1698_s1 + $0x138] sm:$0xff]   ;;  %v216_v8 = vld [vmem:[%s1543_s30 + $0x10] sm:$0xff]  ;;  %v1394_v15 = vld [vmem:[%s1698_s1 + $0x200] sm:$0xff]  }
  0x1b   : > { %1212 = vmatpush3.bf16.msra.mxu0 %v1351_v21  ;;  %v1392_v7 = vld [vmem:[%s1698_s1 + $0x1f8] sm:$0xff]   ;;  %v221_v9 = vmax.bf16 %v1410_v32, %v216_v8  ;;  %v1395_v19 = vld [vmem:[%s1698_s1 + $0x208] sm:$0xff]   ;;  %v218_v20 = vld [vmem:[%s1543_s30 + $0x20] sm:$0xf] }
  0x1c   : > { %1213 = vmatprep.subr.bf16.mxu0 %v1354_v24  ;;  %v1393_v10 = vld [vmem:[%s1698_s1 + $0x1b8] sm:$0xff]   ;;  %v1396_v21 = vld [vmem:[%s1698_s1 + $0x210] sm:$0xff]   ;;  %v223_v22 = vmax.bf16 %v1410_v32, %v218_v20  ;;  %v1398_v24 = vld [vmem:[%s1698_s1 + $0x220] sm:$0xff]  }
  0x1d   : > { %1234 = vmatpush3.bf16.msra.mxu1 %v1353_v23  ;;  %v217_v11 = vld [vmem:[%s1543_s30 + $0x18] sm:$0xff]  ;;  %v1123_v12 = vcombine.high %v221_v9, %v221_v9  ;;  %v1122_v13 = vcombine.low %v221_v9, %v221_v9 }
  0x1e   : > { %1235 = vmatprep.subr.bf16.mxu1 %v1356_v26  ;;  %v222_v14 = vmax.bf16 %v1410_v32, %v217_v11  ;;  %v1397_v23 = vld [vmem:[%s1698_s1 + $0x218] sm:$0xff]   ;;  %v1400_v26 = vld [vmem:[%s1698_s1 + $0x230] sm:$0xff]  }
  0x1f   : > { %1214 = vmatpush3.bf16.msra.mxu0 %v1355_v25  ;;  %v1399_v25 = vld [vmem:[%s1698_s1 + $0x228] sm:$0xff]  }
  0x20   : > { %1215 = vmatprep.subr.bf16.mxu0 %v1358_v28  ;;  %v1125_v17 = vcombine.high %v222_v14, %v222_v14  ;;  %v1124_v18 = vcombine.low %v222_v14, %v222_v14  ;;  %v1126_v28 = vcombine.low %v223_v22, %v223_v22 }
  0x21   : > { %1236 = vmatpush3.bf16.msra.mxu1 %v1357_v27  ;;  %v1401_v27 = vld [vmem:[%s1698_s1 + $0x238] sm:$0xff]  }
  0x22   : > { %1237 = vmatprep.subr.bf16.mxu1 %v1360_v30  ;;  %v1117_v30 = vld [vmem:[%s1699_s2] ss:$0 sm:$0xff] }
  0x23   : > { %1216 = vmatpush3.bf16.msra.mxu0 %v1359_v29 }
  0x24   : > { %1245 = vmatprep.subr.bf16.mxu0 %v1362_v35 }
  0x25   : > { %1238 = vmatpush3.bf16.msra.mxu1 %v1361_v34 }
  0x26   : > { %872 = vmatmul.mubr.bf16.vlgmr.msra.gmra.mrb[0].mxu0 %v1118_v38  ;;  %1267 = vmatprep.subr.bf16.mxu1 %v1364_v41 }
  0x27   : > { %1246 = vmatpush3.bf16.msra.mxu0 %v1363_v40  ;;  %951 = vmatprep.mubr.bf16.mxu0 %v1123_v12 }
  0x28   : > { %912 = vmatmul.mubr.bf16.vlgmr.msra.gmra.mrb[0].mxu1 %v1120_v43  ;;  %1247 = vmatprep.subr.bf16.mxu0 %v1366_v45 }
  0x29   : > { %1268 = vmatpush3.bf16.msra.mxu1 %v1365_v44  ;;  %991 = vmatprep.mubr.bf16.mxu1 %v1125_v17 }
  0x2a   : > { %1269 = vmatprep.subr.bf16.mxu1 %v1368_v47 }
  0x2b   : > { %1248 = vmatpush3.bf16.msra.mxu0 %v1367_v46 }
  0x2c   : > { %1249 = vmatprep.subr.bf16.mxu0 %v1370_v49 }
  0x2d   : > { %1270 = vmatpush3.bf16.msra.mxu1 %v1369_v48 }
  0x2e   : > { %1271 = vmatprep.subr.bf16.mxu1 %v1372_v51 }
  0x2f   : > { %1250 = vmatpush3.bf16.msra.mxu0 %v1371_v50 }
  0x30   : > { %1251 = vmatprep.subr.bf16.mxu0 %v1374_v53 }
  0x31   : > { %1272 = vmatpush3.bf16.msra.mxu1 %v1373_v52 }
  0x32   : > { %1273 = vmatprep.subr.bf16.mxu1 %v1376_v55 }
  0x33   : > { %1252 = vmatpush3.bf16.msra.mxu0 %v1375_v54  ;;  %v1039_v54 = vld [vmem:[%s208_s28] sm:$0xf] }
  0x34   : > { %1253 = vmatprep.subr.bf16.mxu0 %v1378_v57  ;;  %v1040_v55 = vunpack.c.l.bf16 %v1039_v54 }
  0x35   : > { %1274 = vmatpush3.bf16.msra.mxu1 %v1377_v56 }
  0x36   : > { %1275 = vmatprep.subr.bf16.mxu1 %v1380_v59 }
  0x37   : > { %1254 = vmatpush3.bf16.msra.mxu0 %v1379_v58 }
  0x38   : > { %1255 = vmatprep.subr.bf16.mxu0 %v1382_v61 }
  0x39   : > { %1276 = vmatpush3.bf16.msra.mxu1 %v1381_v60 }
  0x3a   : > { %1277 = vmatprep.subr.bf16.mxu1 %v1384_v63 }
  0x3b   : > { %1256 = vmatpush3.bf16.msra.mxu0 %v1383_v62 }
  0x3c   : > { %1257 = vmatprep.subr.bf16.mxu0 %v1386_v1 }
  0x3d   : > { %1278 = vmatpush3.bf16.msra.mxu1 %v1385_v0 }
  0x3e   : > { %1279 = vmatprep.subr.bf16.mxu1 %v1388_v3 }
  0x3f   : > { %1258 = vmatpush3.bf16.msra.mxu0 %v1387_v2 }
  0x40   : > { %1259 = vmatprep.subr.bf16.mxu0 %v1390_v5 }
  0x41   : > { %1280 = vmatpush3.bf16.msra.mxu1 %v1389_v4 }
  0x42   : > { %1281 = vmatprep.subr.bf16.mxu1 %v1392_v7 }
  0x43   : > { %1260 = vmatpush3.bf16.msra.mxu0 %v1391_v6 }
  0x44   : > { %1298 = vmatprep.subr.bf16.mxu0 %v1411_v16 }
  0x45   : > { %1282 = vmatpush3.bf16.msra.mxu1 %v1393_v10 }
  0x46   : > { %952 = vmatmul.mubr.bf16.vlgmr.msra.gmra.mrb[4].mxu0 %v1122_v13 }
  0x47   : > { %1299 = vmatpush3.bf16.msra.mxu0 %v1394_v15  ;;  %1314 = vmatprep.mubr.msk.bf16.mxu0 %vm1412_vm0, %v1411_v16 }
  0x48   : > { %992 = vmatmul.mubr.bf16.vlgmr.msra.gmra.mrb[4].mxu1 %v1124_v18  ;;  %1300 = vmatprep.subr.bf16.mxu0 %v1411_v16 }
  0x4b   : > { %1301 = vmatpush3.bf16.msra.mxu0 %v1395_v19 }
  0x4c   : > { %1302 = vmatprep.subr.bf16.mxu0 %v1411_v16 }
  0x4f   : > { %1303 = vmatpush3.bf16.msra.mxu0 %v1396_v21 }
  0x50   : > { %1304 = vmatprep.subr.bf16.mxu0 %v1411_v16 }
  0x53   : > { %1305 = vmatpush3.bf16.msra.mxu0 %v1397_v23 }
  0x54   : > { %1306 = vmatprep.subr.bf16.mxu0 %v1411_v16 }
  0x57   : > { %1307 = vmatpush3.bf16.msra.mxu0 %v1398_v24 }
  0x58   : > { %1308 = vmatprep.subr.bf16.mxu0 %v1411_v16 }
  0x5b   : > { %1309 = vmatpush3.bf16.msra.mxu0 %v1399_v25 }
  0x5c   : > { %1310 = vmatprep.subr.bf16.mxu0 %v1411_v16 }
  0x5f   : > { %1311 = vmatpush3.bf16.msra.mxu0 %v1400_v26 }
  0x60   : > { %1312 = vmatprep.subr.bf16.mxu0 %v1411_v16 }
  0x63   : > { %1313 = vmatpush3.bf16.msra.mxu0 %v1401_v27 }
  0x66   : > { %1315 = vmatmul.mubr.bf16.vlgmr.msra.gmra.mrb[8].mxu0 %v1126_v28 }
  0xf9   : > { %v1217_v29 = vpop.f32.mrb[0].mxu0 }
  0xfa   : > { %v1218_v31 = vpop.f32.mrb[1].mxu0 }
  0xfb   : > { %v1219_v32 = vadd.f32 %v1218_v31, %v1217_v29  ;;  %v1220_v33 = vpop.f32.mrb[2].mxu0  ;;  %v1239_v34 = vpop.f32.mrb[0].mxu1 }
  0xfc   : > { %v1221_v35 = vpop.f32.mrb[3].mxu0  ;;  %v1240_v36 = vpop.f32.mrb[1].mxu1 }
  0xfd   : > { %v874_v37 = vadd.f32 %v1219_v32, %v1117_v30  ;;  %v1241_v38 = vadd.f32 %v1240_v36, %v1239_v34  ;;  %v1242_v39 = vpop.f32.mrb[2].mxu1 }
  0xfe   : > { %v1243_v40 = vpop.f32.mrb[3].mxu1 }
  0xff   : > { %v914_v41 = vadd.f32 %v1241_v38, %v874_v37 }
 0x119   : > { %v1261_v42 = vpop.f32.mrb[4].mxu0 }
 0x11a   : > { %v1262_v43 = vpop.f32.mrb[5].mxu0 }
 0x11b   : > { %v1263_v44 = vadd.f32 %v1262_v43, %v1261_v42  ;;  %v1264_v45 = vpop.f32.mrb[6].mxu0  ;;  %v1283_v46 = vpop.f32.mrb[4].mxu1 }
 0x11c   : > { %v1265_v47 = vpop.f32.mrb[7].mxu0  ;;  %v1284_v48 = vpop.f32.mrb[5].mxu1 }
 0x11d   : > { %v954_v49 = vadd.f32 %v1263_v44, %v914_v41  ;;  %v1285_v50 = vadd.f32 %v1284_v48, %v1283_v46  ;;  %v1286_v51 = vpop.f32.mrb[6].mxu1 }
 0x11e   : > { %v1287_v52 = vpop.f32.mrb[7].mxu1 }
 0x11f   : > { %v994_v53 = vadd.f32 %v1285_v50, %v954_v49 }
 0x139   : > { %v1033_v56 = vpop.f32.mrb[8].mxu0 }
 0x13a   : > { %v1034_v57 = vadd.f32 %v1033_v56, %v994_v53  ;;  %v1316_v58 = vpop.f32.mrb[9].mxu0 }
 0x13b   : > { %v1036_v59 = vpop.f32.mrb[10].mxu0 }
 0x13c   : > { %v1041_v60 = vadd.f32 %v1040_v55, %v1034_v57  ;;  %v1317_v61 = vpop.f32.mrb[11].mxu0 }
 0x13e   : > { %v1042_v62 = vpack.c.bf16 %v1041_v60, %v1041_v60 }
 0x140   : > { %1043 = vst [vmem:[%s212_s6] sm:$0xf] %v1042_v62 }
 0x141 PF: > { %s14_s15 = sadd.s32 1, %s1408_s15  }
 0x142   : > { %p11_p4 = scmp.ge.s32.totalorder %s14_s15, 4  }
 0x144   :  { %13 = sbr.rel (!%p11_p4) target bundleno = 1 (0x1), region = 69 }

// kernel: modeling_forward.34
= control target key start
LH: loop header
LB: loop body
LE: loop exit
PB: predicated region body
PF: predicated region fallthrough
CT: control target
= control target key end

     0   :  { %s1373_s12 = smov 0   ;;  %s1629_s0 = inlined_call_operand.vmem [shape: bf16[16,1152], index: 0, kind: input, shape index: {}]   ;;  %s1630_s1 = inlined_call_operand.vmem [shape: bf16[1152,128], index: 1, kind: input, shape index: {}]   ;;  %s1631_s2 = inlined_call_operand.vmem [shape: f32[1,128], index: 2, kind: input, shape index: {}]   ;;  %s1632_s3 = inlined_call_operand.vmem [shape: bf16[16,128], index: 3, kind: output, shape index: {}]  }
   0x1 LB: > { %s1050_s13 = sadd.s32 4294967295, %s1348_s12   ;;  %p1054_p0 = scmp.ge.s32.totalorder %s1348_s12, 1  ;;  %s1348_s12 = sphi %s1373_s12, %s13_s12  }
   0x2   : > { %p137_p1 = scmp.lt.s32.totalorder %s1348_s12, 3 }
   0x4   : > { %p138_p2 = pnand %p1054_p0, %p137_p1 }
   0x5   : > { %v1270_v0 = vld [vmem:[%s1630_s1 + $0x40] sm:$0xff] (!%p138_p2)   ;;  %v1274_v4 = vld [vmem:[%s1630_s1 + $0x48] sm:$0xff] (!%p138_p2)   ;;  %v1278_v8 = vld [vmem:[%s1630_s1 + $0x50] sm:$0xff] (!%p138_p2)   ;;  %p160_p3 = scmp.lt.s32.totalorder (!%p138_p2), %s1050_s13, 1  ;;  %v1350_v32 = vmov (!%p138_p2), 0   ;;  %vm1352_vm0 = vmmov (!%p138_p2), 0  }
   0x6   : > { %141 = sbr.rel (%p138_p2) target bundleno = 319 (0x13f), region = 32  ;;  %v1271_v1 = vld [vmem:[%s1630_s1] sm:$0xff] (!%p138_p2)   ;;  %1141 = vmatprep.subr.bf16.mxu0 (!%p138_p2), %v1270_v0  ;;  %v1275_v5 = vld [vmem:[%s1630_s1 + $0x8] sm:$0xff] (!%p138_p2)   ;;  %v1279_v9 = vld [vmem:[%s1630_s1 + $0x10] sm:$0xff] (!%p138_p2)  }
   0x7   : > { %v1272_v2 = vld [vmem:[%s1630_s1 + $0xc0] sm:$0xff] (!%p138_p2)   ;;  %1142 = vmatpush3.bf16.msra.mxu0 (!%p138_p2), %v1271_v1  ;;  %v1276_v6 = vld [vmem:[%s1630_s1 + $0xc8] sm:$0xff] (!%p138_p2)   ;;  %v1280_v10 = vld [vmem:[%s1630_s1 + $0xd0] sm:$0xff] (!%p138_p2)  }
   0x8   : > { %v1273_v3 = vld [vmem:[%s1630_s1 + $0x80] sm:$0xff] (!%p138_p2)   ;;  %1163 = vmatprep.subr.bf16.mxu1 (!%p138_p2), %v1272_v2  ;;  %1143 = vmatprep.subr.bf16.mxu0 (!%p138_p2), %v1274_v4  ;;  %v1277_v7 = vld [vmem:[%s1630_s1 + $0x88] sm:$0xff] (!%p138_p2)   ;;  %v1281_v11 = vld [vmem:[%s1630_s1 + $0x90] sm:$0xff] (!%p138_p2)  }
   0x9   : > { %1164 = vmatpush3.bf16.msra.mxu1 (!%p138_p2), %v1273_v3  ;;  %v1282_v12 = vld [vmem:[%s1630_s1 + $0x58] sm:$0xff] (!%p138_p2)   ;;  %v1286_v16 = vld [vmem:[%s1630_s1 + $0x60] sm:$0xff] (!%p138_p2)   ;;  %v1290_v20 = vld [vmem:[%s1630_s1 + $0x68] sm:$0xff] (!%p138_p2)  }
   0xa   : > { %1165 = vmatprep.subr.bf16.mxu1 (!%p138_p2), %v1276_v6  ;;  %v1283_v13 = vld [vmem:[%s1630_s1 + $0x18] sm:$0xff] (!%p138_p2)   ;;  %v1287_v17 = vld [vmem:[%s1630_s1 + $0x20] sm:$0xff] (!%p138_p2)   ;;  %v1291_v21 = vld [vmem:[%s1630_s1 + $0x28] sm:$0xff] (!%p138_p2)  }
   0xb   : > { %1144 = vmatpush3.bf16.msra.mxu0 (!%p138_p2), %v1275_v5  ;;  %v1284_v14 = vld [vmem:[%s1630_s1 + $0xd8] sm:$0xff] (!%p138_p2)   ;;  %v1288_v18 = vld [vmem:[%s1630_s1 + $0xe0] sm:$0xff] (!%p138_p2)   ;;  %v1292_v22 = vld [vmem:[%s1630_s1 + $0xe8] sm:$0xff] (!%p138_p2)  }
   0xc   : > { %1145 = vmatprep.subr.bf16.mxu0 (!%p138_p2), %v1278_v8  ;;  %v1285_v15 = vld [vmem:[%s1630_s1 + $0x98] sm:$0xff] (!%p138_p2)   ;;  %v1289_v19 = vld [vmem:[%s1630_s1 + $0xa0] sm:$0xff] (!%p138_p2)   ;;  %v1293_v23 = vld [vmem:[%s1630_s1 + $0xa8] sm:$0xff] (!%p138_p2)  }
   0xd   : > { %1166 = vmatpush3.bf16.msra.mxu1 %v1277_v7  ;;  %s1634_s13 = smov (!%p160_p3, %s1050_s13), 1  ;;  %v1294_v24 = vld [vmem:[%s1630_s1 + $0x70] sm:$0xff]   ;;  %v1298_v28 = vld [vmem:[%s1630_s1 + $0x78] sm:$0xff]   ;;  %v1302_v35 = vld [vmem:[%s1630_s1 + $0x140] sm:$0xff]  }
   0xe   : > { %1167 = vmatprep.subr.bf16.mxu1 %v1280_v10  ;;  %s1258_s14 = smul.u32 36, %s1634_s13  ;;  %v1295_v25 = vld [vmem:[%s1630_s1 + $0x30] sm:$0xff]   ;;  %v1299_v29 = vld [vmem:[%s1630_s1 + $0x38] sm:$0xff]   ;;  %v1303_v40 = vld [vmem:[%s1630_s1 + $0x100] sm:$0xff]   ;;  %s1056_s16 = sshll.u32 %s1634_s13, 2 }
   0xf   : > { %1146 = vmatpush3.bf16.msra.mxu0 %v1279_v9  ;;  %v1296_v26 = vld [vmem:[%s1630_s1 + $0xf0] sm:$0xff]   ;;  %v1300_v30 = vld [vmem:[%s1630_s1 + $0xf8] sm:$0xff]   ;;  %v1304_v41 = vld [vmem:[%s1630_s1 + $0x1c0] sm:$0xff]   ;;  %s168_s19 = scalar_lea.vmem %s1632_s3, %s1056_s16 }
  0x10   : > { %1147 = vmatprep.subr.bf16.mxu0 %v1282_v12  ;;  %v1297_v27 = vld [vmem:[%s1630_s1 + $0xb0] sm:$0xff]   ;;  %s1478_s25 = scalar_lea.vmem %s1629_s0, %s1258_s14  ;;  %v1301_v34 = vld [vmem:[%s1630_s1 + $0xb8] sm:$0xff]   ;;  %v1305_v44 = vld [vmem:[%s1630_s1 + $0x180] sm:$0xff]  }
  0x11   : > { %1168 = vmatpush3.bf16.msra.mxu1 %v1281_v11  ;;  %v170_v31 = vld [vmem:[%s1478_s25] sm:$0xff]  ;;  %v171_v36 = vld [vmem:[%s1478_s25 + $0x8] sm:$0xff]  ;;  %v1310_v49 = vld [vmem:[%s1630_s1 + $0x150] sm:$0xff]  }
  0x12   : > { %1169 = vmatprep.subr.bf16.mxu1 %v1284_v14  ;;  %v175_v33 = vmax.bf16 %v1350_v32, %v170_v31  ;;  %v176_v39 = vmax.bf16 %v1350_v32, %v171_v36  ;;  %v1306_v45 = vld [vmem:[%s1630_s1 + $0x148] sm:$0xff]   ;;  %v1311_v50 = vld [vmem:[%s1630_s1 + $0x110] sm:$0xff]   ;;  %v1314_v53 = vld [vmem:[%s1630_s1 + $0x158] sm:$0xff]  }
  0x13   : > { %1148 = vmatpush3.bf16.msra.mxu0 %v1283_v13  ;;  %v1307_v46 = vld [vmem:[%s1630_s1 + $0x108] sm:$0xff]   ;;  %v1312_v51 = vld [vmem:[%s1630_s1 + $0x1d0] sm:$0xff]   ;;  %v1315_v54 = vld [vmem:[%s1630_s1 + $0x118] sm:$0xff]  }
  0x14   : > { %1149 = vmatprep.subr.bf16.mxu0 %v1286_v16  ;;  %v1059_v37 = vcombine.high %v175_v33, %v175_v33  ;;  %v1058_v38 = vcombine.low %v175_v33, %v175_v33  ;;  %v1061_v42 = vcombine.high %v176_v39, %v176_v39  ;;  %v1060_v43 = vcombine.low %v176_v39, %v176_v39  ;;  %v1308_v47 = vld [vmem:[%s1630_s1 + $0x1c8] sm:$0xff]   ;;  %v1313_v52 = vld [vmem:[%s1630_s1 + $0x190] sm:$0xff]   ;;  %v1316_v55 = vld [vmem:[%s1630_s1 + $0x1d8] sm:$0xff]  }
  0x15   : > { %1170 = vmatpush3.bf16.msra.mxu1 %v1285_v15  ;;  %v1309_v48 = vld [vmem:[%s1630_s1 + $0x188] sm:$0xff]   ;;  %v1317_v56 = vld [vmem:[%s1630_s1 + $0x198] sm:$0xff]   ;;  %v1318_v57 = vld [vmem:[%s1630_s1 + $0x160] sm:$0xff]   ;;  %v1351_v16 = vmov 0.0  }
  0x16   : > { %1171 = vmatprep.subr.bf16.mxu1 %v1288_v18  ;;  %827 = vmatprep.mubr.bf16.mxu0 %v1059_v37  ;;  %v1319_v58 = vld [vmem:[%s1630_s1 + $0x120] sm:$0xff]   ;;  %v1322_v61 = vld [vmem:[%s1630_s1 + $0x168] sm:$0xff]   ;;  %v1326_v1 = vld [vmem:[%s1630_s1 + $0x170] sm:$0xff]  }
  0x17   : > { %1150 = vmatpush3.bf16.msra.mxu0 %v1287_v17  ;;  %867 = vmatprep.mubr.bf16.mxu1 %v1061_v42  ;;  %v1320_v59 = vld [vmem:[%s1630_s1 + $0x1e0] sm:$0xff]   ;;  %v1323_v62 = vld [vmem:[%s1630_s1 + $0x128] sm:$0xff]   ;;  %v1327_v2 = vld [vmem:[%s1630_s1 + $0x130] sm:$0xff]  }
  0x18   : > { %1151 = vmatprep.subr.bf16.mxu0 %v1290_v20  ;;  %v1321_v60 = vld [vmem:[%s1630_s1 + $0x1a0] sm:$0xff]   ;;  %v1324_v63 = vld [vmem:[%s1630_s1 + $0x1e8] sm:$0xff]   ;;  %v1328_v3 = vld [vmem:[%s1630_s1 + $0x1f0] sm:$0xff]  }
  0x19   : > { %1172 = vmatpush3.bf16.msra.mxu1 %v1289_v19  ;;  %v1325_v0 = vld [vmem:[%s1630_s1 + $0x1a8] sm:$0xff]   ;;  %v1329_v4 = vld [vmem:[%s1630_s1 + $0x1b0] sm:$0xff]   ;;  %v1330_v5 = vld [vmem:[%s1630_s1 + $0x178] sm:$0xff]  }
  0x1a   : > { %1173 = vmatprep.subr.bf16.mxu1 %v1292_v22  ;;  %v1331_v6 = vld [vmem:[%s1630_s1 + $0x138] sm:$0xff]   ;;  %v172_v8 = vld [vmem:[%s1478_s25 + $0x10] sm:$0xff]  ;;  %v1334_v15 = vld [vmem:[%s1630_s1 + $0x200] sm:$0xff]  }
  0x1b   : > { %1152 = vmatpush3.bf16.msra.mxu0 %v1291_v21  ;;  %v1332_v7 = vld [vmem:[%s1630_s1 + $0x1f8] sm:$0xff]   ;;  %v177_v9 = vmax.bf16 %v1350_v32, %v172_v8  ;;  %v1335_v19 = vld [vmem:[%s1630_s1 + $0x208] sm:$0xff]   ;;  %v174_v20 = vld [vmem:[%s1478_s25 + $0x20] sm:$0xf] }
  0x1c   : > { %1153 = vmatprep.subr.bf16.mxu0 %v1294_v24  ;;  %v1333_v10 = vld [vmem:[%s1630_s1 + $0x1b8] sm:$0xff]   ;;  %v1336_v21 = vld [vmem:[%s1630_s1 + $0x210] sm:$0xff]   ;;  %v179_v22 = vmax.bf16 %v1350_v32, %v174_v20  ;;  %v1338_v24 = vld [vmem:[%s1630_s1 + $0x220] sm:$0xff]  }
  0x1d   : > { %1174 = vmatpush3.bf16.msra.mxu1 %v1293_v23  ;;  %v173_v11 = vld [vmem:[%s1478_s25 + $0x18] sm:$0xff]  ;;  %v1063_v12 = vcombine.high %v177_v9, %v177_v9  ;;  %v1062_v13 = vcombine.low %v177_v9, %v177_v9 }
  0x1e   : > { %1175 = vmatprep.subr.bf16.mxu1 %v1296_v26  ;;  %v178_v14 = vmax.bf16 %v1350_v32, %v173_v11  ;;  %v1337_v23 = vld [vmem:[%s1630_s1 + $0x218] sm:$0xff]   ;;  %v1340_v26 = vld [vmem:[%s1630_s1 + $0x230] sm:$0xff]  }
  0x1f   : > { %1154 = vmatpush3.bf16.msra.mxu0 %v1295_v25  ;;  %v1339_v25 = vld [vmem:[%s1630_s1 + $0x228] sm:$0xff]  }
  0x20   : > { %1155 = vmatprep.subr.bf16.mxu0 %v1298_v28  ;;  %v1065_v17 = vcombine.high %v178_v14, %v178_v14  ;;  %v1064_v18 = vcombine.low %v178_v14, %v178_v14  ;;  %v1066_v28 = vcombine.low %v179_v22, %v179_v22 }
  0x21   : > { %1176 = vmatpush3.bf16.msra.mxu1 %v1297_v27  ;;  %v1341_v27 = vld [vmem:[%s1630_s1 + $0x238] sm:$0xff]  }
  0x22   : > { %1177 = vmatprep.subr.bf16.mxu1 %v1300_v30  ;;  %v1057_v30 = vld [vmem:[%s1631_s2] ss:$0 sm:$0xff] }
  0x23   : > { %1156 = vmatpush3.bf16.msra.mxu0 %v1299_v29 }
  0x24   : > { %1185 = vmatprep.subr.bf16.mxu0 %v1302_v35 }
  0x25   : > { %1178 = vmatpush3.bf16.msra.mxu1 %v1301_v34 }
  0x26   : > { %828 = vmatmul.mubr.bf16.vlgmr.msra.gmra.mrb[0].mxu0 %v1058_v38  ;;  %1207 = vmatprep.subr.bf16.mxu1 %v1304_v41 }
  0x27   : > { %1186 = vmatpush3.bf16.msra.mxu0 %v1303_v40  ;;  %907 = vmatprep.mubr.bf16.mxu0 %v1063_v12 }
  0x28   : > { %868 = vmatmul.mubr.bf16.vlgmr.msra.gmra.mrb[0].mxu1 %v1060_v43  ;;  %1187 = vmatprep.subr.bf16.mxu0 %v1306_v45 }
  0x29   : > { %1208 = vmatpush3.bf16.msra.mxu1 %v1305_v44  ;;  %947 = vmatprep.mubr.bf16.mxu1 %v1065_v17 }
  0x2a   : > { %1209 = vmatprep.subr.bf16.mxu1 %v1308_v47 }
  0x2b   : > { %1188 = vmatpush3.bf16.msra.mxu0 %v1307_v46 }
  0x2c   : > { %1189 = vmatprep.subr.bf16.mxu0 %v1310_v49 }
  0x2d   : > { %1210 = vmatpush3.bf16.msra.mxu1 %v1309_v48 }
  0x2e   : > { %1211 = vmatprep.subr.bf16.mxu1 %v1312_v51 }
  0x2f   : > { %1190 = vmatpush3.bf16.msra.mxu0 %v1311_v50 }
  0x30   : > { %1191 = vmatprep.subr.bf16.mxu0 %v1314_v53 }
  0x31   : > { %1212 = vmatpush3.bf16.msra.mxu1 %v1313_v52 }
  0x32   : > { %1213 = vmatprep.subr.bf16.mxu1 %v1316_v55 }
  0x33   : > { %1192 = vmatpush3.bf16.msra.mxu0 %v1315_v54 }
  0x34   : > { %1193 = vmatprep.subr.bf16.mxu0 %v1318_v57 }
  0x35   : > { %1214 = vmatpush3.bf16.msra.mxu1 %v1317_v56 }
  0x36   : > { %1215 = vmatprep.subr.bf16.mxu1 %v1320_v59 }
  0x37   : > { %1194 = vmatpush3.bf16.msra.mxu0 %v1319_v58 }
  0x38   : > { %1195 = vmatprep.subr.bf16.mxu0 %v1322_v61 }
  0x39   : > { %1216 = vmatpush3.bf16.msra.mxu1 %v1321_v60 }
  0x3a   : > { %1217 = vmatprep.subr.bf16.mxu1 %v1324_v63 }
  0x3b   : > { %1196 = vmatpush3.bf16.msra.mxu0 %v1323_v62 }
  0x3c   : > { %1197 = vmatprep.subr.bf16.mxu0 %v1326_v1 }
  0x3d   : > { %1218 = vmatpush3.bf16.msra.mxu1 %v1325_v0 }
  0x3e   : > { %1219 = vmatprep.subr.bf16.mxu1 %v1328_v3 }
  0x3f   : > { %1198 = vmatpush3.bf16.msra.mxu0 %v1327_v2 }
  0x40   : > { %1199 = vmatprep.subr.bf16.mxu0 %v1330_v5 }
  0x41   : > { %1220 = vmatpush3.bf16.msra.mxu1 %v1329_v4 }
  0x42   : > { %1221 = vmatprep.subr.bf16.mxu1 %v1332_v7 }
  0x43   : > { %1200 = vmatpush3.bf16.msra.mxu0 %v1331_v6 }
  0x44   : > { %1238 = vmatprep.subr.bf16.mxu0 %v1351_v16 }
  0x45   : > { %1222 = vmatpush3.bf16.msra.mxu1 %v1333_v10 }
  0x46   : > { %908 = vmatmul.mubr.bf16.vlgmr.msra.gmra.mrb[4].mxu0 %v1062_v13 }
  0x47   : > { %1239 = vmatpush3.bf16.msra.mxu0 %v1334_v15  ;;  %1254 = vmatprep.mubr.msk.bf16.mxu0 %vm1352_vm0, %v1351_v16 }
  0x48   : > { %948 = vmatmul.mubr.bf16.vlgmr.msra.gmra.mrb[4].mxu1 %v1064_v18  ;;  %1240 = vmatprep.subr.bf16.mxu0 %v1351_v16 }
  0x4b   : > { %1241 = vmatpush3.bf16.msra.mxu0 %v1335_v19 }
  0x4c   : > { %1242 = vmatprep.subr.bf16.mxu0 %v1351_v16 }
  0x4f   : > { %1243 = vmatpush3.bf16.msra.mxu0 %v1336_v21 }
  0x50   : > { %1244 = vmatprep.subr.bf16.mxu0 %v1351_v16 }
  0x53   : > { %1245 = vmatpush3.bf16.msra.mxu0 %v1337_v23 }
  0x54   : > { %1246 = vmatprep.subr.bf16.mxu0 %v1351_v16 }
  0x57   : > { %1247 = vmatpush3.bf16.msra.mxu0 %v1338_v24 }
  0x58   : > { %1248 = vmatprep.subr.bf16.mxu0 %v1351_v16 }
  0x5b   : > { %1249 = vmatpush3.bf16.msra.mxu0 %v1339_v25 }
  0x5c   : > { %1250 = vmatprep.subr.bf16.mxu0 %v1351_v16 }
  0x5f   : > { %1251 = vmatpush3.bf16.msra.mxu0 %v1340_v26 }
  0x60   : > { %1252 = vmatprep.subr.bf16.mxu0 %v1351_v16 }
  0x63   : > { %1253 = vmatpush3.bf16.msra.mxu0 %v1341_v27 }
  0x66   : > { %1255 = vmatmul.mubr.bf16.vlgmr.msra.gmra.mrb[8].mxu0 %v1066_v28 }
  0xf9   : > { %v1157_v29 = vpop.f32.mrb[0].mxu0 }
  0xfa   : > { %v1158_v31 = vpop.f32.mrb[1].mxu0 }
  0xfb   : > { %v1159_v32 = vadd.f32 %v1158_v31, %v1157_v29  ;;  %v1160_v33 = vpop.f32.mrb[2].mxu0  ;;  %v1179_v34 = vpop.f32.mrb[0].mxu1 }
  0xfc   : > { %v1161_v35 = vpop.f32.mrb[3].mxu0  ;;  %v1180_v36 = vpop.f32.mrb[1].mxu1 }
  0xfd   : > { %v830_v37 = vadd.f32 %v1159_v32, %v1057_v30  ;;  %v1181_v38 = vadd.f32 %v1180_v36, %v1179_v34  ;;  %v1182_v39 = vpop.f32.mrb[2].mxu1 }
  0xfe   : > { %v1183_v40 = vpop.f32.mrb[3].mxu1 }
  0xff   : > { %v870_v41 = vadd.f32 %v1181_v38, %v830_v37 }
 0x119   : > { %v1201_v42 = vpop.f32.mrb[4].mxu0 }
 0x11a   : > { %v1202_v43 = vpop.f32.mrb[5].mxu0 }
 0x11b   : > { %v1203_v44 = vadd.f32 %v1202_v43, %v1201_v42  ;;  %v1204_v45 = vpop.f32.mrb[6].mxu0  ;;  %v1223_v46 = vpop.f32.mrb[4].mxu1 }
 0x11c   : > { %v1205_v47 = vpop.f32.mrb[7].mxu0  ;;  %v1224_v48 = vpop.f32.mrb[5].mxu1 }
 0x11d   : > { %v910_v49 = vadd.f32 %v1203_v44, %v870_v41  ;;  %v1225_v50 = vadd.f32 %v1224_v48, %v1223_v46  ;;  %v1226_v51 = vpop.f32.mrb[6].mxu1 }
 0x11e   : > { %v1227_v52 = vpop.f32.mrb[7].mxu1 }
 0x11f   : > { %v950_v53 = vadd.f32 %v1225_v50, %v910_v49 }
 0x139   : > { %v989_v54 = vpop.f32.mrb[8].mxu0 }
 0x13a   : > { %v990_v55 = vadd.f32 %v989_v54, %v950_v53  ;;  %v1256_v56 = vpop.f32.mrb[9].mxu0 }
 0x13b   : > { %v992_v57 = vpop.f32.mrb[10].mxu0 }
 0x13c   : > { %v995_v58 = vpack.c.bf16 %v990_v55, %v990_v55  ;;  %v1257_v59 = vpop.f32.mrb[11].mxu0 }
 0x13e   : > { %996 = vst [vmem:[%s168_s19] sm:$0xf] %v995_v58 }
 0x13f PF: > { %s13_s12 = sadd.s32 1, %s1348_s12  }
 0x140   : > { %p10_p4 = scmp.ge.s32.totalorder %s13_s12, 4  }
 0x142   :  { %12 = sbr.rel (!%p10_p4) target bundleno = 1 (0x1), region = 62 }

// kernel: modeling_forward.41
= control target key start
LH: loop header
LB: loop body
LE: loop exit
PB: predicated region body
PF: predicated region fallthrough
CT: control target
= control target key end

     0   :  { %s1799_s12 = smov 0   ;;  %s2284_s0 = inlined_call_operand.vmem [shape: bf16[16,1152], index: 0, kind: input, shape index: {}]   ;;  %s2285_s1 = inlined_call_operand.vmem [shape: bf16[1152,160], index: 1, kind: input, shape index: {}]   ;;  %s2286_s2 = inlined_call_operand.vmem [shape: f32[1,160], index: 2, kind: input, shape index: {}]   ;;  %s2287_s3 = inlined_call_operand.vmem [shape: bf16[16,160], index: 3, kind: output, shape index: {}]  }
   0x1 LB: > { %s1362_s13 = sadd.s32 4294967295, %s1776_s12   ;;  %p1366_p0 = scmp.ge.s32.totalorder %s1776_s12, 1  ;;  %s1776_s12 = sphi %s1799_s12, %s13_s12  }
   0x2   : > { %p137_p1 = scmp.lt.s32.totalorder %s1776_s12, 3 }
   0x4   : > { %p138_p2 = pnand %p1366_p0, %p137_p1 }
   0x5   : > { %v1554_v0 = vld [vmem:[%s2285_s1 + $0x4] ss:$8 sps:$4 sm:$0xff] (!%p138_p2)   ;;  %v1558_v2 = vld [vmem:[%s2285_s1] ss:$8 sps:$4 sm:$0xff] (!%p138_p2)   ;;  %v1560_v4 = vld [vmem:[%s2285_s1 + $0x14] ss:$8 sps:$4 sm:$0xff] (!%p138_p2)  }
   0x6   : > { %141 = sbr.rel (%p138_p2) target bundleno = 385 (0x181), region = 32  ;;  %v1556_v1 = vld [vmem:[%s2285_s1 + $0x204] ss:$8 sps:$4 sm:$0xff] (!%p138_p2)   ;;  %1090 = vmatprep.subr.bf16.mxu1 (!%p138_p2), %v1554_v0  ;;  %v1559_v3 = vld [vmem:[%s2285_s1 + $0x200] ss:$8 sps:$4 sm:$0xff] (!%p138_p2)   ;;  %p161_p3 = scmp.lt.s32.totalorder (!%p138_p2), %s1362_s13, 1 }
   0x7   : > { %1172 = vmatprep.subr.bf16.mxu0 (!%p138_p2), %v1556_v1  ;;  %1091 = vmatpush1.bf16.msra.mxu1 (!%p138_p2), %v1558_v2  ;;  %v1562_v5 = vld [vmem:[%s2285_s1 + $0x214] ss:$8 sps:$4 sm:$0xff] (!%p138_p2)   ;;  %v1564_v6 = vld [vmem:[%s2285_s1 + $0x10] ss:$8 sps:$4 sm:$0xff] (!%p138_p2)   ;;  %v1566_v8 = vld [vmem:[%s2285_s1 + $0x24] ss:$8 sps:$4 sm:$0xff] (!%p138_p2)  }
   0x8   : > { %1173 = vmatpush1.bf16.msra.mxu0 (!%p138_p2), %v1559_v3  ;;  %1092 = vmatprep.subr.bf16.mxu1 (!%p138_p2), %v1560_v4  ;;  %v1565_v7 = vld [vmem:[%s2285_s1 + $0x210] ss:$8 sps:$4 sm:$0xff] (!%p138_p2)   ;;  %v1568_v9 = vld [vmem:[%s2285_s1 + $0x224] ss:$8 sps:$4 sm:$0xff] (!%p138_p2)   ;;  %v1570_v10 = vld [vmem:[%s2285_s1 + $0x20] ss:$8 sps:$4 sm:$0xff] (!%p138_p2)  }
   0x9   : > { %1174 = vmatprep.subr.bf16.mxu0 (!%p138_p2), %v1562_v5  ;;  %v1571_v11 = vld [vmem:[%s2285_s1 + $0x220] ss:$8 sps:$4 sm:$0xff] (!%p138_p2)   ;;  %v1572_v12 = vld [vmem:[%s2285_s1 + $0x34] ss:$8 sps:$4 sm:$0xff] (!%p138_p2)   ;;  %v1576_v14 = vld [vmem:[%s2285_s1 + $0x30] ss:$8 sps:$4 sm:$0xff] (!%p138_p2)  }
   0xa   : > { %v1574_v13 = vld [vmem:[%s2285_s1 + $0x234] ss:$8 sps:$4 sm:$0xff] (!%p138_p2)   ;;  %v1577_v15 = vld [vmem:[%s2285_s1 + $0x230] ss:$8 sps:$4 sm:$0xff] (!%p138_p2)   ;;  %v1578_v16 = vld [vmem:[%s2285_s1 + $0x44] ss:$8 sps:$4 sm:$0xff] (!%p138_p2)  }
   0xb   : > { %1093 = vmatpush1.bf16.msra.mxu1 (!%p138_p2), %v1564_v6  ;;  %v1580_v17 = vld [vmem:[%s2285_s1 + $0x244] ss:$8 sps:$4 sm:$0xff] (!%p138_p2)   ;;  %v1582_v18 = vld [vmem:[%s2285_s1 + $0x40] ss:$8 sps:$4 sm:$0xff] (!%p138_p2)   ;;  %v1584_v20 = vld [vmem:[%s2285_s1 + $0x54] ss:$8 sps:$4 sm:$0xff] (!%p138_p2)  }
   0xc   : > { %1175 = vmatpush1.bf16.msra.mxu0 (!%p138_p2), %v1565_v7  ;;  %1094 = vmatprep.subr.bf16.mxu1 (!%p138_p2), %v1566_v8  ;;  %v1583_v19 = vld [vmem:[%s2285_s1 + $0x240] ss:$8 sps:$4 sm:$0xff] (!%p138_p2)   ;;  %v1586_v21 = vld [vmem:[%s2285_s1 + $0x254] ss:$8 sps:$4 sm:$0xff] (!%p138_p2)   ;;  %v1588_v22 = vld [vmem:[%s2285_s1 + $0x50] ss:$8 sps:$4 sm:$0xff] (!%p138_p2)  }
   0xd   : > { %1176 = vmatprep.subr.bf16.mxu0 %v1568_v9  ;;  %v1589_v23 = vld [vmem:[%s2285_s1 + $0x250] ss:$8 sps:$4 sm:$0xff]   ;;  %v1590_v24 = vld [vmem:[%s2285_s1 + $0x64] ss:$8 sps:$4 sm:$0xff]   ;;  %v1594_v26 = vld [vmem:[%s2285_s1 + $0x60] ss:$8 sps:$4 sm:$0xff]  }
   0xe   : > { %v1592_v25 = vld [vmem:[%s2285_s1 + $0x264] ss:$8 sps:$4 sm:$0xff]   ;;  %v1595_v27 = vld [vmem:[%s2285_s1 + $0x260] ss:$8 sps:$4 sm:$0xff]   ;;  %v1596_v28 = vld [vmem:[%s2285_s1 + $0x74] ss:$8 sps:$4 sm:$0xff]  }
   0xf   : > { %1095 = vmatpush1.bf16.msra.mxu1 %v1570_v10  ;;  %v1598_v29 = vld [vmem:[%s2285_s1 + $0x274] ss:$8 sps:$4 sm:$0xff]   ;;  %v1600_v30 = vld [vmem:[%s2285_s1 + $0x70] ss:$8 sps:$4 sm:$0xff]   ;;  %v1602_v32 = vld [vmem:[%s2285_s1 + $0x84] ss:$8 sps:$4 sm:$0xff]  }
  0x10   : > { %1177 = vmatpush1.bf16.msra.mxu0 %v1571_v11  ;;  %1096 = vmatprep.subr.bf16.mxu1 %v1572_v12  ;;  %v1601_v31 = vld [vmem:[%s2285_s1 + $0x270] ss:$8 sps:$4 sm:$0xff]   ;;  %v1604_v33 = vld [vmem:[%s2285_s1 + $0x284] ss:$8 sps:$4 sm:$0xff]   ;;  %v1606_v34 = vld [vmem:[%s2285_s1 + $0x80] ss:$8 sps:$4 sm:$0xff]  }
  0x11   : > { %1178 = vmatprep.subr.bf16.mxu0 %v1574_v13  ;;  %v1607_v35 = vld [vmem:[%s2285_s1 + $0x280] ss:$8 sps:$4 sm:$0xff]   ;;  %s2289_s13 = smov (!%p161_p3, %s1362_s13), 1  ;;  %v1608_v36 = vld [vmem:[%s2285_s1 + $0x94] ss:$8 sps:$4 sm:$0xff]   ;;  %v1778_v48 = vmov 0  }
  0x12   : > { %v1610_v37 = vld [vmem:[%s2285_s1 + $0x294] ss:$8 sps:$4 sm:$0xff]   ;;  %v1612_v38 = vld [vmem:[%s2285_s1 + $0x90] ss:$8 sps:$4 sm:$0xff]   ;;  %s1544_s17 = smul.u32 36, %s2289_s13  ;;  %s1526_s15 = sshll.u32 %s2289_s13, 3 }
  0x13   : > { %1097 = vmatpush1.bf16.msra.mxu1 %v1576_v14  ;;  %v1613_v39 = vld [vmem:[%s2285_s1 + $0x290] ss:$8 sps:$4 sm:$0xff]   ;;  %v1614_v40 = vld [vmem:[%s2285_s1 + $0xa4] ss:$8 sps:$4 sm:$0xff]   ;;  %v1618_v42 = vld [vmem:[%s2285_s1 + $0xa0] ss:$8 sps:$4 sm:$0xff]   ;;  %s170_s18 = scalar_lea.vmem %s2287_s3, %s1526_s15 }
  0x14   : > { %1179 = vmatpush1.bf16.msra.mxu0 %v1577_v15  ;;  %1098 = vmatprep.subr.bf16.mxu1 %v1578_v16  ;;  %v1616_v41 = vld [vmem:[%s2285_s1 + $0x2a4] ss:$8 sps:$4 sm:$0xff]   ;;  %v1619_v43 = vld [vmem:[%s2285_s1 + $0x2a0] ss:$8 sps:$4 sm:$0xff]   ;;  %s1949_s30 = scalar_lea.vmem %s2284_s0, %s1544_s17  ;;  %v1620_v44 = vld [vmem:[%s2285_s1 + $0xb4] ss:$8 sps:$4 sm:$0xff]  }
  0x15   : > { %1180 = vmatprep.subr.bf16.mxu0 %v1580_v17  ;;  %v1622_v45 = vld [vmem:[%s2285_s1 + $0x2b4] ss:$8 sps:$4 sm:$0xff]   ;;  %v172_v46 = vld [vmem:[%s1949_s30] sm:$0xff]  ;;  %v1624_v47 = vld [vmem:[%s2285_s1 + $0xb0] ss:$8 sps:$4 sm:$0xff]   ;;  %vm1303_vm0 = vcmask 1043456  }
  0x16   : > { %v177_v49 = vmax.bf16 %v1778_v48, %v172_v46  ;;  %v1625_v50 = vld [vmem:[%s2285_s1 + $0x2b0] ss:$8 sps:$4 sm:$0xff]   ;;  %v1626_v52 = vld [vmem:[%s2285_s1 + $0xc4] ss:$8 sps:$4 sm:$0xff]   ;;  %v1630_v57 = vld [vmem:[%s2285_s1 + $0xc0] ss:$8 sps:$4 sm:$0xff]  }
  0x17   : > { %1099 = vmatpush1.bf16.msra.mxu1 %v1582_v18  ;;  %v174_v51 = vld [vmem:[%s1949_s30 + $0x10] sm:$0xff]  ;;  %v1628_v53 = vld [vmem:[%s2285_s1 + $0x2c4] ss:$8 sps:$4 sm:$0xff]   ;;  %v1631_v58 = vld [vmem:[%s2285_s1 + $0x2c0] ss:$8 sps:$4 sm:$0xff]   ;;  %vm1304_vm1 = vcmask 261124  }
  0x18   : > { %1181 = vmatpush1.bf16.msra.mxu0 %v1583_v19  ;;  %1100 = vmatprep.subr.bf16.mxu1 %v1584_v20  ;;  %v1371_v54 = vcombine.high %v177_v49, %v177_v49  ;;  %v179_v55 = vmax.bf16 %v1778_v48, %v174_v51  ;;  %v1632_v59 = vld [vmem:[%s2285_s1 + $0xd4] ss:$8 sps:$4 sm:$0xff]   ;;  %v1636_v61 = vld [vmem:[%s2285_s1 + $0xd0] ss:$8 sps:$4 sm:$0xff]   ;;  %v1638_v63 = vld [vmem:[%s2285_s1 + $0xe4] ss:$8 sps:$4 sm:$0xff]   ;;  %v1370_v9 = vcombine.low %v177_v49, %v177_v49 }
  0x19   : > { %1182 = vmatprep.subr.bf16.mxu0 %v1586_v21  ;;  %v1634_v60 = vld [vmem:[%s2285_s1 + $0x2d4] ss:$8 sps:$4 sm:$0xff]   ;;  %v1637_v62 = vld [vmem:[%s2285_s1 + $0x2d0] ss:$8 sps:$4 sm:$0xff]   ;;  %v1640_v0 = vld [vmem:[%s2285_s1 + $0x2e4] ss:$8 sps:$4 sm:$0xff]  }
  0x1a   : > { %1122 = vmatprep.mubr.bf16.mxu1 %v1371_v54  ;;  %v1375_v56 = vcombine.high %v179_v55, %v179_v55  ;;  %v1642_v1 = vld [vmem:[%s2285_s1 + $0xe0] ss:$8 sps:$4 sm:$0xff]   ;;  %v1644_v3 = vld [vmem:[%s2285_s1 + $0xf4] ss:$8 sps:$4 sm:$0xff]   ;;  %v1648_v5 = vld [vmem:[%s2285_s1 + $0xf0] ss:$8 sps:$4 sm:$0xff]   ;;  %v1374_v10 = vcombine.low %v179_v55, %v179_v55 }
  0x1b   : > { %1101 = vmatpush1.bf16.msra.mxu1 %v1588_v22  ;;  %v1643_v2 = vld [vmem:[%s2285_s1 + $0x2e0] ss:$8 sps:$4 sm:$0xff]   ;;  %v1646_v4 = vld [vmem:[%s2285_s1 + $0x2f4] ss:$8 sps:$4 sm:$0xff]   ;;  %v1649_v6 = vld [vmem:[%s2285_s1 + $0x2f0] ss:$8 sps:$4 sm:$0xff]  }
  0x1c   : > { %1183 = vmatpush1.bf16.msra.mxu0 %v1589_v23  ;;  %1102 = vmatprep.subr.bf16.mxu1 %v1590_v24  ;;  %v1652_v7 = vld [vmem:[%s2285_s1 + $0x104] ss:$8 sps:$4 sm:$0xff]   ;;  %v1650_v11 = vld [vmem:[%s2285_s1 + $0x100] ss:$8 sps:$4 sm:$0xff]   ;;  %v1658_v13 = vld [vmem:[%s2285_s1 + $0x114] ss:$8 sps:$4 sm:$0xff]  }
  0x1d   : > { %1184 = vmatprep.subr.bf16.mxu0 %v1592_v25  ;;  %1204 = vmatprep.mubr.bf16.mxu0 %v1375_v56  ;;  %v1655_v8 = vld [vmem:[%s2285_s1 + $0x304] ss:$8 sps:$4 sm:$0xff]   ;;  %v1653_v12 = vld [vmem:[%s2285_s1 + $0x300] ss:$8 sps:$4 sm:$0xff]   ;;  %v1661_v14 = vld [vmem:[%s2285_s1 + $0x314] ss:$8 sps:$4 sm:$0xff]  }
  0x1e   : > { %v1656_v15 = vld [vmem:[%s2285_s1 + $0x110] ss:$8 sps:$4 sm:$0xff]   ;;  %v1664_v17 = vld [vmem:[%s2285_s1 + $0x124] ss:$8 sps:$4 sm:$0xff]   ;;  %v1662_v19 = vld [vmem:[%s2285_s1 + $0x120] ss:$8 sps:$4 sm:$0xff]  }
  0x1f   : > { %1103 = vmatpush1.bf16.msra.mxu1 %v1594_v26  ;;  %v1659_v16 = vld [vmem:[%s2285_s1 + $0x310] ss:$8 sps:$4 sm:$0xff]   ;;  %v1667_v18 = vld [vmem:[%s2285_s1 + $0x324] ss:$8 sps:$4 sm:$0xff]   ;;  %v1665_v20 = vld [vmem:[%s2285_s1 + $0x320] ss:$8 sps:$4 sm:$0xff]  }
  0x20   : > { %1185 = vmatpush1.bf16.msra.mxu0 %v1595_v27  ;;  %1104 = vmatprep.subr.bf16.mxu1 %v1596_v28  ;;  %v1670_v21 = vld [vmem:[%s2285_s1 + $0x134] ss:$8 sps:$4 sm:$0xff]   ;;  %v1668_v23 = vld [vmem:[%s2285_s1 + $0x130] ss:$8 sps:$4 sm:$0xff]   ;;  %v1676_v25 = vld [vmem:[%s2285_s1 + $0x144] ss:$8 sps:$4 sm:$0xff]  }
  0x21   : > { %1186 = vmatprep.subr.bf16.mxu0 %v1598_v29  ;;  %v1673_v22 = vld [vmem:[%s2285_s1 + $0x334] ss:$8 sps:$4 sm:$0xff]   ;;  %v1671_v24 = vld [vmem:[%s2285_s1 + $0x330] ss:$8 sps:$4 sm:$0xff]   ;;  %v1679_v26 = vld [vmem:[%s2285_s1 + $0x344] ss:$8 sps:$4 sm:$0xff]  }
  0x22   : > { %v1674_v27 = vld [vmem:[%s2285_s1 + $0x140] ss:$8 sps:$4 sm:$0xff]   ;;  %v1682_v29 = vld [vmem:[%s2285_s1 + $0x154] ss:$8 sps:$4 sm:$0xff]   ;;  %v1695_v46 = vld [vmem:[%s2285_s1 + $0x370] ss:$8 sps:$4 sm:$0xff]  }
  0x23   : > { %1105 = vmatpush1.bf16.msra.mxu1 %v1600_v30  ;;  %v1677_v28 = vld [vmem:[%s2285_s1 + $0x340] ss:$8 sps:$4 sm:$0xff]   ;;  %v1685_v30 = vld [vmem:[%s2285_s1 + $0x354] ss:$8 sps:$4 sm:$0xff]   ;;  %v1703_v49 = vld [vmem:[%s2285_s1 + $0x384] ss:$8 sps:$4 sm:$0xff]  }
  0x24   : > { %1187 = vmatpush1.bf16.msra.mxu0 %v1601_v31  ;;  %1106 = vmatprep.subr.bf16.mxu1 %v1602_v32  ;;  %v1680_v31 = vld [vmem:[%s2285_s1 + $0x150] ss:$8 sps:$4 sm:$0xff]   ;;  %v1701_v51 = vld [vmem:[%s2285_s1 + $0x380] ss:$8 sps:$4 sm:$0xff]   ;;  %v1712_v56 = vld [vmem:[%s2285_s1 + $0x1a4] ss:$8 sps:$4 sm:$0xff]  }
  0x25   : > { %1188 = vmatprep.subr.bf16.mxu0 %v1604_v33  ;;  %v1683_v32 = vld [vmem:[%s2285_s1 + $0x350] ss:$8 sps:$4 sm:$0xff]   ;;  %v1688_v33 = vld [vmem:[%s2285_s1 + $0x164] ss:$8 sps:$4 sm:$0xff]   ;;  %vm1305_vm2 = vmor %vm1304_vm1, %vm1303_vm0 }
  0x26   : > { %v1704_v54 = vld [vmem:[%s2285_s1 + $0x190] ss:$8 sps:$4 sm:$0xff]  }
  0x27   : > { %1107 = vmatpush1.bf16.msra.mxu1 %v1606_v34  ;;  %v1691_v34 = vld [vmem:[%s2285_s1 + $0x364] ss:$8 sps:$4 sm:$0xff]   ;;  %v1707_v55 = vld [vmem:[%s2285_s1 + $0x390] ss:$8 sps:$4 sm:$0xff]  }
  0x28   : > { %1189 = vmatpush1.bf16.msra.mxu0 %v1607_v35  ;;  %1108 = vmatprep.subr.bf16.mxu1 %v1608_v36  ;;  %v173_v35 = vld [vmem:[%s1949_s30 + $0x8] sm:$0xff]  ;;  %v175_v36 = vld [vmem:[%s1949_s30 + $0x18] sm:$0xff] }
  0x29   : > { %1190 = vmatprep.subr.bf16.mxu0 %v1610_v37  ;;  %v1686_v37 = vld [vmem:[%s2285_s1 + $0x160] ss:$8 sps:$4 sm:$0xff]  }
  0x2b   : > { %1109 = vmatpush1.bf16.msra.mxu1 %v1612_v38  ;;  %v1689_v38 = vld [vmem:[%s2285_s1 + $0x360] ss:$8 sps:$4 sm:$0xff]  }
  0x2c   : > { %1191 = vmatpush1.bf16.msra.mxu0 %v1613_v39  ;;  %1110 = vmatprep.subr.bf16.mxu1 %v1614_v40  ;;  %v2102_v39 = vmax.bf16 %v1778_v48, %v173_v35  ;;  %v2105_v40 = vmax.bf16 %v1778_v48, %v175_v36  ;;  %v1767_v35 = vld [vmem:[%s2285_s1 + $0x470] ss:$8 sps:$4 sm:$0xff]  }
  0x2d   : > { %1192 = vmatprep.subr.bf16.mxu0 %v1616_v41  ;;  %v1694_v41 = vld [vmem:[%s2285_s1 + $0x174] ss:$8 sps:$4 sm:$0xff]  }
  0x2f   : > { %1111 = vmatpush1.bf16.msra.mxu1 %v1618_v42  ;;  %v1697_v42 = vld [vmem:[%s2285_s1 + $0x374] ss:$8 sps:$4 sm:$0xff]  }
  0x30   : > { %1193 = vmatpush1.bf16.msra.mxu0 %v1619_v43  ;;  %1112 = vmatprep.subr.bf16.mxu1 %v1620_v44  ;;  %v1373_v43 = vcombine.high %v2102_v39, %v2102_v39  ;;  %v1377_v44 = vcombine.high %v2105_v40, %v2105_v40 }
  0x31   : > { %1194 = vmatprep.subr.bf16.mxu0 %v1622_v45  ;;  %v1692_v45 = vld [vmem:[%s2285_s1 + $0x170] ss:$8 sps:$4 sm:$0xff]  }
  0x33   : > { %1113 = vmatpush1.bf16.msra.mxu1 %v1624_v47  ;;  %v1700_v47 = vld [vmem:[%s2285_s1 + $0x184] ss:$8 sps:$4 sm:$0xff]  }
  0x34   : > { %1195 = vmatpush1.bf16.msra.mxu0 %v1625_v50  ;;  %1114 = vmatprep.subr.bf16.mxu1 %v1626_v52  ;;  %v1698_v50 = vld [vmem:[%s2285_s1 + $0x180] ss:$8 sps:$4 sm:$0xff]   ;;  %v1706_v52 = vld [vmem:[%s2285_s1 + $0x194] ss:$8 sps:$4 sm:$0xff]  }
  0x35   : > { %1196 = vmatprep.subr.bf16.mxu0 %v1628_v53  ;;  %v1709_v53 = vld [vmem:[%s2285_s1 + $0x394] ss:$8 sps:$4 sm:$0xff]  }
  0x37   : > { %1115 = vmatpush1.bf16.msra.mxu1 %v1630_v57  ;;  %v1715_v57 = vld [vmem:[%s2285_s1 + $0x3a4] ss:$8 sps:$4 sm:$0xff]  }
  0x38   : > { %1197 = vmatpush1.bf16.msra.mxu0 %v1631_v58  ;;  %1116 = vmatprep.subr.bf16.mxu1 %v1632_v59  ;;  %v1710_v58 = vld [vmem:[%s2285_s1 + $0x1a0] ss:$8 sps:$4 sm:$0xff]  }
  0x39   : > { %1198 = vmatprep.subr.bf16.mxu0 %v1634_v60  ;;  %v1713_v59 = vld [vmem:[%s2285_s1 + $0x3a0] ss:$8 sps:$4 sm:$0xff]   ;;  %v1718_v60 = vld [vmem:[%s2285_s1 + $0x1b4] ss:$8 sps:$4 sm:$0xff]  }
  0x3b   : > { %1117 = vmatpush1.bf16.msra.mxu1 %v1636_v61  ;;  %v1721_v61 = vld [vmem:[%s2285_s1 + $0x3b4] ss:$8 sps:$4 sm:$0xff]  }
  0x3c   : > { %1199 = vmatpush1.bf16.msra.mxu0 %v1637_v62  ;;  %1118 = vmatprep.subr.bf16.mxu1 %v1638_v63  ;;  %v1716_v62 = vld [vmem:[%s2285_s1 + $0x1b0] ss:$8 sps:$4 sm:$0xff]  }
  0x3d   : > { %1200 = vmatprep.subr.bf16.mxu0 %v1640_v0  ;;  %v1719_v63 = vld [vmem:[%s2285_s1 + $0x3b0] ss:$8 sps:$4 sm:$0xff]   ;;  %v1724_v0 = vld [vmem:[%s2285_s1 + $0x1c4] ss:$8 sps:$4 sm:$0xff]  }
  0x3f   : > { %1119 = vmatpush1.bf16.msra.mxu1 %v1642_v1  ;;  %v1727_v1 = vld [vmem:[%s2285_s1 + $0x3c4] ss:$8 sps:$4 sm:$0xff]  }
  0x40   : > { %1201 = vmatpush1.bf16.msra.mxu0 %v1643_v2  ;;  %1120 = vmatprep.subr.bf16.mxu1 %v1644_v3  ;;  %v1722_v2 = vld [vmem:[%s2285_s1 + $0x1c0] ss:$8 sps:$4 sm:$0xff]  }
  0x41   : > { %1202 = vmatprep.subr.bf16.mxu0 %v1646_v4  ;;  %v1725_v3 = vld [vmem:[%s2285_s1 + $0x3c0] ss:$8 sps:$4 sm:$0xff]   ;;  %v1730_v4 = vld [vmem:[%s2285_s1 + $0x1d4] ss:$8 sps:$4 sm:$0xff]  }
  0x43   : > { %1121 = vmatpush1.bf16.msra.mxu1 %v1648_v5  ;;  %v1733_v5 = vld [vmem:[%s2285_s1 + $0x3d4] ss:$8 sps:$4 sm:$0xff]  }
  0x44   : > { %1203 = vmatpush1.bf16.msra.mxu0 %v1649_v6  ;;  %1131 = vmatprep.subr.bf16.mxu1 %v1652_v7  ;;  %v1728_v6 = vld [vmem:[%s2285_s1 + $0x1d0] ss:$8 sps:$4 sm:$0xff]  }
  0x45   : > { %1213 = vmatprep.subr.bf16.mxu0 %v1655_v8  ;;  %v1731_v7 = vld [vmem:[%s2285_s1 + $0x3d0] ss:$8 sps:$4 sm:$0xff]   ;;  %v1736_v8 = vld [vmem:[%s2285_s1 + $0x1e4] ss:$8 sps:$4 sm:$0xff]  }
  0x46   : > { %1123 = vmatmul.mubr.bf16.vlgmr.msra.gmra.mrb[0].mxu1 %v1370_v9  ;;  %v1739_v9 = vld [vmem:[%s2285_s1 + $0x3e4] ss:$8 sps:$4 sm:$0xff]  }
  0x47   : > { %1205 = vmatmul.mubr.bf16.vlgmr.msra.gmra.mrb[0].mxu0 %v1374_v10  ;;  %1132 = vmatpush1.bf16.msra.mxu1 %v1650_v11  ;;  %v1734_v10 = vld [vmem:[%s2285_s1 + $0x1e0] ss:$8 sps:$4 sm:$0xff]  }
  0x48   : > { %1214 = vmatpush1.bf16.msra.mxu0 %v1653_v12  ;;  %1133 = vmatprep.subr.bf16.mxu1 %v1658_v13  ;;  %v1737_v11 = vld [vmem:[%s2285_s1 + $0x3e0] ss:$8 sps:$4 sm:$0xff]   ;;  %v1742_v12 = vld [vmem:[%s2285_s1 + $0x1f4] ss:$8 sps:$4 sm:$0xff]  }
  0x49   : > { %1215 = vmatprep.subr.bf16.mxu0 %v1661_v14  ;;  %1163 = vmatprep.mubr.bf16.mxu1 %v1373_v43  ;;  %v1745_v13 = vld [vmem:[%s2285_s1 + $0x3f4] ss:$8 sps:$4 sm:$0xff]   ;;  %v1740_v14 = vld [vmem:[%s2285_s1 + $0x1f0] ss:$8 sps:$4 sm:$0xff]  }
  0x4a   : > { %1245 = vmatprep.mubr.bf16.mxu0 %v1377_v44 }
  0x4b   : > { %1134 = vmatpush1.bf16.msra.mxu1 %v1656_v15  ;;  %v1743_v15 = vld [vmem:[%s2285_s1 + $0x3f0] ss:$8 sps:$4 sm:$0xff]  }
  0x4c   : > { %1216 = vmatpush1.bf16.msra.mxu0 %v1659_v16  ;;  %1135 = vmatprep.subr.bf16.mxu1 %v1664_v17  ;;  %v1748_v16 = vld [vmem:[%s2285_s1 + $0x404] ss:$8 sps:$4 sm:$0xff]   ;;  %v1372_v17 = vcombine.low %v2102_v39, %v2102_v39 }
  0x4d   : > { %1217 = vmatprep.subr.bf16.mxu0 %v1667_v18  ;;  %v1376_v18 = vcombine.low %v2105_v40, %v2105_v40 }
  0x4f   : > { %1136 = vmatpush1.bf16.msra.mxu1 %v1662_v19  ;;  %v1746_v19 = vld [vmem:[%s2285_s1 + $0x400] ss:$8 sps:$4 sm:$0xff]  }
  0x50   : > { %1218 = vmatpush1.bf16.msra.mxu0 %v1665_v20  ;;  %1137 = vmatprep.subr.bf16.mxu1 %v1670_v21  ;;  %v1751_v20 = vld [vmem:[%s2285_s1 + $0x414] ss:$8 sps:$4 sm:$0xff]   ;;  %v1749_v21 = vld [vmem:[%s2285_s1 + $0x410] ss:$8 sps:$4 sm:$0xff]  }
  0x51   : > { %1219 = vmatprep.subr.bf16.mxu0 %v1673_v22  ;;  %v1754_v22 = vld [vmem:[%s2285_s1 + $0x424] ss:$8 sps:$4 sm:$0xff]  }
  0x53   : > { %1138 = vmatpush1.bf16.msra.mxu1 %v1668_v23  ;;  %v1752_v23 = vld [vmem:[%s2285_s1 + $0x420] ss:$8 sps:$4 sm:$0xff]  }
  0x54   : > { %1220 = vmatpush1.bf16.msra.mxu0 %v1671_v24  ;;  %1139 = vmatprep.subr.bf16.mxu1 %v1676_v25  ;;  %v1757_v24 = vld [vmem:[%s2285_s1 + $0x434] ss:$8 sps:$4 sm:$0xff]   ;;  %v1755_v25 = vld [vmem:[%s2285_s1 + $0x430] ss:$8 sps:$4 sm:$0xff]  }
  0x55   : > { %1221 = vmatprep.subr.bf16.mxu0 %v1679_v26  ;;  %v1760_v26 = vld [vmem:[%s2285_s1 + $0x444] ss:$8 sps:$4 sm:$0xff]  }
  0x57   : > { %1140 = vmatpush1.bf16.msra.mxu1 %v1674_v27  ;;  %v1758_v27 = vld [vmem:[%s2285_s1 + $0x440] ss:$8 sps:$4 sm:$0xff]  }
  0x58   : > { %1222 = vmatpush1.bf16.msra.mxu0 %v1677_v28  ;;  %1141 = vmatprep.subr.bf16.mxu1 %v1682_v29  ;;  %v1763_v28 = vld [vmem:[%s2285_s1 + $0x454] ss:$8 sps:$4 sm:$0xff]   ;;  %v1761_v29 = vld [vmem:[%s2285_s1 + $0x450] ss:$8 sps:$4 sm:$0xff]  }
  0x59   : > { %1223 = vmatprep.subr.bf16.mxu0 %v1685_v30  ;;  %v1766_v30 = vld [vmem:[%s2285_s1 + $0x464] ss:$8 sps:$4 sm:$0xff]  }
  0x5b   : > { %1142 = vmatpush1.bf16.msra.mxu1 %v1680_v31  ;;  %v1764_v31 = vld [vmem:[%s2285_s1 + $0x460] ss:$8 sps:$4 sm:$0xff]  }
  0x5c   : > { %1224 = vmatpush1.bf16.msra.mxu0 %v1683_v32  ;;  %1143 = vmatprep.subr.bf16.mxu1 %v1688_v33  ;;  %v176_v32 = vld [vmem:[%s1949_s30 + $0x20] sm:$0xf]  ;;  %v1769_v33 = vld [vmem:[%s2285_s1 + $0x474] ss:$8 sps:$4 sm:$0xff]  }
  0x5d   : > { %1225 = vmatprep.subr.bf16.mxu0 %v1691_v34  ;;  %v181_v34 = vmax.bf16 %v1778_v48, %v176_v32 }
  0x5f   : > { %1144 = vmatpush1.bf16.msra.mxu1 %v1686_v37  ;;  %v1378_v36 = vcombine.low %v181_v34, %v181_v34 }
  0x60   : > { %1226 = vmatpush1.bf16.msra.mxu0 %v1689_v38  ;;  %1145 = vmatprep.subr.bf16.mxu1 %v1694_v41  ;;  %v328_v41 = vlaneseq }
  0x61   : > { %1227 = vmatprep.subr.bf16.mxu0 %v1697_v42 }
  0x62   : > { %v329_v42 = vshrl.u32 %v328_v41, 7 }
  0x63   : > { %1146 = vmatpush1.bf16.msra.mxu1 %v1692_v45 }
  0x64   : > { %1228 = vmatpush1.bf16.msra.mxu0 %v1695_v46  ;;  %1147 = vmatprep.subr.bf16.mxu1 %v1700_v47  ;;  %v330_v43 = vsub.s32 0, %v329_v42  ;;  %v334_v44 = vsub.s32 1, %v329_v42 }
  0x65   : > { %1229 = vmatprep.subr.bf16.mxu0 %v1703_v49 }
  0x67   : > { %1148 = vmatpush1.bf16.msra.mxu1 %v1698_v50 }
  0x68   : > { %1230 = vmatpush1.bf16.msra.mxu0 %v1701_v51  ;;  %1149 = vmatprep.subr.bf16.mxu1 %v1706_v52 }
  0x69   : > { %1231 = vmatprep.subr.bf16.mxu0 %v1709_v53 }
  0x6b   : > { %1150 = vmatpush1.bf16.msra.mxu1 %v1704_v54 }
  0x6c   : > { %1232 = vmatpush1.bf16.msra.mxu0 %v1707_v55  ;;  %1151 = vmatprep.subr.bf16.mxu1 %v1712_v56 }
  0x6d   : > { %1233 = vmatprep.subr.bf16.mxu0 %v1715_v57 }
  0x6f   : > { %1152 = vmatpush1.bf16.msra.mxu1 %v1710_v58 }
  0x70   : > { %1234 = vmatpush1.bf16.msra.mxu0 %v1713_v59  ;;  %1153 = vmatprep.subr.bf16.mxu1 %v1718_v60 }
  0x71   : > { %1235 = vmatprep.subr.bf16.mxu0 %v1721_v61 }
  0x73   : > { %1154 = vmatpush1.bf16.msra.mxu1 %v1716_v62 }
  0x74   : > { %1236 = vmatpush1.bf16.msra.mxu0 %v1719_v63  ;;  %1155 = vmatprep.subr.bf16.mxu1 %v1724_v0 }
  0x75   : > { %1237 = vmatprep.subr.bf16.mxu0 %v1727_v1 }
  0x77   : > { %1156 = vmatpush1.bf16.msra.mxu1 %v1722_v2 }
  0x78   : > { %1238 = vmatpush1.bf16.msra.mxu0 %v1725_v3  ;;  %1157 = vmatprep.subr.bf16.mxu1 %v1730_v4 }
  0x79   : > { %1239 = vmatprep.subr.bf16.mxu0 %v1733_v5 }
  0x7b   : > { %1158 = vmatpush1.bf16.msra.mxu1 %v1728_v6 }
  0x7c   : > { %1240 = vmatpush1.bf16.msra.mxu0 %v1731_v7  ;;  %1159 = vmatprep.subr.bf16.mxu1 %v1736_v8 }
  0x7d   : > { %1241 = vmatprep.subr.bf16.mxu0 %v1739_v9 }
  0x7f   : > { %1160 = vmatpush1.bf16.msra.mxu1 %v1734_v10 }
  0x80   : > { %1242 = vmatpush1.bf16.msra.mxu0 %v1737_v11  ;;  %1161 = vmatprep.subr.bf16.mxu1 %v1742_v12 }
  0x81   : > { %1243 = vmatprep.subr.bf16.mxu0 %v1745_v13 }
  0x83   : > { %1162 = vmatpush1.bf16.msra.mxu1 %v1740_v14 }
  0x84   : > { %1244 = vmatpush1.bf16.msra.mxu0 %v1743_v15 }
  0x85   : > { %1254 = vmatprep.subr.bf16.mxu0 %v1748_v16 }
  0x86   : > { %1164 = vmatmul.mubr.bf16.vlgmr.msra.gmra.mrb[0].mxu1 %v1372_v17 }
  0x87   : > { %1246 = vmatmul.mubr.bf16.vlgmr.msra.gmra.mrb[0].mxu0 %v1376_v18 }
  0x88   : > { %1255 = vmatpush1.bf16.msra.mxu0 %v1746_v19  ;;  %1286 = vmatprep.mubr.bf16.mxu0 %v1778_v48  ;;  %v326_v48 = vld [vmem:[%s2286_s2] sm:$0x3] }
  0x89   : > { %1256 = vmatprep.subr.bf16.mxu0 %v1751_v20  ;;  %v331_v45 = vrot.slane %v326_v48, %v330_v43  ;;  %v335_v46 = vrot.slane %v326_v48, %v334_v44 }
  0x8c   : > { %1257 = vmatpush1.bf16.msra.mxu0 %v1749_v21 }
  0x8d   : > { %1258 = vmatprep.subr.bf16.mxu0 %v1754_v22 }
  0x90   : > { %1259 = vmatpush1.bf16.msra.mxu0 %v1752_v23 }
  0x91   : > { %1260 = vmatprep.subr.bf16.mxu0 %v1757_v24 }
  0x94   : > { %1261 = vmatpush1.bf16.msra.mxu0 %v1755_v25 }
  0x95   : > { %1262 = vmatprep.subr.bf16.mxu0 %v1760_v26 }
  0x98   : > { %1263 = vmatpush1.bf16.msra.mxu0 %v1758_v27 }
  0x99   : > { %1264 = vmatprep.subr.bf16.mxu0 %v1763_v28 }
  0x9c   : > { %1265 = vmatpush1.bf16.msra.mxu0 %v1761_v29 }
  0x9d   : > { %1266 = vmatprep.subr.bf16.mxu0 %v1766_v30 }
  0xa0   : > { %1267 = vmatpush1.bf16.msra.mxu0 %v1764_v31 }
  0xa1   : > { %1268 = vmatprep.subr.bf16.mxu0 %v1769_v33 }
  0xa4   : > { %1269 = vmatpush1.bf16.msra.mxu0 %v1767_v35 }
  0xa7   : > { %1287 = vmatmul.mubr.bf16.vlgmr.msra.gmra.mrb[0].mxu0 %v1378_v36 }
 0x159   : > { %v1165_v37 = vpop.f32.mrb[0].mxu1 }
 0x15a   : > { %v1167_v38 = vpop.f32.mrb[1].mxu1  ;;  %v1528_v47 = vadd.f32 %v1165_v37, %v331_v45 }
 0x15b   : > { %v1169_v39 = vpop.f32.mrb[2].mxu1  ;;  %v1530_v49 = vadd.f32 %v1167_v38, %v335_v46 }
 0x15c   : > { %v1170_v40 = vpop.f32.mrb[3].mxu1 }
 0x17a   : > { %v1288_v50 = vpop.f32.mrb[0].mxu0 }
 0x17b   : > { %v1529_v51 = vadd.f32 %v1528_v47, %v1288_v50  ;;  %v1290_v52 = vpop.f32.mrb[1].mxu0 }
 0x17c   : > { %v1531_v53 = vadd.f32 %v1530_v49, %v1290_v52  ;;  %v1292_v54 = vpop.f32.mrb[2].mxu0 }
 0x17d   : > { %v1293_v55 = vpop.f32.mrb[3].mxu0 }
 0x17e   : > { %v1527_v56 = vpack.c.bf16 %v1531_v53, %v1529_v51 }
 0x180   : > { %1306 = vst.msk [vmem:[%s170_s18] sm:$0xff] %vm1305_vm2, %v1527_v56 }
 0x181 PF: > { %s13_s12 = sadd.s32 1, %s1776_s12  }
 0x182   : > { %p10_p4 = scmp.ge.s32.totalorder %s13_s12, 4  }
 0x184   :  { %12 = sbr.rel (!%p10_p4) target bundleno = 1 (0x1), region = 62 }

// kernel: modeling_forward.42
= control target key start
LH: loop header
LB: loop body
LE: loop exit
PB: predicated region body
PF: predicated region fallthrough
CT: control target
= control target key end

     0   :  { %s701_s15 = smov 0   ;;  %s703_s16 = smov 0   ;;  %s837_s0 = inlined_call_operand.vmem [shape: bf16[9,16,160], index: 0, kind: input, shape index: {}]   ;;  %s838_s1 = inlined_call_operand.vmem [shape: bf16[16,128], index: 1, kind: input, shape index: {}]   ;;  %s839_s2 = inlined_call_operand.vmem [shape: bf16[128,160], index: 2, kind: input, shape index: {}]   ;;  %s840_s3 = inlined_call_operand.vmem [shape: f32[1,160], index: 3, kind: input, shape index: {}]   ;;  %s841_s4 = inlined_call_operand.vmem [shape: bf16[16,160], index: 4, kind: output, shape index: {}]  }
   0x1   :  { %s705_s17 = smov 0  }
   0x2 LB: > { %s568_s18 = sadd.s32 4294967295, %s673_s17   ;;  %s718_s19 = sadd.s32 1, %s673_s17   ;;  %s673_s17 = sphi %s705_s17, %s846_s17   ;;  %s669_s16 = sphi %s703_s16, %s845_s16   ;;  %s665_s15 = sphi %s701_s15, %s844_s15  }
   0x3   : > { %s18_s20 = ssub.s32 %s673_s17, %s718_s19  ;;  %s21_s21 = sadd.s32 1, %s669_s16 }
   0x4   : > { %p19_p0 = scmp.eq.s32.totalorder %s18_s20, 0  ;;  %p28_p1 = scmp.ne.s32.totalorder %s669_s16, %s665_s15 }
   0x5   : > { %p29_p2 = scmp.eq.s32.totalorder %s673_s17, 0  ;;  %p571_p4 = scmp.ge.s32.totalorder %s673_s17, 2 }
   0x6   : > { %s727_s22 = scalar_select %p19_p0, %s669_s16, %s21_s21  }
   0x7   : > { %p30_p3 = por %p29_p2, %p28_p1  ;;  %154 = sbr.rel (%p571_p4) target bundleno = 23 (0x17), region = 24 }
   0xe   : > { %157 = sbr.rel (!%p30_p3) target bundleno = 23 (0x17), region = 28  ;;  %s159_s23 = sand.u32 (%p30_p3), 1, %s669_s16  }
   0xf   : > { %s597_s24 = sshll.u32 (%p30_p3), %s673_s17, 3  ;;  %s600_s25 = smul.u32 (%p30_p3), 72, %s159_s23 }
  0x10   : > { %s164_s28 = scalar_lea.vmem (%p30_p3), %s837_s0, %s597_s24 }
  0x11   : > { %v208_v0 = vld [vmem:[%s164_s28] sm:$0xff] (%p30_p3)  ;;  %v210_v1 = vld [vmem:[%s164_s28 + $0x10] sm:$0xff] (%p30_p3)  ;;  %s161_s29 = scalar_lea.vmem (%p30_p3), [#allocation2], %s600_s25 }
  0x12   : > { %v212_v2 = vld [vmem:[%s164_s28 + $0x20] sm:$0xff] (%p30_p3)  ;;  %v214_v3 = vld [vmem:[%s164_s28 + $0x30] sm:$0xff] (%p30_p3)  ;;  %209 = vst [vmem:[%s161_s29] sm:$0xff] (%p30_p3), %v208_v0  ;;  %211 = vst [vmem:[%s161_s29 + $0x8] sm:$0xff] (%p30_p3), %v210_v1 }
  0x13   : > { %v216_v4 = vld [vmem:[%s164_s28 + $0x40] sm:$0xff] (%p30_p3)  ;;  %v218_v5 = vld [vmem:[%s164_s28 + $0x50] sm:$0xff] (%p30_p3)  ;;  %213 = vst [vmem:[%s161_s29 + $0x10] sm:$0xff] (%p30_p3), %v212_v2  ;;  %215 = vst [vmem:[%s161_s29 + $0x18] sm:$0xff] (%p30_p3), %v214_v3 }
  0x14   : > { %217 = vst [vmem:[%s161_s29 + $0x20] sm:$0xff] (%p30_p3), %v216_v4  ;;  %219 = vst [vmem:[%s161_s29 + $0x28] sm:$0xff] (%p30_p3), %v218_v5  ;;  %v220_v6 = vld [vmem:[%s164_s28 + $0x60] sm:$0xff] (%p30_p3)  ;;  %v222_v7 = vld [vmem:[%s164_s28 + $0x70] sm:$0xff] (%p30_p3) }
  0x15   : > { %v224_v8 = vld [vmem:[%s164_s28 + $0x80] sm:$0xff]  ;;  %221 = vst [vmem:[%s161_s29 + $0x30] sm:$0xff] %v220_v6  ;;  %223 = vst [vmem:[%s161_s29 + $0x38] sm:$0xff] %v222_v7 }
  0x16   : > { %225 = vst [vmem:[%s161_s29 + $0x40] sm:$0xff] %v224_v8 }
  0x17 PF: > { %p574_p5 = scmp.ge.s32.totalorder %s673_s17, 1  ;;  %p237_p6 = scmp.lt.s32.totalorder %s673_s17, 3 }
  0x19   : > { %p238_p7 = pnand %p574_p5, %p237_p6 }
  0x1a   : > { %v627_v9 = vld [vmem:[%s839_s2 + $0x4] ss:$8 sps:$4 sm:$0xff] (!%p238_p7)   ;;  %v629_v10 = vld [vmem:[%s839_s2] ss:$8 sps:$4 sm:$0xff] (!%p238_p7)   ;;  %v675_v11 = vmov (!%p238_p7), 0   ;;  %p273_p8 = scmp.lt.s32.totalorder (!%p238_p7), %s568_s18, 1  ;;  %v353_v47 = vlaneseq (!%p238_p7) }
  0x1b   : > { %241 = sbr.rel (%p238_p7) target bundleno = 279 (0x117), region = 70  ;;  %475 = vmatprep.mubr.bf16.mxu0 (!%p238_p7), %v675_v11  ;;  %443 = vmatprep.subr.bf16.mxu0 (!%p238_p7), %v627_v9  ;;  %v630_v12 = vld [vmem:[%s839_s2 + $0x14] ss:$8 sps:$4 sm:$0xff] (!%p238_p7)   ;;  %v632_v13 = vld [vmem:[%s839_s2 + $0x10] ss:$8 sps:$4 sm:$0xff] (!%p238_p7)   ;;  %s244_s25 = sand.u32 (!%p238_p7), 1, %s665_s15  }
  0x1c   : > { %444 = vmatpush1.bf16.msra.mxu0 (!%p238_p7), %v629_v10  ;;  %v633_v14 = vld [vmem:[%s839_s2 + $0x24] ss:$8 sps:$4 sm:$0xff] (!%p238_p7)   ;;  %v635_v15 = vld [vmem:[%s839_s2 + $0x20] ss:$8 sps:$4 sm:$0xff] (!%p238_p7)   ;;  %v636_v16 = vld [vmem:[%s839_s2 + $0x34] ss:$8 sps:$4 sm:$0xff] (!%p238_p7)  }
  0x1d   : > { %445 = vmatprep.subr.bf16.mxu0 (!%p238_p7), %v630_v12  ;;  %v638_v17 = vld [vmem:[%s839_s2 + $0x30] ss:$8 sps:$4 sm:$0xff] (!%p238_p7)   ;;  %v639_v18 = vld [vmem:[%s839_s2 + $0x44] ss:$8 sps:$4 sm:$0xff] (!%p238_p7)   ;;  %v641_v19 = vld [vmem:[%s839_s2 + $0x40] ss:$8 sps:$4 sm:$0xff] (!%p238_p7)  }
  0x1e   : > { %v642_v20 = vld [vmem:[%s839_s2 + $0x54] ss:$8 sps:$4 sm:$0xff] (!%p238_p7)   ;;  %v644_v21 = vld [vmem:[%s839_s2 + $0x50] ss:$8 sps:$4 sm:$0xff] (!%p238_p7)   ;;  %v645_v22 = vld [vmem:[%s839_s2 + $0x64] ss:$8 sps:$4 sm:$0xff] (!%p238_p7)  }
  0x1f   : > { %v647_v23 = vld [vmem:[%s839_s2 + $0x60] ss:$8 sps:$4 sm:$0xff] (!%p238_p7)   ;;  %v648_v24 = vld [vmem:[%s839_s2 + $0x74] ss:$8 sps:$4 sm:$0xff] (!%p238_p7)   ;;  %v650_v25 = vld [vmem:[%s839_s2 + $0x70] ss:$8 sps:$4 sm:$0xff] (!%p238_p7)  }
  0x20   : > { %446 = vmatpush1.bf16.msra.mxu0 (!%p238_p7), %v632_v13  ;;  %s601_s26 = smul.u32 (!%p238_p7), 72, %s244_s25  ;;  %vm293_vm0 = vcmask (!%p238_p7), 1043456   ;;  %vm294_vm1 = vcmask (!%p238_p7), 261124   ;;  %v354_v52 = vshrl.u32 (!%p238_p7), %v353_v47, 7  ;;  %v351_v56 = vld [vmem:[%s840_s3] sm:$0x3] (!%p238_p7) }
  0x21   : > { %447 = vmatprep.subr.bf16.mxu0 (!%p238_p7), %v633_v14  ;;  %vm796_vm2 = vmor (!%p238_p7), %vm294_vm1, %vm293_vm0 }
  0x22   : > { %s848_s18 = smov (!%p273_p8, %s568_s18), 1  ;;  %s246_s27 = scalar_lea.vmem [#allocation2], %s601_s26  ;;  %v355_v55 = vsub.s32 0, %v354_v52  ;;  %v359_v57 = vsub.s32 1, %v354_v52 }
  0x23   : > { %s575_s14 = sshll.u32 %s848_s18, 2  ;;  %v284_v27 = vld [vmem:[%s246_s27] sm:$0xff]  ;;  %v285_v30 = vld [vmem:[%s246_s27 + $0x8] sm:$0xff]  ;;  %v286_v31 = vld [vmem:[%s246_s27 + $0x10] sm:$0xff]  ;;  %s598_s29 = sshll.u32 %s848_s18, 3 }
  0x24   : > { %448 = vmatpush1.bf16.msra.mxu0 %v635_v15  ;;  %s276_s24 = scalar_lea.vmem %s838_s1, %s575_s14  ;;  %v288_v28 = vld [vmem:[%s246_s27 + $0x20] sm:$0xff]  ;;  %v287_v32 = vld [vmem:[%s246_s27 + $0x18] sm:$0xff]  ;;  %v289_v33 = vld [vmem:[%s246_s27 + $0x28] sm:$0xff]  ;;  %v298_v34 = vsel %vm796_vm2, %v284_v27, 4286644096  ;;  %v356_v59 = vrot.slane %v351_v56, %v355_v55  ;;  %v360_v60 = vrot.slane %v351_v56, %v359_v57  ;;  %s281_s6 = scalar_lea.vmem %s841_s4, %s598_s29 }
  0x25   : > { %449 = vmatprep.subr.bf16.mxu0 %v636_v16  ;;  %v334_v26 = vld [vmem:[%s276_s24] sm:$0xf]  ;;  %v310_v35 = vsel %vm796_vm2, %v288_v28, 4286644096  ;;  %v290_v36 = vld [vmem:[%s246_s27 + $0x30] sm:$0xff] }
  0x26   : > { %v291_v37 = vld [vmem:[%s246_s27 + $0x38] sm:$0xff]  ;;  %v292_v38 = vld [vmem:[%s246_s27 + $0x40] sm:$0xff]  ;;  %v301_v39 = vsel %vm796_vm2, %v285_v30, 4286644096  ;;  %v304_v40 = vsel %vm796_vm2, %v286_v31, 4286644096  ;;  %v312_v42 = vmax.bf16 %v310_v35, %v298_v34 }
  0x27   : > { %v307_v41 = vsel %vm796_vm2, %v287_v32, 4286644096  ;;  %v314_v43 = vsel %vm796_vm2, %v289_v33, 4286644096  ;;  %v318_v44 = vsel %vm796_vm2, %v290_v36, 4286644096 }
  0x28   : > { %450 = vmatpush1.bf16.msra.mxu0 %v638_v17  ;;  %v322_v45 = vsel %vm796_vm2, %v291_v37, 4286644096  ;;  %v326_v46 = vsel %vm796_vm2, %v292_v38, 4286644096  ;;  %v316_v48 = vmax.bf16 %v314_v43, %v301_v39  ;;  %v320_v49 = vmax.bf16 %v318_v44, %v304_v40 }
  0x29   : > { %451 = vmatprep.subr.bf16.mxu0 %v639_v18  ;;  %v324_v50 = vmax.bf16 %v322_v45, %v307_v41  ;;  %v328_v51 = vmax.bf16 %v326_v46, %v312_v42 }
  0x2b   : > { %v329_v53 = vmax.bf16 %v328_v51, %v316_v48  ;;  %v330_v54 = vmax.bf16 %v324_v50, %v320_v49 }
  0x2c   : > { %452 = vmatpush1.bf16.msra.mxu0 %v641_v19 }
  0x2d   : > { %453 = vmatprep.subr.bf16.mxu0 %v642_v20  ;;  %v331_v58 = vmax.bf16 %v330_v54, %v329_v53 }
  0x2f   : > { %v332_v61 = vunpack.c.l.bf16 %v331_v58  ;;  %v333_v63 = vunpack.c.h.bf16 %v331_v58 }
  0x30   : > { %454 = vmatpush1.bf16.msra.mxu0 %v644_v21 }
  0x31   : > { %455 = vmatprep.subr.bf16.mxu0 %v645_v22 }
  0x34   : > { %456 = vmatpush1.bf16.msra.mxu0 %v647_v23 }
  0x35   : > { %457 = vmatprep.subr.bf16.mxu0 %v648_v24 }
  0x38   : > { %458 = vmatpush1.bf16.msra.mxu0 %v650_v25 }
  0x3b   : > { %476 = vmatmul.mubr.bf16.vlgmr.msra.gmra.mrb[0].mxu0 %v334_v26 }
 0x10e   : > { %v477_v62 = vpop.f32.mrb[0].mxu0 }
 0x10f   : > { %v478_v0 = vadd.f32 %v477_v62, %v356_v59  ;;  %v479_v1 = vpop.f32.mrb[1].mxu0 }
 0x110   : > { %v480_v2 = vadd.f32 %v479_v1, %v360_v60  ;;  %v481_v3 = vpop.f32.mrb[2].mxu0 }
 0x111   : > { %v484_v4 = vadd.f32 %v478_v0, %v332_v61  ;;  %v482_v5 = vpop.f32.mrb[3].mxu0 }
 0x112   : > { %v485_v6 = vadd.f32 %v480_v2, %v333_v63 }
 0x114   : > { %v599_v7 = vpack.c.bf16 %v485_v6, %v484_v4 }
 0x116   : > { %494 = vst.msk [vmem:[%s281_s6] sm:$0xff] %vm796_vm2, %v599_v7 }
 0x117 PF: > { %p11_p9 = scmp.ge.s32.totalorder %s718_s19, 4   ;;  %s844_s15 = smov %s669_s16 }
 0x118   : > { %s845_s16 = smov %s727_s22  ;;  %s846_s17 = smov %s718_s19 }
 0x119   :  { %13 = sbr.rel (!%p11_p9) target bundleno = 2 (0x2), region = 112 }

// kernel: modeling_forward.43
= control target key start
LH: loop header
LB: loop body
LE: loop exit
PB: predicated region body
PF: predicated region fallthrough
CT: control target
= control target key end

     0   :  { %s2175_s12 = smov 0   ;;  %s2775_s0 = inlined_call_operand.vmem [shape: bf16[16,1440], index: 0, kind: input, shape index: {}]   ;;  %s2776_s1 = inlined_call_operand.vmem [shape: bf16[1440,192], index: 1, kind: input, shape index: {}]   ;;  %s2777_s2 = inlined_call_operand.vmem [shape: f32[1,192], index: 2, kind: input, shape index: {}]   ;;  %s2778_s3 = inlined_call_operand.vmem [shape: bf16[16,192], index: 3, kind: output, shape index: {}]  }
   0x1 LB: > { %s1630_s13 = sadd.s32 4294967295, %s2153_s12   ;;  %p1634_p0 = scmp.ge.s32.totalorder %s2153_s12, 1  ;;  %s2153_s12 = sphi %s2175_s12, %s13_s12  }
   0x2   : > { %p137_p1 = scmp.lt.s32.totalorder %s2153_s12, 3 }
   0x4   : > { %p138_p2 = pnand %p1634_p0, %p137_p1 }
   0x5   : > { %v1865_v0 = vld [vmem:[%s2776_s1 + $0x4] ss:$8 sps:$4 sm:$0xff] (!%p138_p2)   ;;  %v1869_v2 = vld [vmem:[%s2776_s1] ss:$8 sps:$4 sm:$0xff] (!%p138_p2)   ;;  %v1871_v4 = vld [vmem:[%s2776_s1 + $0x14] ss:$8 sps:$4 sm:$0xff] (!%p138_p2)  }
   0x6   : > { %141 = sbr.rel (%p138_p2) target bundleno = 420 (0x1a4), region = 32  ;;  %v1867_v1 = vld [vmem:[%s2776_s1 + $0x304] ss:$8 sps:$4 sm:$0xff] (!%p138_p2)   ;;  %1315 = vmatprep.subr.bf16.mxu1 (!%p138_p2), %v1865_v0  ;;  %v1870_v3 = vld [vmem:[%s2776_s1 + $0x300] ss:$8 sps:$4 sm:$0xff] (!%p138_p2)   ;;  %p161_p3 = scmp.lt.s32.totalorder (!%p138_p2), %s1630_s13, 1 }
   0x7   : > { %1438 = vmatprep.subr.bf16.mxu0 (!%p138_p2), %v1867_v1  ;;  %1316 = vmatpush1.bf16.msra.mxu1 (!%p138_p2), %v1869_v2  ;;  %v1873_v5 = vld [vmem:[%s2776_s1 + $0x314] ss:$8 sps:$4 sm:$0xff] (!%p138_p2)   ;;  %v1875_v6 = vld [vmem:[%s2776_s1 + $0x10] ss:$8 sps:$4 sm:$0xff] (!%p138_p2)   ;;  %v1877_v8 = vld [vmem:[%s2776_s1 + $0x24] ss:$8 sps:$4 sm:$0xff] (!%p138_p2)  }
   0x8   : > { %1439 = vmatpush1.bf16.msra.mxu0 (!%p138_p2), %v1870_v3  ;;  %1317 = vmatprep.subr.bf16.mxu1 (!%p138_p2), %v1871_v4  ;;  %v1876_v7 = vld [vmem:[%s2776_s1 + $0x310] ss:$8 sps:$4 sm:$0xff] (!%p138_p2)   ;;  %v1879_v9 = vld [vmem:[%s2776_s1 + $0x324] ss:$8 sps:$4 sm:$0xff] (!%p138_p2)   ;;  %v1881_v10 = vld [vmem:[%s2776_s1 + $0x20] ss:$8 sps:$4 sm:$0xff] (!%p138_p2)  }
   0x9   : > { %1440 = vmatprep.subr.bf16.mxu0 (!%p138_p2), %v1873_v5  ;;  %v1882_v11 = vld [vmem:[%s2776_s1 + $0x320] ss:$8 sps:$4 sm:$0xff] (!%p138_p2)   ;;  %v1883_v12 = vld [vmem:[%s2776_s1 + $0x34] ss:$8 sps:$4 sm:$0xff] (!%p138_p2)   ;;  %v1887_v14 = vld [vmem:[%s2776_s1 + $0x30] ss:$8 sps:$4 sm:$0xff] (!%p138_p2)  }
   0xa   : > { %v1885_v13 = vld [vmem:[%s2776_s1 + $0x334] ss:$8 sps:$4 sm:$0xff] (!%p138_p2)   ;;  %v1888_v15 = vld [vmem:[%s2776_s1 + $0x330] ss:$8 sps:$4 sm:$0xff] (!%p138_p2)   ;;  %v1889_v16 = vld [vmem:[%s2776_s1 + $0x44] ss:$8 sps:$4 sm:$0xff] (!%p138_p2)  }
   0xb   : > { %1318 = vmatpush1.bf16.msra.mxu1 (!%p138_p2), %v1875_v6  ;;  %v1891_v17 = vld [vmem:[%s2776_s1 + $0x344] ss:$8 sps:$4 sm:$0xff] (!%p138_p2)   ;;  %v1893_v18 = vld [vmem:[%s2776_s1 + $0x40] ss:$8 sps:$4 sm:$0xff] (!%p138_p2)   ;;  %v1895_v20 = vld [vmem:[%s2776_s1 + $0x54] ss:$8 sps:$4 sm:$0xff] (!%p138_p2)  }
   0xc   : > { %1441 = vmatpush1.bf16.msra.mxu0 (!%p138_p2), %v1876_v7  ;;  %1319 = vmatprep.subr.bf16.mxu1 (!%p138_p2), %v1877_v8  ;;  %v1894_v19 = vld [vmem:[%s2776_s1 + $0x340] ss:$8 sps:$4 sm:$0xff] (!%p138_p2)   ;;  %v1897_v21 = vld [vmem:[%s2776_s1 + $0x354] ss:$8 sps:$4 sm:$0xff] (!%p138_p2)   ;;  %v1899_v22 = vld [vmem:[%s2776_s1 + $0x50] ss:$8 sps:$4 sm:$0xff] (!%p138_p2)  }
   0xd   : > { %1442 = vmatprep.subr.bf16.mxu0 %v1879_v9  ;;  %v1900_v23 = vld [vmem:[%s2776_s1 + $0x350] ss:$8 sps:$4 sm:$0xff]   ;;  %v1901_v24 = vld [vmem:[%s2776_s1 + $0x64] ss:$8 sps:$4 sm:$0xff]   ;;  %v1905_v26 = vld [vmem:[%s2776_s1 + $0x60] ss:$8 sps:$4 sm:$0xff]  }
   0xe   : > { %v1903_v25 = vld [vmem:[%s2776_s1 + $0x364] ss:$8 sps:$4 sm:$0xff]   ;;  %v1906_v27 = vld [vmem:[%s2776_s1 + $0x360] ss:$8 sps:$4 sm:$0xff]   ;;  %v1907_v28 = vld [vmem:[%s2776_s1 + $0x74] ss:$8 sps:$4 sm:$0xff]  }
   0xf   : > { %1320 = vmatpush1.bf16.msra.mxu1 %v1881_v10  ;;  %v1909_v29 = vld [vmem:[%s2776_s1 + $0x374] ss:$8 sps:$4 sm:$0xff]   ;;  %v1911_v30 = vld [vmem:[%s2776_s1 + $0x70] ss:$8 sps:$4 sm:$0xff]   ;;  %v1913_v32 = vld [vmem:[%s2776_s1 + $0x84] ss:$8 sps:$4 sm:$0xff]  }
  0x10   : > { %1443 = vmatpush1.bf16.msra.mxu0 %v1882_v11  ;;  %1321 = vmatprep.subr.bf16.mxu1 %v1883_v12  ;;  %v1912_v31 = vld [vmem:[%s2776_s1 + $0x370] ss:$8 sps:$4 sm:$0xff]   ;;  %v1915_v33 = vld [vmem:[%s2776_s1 + $0x384] ss:$8 sps:$4 sm:$0xff]   ;;  %v1917_v34 = vld [vmem:[%s2776_s1 + $0x80] ss:$8 sps:$4 sm:$0xff]  }
  0x11   : > { %1444 = vmatprep.subr.bf16.mxu0 %v1885_v13  ;;  %v1918_v35 = vld [vmem:[%s2776_s1 + $0x380] ss:$8 sps:$4 sm:$0xff]   ;;  %s2780_s13 = smov (!%p161_p3, %s1630_s13), 1  ;;  %v1919_v36 = vld [vmem:[%s2776_s1 + $0x94] ss:$8 sps:$4 sm:$0xff]   ;;  %vm1311_vm0 = vcmask 261120  }
  0x12   : > { %v1921_v37 = vld [vmem:[%s2776_s1 + $0x394] ss:$8 sps:$4 sm:$0xff]   ;;  %v1923_v38 = vld [vmem:[%s2776_s1 + $0x90] ss:$8 sps:$4 sm:$0xff]   ;;  %s1856_s17 = smul.u32 48, %s2780_s13  ;;  %s1834_s10 = sshll.u32 %s2780_s13, 3 }
  0x13   : > { %1322 = vmatpush1.bf16.msra.mxu1 %v1887_v14  ;;  %v1924_v39 = vld [vmem:[%s2776_s1 + $0x390] ss:$8 sps:$4 sm:$0xff]   ;;  %v1925_v40 = vld [vmem:[%s2776_s1 + $0xa4] ss:$8 sps:$4 sm:$0xff]   ;;  %v1929_v42 = vld [vmem:[%s2776_s1 + $0xa0] ss:$8 sps:$4 sm:$0xff]   ;;  %s170_s15 = scalar_lea.vmem %s2778_s3, %s1834_s10 }
  0x14   : > { %1445 = vmatpush1.bf16.msra.mxu0 %v1888_v15  ;;  %1323 = vmatprep.subr.bf16.mxu1 %v1889_v16  ;;  %v1927_v41 = vld [vmem:[%s2776_s1 + $0x3a4] ss:$8 sps:$4 sm:$0xff]   ;;  %v1930_v43 = vld [vmem:[%s2776_s1 + $0x3a0] ss:$8 sps:$4 sm:$0xff]   ;;  %s2325_s30 = scalar_lea.vmem %s2775_s0, %s1856_s17  ;;  %v1931_v44 = vld [vmem:[%s2776_s1 + $0xb4] ss:$8 sps:$4 sm:$0xff]  }
  0x15   : > { %1446 = vmatprep.subr.bf16.mxu0 %v1891_v17  ;;  %v1933_v45 = vld [vmem:[%s2776_s1 + $0x3b4] ss:$8 sps:$4 sm:$0xff]   ;;  %v172_v46 = vld [vmem:[%s2325_s30] sm:$0xff]  ;;  %v1935_v47 = vld [vmem:[%s2776_s1 + $0xb0] ss:$8 sps:$4 sm:$0xff]   ;;  %vm1571_vm1 = vcmask 1043456  }
  0x16   : > { %v1639_v48 = vcombine.high %v172_v46, %v172_v46  ;;  %v1936_v49 = vld [vmem:[%s2776_s1 + $0x3b0] ss:$8 sps:$4 sm:$0xff]   ;;  %v1937_v51 = vld [vmem:[%s2776_s1 + $0xc4] ss:$8 sps:$4 sm:$0xff]   ;;  %v1941_v54 = vld [vmem:[%s2776_s1 + $0xc0] ss:$8 sps:$4 sm:$0xff]   ;;  %v1638_v6 = vcombine.low %v172_v46, %v172_v46 }
  0x17   : > { %1324 = vmatpush1.bf16.msra.mxu1 %v1893_v18  ;;  %v175_v50 = vld [vmem:[%s2325_s30 + $0x18] sm:$0xff]  ;;  %v1939_v52 = vld [vmem:[%s2776_s1 + $0x3c4] ss:$8 sps:$4 sm:$0xff]   ;;  %v1942_v55 = vld [vmem:[%s2776_s1 + $0x3c0] ss:$8 sps:$4 sm:$0xff]   ;;  %vm1572_vm2 = vcmask 523268  }
  0x18   : > { %1447 = vmatpush1.bf16.msra.mxu0 %v1894_v19  ;;  %1325 = vmatprep.subr.bf16.mxu1 %v1895_v20  ;;  %v1645_v53 = vcombine.high %v175_v50, %v175_v50  ;;  %v1943_v56 = vld [vmem:[%s2776_s1 + $0xd4] ss:$8 sps:$4 sm:$0xff]   ;;  %v1947_v58 = vld [vmem:[%s2776_s1 + $0xd0] ss:$8 sps:$4 sm:$0xff]   ;;  %v1949_v60 = vld [vmem:[%s2776_s1 + $0xe4] ss:$8 sps:$4 sm:$0xff]   ;;  %v1644_v7 = vcombine.low %v175_v50, %v175_v50 }
  0x19   : > { %1448 = vmatprep.subr.bf16.mxu0 %v1897_v21  ;;  %1347 = vmatprep.mubr.bf16.mxu1 %v1639_v48  ;;  %v1945_v57 = vld [vmem:[%s2776_s1 + $0x3d4] ss:$8 sps:$4 sm:$0xff]   ;;  %v1948_v59 = vld [vmem:[%s2776_s1 + $0x3d0] ss:$8 sps:$4 sm:$0xff]   ;;  %v1951_v61 = vld [vmem:[%s2776_s1 + $0x3e4] ss:$8 sps:$4 sm:$0xff]  }
  0x1a   : > { %1470 = vmatprep.mubr.bf16.mxu0 %v1645_v53  ;;  %v1953_v62 = vld [vmem:[%s2776_s1 + $0xe0] ss:$8 sps:$4 sm:$0xff]   ;;  %v1955_v0 = vld [vmem:[%s2776_s1 + $0xf4] ss:$8 sps:$4 sm:$0xff]   ;;  %v1959_v2 = vld [vmem:[%s2776_s1 + $0xf0] ss:$8 sps:$4 sm:$0xff]  }
  0x1b   : > { %1326 = vmatpush1.bf16.msra.mxu1 %v1899_v22  ;;  %v1954_v63 = vld [vmem:[%s2776_s1 + $0x3e0] ss:$8 sps:$4 sm:$0xff]   ;;  %v1957_v1 = vld [vmem:[%s2776_s1 + $0x3f4] ss:$8 sps:$4 sm:$0xff]   ;;  %v1960_v3 = vld [vmem:[%s2776_s1 + $0x3f0] ss:$8 sps:$4 sm:$0xff]  }
  0x1c   : > { %1449 = vmatpush1.bf16.msra.mxu0 %v1900_v23  ;;  %1327 = vmatprep.subr.bf16.mxu1 %v1901_v24  ;;  %v1965_v4 = vld [vmem:[%s2776_s1 + $0x104] ss:$8 sps:$4 sm:$0xff]   ;;  %v1963_v8 = vld [vmem:[%s2776_s1 + $0x100] ss:$8 sps:$4 sm:$0xff]   ;;  %v1973_v10 = vld [vmem:[%s2776_s1 + $0x114] ss:$8 sps:$4 sm:$0xff]  }
  0x1d   : > { %1450 = vmatprep.subr.bf16.mxu0 %v1903_v25  ;;  %v1970_v5 = vld [vmem:[%s2776_s1 + $0x404] ss:$8 sps:$4 sm:$0xff]   ;;  %v1968_v9 = vld [vmem:[%s2776_s1 + $0x400] ss:$8 sps:$4 sm:$0xff]   ;;  %v1976_v11 = vld [vmem:[%s2776_s1 + $0x414] ss:$8 sps:$4 sm:$0xff]  }
  0x1e   : > { %v1971_v12 = vld [vmem:[%s2776_s1 + $0x110] ss:$8 sps:$4 sm:$0xff]   ;;  %v1979_v14 = vld [vmem:[%s2776_s1 + $0x124] ss:$8 sps:$4 sm:$0xff]   ;;  %v1977_v16 = vld [vmem:[%s2776_s1 + $0x120] ss:$8 sps:$4 sm:$0xff]  }
  0x1f   : > { %1328 = vmatpush1.bf16.msra.mxu1 %v1905_v26  ;;  %v1974_v13 = vld [vmem:[%s2776_s1 + $0x410] ss:$8 sps:$4 sm:$0xff]   ;;  %v1982_v15 = vld [vmem:[%s2776_s1 + $0x424] ss:$8 sps:$4 sm:$0xff]   ;;  %v1980_v17 = vld [vmem:[%s2776_s1 + $0x420] ss:$8 sps:$4 sm:$0xff]  }
  0x20   : > { %1451 = vmatpush1.bf16.msra.mxu0 %v1906_v27  ;;  %1329 = vmatprep.subr.bf16.mxu1 %v1907_v28  ;;  %v1985_v18 = vld [vmem:[%s2776_s1 + $0x134] ss:$8 sps:$4 sm:$0xff]   ;;  %v1983_v20 = vld [vmem:[%s2776_s1 + $0x130] ss:$8 sps:$4 sm:$0xff]   ;;  %v1991_v22 = vld [vmem:[%s2776_s1 + $0x144] ss:$8 sps:$4 sm:$0xff]  }
  0x21   : > { %1452 = vmatprep.subr.bf16.mxu0 %v1909_v29  ;;  %v1988_v19 = vld [vmem:[%s2776_s1 + $0x434] ss:$8 sps:$4 sm:$0xff]   ;;  %v1986_v21 = vld [vmem:[%s2776_s1 + $0x430] ss:$8 sps:$4 sm:$0xff]   ;;  %v1994_v23 = vld [vmem:[%s2776_s1 + $0x444] ss:$8 sps:$4 sm:$0xff]  }
  0x22   : > { %v1989_v24 = vld [vmem:[%s2776_s1 + $0x140] ss:$8 sps:$4 sm:$0xff]   ;;  %v1997_v26 = vld [vmem:[%s2776_s1 + $0x154] ss:$8 sps:$4 sm:$0xff]   ;;  %v1995_v28 = vld [vmem:[%s2776_s1 + $0x150] ss:$8 sps:$4 sm:$0xff]  }
  0x23   : > { %1330 = vmatpush1.bf16.msra.mxu1 %v1911_v30  ;;  %v1992_v25 = vld [vmem:[%s2776_s1 + $0x440] ss:$8 sps:$4 sm:$0xff]   ;;  %v2000_v27 = vld [vmem:[%s2776_s1 + $0x454] ss:$8 sps:$4 sm:$0xff]   ;;  %v1998_v29 = vld [vmem:[%s2776_s1 + $0x450] ss:$8 sps:$4 sm:$0xff]  }
  0x24   : > { %1453 = vmatpush1.bf16.msra.mxu0 %v1912_v31  ;;  %1331 = vmatprep.subr.bf16.mxu1 %v1913_v32  ;;  %v2003_v30 = vld [vmem:[%s2776_s1 + $0x164] ss:$8 sps:$4 sm:$0xff]   ;;  %v2021_v46 = vld [vmem:[%s2776_s1 + $0x194] ss:$8 sps:$4 sm:$0xff]   ;;  %v2019_v48 = vld [vmem:[%s2776_s1 + $0x190] ss:$8 sps:$4 sm:$0xff]  }
  0x25   : > { %1454 = vmatprep.subr.bf16.mxu0 %v1915_v33  ;;  %v2006_v31 = vld [vmem:[%s2776_s1 + $0x464] ss:$8 sps:$4 sm:$0xff]   ;;  %v2001_v33 = vld [vmem:[%s2776_s1 + $0x160] ss:$8 sps:$4 sm:$0xff]   ;;  %vm1573_vm3 = vmor %vm1572_vm2, %vm1571_vm1 }
  0x26   : > { %v2468_v32 = vld [vmem:[%s2325_s30 + $0x8] sm:$0xff] }
  0x27   : > { %1332 = vmatpush1.bf16.msra.mxu1 %v1917_v34  ;;  %v2004_v34 = vld [vmem:[%s2776_s1 + $0x460] ss:$8 sps:$4 sm:$0xff]   ;;  %v2027_v50 = vld [vmem:[%s2776_s1 + $0x1a4] ss:$8 sps:$4 sm:$0xff]  }
  0x28   : > { %1455 = vmatpush1.bf16.msra.mxu0 %v1918_v35  ;;  %1333 = vmatprep.subr.bf16.mxu1 %v1919_v36  ;;  %v1641_v35 = vcombine.high %v2468_v32, %v2468_v32  ;;  %v2479_v36 = vld [vmem:[%s2325_s30 + $0x20] sm:$0xff] }
  0x29   : > { %1456 = vmatprep.subr.bf16.mxu0 %v1921_v37  ;;  %v2009_v37 = vld [vmem:[%s2776_s1 + $0x174] ss:$8 sps:$4 sm:$0xff]   ;;  %v2028_v53 = vld [vmem:[%s2776_s1 + $0x4a0] ss:$8 sps:$4 sm:$0xff]  }
  0x2b   : > { %1334 = vmatpush1.bf16.msra.mxu1 %v1923_v38  ;;  %v1647_v38 = vcombine.high %v2479_v36, %v2479_v36 }
  0x2c   : > { %1457 = vmatpush1.bf16.msra.mxu0 %v1924_v39  ;;  %1335 = vmatprep.subr.bf16.mxu1 %v1925_v40  ;;  %v2012_v39 = vld [vmem:[%s2776_s1 + $0x474] ss:$8 sps:$4 sm:$0xff]   ;;  %v2007_v40 = vld [vmem:[%s2776_s1 + $0x170] ss:$8 sps:$4 sm:$0xff]  }
  0x2d   : > { %1458 = vmatprep.subr.bf16.mxu0 %v1927_v41  ;;  %v2010_v41 = vld [vmem:[%s2776_s1 + $0x470] ss:$8 sps:$4 sm:$0xff]  }
  0x2f   : > { %1336 = vmatpush1.bf16.msra.mxu1 %v1929_v42  ;;  %v2015_v42 = vld [vmem:[%s2776_s1 + $0x184] ss:$8 sps:$4 sm:$0xff]  }
  0x30   : > { %1459 = vmatpush1.bf16.msra.mxu0 %v1930_v43  ;;  %1337 = vmatprep.subr.bf16.mxu1 %v1931_v44  ;;  %v2018_v43 = vld [vmem:[%s2776_s1 + $0x484] ss:$8 sps:$4 sm:$0xff]   ;;  %v2013_v44 = vld [vmem:[%s2776_s1 + $0x180] ss:$8 sps:$4 sm:$0xff]  }
  0x31   : > { %1460 = vmatprep.subr.bf16.mxu0 %v1933_v45  ;;  %v2016_v45 = vld [vmem:[%s2776_s1 + $0x480] ss:$8 sps:$4 sm:$0xff]  }
  0x33   : > { %1338 = vmatpush1.bf16.msra.mxu1 %v1935_v47  ;;  %v2024_v47 = vld [vmem:[%s2776_s1 + $0x494] ss:$8 sps:$4 sm:$0xff]  }
  0x34   : > { %1461 = vmatpush1.bf16.msra.mxu0 %v1936_v49  ;;  %1339 = vmatprep.subr.bf16.mxu1 %v1937_v51  ;;  %v2022_v49 = vld [vmem:[%s2776_s1 + $0x490] ss:$8 sps:$4 sm:$0xff]   ;;  %v2030_v51 = vld [vmem:[%s2776_s1 + $0x4a4] ss:$8 sps:$4 sm:$0xff]  }
  0x35   : > { %1462 = vmatprep.subr.bf16.mxu0 %v1939_v52  ;;  %v2025_v52 = vld [vmem:[%s2776_s1 + $0x1a0] ss:$8 sps:$4 sm:$0xff]  }
  0x37   : > { %1340 = vmatpush1.bf16.msra.mxu1 %v1941_v54  ;;  %v2033_v54 = vld [vmem:[%s2776_s1 + $0x1b4] ss:$8 sps:$4 sm:$0xff]  }
  0x38   : > { %1463 = vmatpush1.bf16.msra.mxu0 %v1942_v55  ;;  %1341 = vmatprep.subr.bf16.mxu1 %v1943_v56  ;;  %v2036_v55 = vld [vmem:[%s2776_s1 + $0x4b4] ss:$8 sps:$4 sm:$0xff]   ;;  %v2031_v56 = vld [vmem:[%s2776_s1 + $0x1b0] ss:$8 sps:$4 sm:$0xff]  }
  0x39   : > { %1464 = vmatprep.subr.bf16.mxu0 %v1945_v57  ;;  %v2034_v57 = vld [vmem:[%s2776_s1 + $0x4b0] ss:$8 sps:$4 sm:$0xff]  }
  0x3b   : > { %1342 = vmatpush1.bf16.msra.mxu1 %v1947_v58  ;;  %v2039_v58 = vld [vmem:[%s2776_s1 + $0x1c4] ss:$8 sps:$4 sm:$0xff]  }
  0x3c   : > { %1465 = vmatpush1.bf16.msra.mxu0 %v1948_v59  ;;  %1343 = vmatprep.subr.bf16.mxu1 %v1949_v60  ;;  %v2042_v59 = vld [vmem:[%s2776_s1 + $0x4c4] ss:$8 sps:$4 sm:$0xff]   ;;  %v2037_v60 = vld [vmem:[%s2776_s1 + $0x1c0] ss:$8 sps:$4 sm:$0xff]  }
  0x3d   : > { %1466 = vmatprep.subr.bf16.mxu0 %v1951_v61  ;;  %v2040_v61 = vld [vmem:[%s2776_s1 + $0x4c0] ss:$8 sps:$4 sm:$0xff]  }
  0x3f   : > { %1344 = vmatpush1.bf16.msra.mxu1 %v1953_v62  ;;  %v2045_v62 = vld [vmem:[%s2776_s1 + $0x1d4] ss:$8 sps:$4 sm:$0xff]  }
  0x40   : > { %1467 = vmatpush1.bf16.msra.mxu0 %v1954_v63  ;;  %1345 = vmatprep.subr.bf16.mxu1 %v1955_v0  ;;  %v2048_v63 = vld [vmem:[%s2776_s1 + $0x4d4] ss:$8 sps:$4 sm:$0xff]   ;;  %v2043_v0 = vld [vmem:[%s2776_s1 + $0x1d0] ss:$8 sps:$4 sm:$0xff]  }
  0x41   : > { %1468 = vmatprep.subr.bf16.mxu0 %v1957_v1  ;;  %v2046_v1 = vld [vmem:[%s2776_s1 + $0x4d0] ss:$8 sps:$4 sm:$0xff]  }
  0x43   : > { %1346 = vmatpush1.bf16.msra.mxu1 %v1959_v2  ;;  %v2051_v2 = vld [vmem:[%s2776_s1 + $0x1e4] ss:$8 sps:$4 sm:$0xff]  }
  0x44   : > { %1469 = vmatpush1.bf16.msra.mxu0 %v1960_v3  ;;  %1356 = vmatprep.subr.bf16.mxu1 %v1965_v4  ;;  %v2054_v3 = vld [vmem:[%s2776_s1 + $0x4e4] ss:$8 sps:$4 sm:$0xff]   ;;  %v2049_v4 = vld [vmem:[%s2776_s1 + $0x1e0] ss:$8 sps:$4 sm:$0xff]  }
  0x45   : > { %1479 = vmatprep.subr.bf16.mxu0 %v1970_v5  ;;  %v2052_v5 = vld [vmem:[%s2776_s1 + $0x4e0] ss:$8 sps:$4 sm:$0xff]  }
  0x46   : > { %1348 = vmatmul.mubr.bf16.vlgmr.msra.gmra.mrb[0].mxu1 %v1638_v6  ;;  %v2057_v6 = vld [vmem:[%s2776_s1 + $0x1f4] ss:$8 sps:$4 sm:$0xff]  }
  0x47   : > { %1471 = vmatmul.mubr.bf16.vlgmr.msra.gmra.mrb[0].mxu0 %v1644_v7  ;;  %1357 = vmatpush1.bf16.msra.mxu1 %v1963_v8  ;;  %v2060_v7 = vld [vmem:[%s2776_s1 + $0x4f4] ss:$8 sps:$4 sm:$0xff]   ;;  %v2055_v8 = vld [vmem:[%s2776_s1 + $0x1f0] ss:$8 sps:$4 sm:$0xff]  }
  0x48   : > { %1480 = vmatpush1.bf16.msra.mxu0 %v1968_v9  ;;  %1358 = vmatprep.subr.bf16.mxu1 %v1973_v10  ;;  %v2058_v9 = vld [vmem:[%s2776_s1 + $0x4f0] ss:$8 sps:$4 sm:$0xff]   ;;  %v2065_v10 = vld [vmem:[%s2776_s1 + $0x204] ss:$8 sps:$4 sm:$0xff]  }
  0x49   : > { %1481 = vmatprep.subr.bf16.mxu0 %v1976_v11  ;;  %1388 = vmatprep.mubr.bf16.mxu1 %v1641_v35  ;;  %v2070_v11 = vld [vmem:[%s2776_s1 + $0x504] ss:$8 sps:$4 sm:$0xff]   ;;  %v2092_v35 = vld [vmem:[%s2776_s1 + $0x540] ss:$8 sps:$4 sm:$0xff]  }
  0x4a   : > { %1511 = vmatprep.mubr.bf16.mxu0 %v1647_v38  ;;  %v2095_v38 = vld [vmem:[%s2776_s1 + $0x250] ss:$8 sps:$4 sm:$0xff]  }
  0x4b   : > { %1359 = vmatpush1.bf16.msra.mxu1 %v1971_v12  ;;  %v1640_v12 = vcombine.low %v2468_v32, %v2468_v32  ;;  %v2091_v32 = vld [vmem:[%s2776_s1 + $0x244] ss:$8 sps:$4 sm:$0xff]  }
  0x4c   : > { %1482 = vmatpush1.bf16.msra.mxu0 %v1974_v13  ;;  %1360 = vmatprep.subr.bf16.mxu1 %v1979_v14  ;;  %v1646_v13 = vcombine.low %v2479_v36, %v2479_v36  ;;  %v2602_v14 = vld [vmem:[%s2325_s30 + $0x28] sm:$0xff]  ;;  %v2097_v36 = vld [vmem:[%s2776_s1 + $0x254] ss:$8 sps:$4 sm:$0xff]  }
  0x4d   : > { %1483 = vmatprep.subr.bf16.mxu0 %v1982_v15  ;;  %v2605_v15 = vld [vmem:[%s2325_s30 + $0x10] sm:$0xff] }
  0x4f   : > { %1361 = vmatpush1.bf16.msra.mxu1 %v1977_v16  ;;  %v2063_v16 = vld [vmem:[%s2776_s1 + $0x200] ss:$8 sps:$4 sm:$0xff]  }
  0x50   : > { %1484 = vmatpush1.bf16.msra.mxu0 %v1980_v17  ;;  %1362 = vmatprep.subr.bf16.mxu1 %v1985_v18  ;;  %v2068_v17 = vld [vmem:[%s2776_s1 + $0x500] ss:$8 sps:$4 sm:$0xff]   ;;  %v2073_v18 = vld [vmem:[%s2776_s1 + $0x214] ss:$8 sps:$4 sm:$0xff]  }
  0x51   : > { %1485 = vmatprep.subr.bf16.mxu0 %v1988_v19  ;;  %v2076_v19 = vld [vmem:[%s2776_s1 + $0x514] ss:$8 sps:$4 sm:$0xff]  }
  0x53   : > { %1363 = vmatpush1.bf16.msra.mxu1 %v1983_v20  ;;  %v1649_v20 = vcombine.high %v2602_v14, %v2602_v14 }
  0x54   : > { %1486 = vmatpush1.bf16.msra.mxu0 %v1986_v21  ;;  %1364 = vmatprep.subr.bf16.mxu1 %v1991_v22  ;;  %v1643_v21 = vcombine.high %v2605_v15, %v2605_v15  ;;  %v2071_v22 = vld [vmem:[%s2776_s1 + $0x210] ss:$8 sps:$4 sm:$0xff]  }
  0x55   : > { %1487 = vmatprep.subr.bf16.mxu0 %v1994_v23  ;;  %v2074_v23 = vld [vmem:[%s2776_s1 + $0x510] ss:$8 sps:$4 sm:$0xff]  }
  0x57   : > { %1365 = vmatpush1.bf16.msra.mxu1 %v1989_v24  ;;  %v2079_v24 = vld [vmem:[%s2776_s1 + $0x224] ss:$8 sps:$4 sm:$0xff]  }
  0x58   : > { %1488 = vmatpush1.bf16.msra.mxu0 %v1992_v25  ;;  %1366 = vmatprep.subr.bf16.mxu1 %v1997_v26  ;;  %v2082_v25 = vld [vmem:[%s2776_s1 + $0x524] ss:$8 sps:$4 sm:$0xff]   ;;  %v2077_v26 = vld [vmem:[%s2776_s1 + $0x220] ss:$8 sps:$4 sm:$0xff]  }
  0x59   : > { %1489 = vmatprep.subr.bf16.mxu0 %v2000_v27  ;;  %v2080_v27 = vld [vmem:[%s2776_s1 + $0x520] ss:$8 sps:$4 sm:$0xff]  }
  0x5b   : > { %1367 = vmatpush1.bf16.msra.mxu1 %v1995_v28  ;;  %v2085_v28 = vld [vmem:[%s2776_s1 + $0x234] ss:$8 sps:$4 sm:$0xff]  }
  0x5c   : > { %1490 = vmatpush1.bf16.msra.mxu0 %v1998_v29  ;;  %1368 = vmatprep.subr.bf16.mxu1 %v2003_v30  ;;  %v2088_v29 = vld [vmem:[%s2776_s1 + $0x534] ss:$8 sps:$4 sm:$0xff]   ;;  %v2083_v30 = vld [vmem:[%s2776_s1 + $0x230] ss:$8 sps:$4 sm:$0xff]  }
  0x5d   : > { %1491 = vmatprep.subr.bf16.mxu0 %v2006_v31  ;;  %v2086_v31 = vld [vmem:[%s2776_s1 + $0x530] ss:$8 sps:$4 sm:$0xff]  }
  0x5f   : > { %1369 = vmatpush1.bf16.msra.mxu1 %v2001_v33  ;;  %v2094_v33 = vld [vmem:[%s2776_s1 + $0x544] ss:$8 sps:$4 sm:$0xff]  }
  0x60   : > { %1492 = vmatpush1.bf16.msra.mxu0 %v2004_v34  ;;  %1370 = vmatprep.subr.bf16.mxu1 %v2009_v37  ;;  %v2089_v34 = vld [vmem:[%s2776_s1 + $0x240] ss:$8 sps:$4 sm:$0xff]   ;;  %v2100_v37 = vld [vmem:[%s2776_s1 + $0x554] ss:$8 sps:$4 sm:$0xff]  }
  0x61   : > { %1493 = vmatprep.subr.bf16.mxu0 %v2012_v39  ;;  %v2098_v39 = vld [vmem:[%s2776_s1 + $0x550] ss:$8 sps:$4 sm:$0xff]  }
  0x63   : > { %1371 = vmatpush1.bf16.msra.mxu1 %v2007_v40  ;;  %v2103_v40 = vld [vmem:[%s2776_s1 + $0x264] ss:$8 sps:$4 sm:$0xff]  }
  0x64   : > { %1494 = vmatpush1.bf16.msra.mxu0 %v2010_v41  ;;  %1372 = vmatprep.subr.bf16.mxu1 %v2015_v42  ;;  %v2106_v41 = vld [vmem:[%s2776_s1 + $0x564] ss:$8 sps:$4 sm:$0xff]   ;;  %v2101_v42 = vld [vmem:[%s2776_s1 + $0x260] ss:$8 sps:$4 sm:$0xff]  }
  0x65   : > { %1495 = vmatprep.subr.bf16.mxu0 %v2018_v43  ;;  %v2104_v43 = vld [vmem:[%s2776_s1 + $0x560] ss:$8 sps:$4 sm:$0xff]  }
  0x67   : > { %1373 = vmatpush1.bf16.msra.mxu1 %v2013_v44  ;;  %v2109_v44 = vld [vmem:[%s2776_s1 + $0x274] ss:$8 sps:$4 sm:$0xff]  }
  0x68   : > { %1496 = vmatpush1.bf16.msra.mxu0 %v2016_v45  ;;  %1374 = vmatprep.subr.bf16.mxu1 %v2021_v46  ;;  %v2112_v45 = vld [vmem:[%s2776_s1 + $0x574] ss:$8 sps:$4 sm:$0xff]   ;;  %v2107_v46 = vld [vmem:[%s2776_s1 + $0x270] ss:$8 sps:$4 sm:$0xff]  }
  0x69   : > { %1497 = vmatprep.subr.bf16.mxu0 %v2024_v47  ;;  %v2110_v47 = vld [vmem:[%s2776_s1 + $0x570] ss:$8 sps:$4 sm:$0xff]  }
  0x6b   : > { %1375 = vmatpush1.bf16.msra.mxu1 %v2019_v48  ;;  %v2115_v48 = vld [vmem:[%s2776_s1 + $0x284] ss:$8 sps:$4 sm:$0xff]  }
  0x6c   : > { %1498 = vmatpush1.bf16.msra.mxu0 %v2022_v49  ;;  %1376 = vmatprep.subr.bf16.mxu1 %v2027_v50  ;;  %v2118_v49 = vld [vmem:[%s2776_s1 + $0x584] ss:$8 sps:$4 sm:$0xff]   ;;  %v2113_v50 = vld [vmem:[%s2776_s1 + $0x280] ss:$8 sps:$4 sm:$0xff]  }
  0x6d   : > { %1499 = vmatprep.subr.bf16.mxu0 %v2030_v51  ;;  %v2116_v51 = vld [vmem:[%s2776_s1 + $0x580] ss:$8 sps:$4 sm:$0xff]  }
  0x6f   : > { %1377 = vmatpush1.bf16.msra.mxu1 %v2025_v52  ;;  %v2121_v52 = vld [vmem:[%s2776_s1 + $0x294] ss:$8 sps:$4 sm:$0xff]  }
  0x70   : > { %1500 = vmatpush1.bf16.msra.mxu0 %v2028_v53  ;;  %1378 = vmatprep.subr.bf16.mxu1 %v2033_v54  ;;  %v2124_v53 = vld [vmem:[%s2776_s1 + $0x594] ss:$8 sps:$4 sm:$0xff]   ;;  %v2119_v54 = vld [vmem:[%s2776_s1 + $0x290] ss:$8 sps:$4 sm:$0xff]  }
  0x71   : > { %1501 = vmatprep.subr.bf16.mxu0 %v2036_v55  ;;  %v2122_v55 = vld [vmem:[%s2776_s1 + $0x590] ss:$8 sps:$4 sm:$0xff]  }
  0x73   : > { %1379 = vmatpush1.bf16.msra.mxu1 %v2031_v56  ;;  %v2128_v56 = vld [vmem:[%s2776_s1 + $0x2a4] ss:$8 sps:$4 sm:$0xff]  }
  0x74   : > { %1502 = vmatpush1.bf16.msra.mxu0 %v2034_v57  ;;  %1380 = vmatprep.subr.bf16.mxu1 %v2039_v58  ;;  %v1648_v57 = vcombine.low %v2602_v14, %v2602_v14  ;;  %v2126_v58 = vld [vmem:[%s2776_s1 + $0x2a0] ss:$8 sps:$4 sm:$0xff]  }
  0x75   : > { %1503 = vmatprep.subr.bf16.mxu0 %v2042_v59  ;;  %v2132_v59 = vld [vmem:[%s2776_s1 + $0x2b4] ss:$8 sps:$4 sm:$0xff]  }
  0x77   : > { %1381 = vmatpush1.bf16.msra.mxu1 %v2037_v60  ;;  %v2130_v60 = vld [vmem:[%s2776_s1 + $0x2b0] ss:$8 sps:$4 sm:$0xff]  }
  0x78   : > { %1504 = vmatpush1.bf16.msra.mxu0 %v2040_v61  ;;  %1382 = vmatprep.subr.bf16.mxu1 %v2045_v62  ;;  %v2135_v61 = vld [vmem:[%s2776_s1 + $0x2c4] ss:$8 sps:$4 sm:$0xff]   ;;  %v2133_v62 = vld [vmem:[%s2776_s1 + $0x2c0] ss:$8 sps:$4 sm:$0xff]  }
  0x79   : > { %1505 = vmatprep.subr.bf16.mxu0 %v2048_v63  ;;  %v2138_v63 = vld [vmem:[%s2776_s1 + $0x2d4] ss:$8 sps:$4 sm:$0xff]  }
  0x7b   : > { %1383 = vmatpush1.bf16.msra.mxu1 %v2043_v0  ;;  %v2136_v0 = vld [vmem:[%s2776_s1 + $0x2d0] ss:$8 sps:$4 sm:$0xff]  }
  0x7c   : > { %1506 = vmatpush1.bf16.msra.mxu0 %v2046_v1  ;;  %1384 = vmatprep.subr.bf16.mxu1 %v2051_v2  ;;  %v2141_v1 = vld [vmem:[%s2776_s1 + $0x2e4] ss:$8 sps:$4 sm:$0xff]   ;;  %v2139_v2 = vld [vmem:[%s2776_s1 + $0x2e0] ss:$8 sps:$4 sm:$0xff]  }
  0x7d   : > { %1507 = vmatprep.subr.bf16.mxu0 %v2054_v3  ;;  %v2144_v3 = vld [vmem:[%s2776_s1 + $0x2f4] ss:$8 sps:$4 sm:$0xff]  }
  0x7f   : > { %1385 = vmatpush1.bf16.msra.mxu1 %v2049_v4  ;;  %v2142_v4 = vld [vmem:[%s2776_s1 + $0x2f0] ss:$8 sps:$4 sm:$0xff]  }
  0x80   : > { %1508 = vmatpush1.bf16.msra.mxu0 %v2052_v5  ;;  %1386 = vmatprep.subr.bf16.mxu1 %v2057_v6  ;;  %v1642_v5 = vcombine.low %v2605_v15, %v2605_v15 }
  0x81   : > { %1509 = vmatprep.subr.bf16.mxu0 %v2060_v7 }
  0x83   : > { %1387 = vmatpush1.bf16.msra.mxu1 %v2055_v8 }
  0x84   : > { %1510 = vmatpush1.bf16.msra.mxu0 %v2058_v9  ;;  %1397 = vmatprep.subr.bf16.mxu1 %v2065_v10  ;;  %v360_v10 = vlaneseq }
  0x85   : > { %1520 = vmatprep.subr.bf16.mxu0 %v2070_v11 }
  0x86   : > { %1389 = vmatmul.mubr.bf16.vlgmr.msra.gmra.mrb[0].mxu1 %v1640_v12  ;;  %v361_v11 = vshrl.u32 %v360_v10, 7 }
  0x87   : > { %1512 = vmatmul.mubr.bf16.vlgmr.msra.gmra.mrb[0].mxu0 %v1646_v13  ;;  %1398 = vmatpush1.bf16.msra.mxu1 %v2063_v16  ;;  %v358_v13 = vld [vmem:[%s2777_s2] sm:$0x3] }
  0x88   : > { %1521 = vmatpush1.bf16.msra.mxu0 %v2068_v17  ;;  %1399 = vmatprep.subr.bf16.mxu1 %v2073_v18  ;;  %v362_v12 = vsub.s32 0, %v361_v11  ;;  %v366_v14 = vsub.s32 1, %v361_v11 }
  0x89   : > { %1522 = vmatprep.subr.bf16.mxu0 %v2076_v19  ;;  %1830 = vmatprep.mubr.msk.bf16.mxu0 %vm1311_vm0, %v1649_v20 }
  0x8a   : > { %1429 = vmatprep.mubr.bf16.mxu1 %v1643_v21  ;;  %v363_v16 = vrot.slane %v358_v13, %v362_v12  ;;  %v367_v17 = vrot.slane %v358_v13, %v366_v14 }
  0x8b   : > { %1400 = vmatpush1.bf16.msra.mxu1 %v2071_v22 }
  0x8c   : > { %1523 = vmatpush1.bf16.msra.mxu0 %v2074_v23  ;;  %1401 = vmatprep.subr.bf16.mxu1 %v2079_v24 }
  0x8d   : > { %1524 = vmatprep.subr.bf16.mxu0 %v2082_v25 }
  0x8f   : > { %1402 = vmatpush1.bf16.msra.mxu1 %v2077_v26 }
  0x90   : > { %1525 = vmatpush1.bf16.msra.mxu0 %v2080_v27  ;;  %1403 = vmatprep.subr.bf16.mxu1 %v2085_v28 }
  0x91   : > { %1526 = vmatprep.subr.bf16.mxu0 %v2088_v29 }
  0x93   : > { %1404 = vmatpush1.bf16.msra.mxu1 %v2083_v30 }
  0x94   : > { %1527 = vmatpush1.bf16.msra.mxu0 %v2086_v31  ;;  %1405 = vmatprep.subr.bf16.mxu1 %v2091_v32 }
  0x95   : > { %1528 = vmatprep.subr.bf16.mxu0 %v2094_v33 }
  0x97   : > { %1406 = vmatpush1.bf16.msra.mxu1 %v2089_v34 }
  0x98   : > { %1529 = vmatpush1.bf16.msra.mxu0 %v2092_v35  ;;  %1407 = vmatprep.subr.bf16.mxu1 %v2097_v36 }
  0x99   : > { %1530 = vmatprep.subr.bf16.mxu0 %v2100_v37 }
  0x9b   : > { %1408 = vmatpush1.bf16.msra.mxu1 %v2095_v38 }
  0x9c   : > { %1531 = vmatpush1.bf16.msra.mxu0 %v2098_v39  ;;  %1409 = vmatprep.subr.bf16.mxu1 %v2103_v40 }
  0x9d   : > { %1532 = vmatprep.subr.bf16.mxu0 %v2106_v41 }
  0x9f   : > { %1410 = vmatpush1.bf16.msra.mxu1 %v2101_v42 }
  0xa0   : > { %1533 = vmatpush1.bf16.msra.mxu0 %v2104_v43  ;;  %1411 = vmatprep.subr.bf16.mxu1 %v2109_v44 }
  0xa1   : > { %1534 = vmatprep.subr.bf16.mxu0 %v2112_v45 }
  0xa3   : > { %1412 = vmatpush1.bf16.msra.mxu1 %v2107_v46 }
  0xa4   : > { %1535 = vmatpush1.bf16.msra.mxu0 %v2110_v47  ;;  %1413 = vmatprep.subr.bf16.mxu1 %v2115_v48 }
  0xa5   : > { %1536 = vmatprep.subr.bf16.mxu0 %v2118_v49 }
  0xa7   : > { %1414 = vmatpush1.bf16.msra.mxu1 %v2113_v50 }
  0xa8   : > { %1537 = vmatpush1.bf16.msra.mxu0 %v2116_v51  ;;  %1415 = vmatprep.subr.bf16.mxu1 %v2121_v52 }
  0xa9   : > { %1538 = vmatprep.subr.bf16.mxu0 %v2124_v53 }
  0xab   : > { %1416 = vmatpush1.bf16.msra.mxu1 %v2119_v54 }
  0xac   : > { %1539 = vmatpush1.bf16.msra.mxu0 %v2122_v55  ;;  %1417 = vmatprep.subr.bf16.mxu1 %v2128_v56 }
  0xaf   : > { %1553 = vmatmul.mubr.bf16.vlgmr.msra.gmra.mrb[0].mxu0 %v1648_v57  ;;  %1418 = vmatpush1.bf16.msra.mxu1 %v2126_v58 }
  0xb0   : > { %1419 = vmatprep.subr.bf16.mxu1 %v2132_v59 }
  0xb3   : > { %1420 = vmatpush1.bf16.msra.mxu1 %v2130_v60 }
  0xb4   : > { %1421 = vmatprep.subr.bf16.mxu1 %v2135_v61 }
  0xb7   : > { %1422 = vmatpush1.bf16.msra.mxu1 %v2133_v62 }
  0xb8   : > { %1423 = vmatprep.subr.bf16.mxu1 %v2138_v63 }
  0xbb   : > { %1424 = vmatpush1.bf16.msra.mxu1 %v2136_v0 }
  0xbc   : > { %1425 = vmatprep.subr.bf16.mxu1 %v2141_v1 }
  0xbf   : > { %1426 = vmatpush1.bf16.msra.mxu1 %v2139_v2 }
  0xc0   : > { %1427 = vmatprep.subr.bf16.mxu1 %v2144_v3 }
  0xc3   : > { %1428 = vmatpush1.bf16.msra.mxu1 %v2142_v4 }
  0xc6   : > { %1430 = vmatmul.mubr.bf16.vlgmr.msra.gmra.mrb[0].mxu1 %v1642_v5 }
 0x182   : > { %v1554_v6 = vpop.f32.mrb[0].mxu0 }
 0x183   : > { %v1556_v7 = vpop.f32.mrb[1].mxu0 }
 0x184   : > { %v1558_v8 = vpop.f32.mrb[2].mxu0 }
 0x185   : > { %v1559_v9 = vpop.f32.mrb[3].mxu0 }
 0x199   : > { %v1431_v18 = vpop.f32.mrb[0].mxu1 }
 0x19a   : > { %v1836_v19 = vadd.f32 %v1431_v18, %v363_v16  ;;  %v1433_v15 = vpop.f32.mrb[1].mxu1 }
 0x19b   : > { %v1838_v20 = vadd.f32 %v1433_v15, %v367_v17  ;;  %v1435_v21 = vpop.f32.mrb[2].mxu1 }
 0x19c   : > { %v1837_v22 = vadd.f32 %v1836_v19, %v1554_v6  ;;  %v1436_v23 = vpop.f32.mrb[3].mxu1 }
 0x19d   : > { %v1839_v24 = vadd.f32 %v1838_v20, %v1556_v7 }
 0x19e   : > { %v1561_v25 = vmax.f32 %v1837_v22, 0.0 }
 0x19f   : > { %v1562_v26 = vmax.f32 %v1839_v24, 0.0 }
 0x1a1   : > { %v1835_v27 = vpack.c.bf16 %v1562_v26, %v1561_v25 }
 0x1a3   : > { %1574 = vst.msk [vmem:[%s170_s15] sm:$0xff] %vm1573_vm3, %v1835_v27 }
 0x1a4 PF: > { %s13_s12 = sadd.s32 1, %s2153_s12  }
 0x1a5   : > { %p10_p4 = scmp.ge.s32.totalorder %s13_s12, 4  }
 0x1a7   :  { %12 = sbr.rel (!%p10_p4) target bundleno = 1 (0x1), region = 62 }

// kernel: modeling_forward.45
= control target key start
LH: loop header
LB: loop body
LE: loop exit
PB: predicated region body
PF: predicated region fallthrough
CT: control target
= control target key end

     0   :  { %v24_v5 = vlaneseq  ;;  %s444_s0 = inlined_call_operand.vmem [shape: bf16[2,1,256], index: 0, kind: input, shape index: {}]   ;;  %s445_s1 = inlined_call_operand.vmem [shape: bf16[256,10], index: 1, kind: input, shape index: {}]   ;;  %s446_s2 = inlined_call_operand.vmem [shape: f32[1,10], index: 2, kind: input, shape index: {}]   ;;  %s447_s3 = inlined_call_operand.hbm [shape: f32[2,10], index: 3, kind: output, shape index: {}]  }
   0x1   :  { %v307_v0 = vld [vmem:[%s445_s1 + $0x40] sm:$0xff]   ;;  %v309_v2 = vld [vmem:[%s445_s1 + $0x48] sm:$0xff]   ;;  %v311_v4 = vld [vmem:[%s445_s1 + $0x50] sm:$0xff]  }
   0x2   :  { %v308_v1 = vld [vmem:[%s445_s1] sm:$0xff]   ;;  %284 = vmatprep.subr.bf16.mxu0 %v307_v0  ;;  %v310_v3 = vld [vmem:[%s445_s1 + $0x8] sm:$0xff]   ;;  %v312_v6 = vld [vmem:[%s445_s1 + $0x10] sm:$0xff]   ;;  %v25_v8 = vshrl.u32 %v24_v5, 7 }
   0x3   :  { %285 = vmatpush3.bf16.msra.mxu0 %v308_v1  ;;  %v313_v7 = vld [vmem:[%s445_s1 + $0x58] sm:$0xff]   ;;  %v315_v10 = vld [vmem:[%s445_s1 + $0x60] sm:$0xff]   ;;  %v317_v13 = vld [vmem:[%s445_s1 + $0x68] sm:$0xff]  }
   0x4   :  { %286 = vmatprep.subr.bf16.mxu0 %v309_v2  ;;  %v314_v9 = vld [vmem:[%s445_s1 + $0x18] sm:$0xff]   ;;  %v316_v11 = vld [vmem:[%s445_s1 + $0x20] sm:$0xff]   ;;  %v30_v12 = vsub.s32 2, %v25_v8  ;;  %v26_v14 = vsub.s32 0, %v25_v8 }
   0x5   :  { %v16_v15 = vld [vmem:[%s444_s0] sm:$0x3]  ;;  %v17_v16 = vld [vmem:[%s444_s0 + $0x2] sm:$0x3] }
   0x7   :  { %287 = vmatpush3.bf16.msra.mxu0 %v310_v3 }
   0x8   :  { %288 = vmatprep.subr.bf16.mxu0 %v311_v4 }
   0xb   :  { %289 = vmatpush3.bf16.msra.mxu0 %v312_v6 }
   0xc   :  { %290 = vmatprep.subr.bf16.mxu0 %v313_v7 }
   0xf   :  { %291 = vmatpush3.bf16.msra.mxu0 %v314_v9 }
  0x10   :  { %292 = vmatprep.subr.bf16.mxu0 %v315_v10 }
  0x11   :  { %8 = vsyncpa [#allocation3], 0  ;;  %v18_v17 = vunpack.c.l.bf16 %v16_v15  ;;  %v19_v18 = vunpack.c.l.bf16 %v17_v16  ;;  %v318_v19 = vld [vmem:[%s445_s1 + $0x28] sm:$0xff]   ;;  %v319_v24 = vld [vmem:[%s445_s1 + $0x70] sm:$0xff]   ;;  %vm96_vm0 = vcmask 1041409   ;;  %vm240_vm1 = vcmask 74752  }
  0x12   :  { %v320_v29 = vld [vmem:[%s445_s1 + $0x30] sm:$0xff]   ;;  %v321_v34 = vld [vmem:[%s445_s1 + $0x78] sm:$0xff]   ;;  %v267_v44 = vld [vmem:[%s446_s2] ss:$0 sm:$0xff] }
  0x13   :  { %293 = vmatpush3.bf16.msra.mxu0 %v316_v11  ;;  %v31_v20 = vrot.slane %v18_v17, %v30_v12  ;;  %v39_v21 = vrot.slane %v19_v18, %v30_v12  ;;  %v27_v22 = vrot.slane %v18_v17, %v26_v14  ;;  %v35_v23 = vrot.slane %v19_v18, %v26_v14  ;;  %v322_v37 = vld [vmem:[%s445_s1 + $0x38] sm:$0xff]   ;;  %s351_s1 = smov [#allocation2]  }
  0x14   :  { %294 = vmatprep.subr.bf16.mxu0 %v317_v13  ;;  %s259_s2 = sshll.u32 %s351_s1, 4  ;;  %s260_s2 = int_to_ptr.vmem [resolvable:$true] %s259_s2 }
  0x15   :  { %v45_v25 = vpack.c.bf16 %v31_v20, %v31_v20  ;;  %v47_v26 = vpack.c.bf16 %v39_v21, %v39_v21  ;;  %v44_v27 = vpack.c.bf16 %v27_v22, %v27_v22  ;;  %v46_v28 = vpack.c.bf16 %v35_v23, %v35_v23  ;;  %s327_s22 = scalar_lea.vmem %s260_s2, 32  ;;  %p332_p1 = scmp.lt.s32.totalorder %s260_s2, %s260_s2 }
  0x16   :  { %p328_p0 = scmp.ne.s32.totalorder %s260_s2, %s327_s22  ;;  %p333_p2 = scmp.lt.s32.totalorder %s327_s22, %s327_s22 }
  0x17   :  { %295 = vmatpush3.bf16.msra.mxu0 %v318_v19  ;;  %v92_v30 = vunpack.c.l.b16 %v45_v25  ;;  %v94_v31 = vunpack.c.l.b16 %v47_v26  ;;  %v91_v32 = vunpack.c.l.b16 %v44_v27  ;;  %v93_v33 = vunpack.c.l.b16 %v46_v28 }
  0x18   :  { %296 = vmatprep.subr.bf16.mxu0 %v319_v24  ;;  %p334_p3 = por %p333_p2, %p332_p1 }
  0x19   :  { %v98_v35 = vrot.slane %v94_v31, 7  ;;  %v95_v36 = vrot.slane %v93_v33, 7 }
  0x1a   :  { %p335_p4 = pnand %p334_p3, %p328_p0 }
  0x1b   :  { %297 = vmatpush3.bf16.msra.mxu0 %v320_v29  ;;  %v99_v38 = vsel %vm96_vm0, %v98_v35, %v92_v30  ;;  %v97_v39 = vsel %vm96_vm0, %v95_v36, %v91_v32 }
  0x1c   :  { %298 = vmatprep.subr.bf16.mxu0 %v321_v34  ;;  %v101_v40 = vpack.c.b16 %v99_v38, %v99_v38  ;;  %v100_v41 = vpack.c.b16 %v97_v39, %v97_v39 }
  0x1e   :  { %232 = vmatprep.mubr.bf16.mxu0 %v101_v40 }
  0x1f   :  { %299 = vmatpush3.bf16.msra.mxu0 %v322_v37 }
  0x22   :  { %233 = vmatmul.mubr.bf16.vlgmr.msra.gmra.mrb[0].mxu0 %v100_v41 }
  0xf5   :  { %v300_v42 = vpop.f32.mrb[0].mxu0 }
  0xf6   :  { %v301_v43 = vpop.f32.mrb[1].mxu0 }
  0xf7   :  { %v302_v45 = vadd.f32 %v301_v43, %v300_v42  ;;  %v303_v46 = vpop.f32.mrb[2].mxu0 }
  0xf8   :  { %v304_v47 = vpop.f32.mrb[3].mxu0 }
  0xf9   :  { %v235_v48 = vadd.f32 %v302_v45, %v267_v44 }
  0xfb   :  { %v241_v49 = vsel %vm240_vm1, %v235_v48, -inf }
  0xfc   :  { %242 = vmax.xlane.f32.xlu0 %v241_v49 }
 0x189   :  { %v243_v50 = vpop.xlane.xlu0 %242 }
 0x18a   :  { %v244_v51 = vsub.f32 %v235_v48, %v243_v50 }
 0x18c   :  { %v245_v52 = vmul.f32 1.442695, %v244_v51 }
 0x18e   :  { %323 = vpow2.f32 %v245_v52 }
 0x198   :  { %v324_v53 = vpop.eup %323 }
 0x199   :  { %v247_v54 = vsel %vm240_vm1, %v324_v53, 0.0 }
 0x19a   :  { %248 = vadd.xlane.f32.xlu0 %v247_v54 }
 0x227   :  { %v249_v55 = vpop.xlane.xlu0 %248 }
 0x228   :  { %325 = vrcp.f32 %v249_v55 }
 0x232   :  { %v326_v56 = vpop.eup %325 }
 0x233   :  { %v251_v57 = vmul.f32 %v326_v56, %v324_v53 }
 0x235   :  { %252 = vst.msk [vmem:[#allocation2] sm:$0x3] %vm240_vm1, %v251_v57 }
 0x236   :  { %338 = shalt.err (!%p335_p4)
}
 0x237   :  { %s339_s25 = scalar_lea.hbm %s447_s3, 32 }
 0x238   :  { %p340_p5 = scmp.ne.s32.totalorder %s447_s3, %s339_s25  ;;  %p343_p6 = scmp.lt.u32.totalorder %s339_s25, %s447_s3 }
 0x23a   :  { %p345_p7 = pnand %p343_p6, %p340_p5 }
 0x23c   :  { %348 = shalt.err (!%p345_p7)
}
 0x23d   :  { %262 = dma.vmem_to_hbm [thread:$0]  %s260_s2, 32, %s447_s3, [#allocation3]  }
 0x23e   :  { %349 = dma.done.wait [#allocation3], 32  }
 0x23f   :  { %350 = vsyncadd [#allocation3], 4294967264 }
 0x240   :  { %266 = vsyncpa [#allocation3], 1 }

// kernel: modeling_forward.44
= control target key start
LH: loop header
LB: loop body
LE: loop exit
PB: predicated region body
PF: predicated region fallthrough
CT: control target
= control target key end

     0   :  { %s2535_s12 = smov 0   ;;  %s3244_s0 = inlined_call_operand.vmem [shape: bf16[16,1728], index: 0, kind: input, shape index: {}]   ;;  %s3245_s1 = inlined_call_operand.vmem [shape: bf16[1728,256], index: 1, kind: input, shape index: {}]   ;;  %s3246_s2 = inlined_call_operand.vmem [shape: f32[1,256], index: 2, kind: input, shape index: {}]   ;;  %s3247_s3 = inlined_call_operand.vmem [shape: bf16[16,256], index: 3, kind: output, shape index: {}]  }
   0x1 LB: > { %s1892_s13 = sadd.s32 4294967295, %s2513_s12   ;;  %p1896_p0 = scmp.ge.s32.totalorder %s2513_s12, 1  ;;  %s2513_s12 = sphi %s2535_s12, %s13_s12  }
   0x2   : > { %p137_p1 = scmp.lt.s32.totalorder %s2513_s12, 3 }
   0x4   : > { %p138_p2 = pnand %p1896_p0, %p137_p1 }
   0x5   : > { %v2169_v0 = vld [vmem:[%s3245_s1 + $0x4] ss:$8 sps:$4 sm:$0xff] (!%p138_p2)   ;;  %v2173_v2 = vld [vmem:[%s3245_s1] ss:$8 sps:$4 sm:$0xff] (!%p138_p2)   ;;  %v2175_v4 = vld [vmem:[%s3245_s1 + $0x14] ss:$8 sps:$4 sm:$0xff] (!%p138_p2)  }
   0x6   : > { %141 = sbr.rel (%p138_p2) target bundleno = 467 (0x1d3), region = 32  ;;  %v2171_v1 = vld [vmem:[%s3245_s1 + $0x304] ss:$8 sps:$4 sm:$0xff] (!%p138_p2)   ;;  %1539 = vmatprep.subr.bf16.mxu1 (!%p138_p2), %v2169_v0  ;;  %v2174_v3 = vld [vmem:[%s3245_s1 + $0x300] ss:$8 sps:$4 sm:$0xff] (!%p138_p2)   ;;  %p161_p3 = scmp.lt.s32.totalorder (!%p138_p2), %s1892_s13, 1 }
   0x7   : > { %1662 = vmatprep.subr.bf16.mxu0 (!%p138_p2), %v2171_v1  ;;  %1540 = vmatpush1.bf16.msra.mxu1 (!%p138_p2), %v2173_v2  ;;  %v2177_v5 = vld [vmem:[%s3245_s1 + $0x314] ss:$8 sps:$4 sm:$0xff] (!%p138_p2)   ;;  %v2179_v6 = vld [vmem:[%s3245_s1 + $0x10] ss:$8 sps:$4 sm:$0xff] (!%p138_p2)   ;;  %v2181_v8 = vld [vmem:[%s3245_s1 + $0x24] ss:$8 sps:$4 sm:$0xff] (!%p138_p2)  }
   0x8   : > { %1663 = vmatpush1.bf16.msra.mxu0 (!%p138_p2), %v2174_v3  ;;  %1541 = vmatprep.subr.bf16.mxu1 (!%p138_p2), %v2175_v4  ;;  %v2180_v7 = vld [vmem:[%s3245_s1 + $0x310] ss:$8 sps:$4 sm:$0xff] (!%p138_p2)   ;;  %v2183_v9 = vld [vmem:[%s3245_s1 + $0x324] ss:$8 sps:$4 sm:$0xff] (!%p138_p2)   ;;  %v2185_v10 = vld [vmem:[%s3245_s1 + $0x20] ss:$8 sps:$4 sm:$0xff] (!%p138_p2)  }
   0x9   : > { %1664 = vmatprep.subr.bf16.mxu0 (!%p138_p2), %v2177_v5  ;;  %v2186_v11 = vld [vmem:[%s3245_s1 + $0x320] ss:$8 sps:$4 sm:$0xff] (!%p138_p2)   ;;  %v2187_v12 = vld [vmem:[%s3245_s1 + $0x34] ss:$8 sps:$4 sm:$0xff] (!%p138_p2)   ;;  %v2191_v14 = vld [vmem:[%s3245_s1 + $0x30] ss:$8 sps:$4 sm:$0xff] (!%p138_p2)  }
   0xa   : > { %v2189_v13 = vld [vmem:[%s3245_s1 + $0x334] ss:$8 sps:$4 sm:$0xff] (!%p138_p2)   ;;  %v2192_v15 = vld [vmem:[%s3245_s1 + $0x330] ss:$8 sps:$4 sm:$0xff] (!%p138_p2)   ;;  %v2193_v16 = vld [vmem:[%s3245_s1 + $0x44] ss:$8 sps:$4 sm:$0xff] (!%p138_p2)  }
   0xb   : > { %1542 = vmatpush1.bf16.msra.mxu1 (!%p138_p2), %v2179_v6  ;;  %v2195_v17 = vld [vmem:[%s3245_s1 + $0x344] ss:$8 sps:$4 sm:$0xff] (!%p138_p2)   ;;  %v2197_v18 = vld [vmem:[%s3245_s1 + $0x40] ss:$8 sps:$4 sm:$0xff] (!%p138_p2)   ;;  %v2199_v20 = vld [vmem:[%s3245_s1 + $0x54] ss:$8 sps:$4 sm:$0xff] (!%p138_p2)  }
   0xc   : > { %1665 = vmatpush1.bf16.msra.mxu0 (!%p138_p2), %v2180_v7  ;;  %1543 = vmatprep.subr.bf16.mxu1 (!%p138_p2), %v2181_v8  ;;  %v2198_v19 = vld [vmem:[%s3245_s1 + $0x340] ss:$8 sps:$4 sm:$0xff] (!%p138_p2)   ;;  %v2201_v21 = vld [vmem:[%s3245_s1 + $0x354] ss:$8 sps:$4 sm:$0xff] (!%p138_p2)   ;;  %v2203_v22 = vld [vmem:[%s3245_s1 + $0x50] ss:$8 sps:$4 sm:$0xff] (!%p138_p2)  }
   0xd   : > { %1666 = vmatprep.subr.bf16.mxu0 %v2183_v9  ;;  %v2204_v23 = vld [vmem:[%s3245_s1 + $0x350] ss:$8 sps:$4 sm:$0xff]   ;;  %v2205_v24 = vld [vmem:[%s3245_s1 + $0x64] ss:$8 sps:$4 sm:$0xff]   ;;  %v2209_v26 = vld [vmem:[%s3245_s1 + $0x60] ss:$8 sps:$4 sm:$0xff]  }
   0xe   : > { %v2207_v25 = vld [vmem:[%s3245_s1 + $0x364] ss:$8 sps:$4 sm:$0xff]   ;;  %v2210_v27 = vld [vmem:[%s3245_s1 + $0x360] ss:$8 sps:$4 sm:$0xff]   ;;  %v2211_v28 = vld [vmem:[%s3245_s1 + $0x74] ss:$8 sps:$4 sm:$0xff]  }
   0xf   : > { %1544 = vmatpush1.bf16.msra.mxu1 %v2185_v10  ;;  %v2213_v29 = vld [vmem:[%s3245_s1 + $0x374] ss:$8 sps:$4 sm:$0xff]   ;;  %v2215_v30 = vld [vmem:[%s3245_s1 + $0x70] ss:$8 sps:$4 sm:$0xff]   ;;  %v2217_v32 = vld [vmem:[%s3245_s1 + $0x84] ss:$8 sps:$4 sm:$0xff]  }
  0x10   : > { %1667 = vmatpush1.bf16.msra.mxu0 %v2186_v11  ;;  %1545 = vmatprep.subr.bf16.mxu1 %v2187_v12  ;;  %v2216_v31 = vld [vmem:[%s3245_s1 + $0x370] ss:$8 sps:$4 sm:$0xff]   ;;  %v2219_v33 = vld [vmem:[%s3245_s1 + $0x384] ss:$8 sps:$4 sm:$0xff]   ;;  %v2221_v34 = vld [vmem:[%s3245_s1 + $0x80] ss:$8 sps:$4 sm:$0xff]  }
  0x11   : > { %1668 = vmatprep.subr.bf16.mxu0 %v2189_v13  ;;  %v2222_v35 = vld [vmem:[%s3245_s1 + $0x380] ss:$8 sps:$4 sm:$0xff]   ;;  %s3249_s13 = smov (!%p161_p3, %s1892_s13), 1  ;;  %v2223_v36 = vld [vmem:[%s3245_s1 + $0x94] ss:$8 sps:$4 sm:$0xff]   ;;  %vm1535_vm0 = vcmask 523264  }
  0x12   : > { %v2225_v37 = vld [vmem:[%s3245_s1 + $0x394] ss:$8 sps:$4 sm:$0xff]   ;;  %v2227_v38 = vld [vmem:[%s3245_s1 + $0x90] ss:$8 sps:$4 sm:$0xff]   ;;  %s2160_s17 = smul.u32 56, %s3249_s13  ;;  %s2134_s14 = sshll.u32 %s3249_s13, 3 }
  0x13   : > { %1546 = vmatpush1.bf16.msra.mxu1 %v2191_v14  ;;  %v2228_v39 = vld [vmem:[%s3245_s1 + $0x390] ss:$8 sps:$4 sm:$0xff]   ;;  %v2229_v40 = vld [vmem:[%s3245_s1 + $0xa4] ss:$8 sps:$4 sm:$0xff]   ;;  %v2233_v42 = vld [vmem:[%s3245_s1 + $0xa0] ss:$8 sps:$4 sm:$0xff]  }
  0x14   : > { %1669 = vmatpush1.bf16.msra.mxu0 %v2192_v15  ;;  %1547 = vmatprep.subr.bf16.mxu1 %v2193_v16  ;;  %v2231_v41 = vld [vmem:[%s3245_s1 + $0x3a4] ss:$8 sps:$4 sm:$0xff]   ;;  %v2234_v43 = vld [vmem:[%s3245_s1 + $0x3a0] ss:$8 sps:$4 sm:$0xff]   ;;  %s2685_s30 = scalar_lea.vmem %s3244_s0, %s2160_s17  ;;  %v2235_v44 = vld [vmem:[%s3245_s1 + $0xb4] ss:$8 sps:$4 sm:$0xff]   ;;  %s170_s17 = scalar_lea.vmem %s3247_s3, %s2134_s14 }
  0x15   : > { %1670 = vmatprep.subr.bf16.mxu0 %v2195_v17  ;;  %v2237_v45 = vld [vmem:[%s3245_s1 + $0x3b4] ss:$8 sps:$4 sm:$0xff]   ;;  %v172_v46 = vld [vmem:[%s2685_s30] sm:$0xff]  ;;  %v2239_v47 = vld [vmem:[%s3245_s1 + $0xb0] ss:$8 sps:$4 sm:$0xff]  }
  0x16   : > { %v1901_v48 = vcombine.high %v172_v46, %v172_v46  ;;  %v2240_v49 = vld [vmem:[%s3245_s1 + $0x3b0] ss:$8 sps:$4 sm:$0xff]   ;;  %v2241_v51 = vld [vmem:[%s3245_s1 + $0xc4] ss:$8 sps:$4 sm:$0xff]   ;;  %v2245_v54 = vld [vmem:[%s3245_s1 + $0xc0] ss:$8 sps:$4 sm:$0xff]   ;;  %v1900_v6 = vcombine.low %v172_v46, %v172_v46 }
  0x17   : > { %1548 = vmatpush1.bf16.msra.mxu1 %v2197_v18  ;;  %v175_v50 = vld [vmem:[%s2685_s30 + $0x18] sm:$0xff]  ;;  %v2243_v52 = vld [vmem:[%s3245_s1 + $0x3c4] ss:$8 sps:$4 sm:$0xff]   ;;  %v2246_v55 = vld [vmem:[%s3245_s1 + $0x3c0] ss:$8 sps:$4 sm:$0xff]  }
  0x18   : > { %1671 = vmatpush1.bf16.msra.mxu0 %v2198_v19  ;;  %1549 = vmatprep.subr.bf16.mxu1 %v2199_v20  ;;  %v1907_v53 = vcombine.high %v175_v50, %v175_v50  ;;  %v2247_v56 = vld [vmem:[%s3245_s1 + $0xd4] ss:$8 sps:$4 sm:$0xff]   ;;  %v2251_v58 = vld [vmem:[%s3245_s1 + $0xd0] ss:$8 sps:$4 sm:$0xff]   ;;  %v2253_v60 = vld [vmem:[%s3245_s1 + $0xe4] ss:$8 sps:$4 sm:$0xff]   ;;  %v1906_v7 = vcombine.low %v175_v50, %v175_v50 }
  0x19   : > { %1672 = vmatprep.subr.bf16.mxu0 %v2201_v21  ;;  %1571 = vmatprep.mubr.bf16.mxu1 %v1901_v48  ;;  %v2249_v57 = vld [vmem:[%s3245_s1 + $0x3d4] ss:$8 sps:$4 sm:$0xff]   ;;  %v2252_v59 = vld [vmem:[%s3245_s1 + $0x3d0] ss:$8 sps:$4 sm:$0xff]   ;;  %v2255_v61 = vld [vmem:[%s3245_s1 + $0x3e4] ss:$8 sps:$4 sm:$0xff]  }
  0x1a   : > { %1694 = vmatprep.mubr.bf16.mxu0 %v1907_v53  ;;  %v2257_v62 = vld [vmem:[%s3245_s1 + $0xe0] ss:$8 sps:$4 sm:$0xff]   ;;  %v2259_v0 = vld [vmem:[%s3245_s1 + $0xf4] ss:$8 sps:$4 sm:$0xff]   ;;  %v2263_v2 = vld [vmem:[%s3245_s1 + $0xf0] ss:$8 sps:$4 sm:$0xff]  }
  0x1b   : > { %1550 = vmatpush1.bf16.msra.mxu1 %v2203_v22  ;;  %v2258_v63 = vld [vmem:[%s3245_s1 + $0x3e0] ss:$8 sps:$4 sm:$0xff]   ;;  %v2261_v1 = vld [vmem:[%s3245_s1 + $0x3f4] ss:$8 sps:$4 sm:$0xff]   ;;  %v2264_v3 = vld [vmem:[%s3245_s1 + $0x3f0] ss:$8 sps:$4 sm:$0xff]  }
  0x1c   : > { %1673 = vmatpush1.bf16.msra.mxu0 %v2204_v23  ;;  %1551 = vmatprep.subr.bf16.mxu1 %v2205_v24  ;;  %v2269_v4 = vld [vmem:[%s3245_s1 + $0x104] ss:$8 sps:$4 sm:$0xff]   ;;  %v2267_v8 = vld [vmem:[%s3245_s1 + $0x100] ss:$8 sps:$4 sm:$0xff]   ;;  %v2277_v10 = vld [vmem:[%s3245_s1 + $0x114] ss:$8 sps:$4 sm:$0xff]  }
  0x1d   : > { %1674 = vmatprep.subr.bf16.mxu0 %v2207_v25  ;;  %v2274_v5 = vld [vmem:[%s3245_s1 + $0x404] ss:$8 sps:$4 sm:$0xff]   ;;  %v2272_v9 = vld [vmem:[%s3245_s1 + $0x400] ss:$8 sps:$4 sm:$0xff]   ;;  %v2280_v11 = vld [vmem:[%s3245_s1 + $0x414] ss:$8 sps:$4 sm:$0xff]  }
  0x1e   : > { %v2275_v12 = vld [vmem:[%s3245_s1 + $0x110] ss:$8 sps:$4 sm:$0xff]   ;;  %v2283_v14 = vld [vmem:[%s3245_s1 + $0x124] ss:$8 sps:$4 sm:$0xff]   ;;  %v2281_v16 = vld [vmem:[%s3245_s1 + $0x120] ss:$8 sps:$4 sm:$0xff]  }
  0x1f   : > { %1552 = vmatpush1.bf16.msra.mxu1 %v2209_v26  ;;  %v2278_v13 = vld [vmem:[%s3245_s1 + $0x410] ss:$8 sps:$4 sm:$0xff]   ;;  %v2286_v15 = vld [vmem:[%s3245_s1 + $0x424] ss:$8 sps:$4 sm:$0xff]   ;;  %v2284_v17 = vld [vmem:[%s3245_s1 + $0x420] ss:$8 sps:$4 sm:$0xff]  }
  0x20   : > { %1675 = vmatpush1.bf16.msra.mxu0 %v2210_v27  ;;  %1553 = vmatprep.subr.bf16.mxu1 %v2211_v28  ;;  %v2289_v18 = vld [vmem:[%s3245_s1 + $0x134] ss:$8 sps:$4 sm:$0xff]   ;;  %v2287_v20 = vld [vmem:[%s3245_s1 + $0x130] ss:$8 sps:$4 sm:$0xff]   ;;  %v2295_v22 = vld [vmem:[%s3245_s1 + $0x144] ss:$8 sps:$4 sm:$0xff]  }
  0x21   : > { %1676 = vmatprep.subr.bf16.mxu0 %v2213_v29  ;;  %v2292_v19 = vld [vmem:[%s3245_s1 + $0x434] ss:$8 sps:$4 sm:$0xff]   ;;  %v2290_v21 = vld [vmem:[%s3245_s1 + $0x430] ss:$8 sps:$4 sm:$0xff]   ;;  %v2298_v23 = vld [vmem:[%s3245_s1 + $0x444] ss:$8 sps:$4 sm:$0xff]  }
  0x22   : > { %v2293_v24 = vld [vmem:[%s3245_s1 + $0x140] ss:$8 sps:$4 sm:$0xff]   ;;  %v2301_v26 = vld [vmem:[%s3245_s1 + $0x154] ss:$8 sps:$4 sm:$0xff]   ;;  %v2299_v28 = vld [vmem:[%s3245_s1 + $0x150] ss:$8 sps:$4 sm:$0xff]  }
  0x23   : > { %1554 = vmatpush1.bf16.msra.mxu1 %v2215_v30  ;;  %v2296_v25 = vld [vmem:[%s3245_s1 + $0x440] ss:$8 sps:$4 sm:$0xff]   ;;  %v2304_v27 = vld [vmem:[%s3245_s1 + $0x454] ss:$8 sps:$4 sm:$0xff]   ;;  %v2302_v29 = vld [vmem:[%s3245_s1 + $0x450] ss:$8 sps:$4 sm:$0xff]  }
  0x24   : > { %1677 = vmatpush1.bf16.msra.mxu0 %v2216_v31  ;;  %1555 = vmatprep.subr.bf16.mxu1 %v2217_v32  ;;  %v2307_v30 = vld [vmem:[%s3245_s1 + $0x164] ss:$8 sps:$4 sm:$0xff]   ;;  %v2325_v46 = vld [vmem:[%s3245_s1 + $0x194] ss:$8 sps:$4 sm:$0xff]   ;;  %v2323_v48 = vld [vmem:[%s3245_s1 + $0x190] ss:$8 sps:$4 sm:$0xff]  }
  0x25   : > { %1678 = vmatprep.subr.bf16.mxu0 %v2219_v33  ;;  %v2310_v31 = vld [vmem:[%s3245_s1 + $0x464] ss:$8 sps:$4 sm:$0xff]   ;;  %v2305_v33 = vld [vmem:[%s3245_s1 + $0x160] ss:$8 sps:$4 sm:$0xff]  }
  0x26   : > { %v2828_v32 = vld [vmem:[%s2685_s30 + $0x8] sm:$0xff] }
  0x27   : > { %1556 = vmatpush1.bf16.msra.mxu1 %v2221_v34  ;;  %v2308_v34 = vld [vmem:[%s3245_s1 + $0x460] ss:$8 sps:$4 sm:$0xff]   ;;  %v2331_v50 = vld [vmem:[%s3245_s1 + $0x1a4] ss:$8 sps:$4 sm:$0xff]  }
  0x28   : > { %1679 = vmatpush1.bf16.msra.mxu0 %v2222_v35  ;;  %1557 = vmatprep.subr.bf16.mxu1 %v2223_v36  ;;  %v1903_v35 = vcombine.high %v2828_v32, %v2828_v32  ;;  %v2839_v36 = vld [vmem:[%s2685_s30 + $0x20] sm:$0xff] }
  0x29   : > { %1680 = vmatprep.subr.bf16.mxu0 %v2225_v37  ;;  %v2313_v37 = vld [vmem:[%s3245_s1 + $0x174] ss:$8 sps:$4 sm:$0xff]   ;;  %v2332_v53 = vld [vmem:[%s3245_s1 + $0x4a0] ss:$8 sps:$4 sm:$0xff]  }
  0x2b   : > { %1558 = vmatpush1.bf16.msra.mxu1 %v2227_v38  ;;  %v1909_v38 = vcombine.high %v2839_v36, %v2839_v36 }
  0x2c   : > { %1681 = vmatpush1.bf16.msra.mxu0 %v2228_v39  ;;  %1559 = vmatprep.subr.bf16.mxu1 %v2229_v40  ;;  %v2316_v39 = vld [vmem:[%s3245_s1 + $0x474] ss:$8 sps:$4 sm:$0xff]   ;;  %v2311_v40 = vld [vmem:[%s3245_s1 + $0x170] ss:$8 sps:$4 sm:$0xff]  }
  0x2d   : > { %1682 = vmatprep.subr.bf16.mxu0 %v2231_v41  ;;  %v2314_v41 = vld [vmem:[%s3245_s1 + $0x470] ss:$8 sps:$4 sm:$0xff]  }
  0x2f   : > { %1560 = vmatpush1.bf16.msra.mxu1 %v2233_v42  ;;  %v2319_v42 = vld [vmem:[%s3245_s1 + $0x184] ss:$8 sps:$4 sm:$0xff]  }
  0x30   : > { %1683 = vmatpush1.bf16.msra.mxu0 %v2234_v43  ;;  %1561 = vmatprep.subr.bf16.mxu1 %v2235_v44  ;;  %v2322_v43 = vld [vmem:[%s3245_s1 + $0x484] ss:$8 sps:$4 sm:$0xff]   ;;  %v2317_v44 = vld [vmem:[%s3245_s1 + $0x180] ss:$8 sps:$4 sm:$0xff]  }
  0x31   : > { %1684 = vmatprep.subr.bf16.mxu0 %v2237_v45  ;;  %v2320_v45 = vld [vmem:[%s3245_s1 + $0x480] ss:$8 sps:$4 sm:$0xff]  }
  0x33   : > { %1562 = vmatpush1.bf16.msra.mxu1 %v2239_v47  ;;  %v2328_v47 = vld [vmem:[%s3245_s1 + $0x494] ss:$8 sps:$4 sm:$0xff]  }
  0x34   : > { %1685 = vmatpush1.bf16.msra.mxu0 %v2240_v49  ;;  %1563 = vmatprep.subr.bf16.mxu1 %v2241_v51  ;;  %v2326_v49 = vld [vmem:[%s3245_s1 + $0x490] ss:$8 sps:$4 sm:$0xff]   ;;  %v2334_v51 = vld [vmem:[%s3245_s1 + $0x4a4] ss:$8 sps:$4 sm:$0xff]  }
  0x35   : > { %1686 = vmatprep.subr.bf16.mxu0 %v2243_v52  ;;  %v2329_v52 = vld [vmem:[%s3245_s1 + $0x1a0] ss:$8 sps:$4 sm:$0xff]  }
  0x37   : > { %1564 = vmatpush1.bf16.msra.mxu1 %v2245_v54  ;;  %v2337_v54 = vld [vmem:[%s3245_s1 + $0x1b4] ss:$8 sps:$4 sm:$0xff]  }
  0x38   : > { %1687 = vmatpush1.bf16.msra.mxu0 %v2246_v55  ;;  %1565 = vmatprep.subr.bf16.mxu1 %v2247_v56  ;;  %v2340_v55 = vld [vmem:[%s3245_s1 + $0x4b4] ss:$8 sps:$4 sm:$0xff]   ;;  %v2335_v56 = vld [vmem:[%s3245_s1 + $0x1b0] ss:$8 sps:$4 sm:$0xff]  }
  0x39   : > { %1688 = vmatprep.subr.bf16.mxu0 %v2249_v57  ;;  %v2338_v57 = vld [vmem:[%s3245_s1 + $0x4b0] ss:$8 sps:$4 sm:$0xff]  }
  0x3b   : > { %1566 = vmatpush1.bf16.msra.mxu1 %v2251_v58  ;;  %v2343_v58 = vld [vmem:[%s3245_s1 + $0x1c4] ss:$8 sps:$4 sm:$0xff]  }
  0x3c   : > { %1689 = vmatpush1.bf16.msra.mxu0 %v2252_v59  ;;  %1567 = vmatprep.subr.bf16.mxu1 %v2253_v60  ;;  %v2346_v59 = vld [vmem:[%s3245_s1 + $0x4c4] ss:$8 sps:$4 sm:$0xff]   ;;  %v2341_v60 = vld [vmem:[%s3245_s1 + $0x1c0] ss:$8 sps:$4 sm:$0xff]  }
  0x3d   : > { %1690 = vmatprep.subr.bf16.mxu0 %v2255_v61  ;;  %v2344_v61 = vld [vmem:[%s3245_s1 + $0x4c0] ss:$8 sps:$4 sm:$0xff]  }
  0x3f   : > { %1568 = vmatpush1.bf16.msra.mxu1 %v2257_v62  ;;  %v2349_v62 = vld [vmem:[%s3245_s1 + $0x1d4] ss:$8 sps:$4 sm:$0xff]  }
  0x40   : > { %1691 = vmatpush1.bf16.msra.mxu0 %v2258_v63  ;;  %1569 = vmatprep.subr.bf16.mxu1 %v2259_v0  ;;  %v2352_v63 = vld [vmem:[%s3245_s1 + $0x4d4] ss:$8 sps:$4 sm:$0xff]   ;;  %v2347_v0 = vld [vmem:[%s3245_s1 + $0x1d0] ss:$8 sps:$4 sm:$0xff]  }
  0x41   : > { %1692 = vmatprep.subr.bf16.mxu0 %v2261_v1  ;;  %v2350_v1 = vld [vmem:[%s3245_s1 + $0x4d0] ss:$8 sps:$4 sm:$0xff]  }
  0x43   : > { %1570 = vmatpush1.bf16.msra.mxu1 %v2263_v2  ;;  %v2355_v2 = vld [vmem:[%s3245_s1 + $0x1e4] ss:$8 sps:$4 sm:$0xff]  }
  0x44   : > { %1693 = vmatpush1.bf16.msra.mxu0 %v2264_v3  ;;  %1580 = vmatprep.subr.bf16.mxu1 %v2269_v4  ;;  %v2358_v3 = vld [vmem:[%s3245_s1 + $0x4e4] ss:$8 sps:$4 sm:$0xff]   ;;  %v2353_v4 = vld [vmem:[%s3245_s1 + $0x1e0] ss:$8 sps:$4 sm:$0xff]  }
  0x45   : > { %1703 = vmatprep.subr.bf16.mxu0 %v2274_v5  ;;  %v2356_v5 = vld [vmem:[%s3245_s1 + $0x4e0] ss:$8 sps:$4 sm:$0xff]  }
  0x46   : > { %1572 = vmatmul.mubr.bf16.vlgmr.msra.gmra.mrb[0].mxu1 %v1900_v6  ;;  %v2361_v6 = vld [vmem:[%s3245_s1 + $0x1f4] ss:$8 sps:$4 sm:$0xff]  }
  0x47   : > { %1695 = vmatmul.mubr.bf16.vlgmr.msra.gmra.mrb[0].mxu0 %v1906_v7  ;;  %1581 = vmatpush1.bf16.msra.mxu1 %v2267_v8  ;;  %v2364_v7 = vld [vmem:[%s3245_s1 + $0x4f4] ss:$8 sps:$4 sm:$0xff]   ;;  %v2359_v8 = vld [vmem:[%s3245_s1 + $0x1f0] ss:$8 sps:$4 sm:$0xff]  }
  0x48   : > { %1704 = vmatpush1.bf16.msra.mxu0 %v2272_v9  ;;  %1582 = vmatprep.subr.bf16.mxu1 %v2277_v10  ;;  %v2362_v9 = vld [vmem:[%s3245_s1 + $0x4f0] ss:$8 sps:$4 sm:$0xff]   ;;  %v2369_v10 = vld [vmem:[%s3245_s1 + $0x204] ss:$8 sps:$4 sm:$0xff]  }
  0x49   : > { %1705 = vmatprep.subr.bf16.mxu0 %v2280_v11  ;;  %1612 = vmatprep.mubr.bf16.mxu1 %v1903_v35  ;;  %v2374_v11 = vld [vmem:[%s3245_s1 + $0x504] ss:$8 sps:$4 sm:$0xff]   ;;  %v2396_v35 = vld [vmem:[%s3245_s1 + $0x540] ss:$8 sps:$4 sm:$0xff]  }
  0x4a   : > { %1735 = vmatprep.mubr.bf16.mxu0 %v1909_v38  ;;  %v2399_v38 = vld [vmem:[%s3245_s1 + $0x250] ss:$8 sps:$4 sm:$0xff]  }
  0x4b   : > { %1583 = vmatpush1.bf16.msra.mxu1 %v2275_v12  ;;  %v1902_v12 = vcombine.low %v2828_v32, %v2828_v32  ;;  %v2395_v32 = vld [vmem:[%s3245_s1 + $0x244] ss:$8 sps:$4 sm:$0xff]  }
  0x4c   : > { %1706 = vmatpush1.bf16.msra.mxu0 %v2278_v13  ;;  %1584 = vmatprep.subr.bf16.mxu1 %v2283_v14  ;;  %v2367_v13 = vld [vmem:[%s3245_s1 + $0x200] ss:$8 sps:$4 sm:$0xff]   ;;  %v1908_v14 = vcombine.low %v2839_v36, %v2839_v36  ;;  %v2401_v36 = vld [vmem:[%s3245_s1 + $0x254] ss:$8 sps:$4 sm:$0xff]  }
  0x4d   : > { %1707 = vmatprep.subr.bf16.mxu0 %v2286_v15  ;;  %v2372_v15 = vld [vmem:[%s3245_s1 + $0x500] ss:$8 sps:$4 sm:$0xff]  }
  0x4f   : > { %1585 = vmatpush1.bf16.msra.mxu1 %v2281_v16  ;;  %v2377_v16 = vld [vmem:[%s3245_s1 + $0x214] ss:$8 sps:$4 sm:$0xff]  }
  0x50   : > { %1708 = vmatpush1.bf16.msra.mxu0 %v2284_v17  ;;  %1586 = vmatprep.subr.bf16.mxu1 %v2289_v18  ;;  %v2380_v17 = vld [vmem:[%s3245_s1 + $0x514] ss:$8 sps:$4 sm:$0xff]  }
  0x51   : > { %1709 = vmatprep.subr.bf16.mxu0 %v2292_v19  ;;  %v2974_v18 = vld [vmem:[%s2685_s30 + $0x10] sm:$0xff]  ;;  %v2977_v19 = vld [vmem:[%s2685_s30 + $0x28] sm:$0xff] }
  0x53   : > { %1587 = vmatpush1.bf16.msra.mxu1 %v2287_v20  ;;  %v1905_v20 = vcombine.high %v2974_v18, %v2974_v18 }
  0x54   : > { %1710 = vmatpush1.bf16.msra.mxu0 %v2290_v21  ;;  %1588 = vmatprep.subr.bf16.mxu1 %v2295_v22  ;;  %v1911_v21 = vcombine.high %v2977_v19, %v2977_v19  ;;  %v2375_v22 = vld [vmem:[%s3245_s1 + $0x210] ss:$8 sps:$4 sm:$0xff]  }
  0x55   : > { %1711 = vmatprep.subr.bf16.mxu0 %v2298_v23  ;;  %v2378_v23 = vld [vmem:[%s3245_s1 + $0x510] ss:$8 sps:$4 sm:$0xff]  }
  0x57   : > { %1589 = vmatpush1.bf16.msra.mxu1 %v2293_v24  ;;  %v2383_v24 = vld [vmem:[%s3245_s1 + $0x224] ss:$8 sps:$4 sm:$0xff]  }
  0x58   : > { %1712 = vmatpush1.bf16.msra.mxu0 %v2296_v25  ;;  %1590 = vmatprep.subr.bf16.mxu1 %v2301_v26  ;;  %v2386_v25 = vld [vmem:[%s3245_s1 + $0x524] ss:$8 sps:$4 sm:$0xff]   ;;  %v2381_v26 = vld [vmem:[%s3245_s1 + $0x220] ss:$8 sps:$4 sm:$0xff]  }
  0x59   : > { %1713 = vmatprep.subr.bf16.mxu0 %v2304_v27  ;;  %v2384_v27 = vld [vmem:[%s3245_s1 + $0x520] ss:$8 sps:$4 sm:$0xff]  }
  0x5b   : > { %1591 = vmatpush1.bf16.msra.mxu1 %v2299_v28  ;;  %v2389_v28 = vld [vmem:[%s3245_s1 + $0x234] ss:$8 sps:$4 sm:$0xff]  }
  0x5c   : > { %1714 = vmatpush1.bf16.msra.mxu0 %v2302_v29  ;;  %1592 = vmatprep.subr.bf16.mxu1 %v2307_v30  ;;  %v2392_v29 = vld [vmem:[%s3245_s1 + $0x534] ss:$8 sps:$4 sm:$0xff]   ;;  %v2387_v30 = vld [vmem:[%s3245_s1 + $0x230] ss:$8 sps:$4 sm:$0xff]  }
  0x5d   : > { %1715 = vmatprep.subr.bf16.mxu0 %v2310_v31  ;;  %v2390_v31 = vld [vmem:[%s3245_s1 + $0x530] ss:$8 sps:$4 sm:$0xff]  }
  0x5f   : > { %1593 = vmatpush1.bf16.msra.mxu1 %v2305_v33  ;;  %v2398_v33 = vld [vmem:[%s3245_s1 + $0x544] ss:$8 sps:$4 sm:$0xff]  }
  0x60   : > { %1716 = vmatpush1.bf16.msra.mxu0 %v2308_v34  ;;  %1594 = vmatprep.subr.bf16.mxu1 %v2313_v37  ;;  %v2393_v34 = vld [vmem:[%s3245_s1 + $0x240] ss:$8 sps:$4 sm:$0xff]   ;;  %v2404_v37 = vld [vmem:[%s3245_s1 + $0x554] ss:$8 sps:$4 sm:$0xff]  }
  0x61   : > { %1717 = vmatprep.subr.bf16.mxu0 %v2316_v39  ;;  %v2402_v39 = vld [vmem:[%s3245_s1 + $0x550] ss:$8 sps:$4 sm:$0xff]  }
  0x63   : > { %1595 = vmatpush1.bf16.msra.mxu1 %v2311_v40  ;;  %v2407_v40 = vld [vmem:[%s3245_s1 + $0x264] ss:$8 sps:$4 sm:$0xff]  }
  0x64   : > { %1718 = vmatpush1.bf16.msra.mxu0 %v2314_v41  ;;  %1596 = vmatprep.subr.bf16.mxu1 %v2319_v42  ;;  %v2410_v41 = vld [vmem:[%s3245_s1 + $0x564] ss:$8 sps:$4 sm:$0xff]   ;;  %v2405_v42 = vld [vmem:[%s3245_s1 + $0x260] ss:$8 sps:$4 sm:$0xff]  }
  0x65   : > { %1719 = vmatprep.subr.bf16.mxu0 %v2322_v43  ;;  %v2408_v43 = vld [vmem:[%s3245_s1 + $0x560] ss:$8 sps:$4 sm:$0xff]  }
  0x67   : > { %1597 = vmatpush1.bf16.msra.mxu1 %v2317_v44  ;;  %v2413_v44 = vld [vmem:[%s3245_s1 + $0x274] ss:$8 sps:$4 sm:$0xff]  }
  0x68   : > { %1720 = vmatpush1.bf16.msra.mxu0 %v2320_v45  ;;  %1598 = vmatprep.subr.bf16.mxu1 %v2325_v46  ;;  %v2416_v45 = vld [vmem:[%s3245_s1 + $0x574] ss:$8 sps:$4 sm:$0xff]   ;;  %v2411_v46 = vld [vmem:[%s3245_s1 + $0x270] ss:$8 sps:$4 sm:$0xff]  }
  0x69   : > { %1721 = vmatprep.subr.bf16.mxu0 %v2328_v47  ;;  %v2414_v47 = vld [vmem:[%s3245_s1 + $0x570] ss:$8 sps:$4 sm:$0xff]  }
  0x6b   : > { %1599 = vmatpush1.bf16.msra.mxu1 %v2323_v48  ;;  %v2419_v48 = vld [vmem:[%s3245_s1 + $0x284] ss:$8 sps:$4 sm:$0xff]  }
  0x6c   : > { %1722 = vmatpush1.bf16.msra.mxu0 %v2326_v49  ;;  %1600 = vmatprep.subr.bf16.mxu1 %v2331_v50  ;;  %v2422_v49 = vld [vmem:[%s3245_s1 + $0x584] ss:$8 sps:$4 sm:$0xff]   ;;  %v2417_v50 = vld [vmem:[%s3245_s1 + $0x280] ss:$8 sps:$4 sm:$0xff]  }
  0x6d   : > { %1723 = vmatprep.subr.bf16.mxu0 %v2334_v51  ;;  %v2420_v51 = vld [vmem:[%s3245_s1 + $0x580] ss:$8 sps:$4 sm:$0xff]  }
  0x6f   : > { %1601 = vmatpush1.bf16.msra.mxu1 %v2329_v52  ;;  %v2425_v52 = vld [vmem:[%s3245_s1 + $0x294] ss:$8 sps:$4 sm:$0xff]  }
  0x70   : > { %1724 = vmatpush1.bf16.msra.mxu0 %v2332_v53  ;;  %1602 = vmatprep.subr.bf16.mxu1 %v2337_v54  ;;  %v2428_v53 = vld [vmem:[%s3245_s1 + $0x594] ss:$8 sps:$4 sm:$0xff]   ;;  %v2423_v54 = vld [vmem:[%s3245_s1 + $0x290] ss:$8 sps:$4 sm:$0xff]  }
  0x71   : > { %1725 = vmatprep.subr.bf16.mxu0 %v2340_v55  ;;  %v2426_v55 = vld [vmem:[%s3245_s1 + $0x590] ss:$8 sps:$4 sm:$0xff]  }
  0x73   : > { %1603 = vmatpush1.bf16.msra.mxu1 %v2335_v56  ;;  %v2431_v56 = vld [vmem:[%s3245_s1 + $0x2a4] ss:$8 sps:$4 sm:$0xff]  }
  0x74   : > { %1726 = vmatpush1.bf16.msra.mxu0 %v2338_v57  ;;  %1604 = vmatprep.subr.bf16.mxu1 %v2343_v58  ;;  %v2434_v57 = vld [vmem:[%s3245_s1 + $0x5a4] ss:$8 sps:$4 sm:$0xff]   ;;  %v2429_v58 = vld [vmem:[%s3245_s1 + $0x2a0] ss:$8 sps:$4 sm:$0xff]  }
  0x75   : > { %1727 = vmatprep.subr.bf16.mxu0 %v2346_v59  ;;  %v2432_v59 = vld [vmem:[%s3245_s1 + $0x5a0] ss:$8 sps:$4 sm:$0xff]  }
  0x77   : > { %1605 = vmatpush1.bf16.msra.mxu1 %v2341_v60  ;;  %v2437_v60 = vld [vmem:[%s3245_s1 + $0x2b4] ss:$8 sps:$4 sm:$0xff]  }
  0x78   : > { %1728 = vmatpush1.bf16.msra.mxu0 %v2344_v61  ;;  %1606 = vmatprep.subr.bf16.mxu1 %v2349_v62  ;;  %v2440_v61 = vld [vmem:[%s3245_s1 + $0x5b4] ss:$8 sps:$4 sm:$0xff]   ;;  %v2435_v62 = vld [vmem:[%s3245_s1 + $0x2b0] ss:$8 sps:$4 sm:$0xff]  }
  0x79   : > { %1729 = vmatprep.subr.bf16.mxu0 %v2352_v63  ;;  %v2438_v63 = vld [vmem:[%s3245_s1 + $0x5b0] ss:$8 sps:$4 sm:$0xff]  }
  0x7b   : > { %1607 = vmatpush1.bf16.msra.mxu1 %v2347_v0  ;;  %v2443_v0 = vld [vmem:[%s3245_s1 + $0x2c4] ss:$8 sps:$4 sm:$0xff]  }
  0x7c   : > { %1730 = vmatpush1.bf16.msra.mxu0 %v2350_v1  ;;  %1608 = vmatprep.subr.bf16.mxu1 %v2355_v2  ;;  %v2446_v1 = vld [vmem:[%s3245_s1 + $0x5c4] ss:$8 sps:$4 sm:$0xff]   ;;  %v2441_v2 = vld [vmem:[%s3245_s1 + $0x2c0] ss:$8 sps:$4 sm:$0xff]  }
  0x7d   : > { %1731 = vmatprep.subr.bf16.mxu0 %v2358_v3  ;;  %v2444_v3 = vld [vmem:[%s3245_s1 + $0x5c0] ss:$8 sps:$4 sm:$0xff]  }
  0x7f   : > { %1609 = vmatpush1.bf16.msra.mxu1 %v2353_v4  ;;  %v2449_v4 = vld [vmem:[%s3245_s1 + $0x2d4] ss:$8 sps:$4 sm:$0xff]  }
  0x80   : > { %1732 = vmatpush1.bf16.msra.mxu0 %v2356_v5  ;;  %1610 = vmatprep.subr.bf16.mxu1 %v2361_v6  ;;  %v2452_v5 = vld [vmem:[%s3245_s1 + $0x5d4] ss:$8 sps:$4 sm:$0xff]   ;;  %v2447_v6 = vld [vmem:[%s3245_s1 + $0x2d0] ss:$8 sps:$4 sm:$0xff]  }
  0x81   : > { %1733 = vmatprep.subr.bf16.mxu0 %v2364_v7  ;;  %v2450_v7 = vld [vmem:[%s3245_s1 + $0x5d0] ss:$8 sps:$4 sm:$0xff]  }
  0x83   : > { %1611 = vmatpush1.bf16.msra.mxu1 %v2359_v8  ;;  %v2455_v8 = vld [vmem:[%s3245_s1 + $0x2e4] ss:$8 sps:$4 sm:$0xff]  }
  0x84   : > { %1734 = vmatpush1.bf16.msra.mxu0 %v2362_v9  ;;  %1621 = vmatprep.subr.bf16.mxu1 %v2369_v10  ;;  %v2458_v9 = vld [vmem:[%s3245_s1 + $0x5e4] ss:$8 sps:$4 sm:$0xff]   ;;  %v2453_v10 = vld [vmem:[%s3245_s1 + $0x2e0] ss:$8 sps:$4 sm:$0xff]  }
  0x85   : > { %1744 = vmatprep.subr.bf16.mxu0 %v2374_v11  ;;  %v2456_v11 = vld [vmem:[%s3245_s1 + $0x5e0] ss:$8 sps:$4 sm:$0xff]  }
  0x86   : > { %1613 = vmatmul.mubr.bf16.vlgmr.msra.gmra.mrb[0].mxu1 %v1902_v12  ;;  %v2461_v12 = vld [vmem:[%s3245_s1 + $0x2f4] ss:$8 sps:$4 sm:$0xff]  }
  0x87   : > { %1736 = vmatmul.mubr.bf16.vlgmr.msra.gmra.mrb[0].mxu0 %v1908_v14  ;;  %1622 = vmatpush1.bf16.msra.mxu1 %v2367_v13  ;;  %v2464_v13 = vld [vmem:[%s3245_s1 + $0x5f4] ss:$8 sps:$4 sm:$0xff]   ;;  %v2459_v14 = vld [vmem:[%s3245_s1 + $0x2f0] ss:$8 sps:$4 sm:$0xff]  }
  0x88   : > { %1745 = vmatpush1.bf16.msra.mxu0 %v2372_v15  ;;  %1623 = vmatprep.subr.bf16.mxu1 %v2377_v16  ;;  %v2462_v15 = vld [vmem:[%s3245_s1 + $0x5f0] ss:$8 sps:$4 sm:$0xff]   ;;  %v2471_v16 = vld [vmem:[%s3245_s1 + $0x604] ss:$8 sps:$4 sm:$0xff]  }
  0x89   : > { %1746 = vmatprep.subr.bf16.mxu0 %v2380_v17  ;;  %1653 = vmatprep.mubr.bf16.mxu1 %v1905_v20  ;;  %v178_v17 = vld [vmem:[%s2685_s30 + $0x30] sm:$0xff]  ;;  %v1904_v20 = vcombine.low %v2974_v18, %v2974_v18 }
  0x8a   : > { %1776 = vmatprep.mubr.bf16.mxu0 %v1911_v21  ;;  %v1910_v21 = vcombine.low %v2977_v19, %v2977_v19  ;;  %v2472_v18 = vld [vmem:[%s3245_s1 + $0x610] ss:$8 sps:$4 sm:$0xff]   ;;  %v2477_v19 = vld [vmem:[%s3245_s1 + $0x624] ss:$8 sps:$4 sm:$0xff]  }
  0x8b   : > { %1624 = vmatpush1.bf16.msra.mxu1 %v2375_v22  ;;  %v2469_v22 = vld [vmem:[%s3245_s1 + $0x600] ss:$8 sps:$4 sm:$0xff]  }
  0x8c   : > { %1747 = vmatpush1.bf16.msra.mxu0 %v2378_v23  ;;  %1625 = vmatprep.subr.bf16.mxu1 %v2383_v24  ;;  %v1913_v23 = vcombine.high %v178_v17, %v178_v17  ;;  %v2474_v24 = vld [vmem:[%s3245_s1 + $0x614] ss:$8 sps:$4 sm:$0xff]  }
  0x8d   : > { %1748 = vmatprep.subr.bf16.mxu0 %v2386_v25  ;;  %v2475_v25 = vld [vmem:[%s3245_s1 + $0x620] ss:$8 sps:$4 sm:$0xff]  }
  0x8f   : > { %1626 = vmatpush1.bf16.msra.mxu1 %v2381_v26  ;;  %v2480_v26 = vld [vmem:[%s3245_s1 + $0x634] ss:$8 sps:$4 sm:$0xff]  }
  0x90   : > { %1749 = vmatpush1.bf16.msra.mxu0 %v2384_v27  ;;  %1627 = vmatprep.subr.bf16.mxu1 %v2389_v28  ;;  %v2478_v27 = vld [vmem:[%s3245_s1 + $0x630] ss:$8 sps:$4 sm:$0xff]   ;;  %v2483_v28 = vld [vmem:[%s3245_s1 + $0x644] ss:$8 sps:$4 sm:$0xff]  }
  0x91   : > { %1750 = vmatprep.subr.bf16.mxu0 %v2392_v29  ;;  %v2481_v29 = vld [vmem:[%s3245_s1 + $0x640] ss:$8 sps:$4 sm:$0xff]  }
  0x93   : > { %1628 = vmatpush1.bf16.msra.mxu1 %v2387_v30  ;;  %v2486_v30 = vld [vmem:[%s3245_s1 + $0x654] ss:$8 sps:$4 sm:$0xff]  }
  0x94   : > { %1751 = vmatpush1.bf16.msra.mxu0 %v2390_v31  ;;  %1629 = vmatprep.subr.bf16.mxu1 %v2395_v32  ;;  %v2484_v31 = vld [vmem:[%s3245_s1 + $0x650] ss:$8 sps:$4 sm:$0xff]   ;;  %v2489_v32 = vld [vmem:[%s3245_s1 + $0x664] ss:$8 sps:$4 sm:$0xff]  }
  0x95   : > { %1752 = vmatprep.subr.bf16.mxu0 %v2398_v33  ;;  %v2487_v33 = vld [vmem:[%s3245_s1 + $0x660] ss:$8 sps:$4 sm:$0xff]  }
  0x97   : > { %1630 = vmatpush1.bf16.msra.mxu1 %v2393_v34  ;;  %v2492_v34 = vld [vmem:[%s3245_s1 + $0x674] ss:$8 sps:$4 sm:$0xff]  }
  0x98   : > { %1753 = vmatpush1.bf16.msra.mxu0 %v2396_v35  ;;  %1631 = vmatprep.subr.bf16.mxu1 %v2401_v36  ;;  %v2490_v35 = vld [vmem:[%s3245_s1 + $0x670] ss:$8 sps:$4 sm:$0xff]   ;;  %v2495_v36 = vld [vmem:[%s3245_s1 + $0x684] ss:$8 sps:$4 sm:$0xff]  }
  0x99   : > { %1754 = vmatprep.subr.bf16.mxu0 %v2404_v37  ;;  %v2493_v37 = vld [vmem:[%s3245_s1 + $0x680] ss:$8 sps:$4 sm:$0xff]  }
  0x9b   : > { %1632 = vmatpush1.bf16.msra.mxu1 %v2399_v38  ;;  %v2498_v38 = vld [vmem:[%s3245_s1 + $0x694] ss:$8 sps:$4 sm:$0xff]  }
  0x9c   : > { %1755 = vmatpush1.bf16.msra.mxu0 %v2402_v39  ;;  %1633 = vmatprep.subr.bf16.mxu1 %v2407_v40  ;;  %v2496_v39 = vld [vmem:[%s3245_s1 + $0x690] ss:$8 sps:$4 sm:$0xff]   ;;  %v2501_v40 = vld [vmem:[%s3245_s1 + $0x6a4] ss:$8 sps:$4 sm:$0xff]  }
  0x9d   : > { %1756 = vmatprep.subr.bf16.mxu0 %v2410_v41  ;;  %v2499_v41 = vld [vmem:[%s3245_s1 + $0x6a0] ss:$8 sps:$4 sm:$0xff]  }
  0x9f   : > { %1634 = vmatpush1.bf16.msra.mxu1 %v2405_v42  ;;  %v2504_v42 = vld [vmem:[%s3245_s1 + $0x6b4] ss:$8 sps:$4 sm:$0xff]  }
  0xa0   : > { %1757 = vmatpush1.bf16.msra.mxu0 %v2408_v43  ;;  %1635 = vmatprep.subr.bf16.mxu1 %v2413_v44  ;;  %v2502_v43 = vld [vmem:[%s3245_s1 + $0x6b0] ss:$8 sps:$4 sm:$0xff]   ;;  %v1912_v44 = vcombine.low %v178_v17, %v178_v17 }
  0xa1   : > { %1758 = vmatprep.subr.bf16.mxu0 %v2416_v45 }
  0xa3   : > { %1636 = vmatpush1.bf16.msra.mxu1 %v2411_v46 }
  0xa4   : > { %1759 = vmatpush1.bf16.msra.mxu0 %v2414_v47  ;;  %1637 = vmatprep.subr.bf16.mxu1 %v2419_v48 }
  0xa5   : > { %1760 = vmatprep.subr.bf16.mxu0 %v2422_v49  ;;  %v397_v49 = vlaneseq }
  0xa7   : > { %1638 = vmatpush1.bf16.msra.mxu1 %v2417_v50  ;;  %v398_v50 = vshrl.u32 %v397_v49, 7 }
  0xa8   : > { %1761 = vmatpush1.bf16.msra.mxu0 %v2420_v51  ;;  %1639 = vmatprep.subr.bf16.mxu1 %v2425_v52  ;;  %v395_v52 = vld [vmem:[%s3246_s2] sm:$0x3] }
  0xa9   : > { %1762 = vmatprep.subr.bf16.mxu0 %v2428_v53  ;;  %v399_v51 = vsub.s32 0, %v398_v50  ;;  %v403_v53 = vsub.s32 1, %v398_v50 }
  0xab   : > { %1640 = vmatpush1.bf16.msra.mxu1 %v2423_v54  ;;  %v400_v54 = vrot.slane %v395_v52, %v399_v51 }
  0xac   : > { %1763 = vmatpush1.bf16.msra.mxu0 %v2426_v55  ;;  %1641 = vmatprep.subr.bf16.mxu1 %v2431_v56  ;;  %v404_v55 = vrot.slane %v395_v52, %v403_v53 }
  0xad   : > { %1764 = vmatprep.subr.bf16.mxu0 %v2434_v57 }
  0xaf   : > { %1642 = vmatpush1.bf16.msra.mxu1 %v2429_v58 }
  0xb0   : > { %1765 = vmatpush1.bf16.msra.mxu0 %v2432_v59  ;;  %1643 = vmatprep.subr.bf16.mxu1 %v2437_v60 }
  0xb1   : > { %1766 = vmatprep.subr.bf16.mxu0 %v2440_v61 }
  0xb3   : > { %1644 = vmatpush1.bf16.msra.mxu1 %v2435_v62 }
  0xb4   : > { %1767 = vmatpush1.bf16.msra.mxu0 %v2438_v63  ;;  %1645 = vmatprep.subr.bf16.mxu1 %v2443_v0 }
  0xb5   : > { %1768 = vmatprep.subr.bf16.mxu0 %v2446_v1 }
  0xb7   : > { %1646 = vmatpush1.bf16.msra.mxu1 %v2441_v2 }
  0xb8   : > { %1769 = vmatpush1.bf16.msra.mxu0 %v2444_v3  ;;  %1647 = vmatprep.subr.bf16.mxu1 %v2449_v4 }
  0xb9   : > { %1770 = vmatprep.subr.bf16.mxu0 %v2452_v5 }
  0xbb   : > { %1648 = vmatpush1.bf16.msra.mxu1 %v2447_v6 }
  0xbc   : > { %1771 = vmatpush1.bf16.msra.mxu0 %v2450_v7  ;;  %1649 = vmatprep.subr.bf16.mxu1 %v2455_v8 }
  0xbd   : > { %1772 = vmatprep.subr.bf16.mxu0 %v2458_v9 }
  0xbf   : > { %1650 = vmatpush1.bf16.msra.mxu1 %v2453_v10 }
  0xc0   : > { %1773 = vmatpush1.bf16.msra.mxu0 %v2456_v11  ;;  %1651 = vmatprep.subr.bf16.mxu1 %v2461_v12 }
  0xc1   : > { %1774 = vmatprep.subr.bf16.mxu0 %v2464_v13 }
  0xc3   : > { %1652 = vmatpush1.bf16.msra.mxu1 %v2459_v14 }
  0xc4   : > { %1775 = vmatpush1.bf16.msra.mxu0 %v2462_v15 }
  0xc5   : > { %1785 = vmatprep.subr.bf16.mxu0 %v2471_v16 }
  0xc6   : > { %1654 = vmatmul.mubr.bf16.vlgmr.msra.gmra.mrb[0].mxu1 %v1904_v20 }
  0xc7   : > { %1777 = vmatmul.mubr.bf16.vlgmr.msra.gmra.mrb[0].mxu0 %v1910_v21 }
  0xc8   : > { %1786 = vmatpush1.bf16.msra.mxu0 %v2469_v22  ;;  %2130 = vmatprep.mubr.msk.bf16.mxu0 %vm1535_vm0, %v1913_v23 }
  0xc9   : > { %1787 = vmatprep.subr.bf16.mxu0 %v2474_v24 }
  0xcc   : > { %1788 = vmatpush1.bf16.msra.mxu0 %v2472_v18 }
  0xcd   : > { %1789 = vmatprep.subr.bf16.mxu0 %v2477_v19 }
  0xd0   : > { %1790 = vmatpush1.bf16.msra.mxu0 %v2475_v25 }
  0xd1   : > { %1791 = vmatprep.subr.bf16.mxu0 %v2480_v26 }
  0xd4   : > { %1792 = vmatpush1.bf16.msra.mxu0 %v2478_v27 }
  0xd5   : > { %1793 = vmatprep.subr.bf16.mxu0 %v2483_v28 }
  0xd8   : > { %1794 = vmatpush1.bf16.msra.mxu0 %v2481_v29 }
  0xd9   : > { %1795 = vmatprep.subr.bf16.mxu0 %v2486_v30 }
  0xdc   : > { %1796 = vmatpush1.bf16.msra.mxu0 %v2484_v31 }
  0xdd   : > { %1797 = vmatprep.subr.bf16.mxu0 %v2489_v32 }
  0xe0   : > { %1798 = vmatpush1.bf16.msra.mxu0 %v2487_v33 }
  0xe1   : > { %1799 = vmatprep.subr.bf16.mxu0 %v2492_v34 }
  0xe4   : > { %1800 = vmatpush1.bf16.msra.mxu0 %v2490_v35 }
  0xe5   : > { %1801 = vmatprep.subr.bf16.mxu0 %v2495_v36 }
  0xe8   : > { %1802 = vmatpush1.bf16.msra.mxu0 %v2493_v37 }
  0xe9   : > { %1803 = vmatprep.subr.bf16.mxu0 %v2498_v38 }
  0xec   : > { %1804 = vmatpush1.bf16.msra.mxu0 %v2496_v39 }
  0xed   : > { %1805 = vmatprep.subr.bf16.mxu0 %v2501_v40 }
  0xf0   : > { %1806 = vmatpush1.bf16.msra.mxu0 %v2499_v41 }
  0xf1   : > { %1807 = vmatprep.subr.bf16.mxu0 %v2504_v42 }
  0xf4   : > { %1808 = vmatpush1.bf16.msra.mxu0 %v2502_v43 }
  0xf7   : > { %1818 = vmatmul.mubr.bf16.vlgmr.msra.gmra.mrb[0].mxu0 %v1912_v44 }
 0x199   : > { %v1655_v45 = vpop.f32.mrb[0].mxu1 }
 0x19a   : > { %v1657_v46 = vpop.f32.mrb[1].mxu1  ;;  %v2136_v56 = vadd.f32 %v1655_v45, %v400_v54 }
 0x19b   : > { %v1659_v47 = vpop.f32.mrb[2].mxu1  ;;  %v2138_v57 = vadd.f32 %v1657_v46, %v404_v55 }
 0x19c   : > { %v1660_v48 = vpop.f32.mrb[3].mxu1 }
 0x1ca   : > { %v1819_v58 = vpop.f32.mrb[0].mxu0 }
 0x1cb   : > { %v2137_v59 = vadd.f32 %v2136_v56, %v1819_v58  ;;  %v1821_v60 = vpop.f32.mrb[1].mxu0 }
 0x1cc   : > { %v2139_v61 = vadd.f32 %v2138_v57, %v1821_v60  ;;  %v1823_v62 = vpop.f32.mrb[2].mxu0 }
 0x1cd   : > { %v1826_v63 = vmax.f32 %v2137_v59, 0.0  ;;  %v1824_v0 = vpop.f32.mrb[3].mxu0 }
 0x1ce   : > { %v1827_v1 = vmax.f32 %v2139_v61, 0.0 }
 0x1d0   : > { %v2135_v2 = vpack.c.bf16 %v1827_v1, %v1826_v63 }
 0x1d2   : > { %1836 = vst [vmem:[%s170_s17] sm:$0xff] %v2135_v2 }
 0x1d3 PF: > { %s13_s12 = sadd.s32 1, %s2513_s12  }
 0x1d4   : > { %p10_p4 = scmp.ge.s32.totalorder %s13_s12, 4  }
 0x1d6   :  { %12 = sbr.rel (!%p10_p4) target bundleno = 1 (0x1), region = 62 }

</bundles_post_ra>
